<compile_context>
chip_gen: v6e
topology: v6e:2x2x1
jax: 0.10.0
libtpu: 0.0.40
codegen_flags: <defaults>
</compile_context>

<pallas_src>
import functools

import jax
import jax.numpy as jnp
from jax.experimental import pallas as pl
from jax.experimental.pallas import tpu as pltpu

BN_EPS = 1e-5
LANE = 128


def _ru(x, m):
    return (x + m - 1) // m * m


def _reflect1(i, n):
    """Reflection index (pad=1 style) into [0, n)."""
    if i < 0:
        return -i
    if i > n - 1:
        return 2 * (n - 1) - i
    return i


# ----------------------------------------------------------------------------
# Fused matmul kernel:  out = clamp?( act( A @ B + shift )[:, :out_cols] [+ res] )
# Grid = (M blocks,); K and N are single blocks (K <= ~1k, N = 128-padded).
# ----------------------------------------------------------------------------
def _fused_matmul_kernel(*refs, activation, has_residual, clamp, out_cols, np_cols):
    if has_residual:
        a_ref, b_ref, shift_ref, res_ref, o_ref = refs
    else:
        a_ref, b_ref, shift_ref, o_ref = refs
        res_ref = None

    acc = jnp.dot(a_ref[...], b_ref[...], preferred_element_type=jnp.float32)
    y = acc + shift_ref[...]                      # f32 epilogue (v5e-safe)
    if activation == "relu":
        y = jnp.maximum(y, 0.0)
    elif activation == "tanh":
        y = jnp.tanh(y)
    if out_cols != np_cols:                       # drop the 128-lane padding
        y = y[:, :out_cols]
    if res_ref is not None:
        y = y + res_ref[...].astype(jnp.float32)
    if clamp:
        y = jnp.clip(y, -1.0, 1.0)
    o_ref[...] = y.astype(o_ref.dtype)


def _pick_tm(M):
    # >=2 M blocks whenever M >= 32 so a v7x megacore gets both cores busy;
    # cap at 512 rows (A block <= ~0.9 MB bf16 -> trivial VMEM on all gens).
    if M < 32:
        return M
    return min(512, _ru((M + 1) // 2, 16))


def fused_matmul(A, B, shift, residual=None, *, activation="none", clamp=False,
                 out_cols=None, out_dtype=jnp.bfloat16):
    """A: (M, Kp) bf16, B: (Kp, Np) bf16, shift: (1, Np) f32,
    residual: optional (M, out_cols).  Returns (M, out_cols) in out_dtype."""
    M, Kp = A.shape
    Kp2, Np = B.shape
    assert Kp == Kp2 and Kp % LANE == 0 and Np % LANE == 0
    out_cols = Np if out_cols is None else out_cols
    assert out_cols <= Np

    tm = _pick_tm(M)
    grid = (pl.cdiv(M, tm),)

    in_specs = [
        pl.BlockSpec((tm, Kp), lambda i: (i, 0)),
        pl.BlockSpec((Kp, Np), lambda i: (0, 0)),
        pl.BlockSpec((1, Np), lambda i: (0, 0)),
    ]
    args = [A, B, shift]
    if residual is not None:
        in_specs.append(pl.BlockSpec((tm, out_cols), lambda i: (i, 0)))
        args.append(residual)

    return pl.pallas_call(
        functools.partial(_fused_matmul_kernel, activation=activation,
                          has_residual=residual is not None, clamp=clamp,
                          out_cols=out_cols, np_cols=Np),
        out_shape=jax.ShapeDtypeStruct((M, out_cols), out_dtype),
        grid=grid,
        in_specs=in_specs,
        out_specs=pl.BlockSpec((tm, out_cols), lambda i: (i, 0)),
        compiler_params=pltpu.CompilerParams(
            dimension_semantics=("parallel",)),
    )(*args)


# ----------------------------------------------------------------------------
# Fused ResNet-block stack: ONE pallas_call for all n_blocks blocks.
# Weights are VMEM-resident; the activation lives in VMEM scratch; reflect-pad
# + 3x3 conv is 9 shifted-row matmuls over a padded VMEM buffer; residual adds
# are fused.  One grid step per image ("parallel" -> v7x megacore batch split).
# ----------------------------------------------------------------------------
def _res_stack_kernel(y_ref, w_ref, s_ref, o_ref, ypad_ref, ycur_ref, *,
                      h, w, C, n_blocks):
    hp, wp = h + 2, w + 2
    Mp = hp * wp

    ypad_ref[...] = jnp.zeros_like(ypad_ref)           # incl. shift-slack tail
    ycur_ref[...] = y_ref[...].astype(jnp.float32)     # running activation (f32)

    def build_reflect_pad(read_row):
        # ReflectionPad2d(1): write the (hp, wp, C) padded activation into
        # ypad_ref in flat row layout (row = i*wp + j).  read_row(i) -> (w, C).
        for ip in range(hp):
            i = _reflect1(ip - 1, h)
            row = read_row(i)                                          # (w, C) f32
            base = ip * wp
            ypad_ref[base + 1:base + 1 + w, :] = row                   # interior
            ypad_ref[base:base + 1, :] = row[1:2, :]                   # left reflect
            ypad_ref[base + w + 1:base + w + 2, :] = row[w - 2:w - 1, :]  # right

    def conv3x3(ci):
        # 3x3 conv as 9 shifted-row matmuls.  Result is in "padded row layout":
        # valid output (i, j) lives at row i*wp + j.
        acc = jnp.zeros((Mp, C), jnp.float32)
        for k in range(9):
            kh, kw = divmod(k, 3)
            off = kh * wp + kw
            a = ypad_ref[off:off + Mp, :].astype(jnp.bfloat16)         # (Mp, C)
            wk = w_ref[(ci * 9 + k) * C:(ci * 9 + k + 1) * C, :]       # (C, C)
            acc = acc + jnp.dot(a, wk, preferred_element_type=jnp.float32)
        return acc + s_ref[ci:ci + 1, :]                               # BN + bias

    for b in range(n_blocks):
        # conv1: ReflectionPad(1) + Conv3x3 + BN + ReLU   (BN folded into w/s)
        build_reflect_pad(lambda i: ycur_ref[i * w:i * w + w, :])
        a1 = jnp.maximum(conv3x3(2 * b), 0.0)
        # TODO(synk): Dropout(0.5) between the two convs is the inference-mode identity.
        # conv2: ReflectionPad(1) + Conv3x3 + BN, then the residual add.
        build_reflect_pad(lambda i: a1[i * wp:i * wp + w, :])
        a2 = conv3x3(2 * b + 1)
        for i in range(h):
            ycur_ref[i * w:i * w + w, :] = (ycur_ref[i * w:i * w + w, :]
                                            + a2[i * wp:i * wp + w, :])

    o_ref[...] = ycur_ref[...].astype(o_ref.dtype)


def res_stack(y, w_all, s_all, *, n_blocks):
    """y: (N, h, w, C) bf16 -> (N, h, w, C) bf16 after n_blocks ResNet blocks."""
    N, h, w, C = y.shape
    mi = h * w
    hp, wp = h + 2, w + 2
    pad_rows = hp * wp + 2 * wp + 2      # room for the 9 shifted (Mp, C) views

    kernel = functools.partial(_res_stack_kernel, h=h, w=w, C=C,
                               n_blocks=n_blocks)
    out = pl.pallas_call(
        kernel,
        out_shape=jax.ShapeDtypeStruct((N * mi, C), jnp.bfloat16),
        grid=(N,),
        in_specs=[pl.BlockSpec((mi, C), lambda i: (i, 0)),
                  pl.BlockSpec(w_all.shape, lambda i: (0, 0)),
                  pl.BlockSpec(s_all.shape, lambda i: (0, 0))],
        out_specs=pl.BlockSpec((mi, C), lambda i: (i, 0)),
        scratch_shapes=[pltpu.VMEM((pad_rows, C), jnp.float32),
                        pltpu.VMEM((mi, C), jnp.float32)],
        compiler_params=pltpu.CompilerParams(
            dimension_semantics=("parallel",)),
    )(y.reshape(N * mi, C).astype(jnp.bfloat16), w_all, s_all)
    return out.reshape(N, h, w, C)


# ----------------------------------------------------------------------------
# im2col (NHWC, channels-last => lane-dense) with K zero-padding fused in.
# ----------------------------------------------------------------------------
def _im2col_nhwc(x, kH, kW, stride, k_pad):
    N, Hp, Wp, C = x.shape
    Ho = (Hp - kH) // stride + 1
    Wo = (Wp - kW) // stride + 1
    cols = []
    for kh in range(kH):
        for kw in range(kW):
            cols.append(x[:, kh:kh + (Ho - 1) * stride + 1:stride,
                             kw:kw + (Wo - 1) * stride + 1:stride, :])
    if k_pad > 0:
        cols.append(jnp.zeros((N, Ho, Wo, k_pad), x.dtype))
    patches = jnp.concatenate(cols, axis=-1)      # (N, Ho, Wo, kH*kW*C + k_pad)
    return patches.reshape(N * Ho * Wo, kH * kW * C + k_pad), Ho, Wo


# ----------------------------------------------------------------------------
# Layer wrappers (glue: pad + im2col; all compute in fused_matmul)
# ----------------------------------------------------------------------------
def conv_layer(x, lp, *, stride, pad, pad_mode="zeros",
               activation="none", residual=None, clamp=False,
               out_dtype=jnp.bfloat16):
    """x: (N, H, W, Cin) NHWC.  Returns (N, Ho, Wo, cout) in out_dtype."""
    N = x.shape[0]
    xb = x.astype(jnp.bfloat16)
    if pad is not None:
        mode = "reflect" if pad_mode == "reflect" else "constant"
        xb = jnp.pad(xb, ((0, 0), pad[0], pad[1], (0, 0)), mode=mode)
    assert lp["kH"] * lp["kW"] * x.shape[-1] == lp["K"]
    A, Ho, Wo = _im2col_nhwc(xb, lp["kH"], lp["kW"], stride, lp["Kp"] - lp["K"])
    M = N * Ho * Wo

    res2d = None
    if residual is not None:
        assert residual.shape[-1] == lp["cout"]
        res2d = residual.reshape(M, lp["cout"])

    out = fused_matmul(A, lp["W"], lp["shift"], res2d, activation=activation,
                       clamp=clamp, out_cols=lp["cout"], out_dtype=out_dtype)
    return out.reshape(N, Ho, Wo, lp["cout"])


def conv_transpose_layer(x, lp, *, activation="relu"):
    """Sub-pixel ConvTranspose2d(k=3, s=2, p=1, op=1): one 2x2 window matmul
    producing all 4 output phases, then a tiny bf16 interleave."""
    N, H, W, _ = x.shape
    xb = jnp.pad(x.astype(jnp.bfloat16), ((0, 0), (0, 1), (0, 1), (0, 0)))
    A, Ho, Wo = _im2col_nhwc(xb, 2, 2, 1, lp["Kp"] - lp["K"])     # Ho=H, Wo=W
    cout = lp["cout"]
    out = fused_matmul(A, lp["W"], lp["shift"], None, activation=activation,
                       out_cols=4 * cout, out_dtype=jnp.bfloat16)  # (N*H*W, 4*cout)
    out = out.reshape(N, H, W, 2, 2, cout)
    out = out.transpose(0, 1, 3, 2, 4, 5).reshape(N, 2 * H, 2 * W, cout)
    return out


# ----------------------------------------------------------------------------
# Parameter preparation: fold BN into weight/shift, build matmul-ready bf16
# matrices once (not per forward pass).
# ----------------------------------------------------------------------------
def _bn_scale_shift(bias, bn, c_out):
    if bn is None:
        return jnp.ones((c_out,), jnp.float32), bias.astype(jnp.float32)
    gamma, beta, mean, var = bn
    s = gamma / jnp.sqrt(var + BN_EPS)
    return s, beta - mean * s + bias * s


def _fold_conv_core(w, b, bn):
    """w: (Cout, Cin, kH, kW) -> unpadded (kH*kW*Cin, Cout) weight + (Cout,) shift."""
    cout, cin, kH, kW = w.shape
    scale, shift = _bn_scale_shift(b, bn, cout)
    Wm = (w * scale[:, None, None, None]).transpose(2, 3, 1, 0)   # (kH,kW,Cin,Cout)
    Wm = Wm.reshape(kH * kW * cin, cout)
    return Wm.astype(jnp.float32), shift.astype(jnp.float32), kH, kW, cout


def _fold_conv(w, b, bn):
    Wm, shift, kH, kW, cout = _fold_conv_core(w, b, bn)
    K = Wm.shape[0]
    Kp, Np = _ru(K, LANE), _ru(cout, LANE)
    Wm = jnp.pad(Wm, ((0, Kp - K), (0, Np - cout))).astype(jnp.bfloat16)
    shift = jnp.pad(shift, (0, Np - cout)).reshape(1, Np).astype(jnp.float32)
    return {"W": Wm, "shift": shift, "kH": kH, "kW": kW,
            "cout": cout, "K": K, "Kp": Kp, "Np": Np}


def _fold_convT(w, b, bn):
    """w: (Cin, Cout, 3, 3) PyTorch ConvTranspose2d layout (s=2, p=1, op=1).
    Combined sub-pixel weight: rows = (dh, dw, cin) over a 2x2 window of the
    bottom/right zero-padded input, cols = (a, b, cout) output phases with
    out[2i+a, 2j+b] = sum over taps kh = a+1-2dh, kw = b+1-2dw."""
    cin, cout, kH, kW = w.shape
    assert kH == 3 and kW == 3
    scale, shift = _bn_scale_shift(b, bn, cout)
    wf = w.astype(jnp.float32)
    row_blocks = []
    for dh in range(2):
        for dw in range(2):
            col_blocks = []
            for a in range(2):
                for bb in range(2):
                    kh = a + 1 - 2 * dh
                    kw = bb + 1 - 2 * dw
                    if 0 <= kh < 3 and 0 <= kw < 3:
                        col_blocks.append(wf[:, :, kh, kw] * scale[None, :])
                    else:
                        col_blocks.append(jnp.zeros((cin, cout), jnp.float32))
            row_blocks.append(jnp.concatenate(col_blocks, axis=1))   # (cin, 4*cout)
    Wc = jnp.concatenate(row_blocks, axis=0)                         # (4*cin, 4*cout)
    K, Ncol = 4 * cin, 4 * cout
    Kp, Np = _ru(K, LANE), _ru(Ncol, LANE)
    Wc = jnp.pad(Wc, ((0, Kp - K), (0, Np - Ncol))).astype(jnp.bfloat16)
    shift4 = jnp.pad(jnp.tile(shift, 4), (0, Np - Ncol)).reshape(1, Np)
    return {"W": Wc, "shift": shift4.astype(jnp.float32), "kH": 2, "kW": 2,
            "cout": cout, "K": K, "Kp": Kp, "Np": Np}


def prepare_generator_params(raw, n_blocks=3):
    prep = {}
    prep["c0"] = _fold_conv(raw["c0_w"], raw["c0_b"], raw["c0_bn"])
    for i in range(2):
        prep[f"down{i}"] = _fold_conv(raw[f"down{i}_w"], raw[f"down{i}_b"],
                                      raw[f"down{i}_bn"])
    # ResNet stack: stack all 2*n_blocks folded (9*dim, dim) weights and (dim,)
    # shifts so the whole stack lives in VMEM inside ONE pallas_call.
    res_w, res_s = [], []
    for i in range(n_blocks):
        for j in (1, 2):
            Wm, sh, kH, kW, cout = _fold_conv_core(raw[f"res{i}_w{j}"],
                                                   raw[f"res{i}_b{j}"],
                                                   raw[f"res{i}_bn{j}"])
            assert kH == 3 and kW == 3
            res_w.append(Wm)
            res_s.append(sh)
    prep["res_w"] = jnp.concatenate(res_w, axis=0).astype(jnp.bfloat16)   # (2nb*9*C, C)
    prep["res_shift"] = jnp.stack(res_s, axis=0).astype(jnp.float32)      # (2nb, C)
    for i in range(2):
        prep[f"up{i}"] = _fold_convT(raw[f"up{i}_w"], raw[f"up{i}_b"],
                                     raw[f"up{i}_bn"])
    prep["cf"] = _fold_conv(raw["cf_w"], raw["cf_b"], None)
    return prep


# ----------------------------------------------------------------------------
# Raw (PyTorch-layout) parameter init
# ----------------------------------------------------------------------------
def init_generator_params(key, input_nc=3, output_nc=3, ngf=16, n_blocks=3):
    params = {}

    def conv_init(k, cout, cin, ksz):
        k1, k2 = jax.random.split(k)
        fan_in = cin * ksz * ksz
        w = jax.random.normal(k1, (cout, cin, ksz, ksz), jnp.float32) * (0.2 / fan_in ** 0.5)
        b = jax.random.normal(k2, (cout,), jnp.float32) * 0.01
        return w, b

    def convT_init(k, cin, cout, ksz):
        k1, k2 = jax.random.split(k)
        fan_in = cin * ksz * ksz
        w = jax.random.normal(k1, (cin, cout, ksz, ksz), jnp.float32) * (0.2 / fan_in ** 0.5)
        b = jax.random.normal(k2, (cout,), jnp.float32) * 0.01
        return w, b

    def bn_init(c):
        # PyTorch BatchNorm2d init: gamma=1, beta=0, running_mean=0, running_var=1
        return (jnp.ones((c,), jnp.float32), jnp.zeros((c,), jnp.float32),
                jnp.zeros((c,), jnp.float32), jnp.ones((c,), jnp.float32))

    keys = iter(jax.random.split(key, 64))

    params["c0_w"], params["c0_b"] = conv_init(next(keys), ngf, input_nc, 7)
    params["c0_bn"] = bn_init(ngf)

    for i in range(2):
        mult = 2 ** i
        params[f"down{i}_w"], params[f"down{i}_b"] = conv_init(
            next(keys), ngf * mult * 2, ngf * mult, 3)
        params[f"down{i}_bn"] = bn_init(ngf * mult * 2)

    dim = ngf * 4
    for i in range(n_blocks):
        params[f"res{i}_w1"], params[f"res{i}_b1"] = conv_init(next(keys), dim, dim, 3)
        params[f"res{i}_bn1"] = bn_init(dim)
        params[f"res{i}_w2"], params[f"res{i}_b2"] = conv_init(next(keys), dim, dim, 3)
        params[f"res{i}_bn2"] = bn_init(dim)

    for i in range(2):
        mult = 2 ** (2 - i)
        params[f"up{i}_w"], params[f"up{i}_b"] = convT_init(
            next(keys), ngf * mult, ngf * mult // 2, 3)
        params[f"up{i}_bn"] = bn_init(ngf * mult // 2)

    params["cf_w"], params["cf_b"] = conv_init(next(keys), output_nc, ngf, 7)
    return params


# ----------------------------------------------------------------------------
# Generator forward (NHWC internally; NCHW at the boundaries like PyTorch)
# ----------------------------------------------------------------------------
def generator_forward(prep, x, n_blocks=3):
    xh = jnp.transpose(x, (0, 2, 3, 1))                       # NCHW -> NHWC, f32

    # ReflectionPad(3) + Conv7x7 + BN + ReLU
    y = conv_layer(xh, prep["c0"], stride=1, pad=((3, 3), (3, 3)),
                   pad_mode="reflect", activation="relu")
    # 2x downsampling: Conv3x3 s2 p1 + BN + ReLU
    for i in range(2):
        y = conv_layer(y, prep[f"down{i}"], stride=2, pad=((1, 1), (1, 1)),
                       pad_mode="zeros", activation="relu")
    # n_blocks ResNet blocks: ONE fused pallas_call (weights + acts in VMEM)
    y = res_stack(y, prep["res_w"], prep["res_shift"], n_blocks=n_blocks)
    # 2x upsampling: ConvTranspose3x3 s2 p1 op1 + BN + ReLU (sub-pixel)
    for i in range(2):
        y = conv_transpose_layer(y, prep[f"up{i}"], activation="relu")
    # ReflectionPad(3) + Conv7x7 -> tanh -> + input -> clamp, all fused
    y = conv_layer(y, prep["cf"], stride=1, pad=((3, 3), (3, 3)),
                   pad_mode="reflect", activation="tanh",
                   residual=xh, clamp=True, out_dtype=jnp.float32)
    return jnp.transpose(y, (0, 3, 1, 2))                     # NHWC -> NCHW


if __name__ == "__main__":
    key = jax.random.PRNGKey(0)
    k_param, k_x = jax.random.split(key)

    N, C, H, W = 2, 3, 16, 16          # spatial must be divisible by 4
    NGF, N_BLOCKS = 16, 3              # small-but-faithful config

    raw_params = init_generator_params(k_param, input_nc=C, output_nc=C,
                                       ngf=NGF, n_blocks=N_BLOCKS)
    prep = prepare_generator_params(raw_params, n_blocks=N_BLOCKS)

    x = jax.random.uniform(k_x, (N, C, H, W), jnp.float32, minval=-1.0, maxval=1.0)

    fwd = jax.jit(lambda xx: generator_forward(prep, xx, n_blocks=N_BLOCKS))
    out = jax.block_until_ready(fwd(x))

    assert out.shape == x.shape, out.shape
    assert out.dtype == jnp.float32
    assert bool(jnp.all(jnp.isfinite(out)))
    assert bool(jnp.all(out <= 1.0)) and bool(jnp.all(out >= -1.0))
    print("KERNEL_OK")
</pallas_src>

<mosaic_0001>
module attributes {stable_mosaic.version = 11 : i64} {
  func.func @_fused_matmul_kernel(%arg0: i32, %arg1: memref<256x256xbf16, #tpu.memory_space<vmem>>, %arg2: memref<256x128xbf16, #tpu.memory_space<vmem>>, %arg3: memref<1x128xf32, #tpu.memory_space<vmem>>, %arg4: memref<256x16xbf16, #tpu.memory_space<vmem>>) attributes {dimension_semantics = [#tpu.dimension_semantics<parallel>], iteration_bounds = array<i64: 2>, scalar_prefetch = 0 : i64, scratch_operands = 0 : i64, tpu.core_type = #tpu.core_type<tc>, window_params = [{transform_indices = @transform_0, window_bounds = array<i64: 256, 256>}, {pipeline_mode = #tpu.pipeline_mode<synchronous>, transform_indices = @transform_1, window_bounds = array<i64: 256, 128>}, {pipeline_mode = #tpu.pipeline_mode<synchronous>, transform_indices = @transform_2, window_bounds = array<i64: 1, 128>}, {transform_indices = @transform_3, window_bounds = array<i64: 256, 16>}]} {
    %c0 = arith.constant 0 : index
    %c0_0 = arith.constant 0 : index
    %0 = vector.load %arg1[%c0, %c0_0] : memref<256x256xbf16, #tpu.memory_space<vmem>>, vector<256x256xbf16>
    %c0_1 = arith.constant 0 : index
    %c0_2 = arith.constant 0 : index
    %1 = vector.load %arg2[%c0_1, %c0_2] : memref<256x128xbf16, #tpu.memory_space<vmem>>, vector<256x128xbf16>
    %cst = arith.constant dense<0.000000e+00> : vector<256x128xf32>
    %2 = tpu.matmul %0, %1, %cst {dimension_numbers = #tpu.dot_dimension_numbers<[1], [0], [0], [1], [0, 0, 1, 1], [], []>} : vector<256x256xbf16>, vector<256x128xbf16>, vector<256x128xf32> -> vector<256x128xf32>
    %c0_3 = arith.constant 0 : index
    %c0_4 = arith.constant 0 : index
    %3 = vector.load %arg3[%c0_3, %c0_4] : memref<1x128xf32, #tpu.memory_space<vmem>>, vector<1x128xf32>
    %4 = vector.broadcast %3 : vector<1x128xf32> to vector<256x128xf32>
    %5 = arith.addf %2, %4 : vector<256x128xf32>
    %cst_5 = arith.constant 0.000000e+00 : f32
    %6 = vector.broadcast %cst_5 : f32 to vector<256x128xf32>
    %7 = arith.maximumf %5, %6 : vector<256x128xf32>
    %8 = vector.extract_strided_slice %7 {offsets = [0, 0], sizes = [256, 16], strides = [1, 1]} : vector<256x128xf32> to vector<256x16xf32>
    %9 = arith.truncf %8 : vector<256x16xf32> to vector<256x16xbf16>
    %c0_6 = arith.constant 0 : index
    %c0_7 = arith.constant 0 : index
    %10 = vector.load %arg4[%c0_6, %c0_7] : memref<256x16xbf16, #tpu.memory_space<vmem>>, vector<256x16xbf16>
    tpu.vector_store %arg4[%c0_6, %c0_7], %9 {strides = array<i32>} : memref<256x16xbf16, #tpu.memory_space<vmem>>, vector<256x16xbf16>,
    return
  }
  func.func @transform_0(%arg0: i32) -> (i32, i32) {
    %c0_i32 = arith.constant 0 : i32
    %c0_i32_0 = arith.constant 0 : i32
    return %arg0, %c0_i32 : i32, i32
  }
  func.func @transform_1(%arg0: i32) -> (i32, i32) {
    %c0_i32 = arith.constant 0 : i32
    %c0_i32_0 = arith.constant 0 : i32
    %c0_i32_1 = arith.constant 0 : i32
    return %c0_i32, %c0_i32_0 : i32, i32
  }
  func.func @transform_2(%arg0: i32) -> (i32, i32) {
    %c0_i32 = arith.constant 0 : i32
    %c0_i32_0 = arith.constant 0 : i32
    %c0_i32_1 = arith.constant 0 : i32
    return %c0_i32, %c0_i32_0 : i32, i32
  }
  func.func @transform_3(%arg0: i32) -> (i32, i32) {
    %c0_i32 = arith.constant 0 : i32
    %c0_i32_0 = arith.constant 0 : i32
    return %arg0, %c0_i32 : i32, i32
  }
}

module attributes {stable_mosaic.version = 11 : i64} {
  func.func @_fused_matmul_kernel(%arg0: i32, %arg1: memref<64x256xbf16, #tpu.memory_space<vmem>>, %arg2: memref<256x128xbf16, #tpu.memory_space<vmem>>, %arg3: memref<1x128xf32, #tpu.memory_space<vmem>>, %arg4: memref<64x32xbf16, #tpu.memory_space<vmem>>) attributes {dimension_semantics = [#tpu.dimension_semantics<parallel>], iteration_bounds = array<i64: 2>, scalar_prefetch = 0 : i64, scratch_operands = 0 : i64, tpu.core_type = #tpu.core_type<tc>, window_params = [{transform_indices = @transform_0, window_bounds = array<i64: 64, 256>}, {pipeline_mode = #tpu.pipeline_mode<synchronous>, transform_indices = @transform_1, window_bounds = array<i64: 256, 128>}, {pipeline_mode = #tpu.pipeline_mode<synchronous>, transform_indices = @transform_2, window_bounds = array<i64: 1, 128>}, {transform_indices = @transform_3, window_bounds = array<i64: 64, 32>}]} {
    %c0 = arith.constant 0 : index
    %c0_0 = arith.constant 0 : index
    %0 = vector.load %arg1[%c0, %c0_0] : memref<64x256xbf16, #tpu.memory_space<vmem>>, vector<64x256xbf16>
    %c0_1 = arith.constant 0 : index
    %c0_2 = arith.constant 0 : index
    %1 = vector.load %arg2[%c0_1, %c0_2] : memref<256x128xbf16, #tpu.memory_space<vmem>>, vector<256x128xbf16>
    %cst = arith.constant dense<0.000000e+00> : vector<64x128xf32>
    %2 = tpu.matmul %0, %1, %cst {dimension_numbers = #tpu.dot_dimension_numbers<[1], [0], [0], [1], [0, 0, 1, 1], [], []>} : vector<64x256xbf16>, vector<256x128xbf16>, vector<64x128xf32> -> vector<64x128xf32>
    %c0_3 = arith.constant 0 : index
    %c0_4 = arith.constant 0 : index
    %3 = vector.load %arg3[%c0_3, %c0_4] : memref<1x128xf32, #tpu.memory_space<vmem>>, vector<1x128xf32>
    %4 = vector.broadcast %3 : vector<1x128xf32> to vector<64x128xf32>
    %5 = arith.addf %2, %4 : vector<64x128xf32>
    %cst_5 = arith.constant 0.000000e+00 : f32
    %6 = vector.broadcast %cst_5 : f32 to vector<64x128xf32>
    %7 = arith.maximumf %5, %6 : vector<64x128xf32>
    %8 = vector.extract_strided_slice %7 {offsets = [0, 0], sizes = [64, 32], strides = [1, 1]} : vector<64x128xf32> to vector<64x32xf32>
    %9 = arith.truncf %8 : vector<64x32xf32> to vector<64x32xbf16>
    %c0_6 = arith.constant 0 : index
    %c0_7 = arith.constant 0 : index
    %10 = vector.load %arg4[%c0_6, %c0_7] : memref<64x32xbf16, #tpu.memory_space<vmem>>, vector<64x32xbf16>
    tpu.vector_store %arg4[%c0_6, %c0_7], %9 {strides = array<i32>} : memref<64x32xbf16, #tpu.memory_space<vmem>>, vector<64x32xbf16>,
    return
  }
  func.func @transform_0(%arg0: i32) -> (i32, i32) {
    %c0_i32 = arith.constant 0 : i32
    %c0_i32_0 = arith.constant 0 : i32
    return %arg0, %c0_i32 : i32, i32
  }
  func.func @transform_1(%arg0: i32) -> (i32, i32) {
    %c0_i32 = arith.constant 0 : i32
    %c0_i32_0 = arith.constant 0 : i32
    %c0_i32_1 = arith.constant 0 : i32
    return %c0_i32, %c0_i32_0 : i32, i32
  }
  func.func @transform_2(%arg0: i32) -> (i32, i32) {
    %c0_i32 = arith.constant 0 : i32
    %c0_i32_0 = arith.constant 0 : i32
    %c0_i32_1 = arith.constant 0 : i32
    return %c0_i32, %c0_i32_0 : i32, i32
  }
  func.func @transform_3(%arg0: i32) -> (i32, i32) {
    %c0_i32 = arith.constant 0 : i32
    %c0_i32_0 = arith.constant 0 : i32
    return %arg0, %c0_i32 : i32, i32
  }
}

module attributes {stable_mosaic.version = 11 : i64} {
  func.func @_fused_matmul_kernel(%arg0: i32, %arg1: memref<16x384xbf16, #tpu.memory_space<vmem>>, %arg2: memref<384x128xbf16, #tpu.memory_space<vmem>>, %arg3: memref<1x128xf32, #tpu.memory_space<vmem>>, %arg4: memref<16x64xbf16, #tpu.memory_space<vmem>>) attributes {dimension_semantics = [#tpu.dimension_semantics<parallel>], iteration_bounds = array<i64: 2>, scalar_prefetch = 0 : i64, scratch_operands = 0 : i64, tpu.core_type = #tpu.core_type<tc>, window_params = [{transform_indices = @transform_0, window_bounds = array<i64: 16, 384>}, {pipeline_mode = #tpu.pipeline_mode<synchronous>, transform_indices = @transform_1, window_bounds = array<i64: 384, 128>}, {pipeline_mode = #tpu.pipeline_mode<synchronous>, transform_indices = @transform_2, window_bounds = array<i64: 1, 128>}, {transform_indices = @transform_3, window_bounds = array<i64: 16, 64>}]} {
    %c0 = arith.constant 0 : index
    %c0_0 = arith.constant 0 : index
    %0 = vector.load %arg1[%c0, %c0_0] : memref<16x384xbf16, #tpu.memory_space<vmem>>, vector<16x384xbf16>
    %c0_1 = arith.constant 0 : index
    %c0_2 = arith.constant 0 : index
    %1 = vector.load %arg2[%c0_1, %c0_2] : memref<384x128xbf16, #tpu.memory_space<vmem>>, vector<384x128xbf16>
    %cst = arith.constant dense<0.000000e+00> : vector<16x128xf32>
    %2 = tpu.matmul %0, %1, %cst {dimension_numbers = #tpu.dot_dimension_numbers<[1], [0], [0], [1], [0, 0, 1, 1], [], []>} : vector<16x384xbf16>, vector<384x128xbf16>, vector<16x128xf32> -> vector<16x128xf32>
    %c0_3 = arith.constant 0 : index
    %c0_4 = arith.constant 0 : index
    %3 = vector.load %arg3[%c0_3, %c0_4] : memref<1x128xf32, #tpu.memory_space<vmem>>, vector<1x128xf32>
    %4 = vector.broadcast %3 : vector<1x128xf32> to vector<16x128xf32>
    %5 = arith.addf %2, %4 : vector<16x128xf32>
    %cst_5 = arith.constant 0.000000e+00 : f32
    %6 = vector.broadcast %cst_5 : f32 to vector<16x128xf32>
    %7 = arith.maximumf %5, %6 : vector<16x128xf32>
    %8 = vector.extract_strided_slice %7 {offsets = [0, 0], sizes = [16, 64], strides = [1, 1]} : vector<16x128xf32> to vector<16x64xf32>
    %9 = arith.truncf %8 : vector<16x64xf32> to vector<16x64xbf16>
    %c0_6 = arith.constant 0 : index
    %c0_7 = arith.constant 0 : index
    %10 = vector.load %arg4[%c0_6, %c0_7] : memref<16x64xbf16, #tpu.memory_space<vmem>>, vector<16x64xbf16>
    tpu.vector_store %arg4[%c0_6, %c0_7], %9 {strides = array<i32>} : memref<16x64xbf16, #tpu.memory_space<vmem>>, vector<16x64xbf16>,
    return
  }
  func.func @transform_0(%arg0: i32) -> (i32, i32) {
    %c0_i32 = arith.constant 0 : i32
    %c0_i32_0 = arith.constant 0 : i32
    return %arg0, %c0_i32 : i32, i32
  }
  func.func @transform_1(%arg0: i32) -> (i32, i32) {
    %c0_i32 = arith.constant 0 : i32
    %c0_i32_0 = arith.constant 0 : i32
    %c0_i32_1 = arith.constant 0 : i32
    return %c0_i32, %c0_i32_0 : i32, i32
  }
  func.func @transform_2(%arg0: i32) -> (i32, i32) {
    %c0_i32 = arith.constant 0 : i32
    %c0_i32_0 = arith.constant 0 : i32
    %c0_i32_1 = arith.constant 0 : i32
    return %c0_i32, %c0_i32_0 : i32, i32
  }
  func.func @transform_3(%arg0: i32) -> (i32, i32) {
    %c0_i32 = arith.constant 0 : i32
    %c0_i32_0 = arith.constant 0 : i32
    return %arg0, %c0_i32 : i32, i32
  }
}

module attributes {stable_mosaic.version = 11 : i64} {
  func.func @_fused_matmul_kernel(%arg0: i32, %arg1: memref<16x256xbf16, #tpu.memory_space<vmem>>, %arg2: memref<256x128xbf16, #tpu.memory_space<vmem>>, %arg3: memref<1x128xf32, #tpu.memory_space<vmem>>, %arg4: memref<16x128xbf16, #tpu.memory_space<vmem>>) attributes {dimension_semantics = [#tpu.dimension_semantics<parallel>], iteration_bounds = array<i64: 2>, scalar_prefetch = 0 : i64, scratch_operands = 0 : i64, tpu.core_type = #tpu.core_type<tc>, window_params = [{transform_indices = @transform_0, window_bounds = array<i64: 16, 256>}, {pipeline_mode = #tpu.pipeline_mode<synchronous>, transform_indices = @transform_1, window_bounds = array<i64: 256, 128>}, {pipeline_mode = #tpu.pipeline_mode<synchronous>, transform_indices = @transform_2, window_bounds = array<i64: 1, 128>}, {transform_indices = @transform_3, window_bounds = array<i64: 16, 128>}]} {
    %c0 = arith.constant 0 : index
    %c0_0 = arith.constant 0 : index
    %0 = vector.load %arg1[%c0, %c0_0] : memref<16x256xbf16, #tpu.memory_space<vmem>>, vector<16x256xbf16>
    %c0_1 = arith.constant 0 : index
    %c0_2 = arith.constant 0 : index
    %1 = vector.load %arg2[%c0_1, %c0_2] : memref<256x128xbf16, #tpu.memory_space<vmem>>, vector<256x128xbf16>
    %cst = arith.constant dense<0.000000e+00> : vector<16x128xf32>
    %2 = tpu.matmul %0, %1, %cst {dimension_numbers = #tpu.dot_dimension_numbers<[1], [0], [0], [1], [0, 0, 1, 1], [], []>} : vector<16x256xbf16>, vector<256x128xbf16>, vector<16x128xf32> -> vector<16x128xf32>
    %c0_3 = arith.constant 0 : index
    %c0_4 = arith.constant 0 : index
    %3 = vector.load %arg3[%c0_3, %c0_4] : memref<1x128xf32, #tpu.memory_space<vmem>>, vector<1x128xf32>
    %4 = vector.broadcast %3 : vector<1x128xf32> to vector<16x128xf32>
    %5 = arith.addf %2, %4 : vector<16x128xf32>
    %cst_5 = arith.constant 0.000000e+00 : f32
    %6 = vector.broadcast %cst_5 : f32 to vector<16x128xf32>
    %7 = arith.maximumf %5, %6 : vector<16x128xf32>
    %8 = arith.truncf %7 : vector<16x128xf32> to vector<16x128xbf16>
    %c0_6 = arith.constant 0 : index
    %c0_7 = arith.constant 0 : index
    %9 = vector.load %arg4[%c0_6, %c0_7] : memref<16x128xbf16, #tpu.memory_space<vmem>>, vector<16x128xbf16>
    tpu.vector_store %arg4[%c0_6, %c0_7], %8 {strides = array<i32>} : memref<16x128xbf16, #tpu.memory_space<vmem>>, vector<16x128xbf16>,
    return
  }
  func.func @transform_0(%arg0: i32) -> (i32, i32) {
    %c0_i32 = arith.constant 0 : i32
    %c0_i32_0 = arith.constant 0 : i32
    return %arg0, %c0_i32 : i32, i32
  }
  func.func @transform_1(%arg0: i32) -> (i32, i32) {
    %c0_i32 = arith.constant 0 : i32
    %c0_i32_0 = arith.constant 0 : i32
    %c0_i32_1 = arith.constant 0 : i32
    return %c0_i32, %c0_i32_0 : i32, i32
  }
  func.func @transform_2(%arg0: i32) -> (i32, i32) {
    %c0_i32 = arith.constant 0 : i32
    %c0_i32_0 = arith.constant 0 : i32
    %c0_i32_1 = arith.constant 0 : i32
    return %c0_i32, %c0_i32_0 : i32, i32
  }
  func.func @transform_3(%arg0: i32) -> (i32, i32) {
    %c0_i32 = arith.constant 0 : i32
    %c0_i32_0 = arith.constant 0 : i32
    return %arg0, %c0_i32 : i32, i32
  }
}

module attributes {stable_mosaic.version = 11 : i64} {
  func.func @_res_stack_kernel(%arg0: i32, %arg1: memref<16x64xbf16, #tpu.memory_space<vmem>>, %arg2: memref<3456x64xbf16, #tpu.memory_space<vmem>>, %arg3: memref<6x64xf32, #tpu.memory_space<vmem>>, %arg4: memref<16x64xbf16, #tpu.memory_space<vmem>>, %arg5: memref<50x64xf32, #tpu.memory_space<vmem>>, %arg6: memref<16x64xf32, #tpu.memory_space<vmem>>) attributes {dimension_semantics = [#tpu.dimension_semantics<parallel>], iteration_bounds = array<i64: 2>, scalar_prefetch = 0 : i64, scratch_operands = 2 : i64, tpu.core_type = #tpu.core_type<tc>, window_params = [{transform_indices = @transform_0, window_bounds = array<i64: 16, 64>}, {pipeline_mode = #tpu.pipeline_mode<synchronous>, transform_indices = @transform_1, window_bounds = array<i64: 3456, 64>}, {pipeline_mode = #tpu.pipeline_mode<synchronous>, transform_indices = @transform_2, window_bounds = array<i64: 6, 64>}, {transform_indices = @transform_3, window_bounds = array<i64: 16, 64>}]} {
    %cst = arith.constant 0.000000e+00 : f32
    %0 = vector.broadcast %cst : f32 to vector<50x64xf32>
    %c0 = arith.constant 0 : index
    %c0_0 = arith.constant 0 : index
    %1 = vector.load %arg5[%c0, %c0_0] : memref<50x64xf32, #tpu.memory_space<vmem>>, vector<50x64xf32>
    tpu.vector_store %arg5[%c0, %c0_0], %0 {strides = array<i32>} : memref<50x64xf32, #tpu.memory_space<vmem>>, vector<50x64xf32>,
    %c0_1 = arith.constant 0 : index
    %c0_2 = arith.constant 0 : index
    %2 = vector.load %arg1[%c0_1, %c0_2] : memref<16x64xbf16, #tpu.memory_space<vmem>>, vector<16x64xbf16>
    %3 = arith.extf %2 : vector<16x64xbf16> to vector<16x64xf32>
    %c0_3 = arith.constant 0 : index
    %c0_4 = arith.constant 0 : index
    %4 = vector.load %arg6[%c0_3, %c0_4] : memref<16x64xf32, #tpu.memory_space<vmem>>, vector<16x64xf32>
    tpu.vector_store %arg6[%c0_3, %c0_4], %3 {strides = array<i32>} : memref<16x64xf32, #tpu.memory_space<vmem>>, vector<16x64xf32>,
    %c4 = arith.constant 4 : index
    %c0_5 = arith.constant 0 : index
    %5 = vector.load %arg6[%c4, %c0_5] : memref<16x64xf32, #tpu.memory_space<vmem>>, vector<4x64xf32>
    %c1 = arith.constant 1 : index
    %c0_6 = arith.constant 0 : index
    %6 = vector.load %arg5[%c1, %c0_6] : memref<50x64xf32, #tpu.memory_space<vmem>>, vector<4x64xf32>
    tpu.vector_store %arg5[%c1, %c0_6], %5 {strides = array<i32>} : memref<50x64xf32, #tpu.memory_space<vmem>>, vector<4x64xf32>,
    %7 = vector.extract_strided_slice %5 {offsets = [1, 0], sizes = [1, 64], strides = [1, 1]} : vector<4x64xf32> to vector<1x64xf32>
    %c0_7 = arith.constant 0 : index
    %c0_8 = arith.constant 0 : index
    %8 = vector.load %arg5[%c0_7, %c0_8] : memref<50x64xf32, #tpu.memory_space<vmem>>, vector<1x64xf32>
    tpu.vector_store %arg5[%c0_7, %c0_8], %7 {strides = array<i32>} : memref<50x64xf32, #tpu.memory_space<vmem>>, vector<1x64xf32>,
    %9 = vector.extract_strided_slice %5 {offsets = [2, 0], sizes = [1, 64], strides = [1, 1]} : vector<4x64xf32> to vector<1x64xf32>
    %c5 = arith.constant 5 : index
    %c0_9 = arith.constant 0 : index
    %10 = vector.load %arg5[%c5, %c0_9] : memref<50x64xf32, #tpu.memory_space<vmem>>, vector<1x64xf32>
    tpu.vector_store %arg5[%c5, %c0_9], %9 {strides = array<i32>} : memref<50x64xf32, #tpu.memory_space<vmem>>, vector<1x64xf32>,
    %c0_10 = arith.constant 0 : index
    %c0_11 = arith.constant 0 : index
    %11 = vector.load %arg6[%c0_10, %c0_11] : memref<16x64xf32, #tpu.memory_space<vmem>>, vector<4x64xf32>
    %c7 = arith.constant 7 : index
    %c0_12 = arith.constant 0 : index
    %12 = vector.load %arg5[%c7, %c0_12] : memref<50x64xf32, #tpu.memory_space<vmem>>, vector<4x64xf32>
    tpu.vector_store %arg5[%c7, %c0_12], %11 {strides = array<i32>} : memref<50x64xf32, #tpu.memory_space<vmem>>, vector<4x64xf32>,
    %13 = vector.extract_strided_slice %11 {offsets = [1, 0], sizes = [1, 64], strides = [1, 1]} : vector<4x64xf32> to vector<1x64xf32>
    %c6 = arith.constant 6 : index
    %c0_13 = arith.constant 0 : index
    %14 = vector.load %arg5[%c6, %c0_13] : memref<50x64xf32, #tpu.memory_space<vmem>>, vector<1x64xf32>
    tpu.vector_store %arg5[%c6, %c0_13], %13 {strides = array<i32>} : memref<50x64xf32, #tpu.memory_space<vmem>>, vector<1x64xf32>,
    %15 = vector.extract_strided_slice %11 {offsets = [2, 0], sizes = [1, 64], strides = [1, 1]} : vector<4x64xf32> to vector<1x64xf32>
    %c11 = arith.constant 11 : index
    %c0_14 = arith.constant 0 : index
    %16 = vector.load %arg5[%c11, %c0_14] : memref<50x64xf32, #tpu.memory_space<vmem>>, vector<1x64xf32>
    tpu.vector_store %arg5[%c11, %c0_14], %15 {strides = array<i32>} : memref<50x64xf32, #tpu.memory_space<vmem>>, vector<1x64xf32>,
    %c4_15 = arith.constant 4 : index
    %c0_16 = arith.constant 0 : index
    %17 = vector.load %arg6[%c4_15, %c0_16] : memref<16x64xf32, #tpu.memory_space<vmem>>, vector<4x64xf32>
    %c13 = arith.constant 13 : index
    %c0_17 = arith.constant 0 : index
    %18 = vector.load %arg5[%c13, %c0_17] : memref<50x64xf32, #tpu.memory_space<vmem>>, vector<4x64xf32>
    tpu.vector_store %arg5[%c13, %c0_17], %17 {strides = array<i32>} : memref<50x64xf32, #tpu.memory_space<vmem>>, vector<4x64xf32>,
    %19 = vector.extract_strided_slice %17 {offsets = [1, 0], sizes = [1, 64], strides = [1, 1]} : vector<4x64xf32> to vector<1x64xf32>
    %c12 = arith.constant 12 : index
    %c0_18 = arith.constant 0 : index
    %20 = vector.load %arg5[%c12, %c0_18] : memref<50x64xf32, #tpu.memory_space<vmem>>, vector<1x64xf32>
    tpu.vector_store %arg5[%c12, %c0_18], %19 {strides = array<i32>} : memref<50x64xf32, #tpu.memory_space<vmem>>, vector<1x64xf32>,
    %21 = vector.extract_strided_slice %17 {offsets = [2, 0], sizes = [1, 64], strides = [1, 1]} : vector<4x64xf32> to vector<1x64xf32>
    %c17 = arith.constant 17 : index
    %c0_19 = arith.constant 0 : index
    %22 = vector.load %arg5[%c17, %c0_19] : memref<50x64xf32, #tpu.memory_space<vmem>>, vector<1x64xf32>
    tpu.vector_store %arg5[%c17, %c0_19], %21 {strides = array<i32>} : memref<50x64xf32, #tpu.memory_space<vmem>>, vector<1x64xf32>,
    %c8 = arith.constant 8 : index
    %c0_20 = arith.constant 0 : index
    %23 = vector.load %arg6[%c8, %c0_20] : memref<16x64xf32, #tpu.memory_space<vmem>>, vector<4x64xf32>
    %c19 = arith.constant 19 : index
    %c0_21 = arith.constant 0 : index
    %24 = vector.load %arg5[%c19, %c0_21] : memref<50x64xf32, #tpu.memory_space<vmem>>, vector<4x64xf32>
    tpu.vector_store %arg5[%c19, %c0_21], %23 {strides = array<i32>} : memref<50x64xf32, #tpu.memory_space<vmem>>, vector<4x64xf32>,
    %25 = vector.extract_strided_slice %23 {offsets = [1, 0], sizes = [1, 64], strides = [1, 1]} : vector<4x64xf32> to vector<1x64xf32>
    %c18 = arith.constant 18 : index
    %c0_22 = arith.constant 0 : index
    %26 = vector.load %arg5[%c18, %c0_22] : memref<50x64xf32, #tpu.memory_space<vmem>>, vector<1x64xf32>
    tpu.vector_store %arg5[%c18, %c0_22], %25 {strides = array<i32>} : memref<50x64xf32, #tpu.memory_space<vmem>>, vector<1x64xf32>,
    %27 = vector.extract_strided_slice %23 {offsets = [2, 0], sizes = [1, 64], strides = [1, 1]} : vector<4x64xf32> to vector<1x64xf32>
    %c23 = arith.constant 23 : index
    %c0_23 = arith.constant 0 : index
    %28 = vector.load %arg5[%c23, %c0_23] : memref<50x64xf32, #tpu.memory_space<vmem>>, vector<1x64xf32>
    tpu.vector_store %arg5[%c23, %c0_23], %27 {strides = array<i32>} : memref<50x64xf32, #tpu.memory_space<vmem>>, vector<1x64xf32>,
    %c12_24 = arith.constant 12 : index
    %c0_25 = arith.constant 0 : index
    %29 = vector.load %arg6[%c12_24, %c0_25] : memref<16x64xf32, #tpu.memory_space<vmem>>, vector<4x64xf32>
    %c25 = arith.constant 25 : index
    %c0_26 = arith.constant 0 : index
    %30 = vector.load %arg5[%c25, %c0_26] : memref<50x64xf32, #tpu.memory_space<vmem>>, vector<4x64xf32>
    tpu.vector_store %arg5[%c25, %c0_26], %29 {strides = array<i32>} : memref<50x64xf32, #tpu.memory_space<vmem>>, vector<4x64xf32>,
    %31 = vector.extract_strided_slice %29 {offsets = [1, 0], sizes = [1, 64], strides = [1, 1]} : vector<4x64xf32> to vector<1x64xf32>
    %c24 = arith.constant 24 : index
    %c0_27 = arith.constant 0 : index
    %32 = vector.load %arg5[%c24, %c0_27] : memref<50x64xf32, #tpu.memory_space<vmem>>, vector<1x64xf32>
    tpu.vector_store %arg5[%c24, %c0_27], %31 {strides = array<i32>} : memref<50x64xf32, #tpu.memory_space<vmem>>, vector<1x64xf32>,
    %33 = vector.extract_strided_slice %29 {offsets = [2, 0], sizes = [1, 64], strides = [1, 1]} : vector<4x64xf32> to vector<1x64xf32>
    %c29 = arith.constant 29 : index
    %c0_28 = arith.constant 0 : index
    %34 = vector.load %arg5[%c29, %c0_28] : memref<50x64xf32, #tpu.memory_space<vmem>>, vector<1x64xf32>
    tpu.vector_store %arg5[%c29, %c0_28], %33 {strides = array<i32>} : memref<50x64xf32, #tpu.memory_space<vmem>>, vector<1x64xf32>,
    %c8_29 = arith.constant 8 : index
    %c0_30 = arith.constant 0 : index
    %35 = vector.load %arg6[%c8_29, %c0_30] : memref<16x64xf32, #tpu.memory_space<vmem>>, vector<4x64xf32>
    %c31 = arith.constant 31 : index
    %c0_31 = arith.constant 0 : index
    %36 = vector.load %arg5[%c31, %c0_31] : memref<50x64xf32, #tpu.memory_space<vmem>>, vector<4x64xf32>
    tpu.vector_store %arg5[%c31, %c0_31], %35 {strides = array<i32>} : memref<50x64xf32, #tpu.memory_space<vmem>>, vector<4x64xf32>,
    %37 = vector.extract_strided_slice %35 {offsets = [1, 0], sizes = [1, 64], strides = [1, 1]} : vector<4x64xf32> to vector<1x64xf32>
    %c30 = arith.constant 30 : index
    %c0_32 = arith.constant 0 : index
    %38 = vector.load %arg5[%c30, %c0_32] : memref<50x64xf32, #tpu.memory_space<vmem>>, vector<1x64xf32>
    tpu.vector_store %arg5[%c30, %c0_32], %37 {strides = array<i32>} : memref<50x64xf32, #tpu.memory_space<vmem>>, vector<1x64xf32>,
    %39 = vector.extract_strided_slice %35 {offsets = [2, 0], sizes = [1, 64], strides = [1, 1]} : vector<4x64xf32> to vector<1x64xf32>
    %c35 = arith.constant 35 : index
    %c0_33 = arith.constant 0 : index
    %40 = vector.load %arg5[%c35, %c0_33] : memref<50x64xf32, #tpu.memory_space<vmem>>, vector<1x64xf32>
    tpu.vector_store %arg5[%c35, %c0_33], %39 {strides = array<i32>} : memref<50x64xf32, #tpu.memory_space<vmem>>, vector<1x64xf32>,
    %cst_34 = arith.constant 0.000000e+00 : f32
    %41 = vector.broadcast %cst_34 : f32 to vector<36x64xf32>
    %c0_35 = arith.constant 0 : index
    %c0_36 = arith.constant 0 : index
    %42 = vector.load %arg5[%c0_35, %c0_36] : memref<50x64xf32, #tpu.memory_space<vmem>>, vector<36x64xf32>
    %43 = arith.truncf %42 : vector<36x64xf32> to vector<36x64xbf16>
    %c0_37 = arith.constant 0 : index
    %c0_38 = arith.constant 0 : index
    %44 = vector.load %arg2[%c0_37, %c0_38] : memref<3456x64xbf16, #tpu.memory_space<vmem>>, vector<64x64xbf16>
    %cst_39 = arith.constant dense<0.000000e+00> : vector<36x64xf32>
    %45 = tpu.matmul %43, %44, %cst_39 {dimension_numbers = #tpu.dot_dimension_numbers<[1], [0], [0], [1], [0, 0, 1, 1], [], []>} : vector<36x64xbf16>, vector<64x64xbf16>, vector<36x64xf32> -> vector<36x64xf32>
    %46 = arith.addf %41, %45 : vector<36x64xf32>
    %c1_40 = arith.constant 1 : index
    %c0_41 = arith.constant 0 : index
    %47 = vector.load %arg5[%c1_40, %c0_41] : memref<50x64xf32, #tpu.memory_space<vmem>>, vector<36x64xf32>
    %48 = arith.truncf %47 : vector<36x64xf32> to vector<36x64xbf16>
    %c64 = arith.constant 64 : index
    %c0_42 = arith.constant 0 : index
    %49 = vector.load %arg2[%c64, %c0_42] : memref<3456x64xbf16, #tpu.memory_space<vmem>>, vector<64x64xbf16>
    %cst_43 = arith.constant dense<0.000000e+00> : vector<36x64xf32>
    %50 = tpu.matmul %48, %49, %cst_43 {dimension_numbers = #tpu.dot_dimension_numbers<[1], [0], [0], [1], [0, 0, 1, 1], [], []>} : vector<36x64xbf16>, vector<64x64xbf16>, vector<36x64xf32> -> vector<36x64xf32>
    %51 = arith.addf %46, %50 : vector<36x64xf32>
    %c2 = arith.constant 2 : index
    %c0_44 = arith.constant 0 : index
    %52 = vector.load %arg5[%c2, %c0_44] : memref<50x64xf32, #tpu.memory_space<vmem>>, vector<36x64xf32>
    %53 = arith.truncf %52 : vector<36x64xf32> to vector<36x64xbf16>
    %c128 = arith.constant 128 : index
    %c0_45 = arith.constant 0 : index
    %54 = vector.load %arg2[%c128, %c0_45] : memref<3456x64xbf16, #tpu.memory_space<vmem>>, vector<64x64xbf16>
    %cst_46 = arith.constant dense<0.000000e+00> : vector<36x64xf32>
    %55 = tpu.matmul %53, %54, %cst_46 {dimension_numbers = #tpu.dot_dimension_numbers<[1], [0], [0], [1], [0, 0, 1, 1], [], []>} : vector<36x64xbf16>, vector<64x64xbf16>, vector<36x64xf32> -> vector<36x64xf32>
    %56 = arith.addf %51, %55 : vector<36x64xf32>
    %c6_47 = arith.constant 6 : index
    %c0_48 = arith.constant 0 : index
    %57 = vector.load %arg5[%c6_47, %c0_48] : memref<50x64xf32, #tpu.memory_space<vmem>>, vector<36x64xf32>
    %58 = arith.truncf %57 : vector<36x64xf32> to vector<36x64xbf16>
    %c192 = arith.constant 192 : index
    %c0_49 = arith.constant 0 : index
    %59 = vector.load %arg2[%c192, %c0_49] : memref<3456x64xbf16, #tpu.memory_space<vmem>>, vector<64x64xbf16>
    %cst_50 = arith.constant dense<0.000000e+00> : vector<36x64xf32>
    %60 = tpu.matmul %58, %59, %cst_50 {dimension_numbers = #tpu.dot_dimension_numbers<[1], [0], [0], [1], [0, 0, 1, 1], [], []>} : vector<36x64xbf16>, vector<64x64xbf16>, vector<36x64xf32> -> vector<36x64xf32>
    %61 = arith.addf %56, %60 : vector<36x64xf32>
    %c7_51 = arith.constant 7 : index
    %c0_52 = arith.constant 0 : index
    %62 = vector.load %arg5[%c7_51, %c0_52] : memref<50x64xf32, #tpu.memory_space<vmem>>, vector<36x64xf32>
    %63 = arith.truncf %62 : vector<36x64xf32> to vector<36x64xbf16>
    %c256 = arith.constant 256 : index
    %c0_53 = arith.constant 0 : index
    %64 = vector.load %arg2[%c256, %c0_53] : memref<3456x64xbf16, #tpu.memory_space<vmem>>, vector<64x64xbf16>
    %cst_54 = arith.constant dense<0.000000e+00> : vector<36x64xf32>
    %65 = tpu.matmul %63, %64, %cst_54 {dimension_numbers = #tpu.dot_dimension_numbers<[1], [0], [0], [1], [0, 0, 1, 1], [], []>} : vector<36x64xbf16>, vector<64x64xbf16>, vector<36x64xf32> -> vector<36x64xf32>
    %66 = arith.addf %61, %65 : vector<36x64xf32>
    %c8_55 = arith.constant 8 : index
    %c0_56 = arith.constant 0 : index
    %67 = vector.load %arg5[%c8_55, %c0_56] : memref<50x64xf32, #tpu.memory_space<vmem>>, vector<36x64xf32>
    %68 = arith.truncf %67 : vector<36x64xf32> to vector<36x64xbf16>
    %c320 = arith.constant 320 : index
    %c0_57 = arith.constant 0 : index
    %69 = vector.load %arg2[%c320, %c0_57] : memref<3456x64xbf16, #tpu.memory_space<vmem>>, vector<64x64xbf16>
    %cst_58 = arith.constant dense<0.000000e+00> : vector<36x64xf32>
    %70 = tpu.matmul %68, %69, %cst_58 {dimension_numbers = #tpu.dot_dimension_numbers<[1], [0], [0], [1], [0, 0, 1, 1], [], []>} : vector<36x64xbf16>, vector<64x64xbf16>, vector<36x64xf32> -> vector<36x64xf32>
    %71 = arith.addf %66, %70 : vector<36x64xf32>
    %c12_59 = arith.constant 12 : index
    %c0_60 = arith.constant 0 : index
    %72 = vector.load %arg5[%c12_59, %c0_60] : memref<50x64xf32, #tpu.memory_space<vmem>>, vector<36x64xf32>
    %73 = arith.truncf %72 : vector<36x64xf32> to vector<36x64xbf16>
    %c384 = arith.constant 384 : index
    %c0_61 = arith.constant 0 : index
    %74 = vector.load %arg2[%c384, %c0_61] : memref<3456x64xbf16, #tpu.memory_space<vmem>>, vector<64x64xbf16>
    %cst_62 = arith.constant dense<0.000000e+00> : vector<36x64xf32>
    %75 = tpu.matmul %73, %74, %cst_62 {dimension_numbers = #tpu.dot_dimension_numbers<[1], [0], [0], [1], [0, 0, 1, 1], [], []>} : vector<36x64xbf16>, vector<64x64xbf16>, vector<36x64xf32> -> vector<36x64xf32>
    %76 = arith.addf %71, %75 : vector<36x64xf32>
    %c13_63 = arith.constant 13 : index
    %c0_64 = arith.constant 0 : index
    %77 = vector.load %arg5[%c13_63, %c0_64] : memref<50x64xf32, #tpu.memory_space<vmem>>, vector<36x64xf32>
    %78 = arith.truncf %77 : vector<36x64xf32> to vector<36x64xbf16>
    %c448 = arith.constant 448 : index
    %c0_65 = arith.constant 0 : index
    %79 = vector.load %arg2[%c448, %c0_65] : memref<3456x64xbf16, #tpu.memory_space<vmem>>, vector<64x64xbf16>
    %cst_66 = arith.constant dense<0.000000e+00> : vector<36x64xf32>
    %80 = tpu.matmul %78, %79, %cst_66 {dimension_numbers = #tpu.dot_dimension_numbers<[1], [0], [0], [1], [0, 0, 1, 1], [], []>} : vector<36x64xbf16>, vector<64x64xbf16>, vector<36x64xf32> -> vector<36x64xf32>
    %81 = arith.addf %76, %80 : vector<36x64xf32>
    %c14 = arith.constant 14 : index
    %c0_67 = arith.constant 0 : index
    %82 = vector.load %arg5[%c14, %c0_67] : memref<50x64xf32, #tpu.memory_space<vmem>>, vector<36x64xf32>
    %83 = arith.truncf %82 : vector<36x64xf32> to vector<36x64xbf16>
    %c512 = arith.constant 512 : index
    %c0_68 = arith.constant 0 : index
    %84 = vector.load %arg2[%c512, %c0_68] : memref<3456x64xbf16, #tpu.memory_space<vmem>>, vector<64x64xbf16>
    %cst_69 = arith.constant dense<0.000000e+00> : vector<36x64xf32>
    %85 = tpu.matmul %83, %84, %cst_69 {dimension_numbers = #tpu.dot_dimension_numbers<[1], [0], [0], [1], [0, 0, 1, 1], [], []>} : vector<36x64xbf16>, vector<64x64xbf16>, vector<36x64xf32> -> vector<36x64xf32>
    %86 = arith.addf %81, %85 : vector<36x64xf32>
    %c0_70 = arith.constant 0 : index
    %c0_71 = arith.constant 0 : index
    %87 = vector.load %arg3[%c0_70, %c0_71] : memref<6x64xf32, #tpu.memory_space<vmem>>, vector<1x64xf32>
    %88 = vector.broadcast %87 : vector<1x64xf32> to vector<36x64xf32>
    %89 = arith.addf %86, %88 : vector<36x64xf32>
    %cst_72 = arith.constant 0.000000e+00 : f32
    %90 = vector.broadcast %cst_72 : f32 to vector<36x64xf32>
    %91 = arith.maximumf %89, %90 : vector<36x64xf32>
    %92 = vector.extract_strided_slice %91 {offsets = [6, 0], sizes = [4, 64], strides = [1, 1]} : vector<36x64xf32> to vector<4x64xf32>
    %c1_73 = arith.constant 1 : index
    %c0_74 = arith.constant 0 : index
    %93 = vector.load %arg5[%c1_73, %c0_74] : memref<50x64xf32, #tpu.memory_space<vmem>>, vector<4x64xf32>
    tpu.vector_store %arg5[%c1_73, %c0_74], %92 {strides = array<i32>} : memref<50x64xf32, #tpu.memory_space<vmem>>, vector<4x64xf32>,
    %94 = vector.extract_strided_slice %92 {offsets = [1, 0], sizes = [1, 64], strides = [1, 1]} : vector<4x64xf32> to vector<1x64xf32>
    %c0_75 = arith.constant 0 : index
    %c0_76 = arith.constant 0 : index
    %95 = vector.load %arg5[%c0_75, %c0_76] : memref<50x64xf32, #tpu.memory_space<vmem>>, vector<1x64xf32>
    tpu.vector_store %arg5[%c0_75, %c0_76], %94 {strides = array<i32>} : memref<50x64xf32, #tpu.memory_space<vmem>>, vector<1x64xf32>,
    %96 = vector.extract_strided_slice %92 {offsets = [2, 0], sizes = [1, 64], strides = [1, 1]} : vector<4x64xf32> to vector<1x64xf32>
    %c5_77 = arith.constant 5 : index
    %c0_78 = arith.constant 0 : index
    %97 = vector.load %arg5[%c5_77, %c0_78] : memref<50x64xf32, #tpu.memory_space<vmem>>, vector<1x64xf32>
    tpu.vector_store %arg5[%c5_77, %c0_78], %96 {strides = array<i32>} : memref<50x64xf32, #tpu.memory_space<vmem>>, vector<1x64xf32>,
    %98 = vector.extract_strided_slice %91 {offsets = [0, 0], sizes = [4, 64], strides = [1, 1]} : vector<36x64xf32> to vector<4x64xf32>
    %c7_79 = arith.constant 7 : index
    %c0_80 = arith.constant 0 : index
    %99 = vector.load %arg5[%c7_79, %c0_80] : memref<50x64xf32, #tpu.memory_space<vmem>>, vector<4x64xf32>
    tpu.vector_store %arg5[%c7_79, %c0_80], %98 {strides = array<i32>} : memref<50x64xf32, #tpu.memory_space<vmem>>, vector<4x64xf32>,
    %100 = vector.extract_strided_slice %98 {offsets = [1, 0], sizes = [1, 64], strides = [1, 1]} : vector<4x64xf32> to vector<1x64xf32>
    %c6_81 = arith.constant 6 : index
    %c0_82 = arith.constant 0 : index
    %101 = vector.load %arg5[%c6_81, %c0_82] : memref<50x64xf32, #tpu.memory_space<vmem>>, vector<1x64xf32>
    tpu.vector_store %arg5[%c6_81, %c0_82], %100 {strides = array<i32>} : memref<50x64xf32, #tpu.memory_space<vmem>>, vector<1x64xf32>,
    %102 = vector.extract_strided_slice %98 {offsets = [2, 0], sizes = [1, 64], strides = [1, 1]} : vector<4x64xf32> to vector<1x64xf32>
    %c11_83 = arith.constant 11 : index
    %c0_84 = arith.constant 0 : index
    %103 = vector.load %arg5[%c11_83, %c0_84] : memref<50x64xf32, #tpu.memory_space<vmem>>, vector<1x64xf32>
    tpu.vector_store %arg5[%c11_83, %c0_84], %102 {strides = array<i32>} : memref<50x64xf32, #tpu.memory_space<vmem>>, vector<1x64xf32>,
    %104 = vector.extract_strided_slice %91 {offsets = [6, 0], sizes = [4, 64], strides = [1, 1]} : vector<36x64xf32> to vector<4x64xf32>
    %c13_85 = arith.constant 13 : index
    %c0_86 = arith.constant 0 : index
    %105 = vector.load %arg5[%c13_85, %c0_86] : memref<50x64xf32, #tpu.memory_space<vmem>>, vector<4x64xf32>
    tpu.vector_store %arg5[%c13_85, %c0_86], %104 {strides = array<i32>} : memref<50x64xf32, #tpu.memory_space<vmem>>, vector<4x64xf32>,
    %106 = vector.extract_strided_slice %104 {offsets = [1, 0], sizes = [1, 64], strides = [1, 1]} : vector<4x64xf32> to vector<1x64xf32>
    %c12_87 = arith.constant 12 : index
    %c0_88 = arith.constant 0 : index
    %107 = vector.load %arg5[%c12_87, %c0_88] : memref<50x64xf32, #tpu.memory_space<vmem>>, vector<1x64xf32>
    tpu.vector_store %arg5[%c12_87, %c0_88], %106 {strides = array<i32>} : memref<50x64xf32, #tpu.memory_space<vmem>>, vector<1x64xf32>,
    %108 = vector.extract_strided_slice %104 {offsets = [2, 0], sizes = [1, 64], strides = [1, 1]} : vector<4x64xf32> to vector<1x64xf32>
    %c17_89 = arith.constant 17 : index
    %c0_90 = arith.constant 0 : index
    %109 = vector.load %arg5[%c17_89, %c0_90] : memref<50x64xf32, #tpu.memory_space<vmem>>, vector<1x64xf32>
    tpu.vector_store %arg5[%c17_89, %c0_90], %108 {strides = array<i32>} : memref<50x64xf32, #tpu.memory_space<vmem>>, vector<1x64xf32>,
    %110 = vector.extract_strided_slice %91 {offsets = [12, 0], sizes = [4, 64], strides = [1, 1]} : vector<36x64xf32> to vector<4x64xf32>
    %c19_91 = arith.constant 19 : index
    %c0_92 = arith.constant 0 : index
    %111 = vector.load %arg5[%c19_91, %c0_92] : memref<50x64xf32, #tpu.memory_space<vmem>>, vector<4x64xf32>
    tpu.vector_store %arg5[%c19_91, %c0_92], %110 {strides = array<i32>} : memref<50x64xf32, #tpu.memory_space<vmem>>, vector<4x64xf32>,
    %112 = vector.extract_strided_slice %110 {offsets = [1, 0], sizes = [1, 64], strides = [1, 1]} : vector<4x64xf32> to vector<1x64xf32>
    %c18_93 = arith.constant 18 : index
    %c0_94 = arith.constant 0 : index
    %113 = vector.load %arg5[%c18_93, %c0_94] : memref<50x64xf32, #tpu.memory_space<vmem>>, vector<1x64xf32>
    tpu.vector_store %arg5[%c18_93, %c0_94], %112 {strides = array<i32>} : memref<50x64xf32, #tpu.memory_space<vmem>>, vector<1x64xf32>,
    %114 = vector.extract_strided_slice %110 {offsets = [2, 0], sizes = [1, 64], strides = [1, 1]} : vector<4x64xf32> to vector<1x64xf32>
    %c23_95 = arith.constant 23 : index
    %c0_96 = arith.constant 0 : index
    %115 = vector.load %arg5[%c23_95, %c0_96] : memref<50x64xf32, #tpu.memory_space<vmem>>, vector<1x64xf32>
    tpu.vector_store %arg5[%c23_95, %c0_96], %114 {strides = array<i32>} : memref<50x64xf32, #tpu.memory_space<vmem>>, vector<1x64xf32>,
    %116 = vector.extract_strided_slice %91 {offsets = [18, 0], sizes = [4, 64], strides = [1, 1]} : vector<36x64xf32> to vector<4x64xf32>
    %c25_97 = arith.constant 25 : index
    %c0_98 = arith.constant 0 : index
    %117 = vector.load %arg5[%c25_97, %c0_98] : memref<50x64xf32, #tpu.memory_space<vmem>>, vector<4x64xf32>
    tpu.vector_store %arg5[%c25_97, %c0_98], %116 {strides = array<i32>} : memref<50x64xf32, #tpu.memory_space<vmem>>, vector<4x64xf32>,
    %118 = vector.extract_strided_slice %116 {offsets = [1, 0], sizes = [1, 64], strides = [1, 1]} : vector<4x64xf32> to vector<1x64xf32>
    %c24_99 = arith.constant 24 : index
    %c0_100 = arith.constant 0 : index
    %119 = vector.load %arg5[%c24_99, %c0_100] : memref<50x64xf32, #tpu.memory_space<vmem>>, vector<1x64xf32>
    tpu.vector_store %arg5[%c24_99, %c0_100], %118 {strides = array<i32>} : memref<50x64xf32, #tpu.memory_space<vmem>>, vector<1x64xf32>,
    %120 = vector.extract_strided_slice %116 {offsets = [2, 0], sizes = [1, 64], strides = [1, 1]} : vector<4x64xf32> to vector<1x64xf32>
    %c29_101 = arith.constant 29 : index
    %c0_102 = arith.constant 0 : index
    %121 = vector.load %arg5[%c29_101, %c0_102] : memref<50x64xf32, #tpu.memory_space<vmem>>, vector<1x64xf32>
    tpu.vector_store %arg5[%c29_101, %c0_102], %120 {strides = array<i32>} : memref<50x64xf32, #tpu.memory_space<vmem>>, vector<1x64xf32>,
    %122 = vector.extract_strided_slice %91 {offsets = [12, 0], sizes = [4, 64], strides = [1, 1]} : vector<36x64xf32> to vector<4x64xf32>
    %c31_103 = arith.constant 31 : index
    %c0_104 = arith.constant 0 : index
    %123 = vector.load %arg5[%c31_103, %c0_104] : memref<50x64xf32, #tpu.memory_space<vmem>>, vector<4x64xf32>
    tpu.vector_store %arg5[%c31_103, %c0_104], %122 {strides = array<i32>} : memref<50x64xf32, #tpu.memory_space<vmem>>, vector<4x64xf32>,
    %124 = vector.extract_strided_slice %122 {offsets = [1, 0], sizes = [1, 64], strides = [1, 1]} : vector<4x64xf32> to vector<1x64xf32>
    %c30_105 = arith.constant 30 : index
    %c0_106 = arith.constant 0 : index
    %125 = vector.load %arg5[%c30_105, %c0_106] : memref<50x64xf32, #tpu.memory_space<vmem>>, vector<1x64xf32>
    tpu.vector_store %arg5[%c30_105, %c0_106], %124 {strides = array<i32>} : memref<50x64xf32, #tpu.memory_space<vmem>>, vector<1x64xf32>,
    %126 = vector.extract_strided_slice %122 {offsets = [2, 0], sizes = [1, 64], strides = [1, 1]} : vector<4x64xf32> to vector<1x64xf32>
    %c35_107 = arith.constant 35 : index
    %c0_108 = arith.constant 0 : index
    %127 = vector.load %arg5[%c35_107, %c0_108] : memref<50x64xf32, #tpu.memory_space<vmem>>, vector<1x64xf32>
    tpu.vector_store %arg5[%c35_107, %c0_108], %126 {strides = array<i32>} : memref<50x64xf32, #tpu.memory_space<vmem>>, vector<1x64xf32>,
    %cst_109 = arith.constant 0.000000e+00 : f32
    %128 = vector.broadcast %cst_109 : f32 to vector<36x64xf32>
    %c0_110 = arith.constant 0 : index
    %c0_111 = arith.constant 0 : index
    %129 = vector.load %arg5[%c0_110, %c0_111] : memref<50x64xf32, #tpu.memory_space<vmem>>, vector<36x64xf32>
    %130 = arith.truncf %129 : vector<36x64xf32> to vector<36x64xbf16>
    %c576 = arith.constant 576 : index
    %c0_112 = arith.constant 0 : index
    %131 = vector.load %arg2[%c576, %c0_112] : memref<3456x64xbf16, #tpu.memory_space<vmem>>, vector<64x64xbf16>
    %cst_113 = arith.constant dense<0.000000e+00> : vector<36x64xf32>
    %132 = tpu.matmul %130, %131, %cst_113 {dimension_numbers = #tpu.dot_dimension_numbers<[1], [0], [0], [1], [0, 0, 1, 1], [], []>} : vector<36x64xbf16>, vector<64x64xbf16>, vector<36x64xf32> -> vector<36x64xf32>
    %133 = arith.addf %128, %132 : vector<36x64xf32>
    %c1_114 = arith.constant 1 : index
    %c0_115 = arith.constant 0 : index
    %134 = vector.load %arg5[%c1_114, %c0_115] : memref<50x64xf32, #tpu.memory_space<vmem>>, vector<36x64xf32>
    %135 = arith.truncf %134 : vector<36x64xf32> to vector<36x64xbf16>
    %c640 = arith.constant 640 : index
    %c0_116 = arith.constant 0 : index
    %136 = vector.load %arg2[%c640, %c0_116] : memref<3456x64xbf16, #tpu.memory_space<vmem>>, vector<64x64xbf16>
    %cst_117 = arith.constant dense<0.000000e+00> : vector<36x64xf32>
    %137 = tpu.matmul %135, %136, %cst_117 {dimension_numbers = #tpu.dot_dimension_numbers<[1], [0], [0], [1], [0, 0, 1, 1], [], []>} : vector<36x64xbf16>, vector<64x64xbf16>, vector<36x64xf32> -> vector<36x64xf32>
    %138 = arith.addf %133, %137 : vector<36x64xf32>
    %c2_118 = arith.constant 2 : index
    %c0_119 = arith.constant 0 : index
    %139 = vector.load %arg5[%c2_118, %c0_119] : memref<50x64xf32, #tpu.memory_space<vmem>>, vector<36x64xf32>
    %140 = arith.truncf %139 : vector<36x64xf32> to vector<36x64xbf16>
    %c704 = arith.constant 704 : index
    %c0_120 = arith.constant 0 : index
    %141 = vector.load %arg2[%c704, %c0_120] : memref<3456x64xbf16, #tpu.memory_space<vmem>>, vector<64x64xbf16>
    %cst_121 = arith.constant dense<0.000000e+00> : vector<36x64xf32>
    %142 = tpu.matmul %140, %141, %cst_121 {dimension_numbers = #tpu.dot_dimension_numbers<[1], [0], [0], [1], [0, 0, 1, 1], [], []>} : vector<36x64xbf16>, vector<64x64xbf16>, vector<36x64xf32> -> vector<36x64xf32>
    %143 = arith.addf %138, %142 : vector<36x64xf32>
    %c6_122 = arith.constant 6 : index
    %c0_123 = arith.constant 0 : index
    %144 = vector.load %arg5[%c6_122, %c0_123] : memref<50x64xf32, #tpu.memory_space<vmem>>, vector<36x64xf32>
    %145 = arith.truncf %144 : vector<36x64xf32> to vector<36x64xbf16>
    %c768 = arith.constant 768 : index
    %c0_124 = arith.constant 0 : index
    %146 = vector.load %arg2[%c768, %c0_124] : memref<3456x64xbf16, #tpu.memory_space<vmem>>, vector<64x64xbf16>
    %cst_125 = arith.constant dense<0.000000e+00> : vector<36x64xf32>
    %147 = tpu.matmul %145, %146, %cst_125 {dimension_numbers = #tpu.dot_dimension_numbers<[1], [0], [0], [1], [0, 0, 1, 1], [], []>} : vector<36x64xbf16>, vector<64x64xbf16>, vector<36x64xf32> -> vector<36x64xf32>
    %148 = arith.addf %143, %147 : vector<36x64xf32>
    %c7_126 = arith.constant 7 : index
    %c0_127 = arith.constant 0 : index
    %149 = vector.load %arg5[%c7_126, %c0_127] : memref<50x64xf32, #tpu.memory_space<vmem>>, vector<36x64xf32>
    %150 = arith.truncf %149 : vector<36x64xf32> to vector<36x64xbf16>
    %c832 = arith.constant 832 : index
    %c0_128 = arith.constant 0 : index
    %151 = vector.load %arg2[%c832, %c0_128] : memref<3456x64xbf16, #tpu.memory_space<vmem>>, vector<64x64xbf16>
    %cst_129 = arith.constant dense<0.000000e+00> : vector<36x64xf32>
    %152 = tpu.matmul %150, %151, %cst_129 {dimension_numbers = #tpu.dot_dimension_numbers<[1], [0], [0], [1], [0, 0, 1, 1], [], []>} : vector<36x64xbf16>, vector<64x64xbf16>, vector<36x64xf32> -> vector<36x64xf32>
    %153 = arith.addf %148, %152 : vector<36x64xf32>
    %c8_130 = arith.constant 8 : index
    %c0_131 = arith.constant 0 : index
    %154 = vector.load %arg5[%c8_130, %c0_131] : memref<50x64xf32, #tpu.memory_space<vmem>>, vector<36x64xf32>
    %155 = arith.truncf %154 : vector<36x64xf32> to vector<36x64xbf16>
    %c896 = arith.constant 896 : index
    %c0_132 = arith.constant 0 : index
    %156 = vector.load %arg2[%c896, %c0_132] : memref<3456x64xbf16, #tpu.memory_space<vmem>>, vector<64x64xbf16>
    %cst_133 = arith.constant dense<0.000000e+00> : vector<36x64xf32>
    %157 = tpu.matmul %155, %156, %cst_133 {dimension_numbers = #tpu.dot_dimension_numbers<[1], [0], [0], [1], [0, 0, 1, 1], [], []>} : vector<36x64xbf16>, vector<64x64xbf16>, vector<36x64xf32> -> vector<36x64xf32>
    %158 = arith.addf %153, %157 : vector<36x64xf32>
    %c12_134 = arith.constant 12 : index
    %c0_135 = arith.constant 0 : index
    %159 = vector.load %arg5[%c12_134, %c0_135] : memref<50x64xf32, #tpu.memory_space<vmem>>, vector<36x64xf32>
    %160 = arith.truncf %159 : vector<36x64xf32> to vector<36x64xbf16>
    %c960 = arith.constant 960 : index
    %c0_136 = arith.constant 0 : index
    %161 = vector.load %arg2[%c960, %c0_136] : memref<3456x64xbf16, #tpu.memory_space<vmem>>, vector<64x64xbf16>
    %cst_137 = arith.constant dense<0.000000e+00> : vector<36x64xf32>
    %162 = tpu.matmul %160, %161, %cst_137 {dimension_numbers = #tpu.dot_dimension_numbers<[1], [0], [0], [1], [0, 0, 1, 1], [], []>} : vector<36x64xbf16>, vector<64x64xbf16>, vector<36x64xf32> -> vector<36x64xf32>
    %163 = arith.addf %158, %162 : vector<36x64xf32>
    %c13_138 = arith.constant 13 : index
    %c0_139 = arith.constant 0 : index
    %164 = vector.load %arg5[%c13_138, %c0_139] : memref<50x64xf32, #tpu.memory_space<vmem>>, vector<36x64xf32>
    %165 = arith.truncf %164 : vector<36x64xf32> to vector<36x64xbf16>
    %c1024 = arith.constant 1024 : index
    %c0_140 = arith.constant 0 : index
    %166 = vector.load %arg2[%c1024, %c0_140] : memref<3456x64xbf16, #tpu.memory_space<vmem>>, vector<64x64xbf16>
    %cst_141 = arith.constant dense<0.000000e+00> : vector<36x64xf32>
    %167 = tpu.matmul %165, %166, %cst_141 {dimension_numbers = #tpu.dot_dimension_numbers<[1], [0], [0], [1], [0, 0, 1, 1], [], []>} : vector<36x64xbf16>, vector<64x64xbf16>, vector<36x64xf32> -> vector<36x64xf32>
    %168 = arith.addf %163, %167 : vector<36x64xf32>
    %c14_142 = arith.constant 14 : index
    %c0_143 = arith.constant 0 : index
    %169 = vector.load %arg5[%c14_142, %c0_143] : memref<50x64xf32, #tpu.memory_space<vmem>>, vector<36x64xf32>
    %170 = arith.truncf %169 : vector<36x64xf32> to vector<36x64xbf16>
    %c1088 = arith.constant 1088 : index
    %c0_144 = arith.constant 0 : index
    %171 = vector.load %arg2[%c1088, %c0_144] : memref<3456x64xbf16, #tpu.memory_space<vmem>>, vector<64x64xbf16>
    %cst_145 = arith.constant dense<0.000000e+00> : vector<36x64xf32>
    %172 = tpu.matmul %170, %171, %cst_145 {dimension_numbers = #tpu.dot_dimension_numbers<[1], [0], [0], [1], [0, 0, 1, 1], [], []>} : vector<36x64xbf16>, vector<64x64xbf16>, vector<36x64xf32> -> vector<36x64xf32>
    %173 = arith.addf %168, %172 : vector<36x64xf32>
    %c1_146 = arith.constant 1 : index
    %c0_147 = arith.constant 0 : index
    %174 = vector.load %arg3[%c1_146, %c0_147] : memref<6x64xf32, #tpu.memory_space<vmem>>, vector<1x64xf32>
    %175 = vector.broadcast %174 : vector<1x64xf32> to vector<36x64xf32>
    %176 = arith.addf %173, %175 : vector<36x64xf32>
    %c0_148 = arith.constant 0 : index
    %c0_149 = arith.constant 0 : index
    %177 = vector.load %arg6[%c0_148, %c0_149] : memref<16x64xf32, #tpu.memory_space<vmem>>, vector<4x64xf32>
    %178 = vector.extract_strided_slice %176 {offsets = [0, 0], sizes = [4, 64], strides = [1, 1]} : vector<36x64xf32> to vector<4x64xf32>
    %179 = arith.addf %177, %178 : vector<4x64xf32>
    %c0_150 = arith.constant 0 : index
    %c0_151 = arith.constant 0 : index
    %180 = vector.load %arg6[%c0_150, %c0_151] : memref<16x64xf32, #tpu.memory_space<vmem>>, vector<4x64xf32>
    tpu.vector_store %arg6[%c0_150, %c0_151], %179 {strides = array<i32>} : memref<16x64xf32, #tpu.memory_space<vmem>>, vector<4x64xf32>,
    %c4_152 = arith.constant 4 : index
    %c0_153 = arith.constant 0 : index
    %181 = vector.load %arg6[%c4_152, %c0_153] : memref<16x64xf32, #tpu.memory_space<vmem>>, vector<4x64xf32>
    %182 = vector.extract_strided_slice %176 {offsets = [6, 0], sizes = [4, 64], strides = [1, 1]} : vector<36x64xf32> to vector<4x64xf32>
    %183 = arith.addf %181, %182 : vector<4x64xf32>
    %c4_154 = arith.constant 4 : index
    %c0_155 = arith.constant 0 : index
    %184 = vector.load %arg6[%c4_154, %c0_155] : memref<16x64xf32, #tpu.memory_space<vmem>>, vector<4x64xf32>
    tpu.vector_store %arg6[%c4_154, %c0_155], %183 {strides = array<i32>} : memref<16x64xf32, #tpu.memory_space<vmem>>, vector<4x64xf32>,
    %c8_156 = arith.constant 8 : index
    %c0_157 = arith.constant 0 : index
    %185 = vector.load %arg6[%c8_156, %c0_157] : memref<16x64xf32, #tpu.memory_space<vmem>>, vector<4x64xf32>
    %186 = vector.extract_strided_slice %176 {offsets = [12, 0], sizes = [4, 64], strides = [1, 1]} : vector<36x64xf32> to vector<4x64xf32>
    %187 = arith.addf %185, %186 : vector<4x64xf32>
    %c8_158 = arith.constant 8 : index
    %c0_159 = arith.constant 0 : index
    %188 = vector.load %arg6[%c8_158, %c0_159] : memref<16x64xf32, #tpu.memory_space<vmem>>, vector<4x64xf32>
    tpu.vector_store %arg6[%c8_158, %c0_159], %187 {strides = array<i32>} : memref<16x64xf32, #tpu.memory_space<vmem>>, vector<4x64xf32>,
    %c12_160 = arith.constant 12 : index
    %c0_161 = arith.constant 0 : index
    %189 = vector.load %arg6[%c12_160, %c0_161] : memref<16x64xf32, #tpu.memory_space<vmem>>, vector<4x64xf32>
    %190 = vector.extract_strided_slice %176 {offsets = [18, 0], sizes = [4, 64], strides = [1, 1]} : vector<36x64xf32> to vector<4x64xf32>
    %191 = arith.addf %189, %190 : vector<4x64xf32>
    %c12_162 = arith.constant 12 : index
    %c0_163 = arith.constant 0 : index
    %192 = vector.load %arg6[%c12_162, %c0_163] : memref<16x64xf32, #tpu.memory_space<vmem>>, vector<4x64xf32>
    tpu.vector_store %arg6[%c12_162, %c0_163], %191 {strides = array<i32>} : memref<16x64xf32, #tpu.memory_space<vmem>>, vector<4x64xf32>,
    %c4_164 = arith.constant 4 : index
    %c0_165 = arith.constant 0 : index
    %193 = vector.load %arg6[%c4_164, %c0_165] : memref<16x64xf32, #tpu.memory_space<vmem>>, vector<4x64xf32>
    %c1_166 = arith.constant 1 : index
    %c0_167 = arith.constant 0 : index
    %194 = vector.load %arg5[%c1_166, %c0_167] : memref<50x64xf32, #tpu.memory_space<vmem>>, vector<4x64xf32>
    tpu.vector_store %arg5[%c1_166, %c0_167], %193 {strides = array<i32>} : memref<50x64xf32, #tpu.memory_space<vmem>>, vector<4x64xf32>,
    %195 = vector.extract_strided_slice %193 {offsets = [1, 0], sizes = [1, 64], strides = [1, 1]} : vector<4x64xf32> to vector<1x64xf32>
    %c0_168 = arith.constant 0 : index
    %c0_169 = arith.constant 0 : index
    %196 = vector.load %arg5[%c0_168, %c0_169] : memref<50x64xf32, #tpu.memory_space<vmem>>, vector<1x64xf32>
    tpu.vector_store %arg5[%c0_168, %c0_169], %195 {strides = array<i32>} : memref<50x64xf32, #tpu.memory_space<vmem>>, vector<1x64xf32>,
    %197 = vector.extract_strided_slice %193 {offsets = [2, 0], sizes = [1, 64], strides = [1, 1]} : vector<4x64xf32> to vector<1x64xf32>
    %c5_170 = arith.constant 5 : index
    %c0_171 = arith.constant 0 : index
    %198 = vector.load %arg5[%c5_170, %c0_171] : memref<50x64xf32, #tpu.memory_space<vmem>>, vector<1x64xf32>
    tpu.vector_store %arg5[%c5_170, %c0_171], %197 {strides = array<i32>} : memref<50x64xf32, #tpu.memory_space<vmem>>, vector<1x64xf32>,
    %c0_172 = arith.constant 0 : index
    %c0_173 = arith.constant 0 : index
    %199 = vector.load %arg6[%c0_172, %c0_173] : memref<16x64xf32, #tpu.memory_space<vmem>>, vector<4x64xf32>
    %c7_174 = arith.constant 7 : index
    %c0_175 = arith.constant 0 : index
    %200 = vector.load %arg5[%c7_174, %c0_175] : memref<50x64xf32, #tpu.memory_space<vmem>>, vector<4x64xf32>
    tpu.vector_store %arg5[%c7_174, %c0_175], %199 {strides = array<i32>} : memref<50x64xf32, #tpu.memory_space<vmem>>, vector<4x64xf32>,
    %201 = vector.extract_strided_slice %199 {offsets = [1, 0], sizes = [1, 64], strides = [1, 1]} : vector<4x64xf32> to vector<1x64xf32>
    %c6_176 = arith.constant 6 : index
    %c0_177 = arith.constant 0 : index
    %202 = vector.load %arg5[%c6_176, %c0_177] : memref<50x64xf32, #tpu.memory_space<vmem>>, vector<1x64xf32>
    tpu.vector_store %arg5[%c6_176, %c0_177], %201 {strides = array<i32>} : memref<50x64xf32, #tpu.memory_space<vmem>>, vector<1x64xf32>,
    %203 = vector.extract_strided_slice %199 {offsets = [2, 0], sizes = [1, 64], strides = [1, 1]} : vector<4x64xf32> to vector<1x64xf32>
    %c11_178 = arith.constant 11 : index
    %c0_179 = arith.constant 0 : index
    %204 = vector.load %arg5[%c11_178, %c0_179] : memref<50x64xf32, #tpu.memory_space<vmem>>, vector<1x64xf32>
    tpu.vector_store %arg5[%c11_178, %c0_179], %203 {strides = array<i32>} : memref<50x64xf32, #tpu.memory_space<vmem>>, vector<1x64xf32>,
    %c4_180 = arith.constant 4 : index
    %c0_181 = arith.constant 0 : index
    %205 = vector.load %arg6[%c4_180, %c0_181] : memref<16x64xf32, #tpu.memory_space<vmem>>, vector<4x64xf32>
    %c13_182 = arith.constant 13 : index
    %c0_183 = arith.constant 0 : index
    %206 = vector.load %arg5[%c13_182, %c0_183] : memref<50x64xf32, #tpu.memory_space<vmem>>, vector<4x64xf32>
    tpu.vector_store %arg5[%c13_182, %c0_183], %205 {strides = array<i32>} : memref<50x64xf32, #tpu.memory_space<vmem>>, vector<4x64xf32>,
    %207 = vector.extract_strided_slice %205 {offsets = [1, 0], sizes = [1, 64], strides = [1, 1]} : vector<4x64xf32> to vector<1x64xf32>
    %c12_184 = arith.constant 12 : index
    %c0_185 = arith.constant 0 : index
    %208 = vector.load %arg5[%c12_184, %c0_185] : memref<50x64xf32, #tpu.memory_space<vmem>>, vector<1x64xf32>
    tpu.vector_store %arg5[%c12_184, %c0_185], %207 {strides = array<i32>} : memref<50x64xf32, #tpu.memory_space<vmem>>, vector<1x64xf32>,
    %209 = vector.extract_strided_slice %205 {offsets = [2, 0], sizes = [1, 64], strides = [1, 1]} : vector<4x64xf32> to vector<1x64xf32>
    %c17_186 = arith.constant 17 : index
    %c0_187 = arith.constant 0 : index
    %210 = vector.load %arg5[%c17_186, %c0_187] : memref<50x64xf32, #tpu.memory_space<vmem>>, vector<1x64xf32>
    tpu.vector_store %arg5[%c17_186, %c0_187], %209 {strides = array<i32>} : memref<50x64xf32, #tpu.memory_space<vmem>>, vector<1x64xf32>,
    %c8_188 = arith.constant 8 : index
    %c0_189 = arith.constant 0 : index
    %211 = vector.load %arg6[%c8_188, %c0_189] : memref<16x64xf32, #tpu.memory_space<vmem>>, vector<4x64xf32>
    %c19_190 = arith.constant 19 : index
    %c0_191 = arith.constant 0 : index
    %212 = vector.load %arg5[%c19_190, %c0_191] : memref<50x64xf32, #tpu.memory_space<vmem>>, vector<4x64xf32>
    tpu.vector_store %arg5[%c19_190, %c0_191], %211 {strides = array<i32>} : memref<50x64xf32, #tpu.memory_space<vmem>>, vector<4x64xf32>,
    %213 = vector.extract_strided_slice %211 {offsets = [1, 0], sizes = [1, 64], strides = [1, 1]} : vector<4x64xf32> to vector<1x64xf32>
    %c18_192 = arith.constant 18 : index
    %c0_193 = arith.constant 0 : index
    %214 = vector.load %arg5[%c18_192, %c0_193] : memref<50x64xf32, #tpu.memory_space<vmem>>, vector<1x64xf32>
    tpu.vector_store %arg5[%c18_192, %c0_193], %213 {strides = array<i32>} : memref<50x64xf32, #tpu.memory_space<vmem>>, vector<1x64xf32>,
    %215 = vector.extract_strided_slice %211 {offsets = [2, 0], sizes = [1, 64], strides = [1, 1]} : vector<4x64xf32> to vector<1x64xf32>
    %c23_194 = arith.constant 23 : index
    %c0_195 = arith.constant 0 : index
    %216 = vector.load %arg5[%c23_194, %c0_195] : memref<50x64xf32, #tpu.memory_space<vmem>>, vector<1x64xf32>
    tpu.vector_store %arg5[%c23_194, %c0_195], %215 {strides = array<i32>} : memref<50x64xf32, #tpu.memory_space<vmem>>, vector<1x64xf32>,
    %c12_196 = arith.constant 12 : index
    %c0_197 = arith.constant 0 : index
    %217 = vector.load %arg6[%c12_196, %c0_197] : memref<16x64xf32, #tpu.memory_space<vmem>>, vector<4x64xf32>
    %c25_198 = arith.constant 25 : index
    %c0_199 = arith.constant 0 : index
    %218 = vector.load %arg5[%c25_198, %c0_199] : memref<50x64xf32, #tpu.memory_space<vmem>>, vector<4x64xf32>
    tpu.vector_store %arg5[%c25_198, %c0_199], %217 {strides = array<i32>} : memref<50x64xf32, #tpu.memory_space<vmem>>, vector<4x64xf32>,
    %219 = vector.extract_strided_slice %217 {offsets = [1, 0], sizes = [1, 64], strides = [1, 1]} : vector<4x64xf32> to vector<1x64xf32>
    %c24_200 = arith.constant 24 : index
    %c0_201 = arith.constant 0 : index
    %220 = vector.load %arg5[%c24_200, %c0_201] : memref<50x64xf32, #tpu.memory_space<vmem>>, vector<1x64xf32>
    tpu.vector_store %arg5[%c24_200, %c0_201], %219 {strides = array<i32>} : memref<50x64xf32, #tpu.memory_space<vmem>>, vector<1x64xf32>,
    %221 = vector.extract_strided_slice %217 {offsets = [2, 0], sizes = [1, 64], strides = [1, 1]} : vector<4x64xf32> to vector<1x64xf32>
    %c29_202 = arith.constant 29 : index
    %c0_203 = arith.constant 0 : index
    %222 = vector.load %arg5[%c29_202, %c0_203] : memref<50x64xf32, #tpu.memory_space<vmem>>, vector<1x64xf32>
    tpu.vector_store %arg5[%c29_202, %c0_203], %221 {strides = array<i32>} : memref<50x64xf32, #tpu.memory_space<vmem>>, vector<1x64xf32>,
    %c8_204 = arith.constant 8 : index
    %c0_205 = arith.constant 0 : index
    %223 = vector.load %arg6[%c8_204, %c0_205] : memref<16x64xf32, #tpu.memory_space<vmem>>, vector<4x64xf32>
    %c31_206 = arith.constant 31 : index
    %c0_207 = arith.constant 0 : index
    %224 = vector.load %arg5[%c31_206, %c0_207] : memref<50x64xf32, #tpu.memory_space<vmem>>, vector<4x64xf32>
    tpu.vector_store %arg5[%c31_206, %c0_207], %223 {strides = array<i32>} : memref<50x64xf32, #tpu.memory_space<vmem>>, vector<4x64xf32>,
    %225 = vector.extract_strided_slice %223 {offsets = [1, 0], sizes = [1, 64], strides = [1, 1]} : vector<4x64xf32> to vector<1x64xf32>
    %c30_208 = arith.constant 30 : index
    %c0_209 = arith.constant 0 : index
    %226 = vector.load %arg5[%c30_208, %c0_209] : memref<50x64xf32, #tpu.memory_space<vmem>>, vector<1x64xf32>
    tpu.vector_store %arg5[%c30_208, %c0_209], %225 {strides = array<i32>} : memref<50x64xf32, #tpu.memory_space<vmem>>, vector<1x64xf32>,
    %227 = vector.extract_strided_slice %223 {offsets = [2, 0], sizes = [1, 64], strides = [1, 1]} : vector<4x64xf32> to vector<1x64xf32>
    %c35_210 = arith.constant 35 : index
    %c0_211 = arith.constant 0 : index
    %228 = vector.load %arg5[%c35_210, %c0_211] : memref<50x64xf32, #tpu.memory_space<vmem>>, vector<1x64xf32>
    tpu.vector_store %arg5[%c35_210, %c0_211], %227 {strides = array<i32>} : memref<50x64xf32, #tpu.memory_space<vmem>>, vector<1x64xf32>,
    %cst_212 = arith.constant 0.000000e+00 : f32
    %229 = vector.broadcast %cst_212 : f32 to vector<36x64xf32>
    %c0_213 = arith.constant 0 : index
    %c0_214 = arith.constant 0 : index
    %230 = vector.load %arg5[%c0_213, %c0_214] : memref<50x64xf32, #tpu.memory_space<vmem>>, vector<36x64xf32>
    %231 = arith.truncf %230 : vector<36x64xf32> to vector<36x64xbf16>
    %c1152 = arith.constant 1152 : index
    %c0_215 = arith.constant 0 : index
    %232 = vector.load %arg2[%c1152, %c0_215] : memref<3456x64xbf16, #tpu.memory_space<vmem>>, vector<64x64xbf16>
    %cst_216 = arith.constant dense<0.000000e+00> : vector<36x64xf32>
    %233 = tpu.matmul %231, %232, %cst_216 {dimension_numbers = #tpu.dot_dimension_numbers<[1], [0], [0], [1], [0, 0, 1, 1], [], []>} : vector<36x64xbf16>, vector<64x64xbf16>, vector<36x64xf32> -> vector<36x64xf32>
    %234 = arith.addf %229, %233 : vector<36x64xf32>
    %c1_217 = arith.constant 1 : index
    %c0_218 = arith.constant 0 : index
    %235 = vector.load %arg5[%c1_217, %c0_218] : memref<50x64xf32, #tpu.memory_space<vmem>>, vector<36x64xf32>
    %236 = arith.truncf %235 : vector<36x64xf32> to vector<36x64xbf16>
    %c1216 = arith.constant 1216 : index
    %c0_219 = arith.constant 0 : index
    %237 = vector.load %arg2[%c1216, %c0_219] : memref<3456x64xbf16, #tpu.memory_space<vmem>>, vector<64x64xbf16>
    %cst_220 = arith.constant dense<0.000000e+00> : vector<36x64xf32>
    %238 = tpu.matmul %236, %237, %cst_220 {dimension_numbers = #tpu.dot_dimension_numbers<[1], [0], [0], [1], [0, 0, 1, 1], [], []>} : vector<36x64xbf16>, vector<64x64xbf16>, vector<36x64xf32> -> vector<36x64xf32>
    %239 = arith.addf %234, %238 : vector<36x64xf32>
    %c2_221 = arith.constant 2 : index
    %c0_222 = arith.constant 0 : index
    %240 = vector.load %arg5[%c2_221, %c0_222] : memref<50x64xf32, #tpu.memory_space<vmem>>, vector<36x64xf32>
    %241 = arith.truncf %240 : vector<36x64xf32> to vector<36x64xbf16>
    %c1280 = arith.constant 1280 : index
    %c0_223 = arith.constant 0 : index
    %242 = vector.load %arg2[%c1280, %c0_223] : memref<3456x64xbf16, #tpu.memory_space<vmem>>, vector<64x64xbf16>
    %cst_224 = arith.constant dense<0.000000e+00> : vector<36x64xf32>
    %243 = tpu.matmul %241, %242, %cst_224 {dimension_numbers = #tpu.dot_dimension_numbers<[1], [0], [0], [1], [0, 0, 1, 1], [], []>} : vector<36x64xbf16>, vector<64x64xbf16>, vector<36x64xf32> -> vector<36x64xf32>
    %244 = arith.addf %239, %243 : vector<36x64xf32>
    %c6_225 = arith.constant 6 : index
    %c0_226 = arith.constant 0 : index
    %245 = vector.load %arg5[%c6_225, %c0_226] : memref<50x64xf32, #tpu.memory_space<vmem>>, vector<36x64xf32>
    %246 = arith.truncf %245 : vector<36x64xf32> to vector<36x64xbf16>
    %c1344 = arith.constant 1344 : index
    %c0_227 = arith.constant 0 : index
    %247 = vector.load %arg2[%c1344, %c0_227] : memref<3456x64xbf16, #tpu.memory_space<vmem>>, vector<64x64xbf16>
    %cst_228 = arith.constant dense<0.000000e+00> : vector<36x64xf32>
    %248 = tpu.matmul %246, %247, %cst_228 {dimension_numbers = #tpu.dot_dimension_numbers<[1], [0], [0], [1], [0, 0, 1, 1], [], []>} : vector<36x64xbf16>, vector<64x64xbf16>, vector<36x64xf32> -> vector<36x64xf32>
    %249 = arith.addf %244, %248 : vector<36x64xf32>
    %c7_229 = arith.constant 7 : index
    %c0_230 = arith.constant 0 : index
    %250 = vector.load %arg5[%c7_229, %c0_230] : memref<50x64xf32, #tpu.memory_space<vmem>>, vector<36x64xf32>
    %251 = arith.truncf %250 : vector<36x64xf32> to vector<36x64xbf16>
    %c1408 = arith.constant 1408 : index
    %c0_231 = arith.constant 0 : index
    %252 = vector.load %arg2[%c1408, %c0_231] : memref<3456x64xbf16, #tpu.memory_space<vmem>>, vector<64x64xbf16>
    %cst_232 = arith.constant dense<0.000000e+00> : vector<36x64xf32>
    %253 = tpu.matmul %251, %252, %cst_232 {dimension_numbers = #tpu.dot_dimension_numbers<[1], [0], [0], [1], [0, 0, 1, 1], [], []>} : vector<36x64xbf16>, vector<64x64xbf16>, vector<36x64xf32> -> vector<36x64xf32>
    %254 = arith.addf %249, %253 : vector<36x64xf32>
    %c8_233 = arith.constant 8 : index
    %c0_234 = arith.constant 0 : index
    %255 = vector.load %arg5[%c8_233, %c0_234] : memref<50x64xf32, #tpu.memory_space<vmem>>, vector<36x64xf32>
    %256 = arith.truncf %255 : vector<36x64xf32> to vector<36x64xbf16>
    %c1472 = arith.constant 1472 : index
    %c0_235 = arith.constant 0 : index
    %257 = vector.load %arg2[%c1472, %c0_235] : memref<3456x64xbf16, #tpu.memory_space<vmem>>, vector<64x64xbf16>
    %cst_236 = arith.constant dense<0.000000e+00> : vector<36x64xf32>
    %258 = tpu.matmul %256, %257, %cst_236 {dimension_numbers = #tpu.dot_dimension_numbers<[1], [0], [0], [1], [0, 0, 1, 1], [], []>} : vector<36x64xbf16>, vector<64x64xbf16>, vector<36x64xf32> -> vector<36x64xf32>
    %259 = arith.addf %254, %258 : vector<36x64xf32>
    %c12_237 = arith.constant 12 : index
    %c0_238 = arith.constant 0 : index
    %260 = vector.load %arg5[%c12_237, %c0_238] : memref<50x64xf32, #tpu.memory_space<vmem>>, vector<36x64xf32>
    %261 = arith.truncf %260 : vector<36x64xf32> to vector<36x64xbf16>
    %c1536 = arith.constant 1536 : index
    %c0_239 = arith.constant 0 : index
    %262 = vector.load %arg2[%c1536, %c0_239] : memref<3456x64xbf16, #tpu.memory_space<vmem>>, vector<64x64xbf16>
    %cst_240 = arith.constant dense<0.000000e+00> : vector<36x64xf32>
    %263 = tpu.matmul %261, %262, %cst_240 {dimension_numbers = #tpu.dot_dimension_numbers<[1], [0], [0], [1], [0, 0, 1, 1], [], []>} : vector<36x64xbf16>, vector<64x64xbf16>, vector<36x64xf32> -> vector<36x64xf32>
    %264 = arith.addf %259, %263 : vector<36x64xf32>
    %c13_241 = arith.constant 13 : index
    %c0_242 = arith.constant 0 : index
    %265 = vector.load %arg5[%c13_241, %c0_242] : memref<50x64xf32, #tpu.memory_space<vmem>>, vector<36x64xf32>
    %266 = arith.truncf %265 : vector<36x64xf32> to vector<36x64xbf16>
    %c1600 = arith.constant 1600 : index
    %c0_243 = arith.constant 0 : index
    %267 = vector.load %arg2[%c1600, %c0_243] : memref<3456x64xbf16, #tpu.memory_space<vmem>>, vector<64x64xbf16>
    %cst_244 = arith.constant dense<0.000000e+00> : vector<36x64xf32>
    %268 = tpu.matmul %266, %267, %cst_244 {dimension_numbers = #tpu.dot_dimension_numbers<[1], [0], [0], [1], [0, 0, 1, 1], [], []>} : vector<36x64xbf16>, vector<64x64xbf16>, vector<36x64xf32> -> vector<36x64xf32>
    %269 = arith.addf %264, %268 : vector<36x64xf32>
    %c14_245 = arith.constant 14 : index
    %c0_246 = arith.constant 0 : index
    %270 = vector.load %arg5[%c14_245, %c0_246] : memref<50x64xf32, #tpu.memory_space<vmem>>, vector<36x64xf32>
    %271 = arith.truncf %270 : vector<36x64xf32> to vector<36x64xbf16>
    %c1664 = arith.constant 1664 : index
    %c0_247 = arith.constant 0 : index
    %272 = vector.load %arg2[%c1664, %c0_247] : memref<3456x64xbf16, #tpu.memory_space<vmem>>, vector<64x64xbf16>
    %cst_248 = arith.constant dense<0.000000e+00> : vector<36x64xf32>
    %273 = tpu.matmul %271, %272, %cst_248 {dimension_numbers = #tpu.dot_dimension_numbers<[1], [0], [0], [1], [0, 0, 1, 1], [], []>} : vector<36x64xbf16>, vector<64x64xbf16>, vector<36x64xf32> -> vector<36x64xf32>
    %274 = arith.addf %269, %273 : vector<36x64xf32>
    %c2_249 = arith.constant 2 : index
    %c0_250 = arith.constant 0 : index
    %275 = vector.load %arg3[%c2_249, %c0_250] : memref<6x64xf32, #tpu.memory_space<vmem>>, vector<1x64xf32>
    %276 = vector.broadcast %275 : vector<1x64xf32> to vector<36x64xf32>
    %277 = arith.addf %274, %276 : vector<36x64xf32>
    %cst_251 = arith.constant 0.000000e+00 : f32
    %278 = vector.broadcast %cst_251 : f32 to vector<36x64xf32>
    %279 = arith.maximumf %277, %278 : vector<36x64xf32>
    %280 = vector.extract_strided_slice %279 {offsets = [6, 0], sizes = [4, 64], strides = [1, 1]} : vector<36x64xf32> to vector<4x64xf32>
    %c1_252 = arith.constant 1 : index
    %c0_253 = arith.constant 0 : index
    %281 = vector.load %arg5[%c1_252, %c0_253] : memref<50x64xf32, #tpu.memory_space<vmem>>, vector<4x64xf32>
    tpu.vector_store %arg5[%c1_252, %c0_253], %280 {strides = array<i32>} : memref<50x64xf32, #tpu.memory_space<vmem>>, vector<4x64xf32>,
    %282 = vector.extract_strided_slice %280 {offsets = [1, 0], sizes = [1, 64], strides = [1, 1]} : vector<4x64xf32> to vector<1x64xf32>
    %c0_254 = arith.constant 0 : index
    %c0_255 = arith.constant 0 : index
    %283 = vector.load %arg5[%c0_254, %c0_255] : memref<50x64xf32, #tpu.memory_space<vmem>>, vector<1x64xf32>
    tpu.vector_store %arg5[%c0_254, %c0_255], %282 {strides = array<i32>} : memref<50x64xf32, #tpu.memory_space<vmem>>, vector<1x64xf32>,
    %284 = vector.extract_strided_slice %280 {offsets = [2, 0], sizes = [1, 64], strides = [1, 1]} : vector<4x64xf32> to vector<1x64xf32>
    %c5_256 = arith.constant 5 : index
    %c0_257 = arith.constant 0 : index
    %285 = vector.load %arg5[%c5_256, %c0_257] : memref<50x64xf32, #tpu.memory_space<vmem>>, vector<1x64xf32>
    tpu.vector_store %arg5[%c5_256, %c0_257], %284 {strides = array<i32>} : memref<50x64xf32, #tpu.memory_space<vmem>>, vector<1x64xf32>,
    %286 = vector.extract_strided_slice %279 {offsets = [0, 0], sizes = [4, 64], strides = [1, 1]} : vector<36x64xf32> to vector<4x64xf32>
    %c7_258 = arith.constant 7 : index
    %c0_259 = arith.constant 0 : index
    %287 = vector.load %arg5[%c7_258, %c0_259] : memref<50x64xf32, #tpu.memory_space<vmem>>, vector<4x64xf32>
    tpu.vector_store %arg5[%c7_258, %c0_259], %286 {strides = array<i32>} : memref<50x64xf32, #tpu.memory_space<vmem>>, vector<4x64xf32>,
    %288 = vector.extract_strided_slice %286 {offsets = [1, 0], sizes = [1, 64], strides = [1, 1]} : vector<4x64xf32> to vector<1x64xf32>
    %c6_260 = arith.constant 6 : index
    %c0_261 = arith.constant 0 : index
    %289 = vector.load %arg5[%c6_260, %c0_261] : memref<50x64xf32, #tpu.memory_space<vmem>>, vector<1x64xf32>
    tpu.vector_store %arg5[%c6_260, %c0_261], %288 {strides = array<i32>} : memref<50x64xf32, #tpu.memory_space<vmem>>, vector<1x64xf32>,
    %290 = vector.extract_strided_slice %286 {offsets = [2, 0], sizes = [1, 64], strides = [1, 1]} : vector<4x64xf32> to vector<1x64xf32>
    %c11_262 = arith.constant 11 : index
    %c0_263 = arith.constant 0 : index
    %291 = vector.load %arg5[%c11_262, %c0_263] : memref<50x64xf32, #tpu.memory_space<vmem>>, vector<1x64xf32>
    tpu.vector_store %arg5[%c11_262, %c0_263], %290 {strides = array<i32>} : memref<50x64xf32, #tpu.memory_space<vmem>>, vector<1x64xf32>,
    %292 = vector.extract_strided_slice %279 {offsets = [6, 0], sizes = [4, 64], strides = [1, 1]} : vector<36x64xf32> to vector<4x64xf32>
    %c13_264 = arith.constant 13 : index
    %c0_265 = arith.constant 0 : index
    %293 = vector.load %arg5[%c13_264, %c0_265] : memref<50x64xf32, #tpu.memory_space<vmem>>, vector<4x64xf32>
    tpu.vector_store %arg5[%c13_264, %c0_265], %292 {strides = array<i32>} : memref<50x64xf32, #tpu.memory_space<vmem>>, vector<4x64xf32>,
    %294 = vector.extract_strided_slice %292 {offsets = [1, 0], sizes = [1, 64], strides = [1, 1]} : vector<4x64xf32> to vector<1x64xf32>
    %c12_266 = arith.constant 12 : index
    %c0_267 = arith.constant 0 : index
    %295 = vector.load %arg5[%c12_266, %c0_267] : memref<50x64xf32, #tpu.memory_space<vmem>>, vector<1x64xf32>
    tpu.vector_store %arg5[%c12_266, %c0_267], %294 {strides = array<i32>} : memref<50x64xf32, #tpu.memory_space<vmem>>, vector<1x64xf32>,
    %296 = vector.extract_strided_slice %292 {offsets = [2, 0], sizes = [1, 64], strides = [1, 1]} : vector<4x64xf32> to vector<1x64xf32>
    %c17_268 = arith.constant 17 : index
    %c0_269 = arith.constant 0 : index
    %297 = vector.load %arg5[%c17_268, %c0_269] : memref<50x64xf32, #tpu.memory_space<vmem>>, vector<1x64xf32>
    tpu.vector_store %arg5[%c17_268, %c0_269], %296 {strides = array<i32>} : memref<50x64xf32, #tpu.memory_space<vmem>>, vector<1x64xf32>,
    %298 = vector.extract_strided_slice %279 {offsets = [12, 0], sizes = [4, 64], strides = [1, 1]} : vector<36x64xf32> to vector<4x64xf32>
    %c19_270 = arith.constant 19 : index
    %c0_271 = arith.constant 0 : index
    %299 = vector.load %arg5[%c19_270, %c0_271] : memref<50x64xf32, #tpu.memory_space<vmem>>, vector<4x64xf32>
    tpu.vector_store %arg5[%c19_270, %c0_271], %298 {strides = array<i32>} : memref<50x64xf32, #tpu.memory_space<vmem>>, vector<4x64xf32>,
    %300 = vector.extract_strided_slice %298 {offsets = [1, 0], sizes = [1, 64], strides = [1, 1]} : vector<4x64xf32> to vector<1x64xf32>
    %c18_272 = arith.constant 18 : index
    %c0_273 = arith.constant 0 : index
    %301 = vector.load %arg5[%c18_272, %c0_273] : memref<50x64xf32, #tpu.memory_space<vmem>>, vector<1x64xf32>
    tpu.vector_store %arg5[%c18_272, %c0_273], %300 {strides = array<i32>} : memref<50x64xf32, #tpu.memory_space<vmem>>, vector<1x64xf32>,
    %302 = vector.extract_strided_slice %298 {offsets = [2, 0], sizes = [1, 64], strides = [1, 1]} : vector<4x64xf32> to vector<1x64xf32>
    %c23_274 = arith.constant 23 : index
    %c0_275 = arith.constant 0 : index
    %303 = vector.load %arg5[%c23_274, %c0_275] : memref<50x64xf32, #tpu.memory_space<vmem>>, vector<1x64xf32>
    tpu.vector_store %arg5[%c23_274, %c0_275], %302 {strides = array<i32>} : memref<50x64xf32, #tpu.memory_space<vmem>>, vector<1x64xf32>,
    %304 = vector.extract_strided_slice %279 {offsets = [18, 0], sizes = [4, 64], strides = [1, 1]} : vector<36x64xf32> to vector<4x64xf32>
    %c25_276 = arith.constant 25 : index
    %c0_277 = arith.constant 0 : index
    %305 = vector.load %arg5[%c25_276, %c0_277] : memref<50x64xf32, #tpu.memory_space<vmem>>, vector<4x64xf32>
    tpu.vector_store %arg5[%c25_276, %c0_277], %304 {strides = array<i32>} : memref<50x64xf32, #tpu.memory_space<vmem>>, vector<4x64xf32>,
    %306 = vector.extract_strided_slice %304 {offsets = [1, 0], sizes = [1, 64], strides = [1, 1]} : vector<4x64xf32> to vector<1x64xf32>
    %c24_278 = arith.constant 24 : index
    %c0_279 = arith.constant 0 : index
    %307 = vector.load %arg5[%c24_278, %c0_279] : memref<50x64xf32, #tpu.memory_space<vmem>>, vector<1x64xf32>
    tpu.vector_store %arg5[%c24_278, %c0_279], %306 {strides = array<i32>} : memref<50x64xf32, #tpu.memory_space<vmem>>, vector<1x64xf32>,
    %308 = vector.extract_strided_slice %304 {offsets = [2, 0], sizes = [1, 64], strides = [1, 1]} : vector<4x64xf32> to vector<1x64xf32>
    %c29_280 = arith.constant 29 : index
    %c0_281 = arith.constant 0 : index
    %309 = vector.load %arg5[%c29_280, %c0_281] : memref<50x64xf32, #tpu.memory_space<vmem>>, vector<1x64xf32>
    tpu.vector_store %arg5[%c29_280, %c0_281], %308 {strides = array<i32>} : memref<50x64xf32, #tpu.memory_space<vmem>>, vector<1x64xf32>,
    %310 = vector.extract_strided_slice %279 {offsets = [12, 0], sizes = [4, 64], strides = [1, 1]} : vector<36x64xf32> to vector<4x64xf32>
    %c31_282 = arith.constant 31 : index
    %c0_283 = arith.constant 0 : index
    %311 = vector.load %arg5[%c31_282, %c0_283] : memref<50x64xf32, #tpu.memory_space<vmem>>, vector<4x64xf32>
    tpu.vector_store %arg5[%c31_282, %c0_283], %310 {strides = array<i32>} : memref<50x64xf32, #tpu.memory_space<vmem>>, vector<4x64xf32>,
    %312 = vector.extract_strided_slice %310 {offsets = [1, 0], sizes = [1, 64], strides = [1, 1]} : vector<4x64xf32> to vector<1x64xf32>
    %c30_284 = arith.constant 30 : index
    %c0_285 = arith.constant 0 : index
    %313 = vector.load %arg5[%c30_284, %c0_285] : memref<50x64xf32, #tpu.memory_space<vmem>>, vector<1x64xf32>
    tpu.vector_store %arg5[%c30_284, %c0_285], %312 {strides = array<i32>} : memref<50x64xf32, #tpu.memory_space<vmem>>, vector<1x64xf32>,
    %314 = vector.extract_strided_slice %310 {offsets = [2, 0], sizes = [1, 64], strides = [1, 1]} : vector<4x64xf32> to vector<1x64xf32>
    %c35_286 = arith.constant 35 : index
    %c0_287 = arith.constant 0 : index
    %315 = vector.load %arg5[%c35_286, %c0_287] : memref<50x64xf32, #tpu.memory_space<vmem>>, vector<1x64xf32>
    tpu.vector_store %arg5[%c35_286, %c0_287], %314 {strides = array<i32>} : memref<50x64xf32, #tpu.memory_space<vmem>>, vector<1x64xf32>,
    %cst_288 = arith.constant 0.000000e+00 : f32
    %316 = vector.broadcast %cst_288 : f32 to vector<36x64xf32>
    %c0_289 = arith.constant 0 : index
    %c0_290 = arith.constant 0 : index
    %317 = vector.load %arg5[%c0_289, %c0_290] : memref<50x64xf32, #tpu.memory_space<vmem>>, vector<36x64xf32>
    %318 = arith.truncf %317 : vector<36x64xf32> to vector<36x64xbf16>
    %c1728 = arith.constant 1728 : index
    %c0_291 = arith.constant 0 : index
    %319 = vector.load %arg2[%c1728, %c0_291] : memref<3456x64xbf16, #tpu.memory_space<vmem>>, vector<64x64xbf16>
    %cst_292 = arith.constant dense<0.000000e+00> : vector<36x64xf32>
    %320 = tpu.matmul %318, %319, %cst_292 {dimension_numbers = #tpu.dot_dimension_numbers<[1], [0], [0], [1], [0, 0, 1, 1], [], []>} : vector<36x64xbf16>, vector<64x64xbf16>, vector<36x64xf32> -> vector<36x64xf32>
    %321 = arith.addf %316, %320 : vector<36x64xf32>
    %c1_293 = arith.constant 1 : index
    %c0_294 = arith.constant 0 : index
    %322 = vector.load %arg5[%c1_293, %c0_294] : memref<50x64xf32, #tpu.memory_space<vmem>>, vector<36x64xf32>
    %323 = arith.truncf %322 : vector<36x64xf32> to vector<36x64xbf16>
    %c1792 = arith.constant 1792 : index
    %c0_295 = arith.constant 0 : index
    %324 = vector.load %arg2[%c1792, %c0_295] : memref<3456x64xbf16, #tpu.memory_space<vmem>>, vector<64x64xbf16>
    %cst_296 = arith.constant dense<0.000000e+00> : vector<36x64xf32>
    %325 = tpu.matmul %323, %324, %cst_296 {dimension_numbers = #tpu.dot_dimension_numbers<[1], [0], [0], [1], [0, 0, 1, 1], [], []>} : vector<36x64xbf16>, vector<64x64xbf16>, vector<36x64xf32> -> vector<36x64xf32>
    %326 = arith.addf %321, %325 : vector<36x64xf32>
    %c2_297 = arith.constant 2 : index
    %c0_298 = arith.constant 0 : index
    %327 = vector.load %arg5[%c2_297, %c0_298] : memref<50x64xf32, #tpu.memory_space<vmem>>, vector<36x64xf32>
    %328 = arith.truncf %327 : vector<36x64xf32> to vector<36x64xbf16>
    %c1856 = arith.constant 1856 : index
    %c0_299 = arith.constant 0 : index
    %329 = vector.load %arg2[%c1856, %c0_299] : memref<3456x64xbf16, #tpu.memory_space<vmem>>, vector<64x64xbf16>
    %cst_300 = arith.constant dense<0.000000e+00> : vector<36x64xf32>
    %330 = tpu.matmul %328, %329, %cst_300 {dimension_numbers = #tpu.dot_dimension_numbers<[1], [0], [0], [1], [0, 0, 1, 1], [], []>} : vector<36x64xbf16>, vector<64x64xbf16>, vector<36x64xf32> -> vector<36x64xf32>
    %331 = arith.addf %326, %330 : vector<36x64xf32>
    %c6_301 = arith.constant 6 : index
    %c0_302 = arith.constant 0 : index
    %332 = vector.load %arg5[%c6_301, %c0_302] : memref<50x64xf32, #tpu.memory_space<vmem>>, vector<36x64xf32>
    %333 = arith.truncf %332 : vector<36x64xf32> to vector<36x64xbf16>
    %c1920 = arith.constant 1920 : index
    %c0_303 = arith.constant 0 : index
    %334 = vector.load %arg2[%c1920, %c0_303] : memref<3456x64xbf16, #tpu.memory_space<vmem>>, vector<64x64xbf16>
    %cst_304 = arith.constant dense<0.000000e+00> : vector<36x64xf32>
    %335 = tpu.matmul %333, %334, %cst_304 {dimension_numbers = #tpu.dot_dimension_numbers<[1], [0], [0], [1], [0, 0, 1, 1], [], []>} : vector<36x64xbf16>, vector<64x64xbf16>, vector<36x64xf32> -> vector<36x64xf32>
    %336 = arith.addf %331, %335 : vector<36x64xf32>
    %c7_305 = arith.constant 7 : index
    %c0_306 = arith.constant 0 : index
    %337 = vector.load %arg5[%c7_305, %c0_306] : memref<50x64xf32, #tpu.memory_space<vmem>>, vector<36x64xf32>
    %338 = arith.truncf %337 : vector<36x64xf32> to vector<36x64xbf16>
    %c1984 = arith.constant 1984 : index
    %c0_307 = arith.constant 0 : index
    %339 = vector.load %arg2[%c1984, %c0_307] : memref<3456x64xbf16, #tpu.memory_space<vmem>>, vector<64x64xbf16>
    %cst_308 = arith.constant dense<0.000000e+00> : vector<36x64xf32>
    %340 = tpu.matmul %338, %339, %cst_308 {dimension_numbers = #tpu.dot_dimension_numbers<[1], [0], [0], [1], [0, 0, 1, 1], [], []>} : vector<36x64xbf16>, vector<64x64xbf16>, vector<36x64xf32> -> vector<36x64xf32>
    %341 = arith.addf %336, %340 : vector<36x64xf32>
    %c8_309 = arith.constant 8 : index
    %c0_310 = arith.constant 0 : index
    %342 = vector.load %arg5[%c8_309, %c0_310] : memref<50x64xf32, #tpu.memory_space<vmem>>, vector<36x64xf32>
    %343 = arith.truncf %342 : vector<36x64xf32> to vector<36x64xbf16>
    %c2048 = arith.constant 2048 : index
    %c0_311 = arith.constant 0 : index
    %344 = vector.load %arg2[%c2048, %c0_311] : memref<3456x64xbf16, #tpu.memory_space<vmem>>, vector<64x64xbf16>
    %cst_312 = arith.constant dense<0.000000e+00> : vector<36x64xf32>
    %345 = tpu.matmul %343, %344, %cst_312 {dimension_numbers = #tpu.dot_dimension_numbers<[1], [0], [0], [1], [0, 0, 1, 1], [], []>} : vector<36x64xbf16>, vector<64x64xbf16>, vector<36x64xf32> -> vector<36x64xf32>
    %346 = arith.addf %341, %345 : vector<36x64xf32>
    %c12_313 = arith.constant 12 : index
    %c0_314 = arith.constant 0 : index
    %347 = vector.load %arg5[%c12_313, %c0_314] : memref<50x64xf32, #tpu.memory_space<vmem>>, vector<36x64xf32>
    %348 = arith.truncf %347 : vector<36x64xf32> to vector<36x64xbf16>
    %c2112 = arith.constant 2112 : index
    %c0_315 = arith.constant 0 : index
    %349 = vector.load %arg2[%c2112, %c0_315] : memref<3456x64xbf16, #tpu.memory_space<vmem>>, vector<64x64xbf16>
    %cst_316 = arith.constant dense<0.000000e+00> : vector<36x64xf32>
    %350 = tpu.matmul %348, %349, %cst_316 {dimension_numbers = #tpu.dot_dimension_numbers<[1], [0], [0], [1], [0, 0, 1, 1], [], []>} : vector<36x64xbf16>, vector<64x64xbf16>, vector<36x64xf32> -> vector<36x64xf32>
    %351 = arith.addf %346, %350 : vector<36x64xf32>
    %c13_317 = arith.constant 13 : index
    %c0_318 = arith.constant 0 : index
    %352 = vector.load %arg5[%c13_317, %c0_318] : memref<50x64xf32, #tpu.memory_space<vmem>>, vector<36x64xf32>
    %353 = arith.truncf %352 : vector<36x64xf32> to vector<36x64xbf16>
    %c2176 = arith.constant 2176 : index
    %c0_319 = arith.constant 0 : index
    %354 = vector.load %arg2[%c2176, %c0_319] : memref<3456x64xbf16, #tpu.memory_space<vmem>>, vector<64x64xbf16>
    %cst_320 = arith.constant dense<0.000000e+00> : vector<36x64xf32>
    %355 = tpu.matmul %353, %354, %cst_320 {dimension_numbers = #tpu.dot_dimension_numbers<[1], [0], [0], [1], [0, 0, 1, 1], [], []>} : vector<36x64xbf16>, vector<64x64xbf16>, vector<36x64xf32> -> vector<36x64xf32>
    %356 = arith.addf %351, %355 : vector<36x64xf32>
    %c14_321 = arith.constant 14 : index
    %c0_322 = arith.constant 0 : index
    %357 = vector.load %arg5[%c14_321, %c0_322] : memref<50x64xf32, #tpu.memory_space<vmem>>, vector<36x64xf32>
    %358 = arith.truncf %357 : vector<36x64xf32> to vector<36x64xbf16>
    %c2240 = arith.constant 2240 : index
    %c0_323 = arith.constant 0 : index
    %359 = vector.load %arg2[%c2240, %c0_323] : memref<3456x64xbf16, #tpu.memory_space<vmem>>, vector<64x64xbf16>
    %cst_324 = arith.constant dense<0.000000e+00> : vector<36x64xf32>
    %360 = tpu.matmul %358, %359, %cst_324 {dimension_numbers = #tpu.dot_dimension_numbers<[1], [0], [0], [1], [0, 0, 1, 1], [], []>} : vector<36x64xbf16>, vector<64x64xbf16>, vector<36x64xf32> -> vector<36x64xf32>
    %361 = arith.addf %356, %360 : vector<36x64xf32>
    %c3 = arith.constant 3 : index
    %c0_325 = arith.constant 0 : index
    %362 = vector.load %arg3[%c3, %c0_325] : memref<6x64xf32, #tpu.memory_space<vmem>>, vector<1x64xf32>
    %363 = vector.broadcast %362 : vector<1x64xf32> to vector<36x64xf32>
    %364 = arith.addf %361, %363 : vector<36x64xf32>
    %c0_326 = arith.constant 0 : index
    %c0_327 = arith.constant 0 : index
    %365 = vector.load %arg6[%c0_326, %c0_327] : memref<16x64xf32, #tpu.memory_space<vmem>>, vector<4x64xf32>
    %366 = vector.extract_strided_slice %364 {offsets = [0, 0], sizes = [4, 64], strides = [1, 1]} : vector<36x64xf32> to vector<4x64xf32>
    %367 = arith.addf %365, %366 : vector<4x64xf32>
    %c0_328 = arith.constant 0 : index
    %c0_329 = arith.constant 0 : index
    %368 = vector.load %arg6[%c0_328, %c0_329] : memref<16x64xf32, #tpu.memory_space<vmem>>, vector<4x64xf32>
    tpu.vector_store %arg6[%c0_328, %c0_329], %367 {strides = array<i32>} : memref<16x64xf32, #tpu.memory_space<vmem>>, vector<4x64xf32>,
    %c4_330 = arith.constant 4 : index
    %c0_331 = arith.constant 0 : index
    %369 = vector.load %arg6[%c4_330, %c0_331] : memref<16x64xf32, #tpu.memory_space<vmem>>, vector<4x64xf32>
    %370 = vector.extract_strided_slice %364 {offsets = [6, 0], sizes = [4, 64], strides = [1, 1]} : vector<36x64xf32> to vector<4x64xf32>
    %371 = arith.addf %369, %370 : vector<4x64xf32>
    %c4_332 = arith.constant 4 : index
    %c0_333 = arith.constant 0 : index
    %372 = vector.load %arg6[%c4_332, %c0_333] : memref<16x64xf32, #tpu.memory_space<vmem>>, vector<4x64xf32>
    tpu.vector_store %arg6[%c4_332, %c0_333], %371 {strides = array<i32>} : memref<16x64xf32, #tpu.memory_space<vmem>>, vector<4x64xf32>,
    %c8_334 = arith.constant 8 : index
    %c0_335 = arith.constant 0 : index
    %373 = vector.load %arg6[%c8_334, %c0_335] : memref<16x64xf32, #tpu.memory_space<vmem>>, vector<4x64xf32>
    %374 = vector.extract_strided_slice %364 {offsets = [12, 0], sizes = [4, 64], strides = [1, 1]} : vector<36x64xf32> to vector<4x64xf32>
    %375 = arith.addf %373, %374 : vector<4x64xf32>
    %c8_336 = arith.constant 8 : index
    %c0_337 = arith.constant 0 : index
    %376 = vector.load %arg6[%c8_336, %c0_337] : memref<16x64xf32, #tpu.memory_space<vmem>>, vector<4x64xf32>
    tpu.vector_store %arg6[%c8_336, %c0_337], %375 {strides = array<i32>} : memref<16x64xf32, #tpu.memory_space<vmem>>, vector<4x64xf32>,
    %c12_338 = arith.constant 12 : index
    %c0_339 = arith.constant 0 : index
    %377 = vector.load %arg6[%c12_338, %c0_339] : memref<16x64xf32, #tpu.memory_space<vmem>>, vector<4x64xf32>
    %378 = vector.extract_strided_slice %364 {offsets = [18, 0], sizes = [4, 64], strides = [1, 1]} : vector<36x64xf32> to vector<4x64xf32>
    %379 = arith.addf %377, %378 : vector<4x64xf32>
    %c12_340 = arith.constant 12 : index
    %c0_341 = arith.constant 0 : index
    %380 = vector.load %arg6[%c12_340, %c0_341] : memref<16x64xf32, #tpu.memory_space<vmem>>, vector<4x64xf32>
    tpu.vector_store %arg6[%c12_340, %c0_341], %379 {strides = array<i32>} : memref<16x64xf32, #tpu.memory_space<vmem>>, vector<4x64xf32>,
    %c4_342 = arith.constant 4 : index
    %c0_343 = arith.constant 0 : index
    %381 = vector.load %arg6[%c4_342, %c0_343] : memref<16x64xf32, #tpu.memory_space<vmem>>, vector<4x64xf32>
    %c1_344 = arith.constant 1 : index
    %c0_345 = arith.constant 0 : index
    %382 = vector.load %arg5[%c1_344, %c0_345] : memref<50x64xf32, #tpu.memory_space<vmem>>, vector<4x64xf32>
    tpu.vector_store %arg5[%c1_344, %c0_345], %381 {strides = array<i32>} : memref<50x64xf32, #tpu.memory_space<vmem>>, vector<4x64xf32>,
    %383 = vector.extract_strided_slice %381 {offsets = [1, 0], sizes = [1, 64], strides = [1, 1]} : vector<4x64xf32> to vector<1x64xf32>
    %c0_346 = arith.constant 0 : index
    %c0_347 = arith.constant 0 : index
    %384 = vector.load %arg5[%c0_346, %c0_347] : memref<50x64xf32, #tpu.memory_space<vmem>>, vector<1x64xf32>
    tpu.vector_store %arg5[%c0_346, %c0_347], %383 {strides = array<i32>} : memref<50x64xf32, #tpu.memory_space<vmem>>, vector<1x64xf32>,
    %385 = vector.extract_strided_slice %381 {offsets = [2, 0], sizes = [1, 64], strides = [1, 1]} : vector<4x64xf32> to vector<1x64xf32>
    %c5_348 = arith.constant 5 : index
    %c0_349 = arith.constant 0 : index
    %386 = vector.load %arg5[%c5_348, %c0_349] : memref<50x64xf32, #tpu.memory_space<vmem>>, vector<1x64xf32>
    tpu.vector_store %arg5[%c5_348, %c0_349], %385 {strides = array<i32>} : memref<50x64xf32, #tpu.memory_space<vmem>>, vector<1x64xf32>,
    %c0_350 = arith.constant 0 : index
    %c0_351 = arith.constant 0 : index
    %387 = vector.load %arg6[%c0_350, %c0_351] : memref<16x64xf32, #tpu.memory_space<vmem>>, vector<4x64xf32>
    %c7_352 = arith.constant 7 : index
    %c0_353 = arith.constant 0 : index
    %388 = vector.load %arg5[%c7_352, %c0_353] : memref<50x64xf32, #tpu.memory_space<vmem>>, vector<4x64xf32>
    tpu.vector_store %arg5[%c7_352, %c0_353], %387 {strides = array<i32>} : memref<50x64xf32, #tpu.memory_space<vmem>>, vector<4x64xf32>,
    %389 = vector.extract_strided_slice %387 {offsets = [1, 0], sizes = [1, 64], strides = [1, 1]} : vector<4x64xf32> to vector<1x64xf32>
    %c6_354 = arith.constant 6 : index
    %c0_355 = arith.constant 0 : index
    %390 = vector.load %arg5[%c6_354, %c0_355] : memref<50x64xf32, #tpu.memory_space<vmem>>, vector<1x64xf32>
    tpu.vector_store %arg5[%c6_354, %c0_355], %389 {strides = array<i32>} : memref<50x64xf32, #tpu.memory_space<vmem>>, vector<1x64xf32>,
    %391 = vector.extract_strided_slice %387 {offsets = [2, 0], sizes = [1, 64], strides = [1, 1]} : vector<4x64xf32> to vector<1x64xf32>
    %c11_356 = arith.constant 11 : index
    %c0_357 = arith.constant 0 : index
    %392 = vector.load %arg5[%c11_356, %c0_357] : memref<50x64xf32, #tpu.memory_space<vmem>>, vector<1x64xf32>
    tpu.vector_store %arg5[%c11_356, %c0_357], %391 {strides = array<i32>} : memref<50x64xf32, #tpu.memory_space<vmem>>, vector<1x64xf32>,
    %c4_358 = arith.constant 4 : index
    %c0_359 = arith.constant 0 : index
    %393 = vector.load %arg6[%c4_358, %c0_359] : memref<16x64xf32, #tpu.memory_space<vmem>>, vector<4x64xf32>
    %c13_360 = arith.constant 13 : index
    %c0_361 = arith.constant 0 : index
    %394 = vector.load %arg5[%c13_360, %c0_361] : memref<50x64xf32, #tpu.memory_space<vmem>>, vector<4x64xf32>
    tpu.vector_store %arg5[%c13_360, %c0_361], %393 {strides = array<i32>} : memref<50x64xf32, #tpu.memory_space<vmem>>, vector<4x64xf32>,
    %395 = vector.extract_strided_slice %393 {offsets = [1, 0], sizes = [1, 64], strides = [1, 1]} : vector<4x64xf32> to vector<1x64xf32>
    %c12_362 = arith.constant 12 : index
    %c0_363 = arith.constant 0 : index
    %396 = vector.load %arg5[%c12_362, %c0_363] : memref<50x64xf32, #tpu.memory_space<vmem>>, vector<1x64xf32>
    tpu.vector_store %arg5[%c12_362, %c0_363], %395 {strides = array<i32>} : memref<50x64xf32, #tpu.memory_space<vmem>>, vector<1x64xf32>,
    %397 = vector.extract_strided_slice %393 {offsets = [2, 0], sizes = [1, 64], strides = [1, 1]} : vector<4x64xf32> to vector<1x64xf32>
    %c17_364 = arith.constant 17 : index
    %c0_365 = arith.constant 0 : index
    %398 = vector.load %arg5[%c17_364, %c0_365] : memref<50x64xf32, #tpu.memory_space<vmem>>, vector<1x64xf32>
    tpu.vector_store %arg5[%c17_364, %c0_365], %397 {strides = array<i32>} : memref<50x64xf32, #tpu.memory_space<vmem>>, vector<1x64xf32>,
    %c8_366 = arith.constant 8 : index
    %c0_367 = arith.constant 0 : index
    %399 = vector.load %arg6[%c8_366, %c0_367] : memref<16x64xf32, #tpu.memory_space<vmem>>, vector<4x64xf32>
    %c19_368 = arith.constant 19 : index
    %c0_369 = arith.constant 0 : index
    %400 = vector.load %arg5[%c19_368, %c0_369] : memref<50x64xf32, #tpu.memory_space<vmem>>, vector<4x64xf32>
    tpu.vector_store %arg5[%c19_368, %c0_369], %399 {strides = array<i32>} : memref<50x64xf32, #tpu.memory_space<vmem>>, vector<4x64xf32>,
    %401 = vector.extract_strided_slice %399 {offsets = [1, 0], sizes = [1, 64], strides = [1, 1]} : vector<4x64xf32> to vector<1x64xf32>
    %c18_370 = arith.constant 18 : index
    %c0_371 = arith.constant 0 : index
    %402 = vector.load %arg5[%c18_370, %c0_371] : memref<50x64xf32, #tpu.memory_space<vmem>>, vector<1x64xf32>
    tpu.vector_store %arg5[%c18_370, %c0_371], %401 {strides = array<i32>} : memref<50x64xf32, #tpu.memory_space<vmem>>, vector<1x64xf32>,
    %403 = vector.extract_strided_slice %399 {offsets = [2, 0], sizes = [1, 64], strides = [1, 1]} : vector<4x64xf32> to vector<1x64xf32>
    %c23_372 = arith.constant 23 : index
    %c0_373 = arith.constant 0 : index
    %404 = vector.load %arg5[%c23_372, %c0_373] : memref<50x64xf32, #tpu.memory_space<vmem>>, vector<1x64xf32>
    tpu.vector_store %arg5[%c23_372, %c0_373], %403 {strides = array<i32>} : memref<50x64xf32, #tpu.memory_space<vmem>>, vector<1x64xf32>,
    %c12_374 = arith.constant 12 : index
    %c0_375 = arith.constant 0 : index
    %405 = vector.load %arg6[%c12_374, %c0_375] : memref<16x64xf32, #tpu.memory_space<vmem>>, vector<4x64xf32>
    %c25_376 = arith.constant 25 : index
    %c0_377 = arith.constant 0 : index
    %406 = vector.load %arg5[%c25_376, %c0_377] : memref<50x64xf32, #tpu.memory_space<vmem>>, vector<4x64xf32>
    tpu.vector_store %arg5[%c25_376, %c0_377], %405 {strides = array<i32>} : memref<50x64xf32, #tpu.memory_space<vmem>>, vector<4x64xf32>,
    %407 = vector.extract_strided_slice %405 {offsets = [1, 0], sizes = [1, 64], strides = [1, 1]} : vector<4x64xf32> to vector<1x64xf32>
    %c24_378 = arith.constant 24 : index
    %c0_379 = arith.constant 0 : index
    %408 = vector.load %arg5[%c24_378, %c0_379] : memref<50x64xf32, #tpu.memory_space<vmem>>, vector<1x64xf32>
    tpu.vector_store %arg5[%c24_378, %c0_379], %407 {strides = array<i32>} : memref<50x64xf32, #tpu.memory_space<vmem>>, vector<1x64xf32>,
    %409 = vector.extract_strided_slice %405 {offsets = [2, 0], sizes = [1, 64], strides = [1, 1]} : vector<4x64xf32> to vector<1x64xf32>
    %c29_380 = arith.constant 29 : index
    %c0_381 = arith.constant 0 : index
    %410 = vector.load %arg5[%c29_380, %c0_381] : memref<50x64xf32, #tpu.memory_space<vmem>>, vector<1x64xf32>
    tpu.vector_store %arg5[%c29_380, %c0_381], %409 {strides = array<i32>} : memref<50x64xf32, #tpu.memory_space<vmem>>, vector<1x64xf32>,
    %c8_382 = arith.constant 8 : index
    %c0_383 = arith.constant 0 : index
    %411 = vector.load %arg6[%c8_382, %c0_383] : memref<16x64xf32, #tpu.memory_space<vmem>>, vector<4x64xf32>
    %c31_384 = arith.constant 31 : index
    %c0_385 = arith.constant 0 : index
    %412 = vector.load %arg5[%c31_384, %c0_385] : memref<50x64xf32, #tpu.memory_space<vmem>>, vector<4x64xf32>
    tpu.vector_store %arg5[%c31_384, %c0_385], %411 {strides = array<i32>} : memref<50x64xf32, #tpu.memory_space<vmem>>, vector<4x64xf32>,
    %413 = vector.extract_strided_slice %411 {offsets = [1, 0], sizes = [1, 64], strides = [1, 1]} : vector<4x64xf32> to vector<1x64xf32>
    %c30_386 = arith.constant 30 : index
    %c0_387 = arith.constant 0 : index
    %414 = vector.load %arg5[%c30_386, %c0_387] : memref<50x64xf32, #tpu.memory_space<vmem>>, vector<1x64xf32>
    tpu.vector_store %arg5[%c30_386, %c0_387], %413 {strides = array<i32>} : memref<50x64xf32, #tpu.memory_space<vmem>>, vector<1x64xf32>,
    %415 = vector.extract_strided_slice %411 {offsets = [2, 0], sizes = [1, 64], strides = [1, 1]} : vector<4x64xf32> to vector<1x64xf32>
    %c35_388 = arith.constant 35 : index
    %c0_389 = arith.constant 0 : index
    %416 = vector.load %arg5[%c35_388, %c0_389] : memref<50x64xf32, #tpu.memory_space<vmem>>, vector<1x64xf32>
    tpu.vector_store %arg5[%c35_388, %c0_389], %415 {strides = array<i32>} : memref<50x64xf32, #tpu.memory_space<vmem>>, vector<1x64xf32>,
    %cst_390 = arith.constant 0.000000e+00 : f32
    %417 = vector.broadcast %cst_390 : f32 to vector<36x64xf32>
    %c0_391 = arith.constant 0 : index
    %c0_392 = arith.constant 0 : index
    %418 = vector.load %arg5[%c0_391, %c0_392] : memref<50x64xf32, #tpu.memory_space<vmem>>, vector<36x64xf32>
    %419 = arith.truncf %418 : vector<36x64xf32> to vector<36x64xbf16>
    %c2304 = arith.constant 2304 : index
    %c0_393 = arith.constant 0 : index
    %420 = vector.load %arg2[%c2304, %c0_393] : memref<3456x64xbf16, #tpu.memory_space<vmem>>, vector<64x64xbf16>
    %cst_394 = arith.constant dense<0.000000e+00> : vector<36x64xf32>
    %421 = tpu.matmul %419, %420, %cst_394 {dimension_numbers = #tpu.dot_dimension_numbers<[1], [0], [0], [1], [0, 0, 1, 1], [], []>} : vector<36x64xbf16>, vector<64x64xbf16>, vector<36x64xf32> -> vector<36x64xf32>
    %422 = arith.addf %417, %421 : vector<36x64xf32>
    %c1_395 = arith.constant 1 : index
    %c0_396 = arith.constant 0 : index
    %423 = vector.load %arg5[%c1_395, %c0_396] : memref<50x64xf32, #tpu.memory_space<vmem>>, vector<36x64xf32>
    %424 = arith.truncf %423 : vector<36x64xf32> to vector<36x64xbf16>
    %c2368 = arith.constant 2368 : index
    %c0_397 = arith.constant 0 : index
    %425 = vector.load %arg2[%c2368, %c0_397] : memref<3456x64xbf16, #tpu.memory_space<vmem>>, vector<64x64xbf16>
    %cst_398 = arith.constant dense<0.000000e+00> : vector<36x64xf32>
    %426 = tpu.matmul %424, %425, %cst_398 {dimension_numbers = #tpu.dot_dimension_numbers<[1], [0], [0], [1], [0, 0, 1, 1], [], []>} : vector<36x64xbf16>, vector<64x64xbf16>, vector<36x64xf32> -> vector<36x64xf32>
    %427 = arith.addf %422, %426 : vector<36x64xf32>
    %c2_399 = arith.constant 2 : index
    %c0_400 = arith.constant 0 : index
    %428 = vector.load %arg5[%c2_399, %c0_400] : memref<50x64xf32, #tpu.memory_space<vmem>>, vector<36x64xf32>
    %429 = arith.truncf %428 : vector<36x64xf32> to vector<36x64xbf16>
    %c2432 = arith.constant 2432 : index
    %c0_401 = arith.constant 0 : index
    %430 = vector.load %arg2[%c2432, %c0_401] : memref<3456x64xbf16, #tpu.memory_space<vmem>>, vector<64x64xbf16>
    %cst_402 = arith.constant dense<0.000000e+00> : vector<36x64xf32>
    %431 = tpu.matmul %429, %430, %cst_402 {dimension_numbers = #tpu.dot_dimension_numbers<[1], [0], [0], [1], [0, 0, 1, 1], [], []>} : vector<36x64xbf16>, vector<64x64xbf16>, vector<36x64xf32> -> vector<36x64xf32>
    %432 = arith.addf %427, %431 : vector<36x64xf32>
    %c6_403 = arith.constant 6 : index
    %c0_404 = arith.constant 0 : index
    %433 = vector.load %arg5[%c6_403, %c0_404] : memref<50x64xf32, #tpu.memory_space<vmem>>, vector<36x64xf32>
    %434 = arith.truncf %433 : vector<36x64xf32> to vector<36x64xbf16>
    %c2496 = arith.constant 2496 : index
    %c0_405 = arith.constant 0 : index
    %435 = vector.load %arg2[%c2496, %c0_405] : memref<3456x64xbf16, #tpu.memory_space<vmem>>, vector<64x64xbf16>
    %cst_406 = arith.constant dense<0.000000e+00> : vector<36x64xf32>
    %436 = tpu.matmul %434, %435, %cst_406 {dimension_numbers = #tpu.dot_dimension_numbers<[1], [0], [0], [1], [0, 0, 1, 1], [], []>} : vector<36x64xbf16>, vector<64x64xbf16>, vector<36x64xf32> -> vector<36x64xf32>
    %437 = arith.addf %432, %436 : vector<36x64xf32>
    %c7_407 = arith.constant 7 : index
    %c0_408 = arith.constant 0 : index
    %438 = vector.load %arg5[%c7_407, %c0_408] : memref<50x64xf32, #tpu.memory_space<vmem>>, vector<36x64xf32>
    %439 = arith.truncf %438 : vector<36x64xf32> to vector<36x64xbf16>
    %c2560 = arith.constant 2560 : index
    %c0_409 = arith.constant 0 : index
    %440 = vector.load %arg2[%c2560, %c0_409] : memref<3456x64xbf16, #tpu.memory_space<vmem>>, vector<64x64xbf16>
    %cst_410 = arith.constant dense<0.000000e+00> : vector<36x64xf32>
    %441 = tpu.matmul %439, %440, %cst_410 {dimension_numbers = #tpu.dot_dimension_numbers<[1], [0], [0], [1], [0, 0, 1, 1], [], []>} : vector<36x64xbf16>, vector<64x64xbf16>, vector<36x64xf32> -> vector<36x64xf32>
    %442 = arith.addf %437, %441 : vector<36x64xf32>
    %c8_411 = arith.constant 8 : index
    %c0_412 = arith.constant 0 : index
    %443 = vector.load %arg5[%c8_411, %c0_412] : memref<50x64xf32, #tpu.memory_space<vmem>>, vector<36x64xf32>
    %444 = arith.truncf %443 : vector<36x64xf32> to vector<36x64xbf16>
    %c2624 = arith.constant 2624 : index
    %c0_413 = arith.constant 0 : index
    %445 = vector.load %arg2[%c2624, %c0_413] : memref<3456x64xbf16, #tpu.memory_space<vmem>>, vector<64x64xbf16>
    %cst_414 = arith.constant dense<0.000000e+00> : vector<36x64xf32>
    %446 = tpu.matmul %444, %445, %cst_414 {dimension_numbers = #tpu.dot_dimension_numbers<[1], [0], [0], [1], [0, 0, 1, 1], [], []>} : vector<36x64xbf16>, vector<64x64xbf16>, vector<36x64xf32> -> vector<36x64xf32>
    %447 = arith.addf %442, %446 : vector<36x64xf32>
    %c12_415 = arith.constant 12 : index
    %c0_416 = arith.constant 0 : index
    %448 = vector.load %arg5[%c12_415, %c0_416] : memref<50x64xf32, #tpu.memory_space<vmem>>, vector<36x64xf32>
    %449 = arith.truncf %448 : vector<36x64xf32> to vector<36x64xbf16>
    %c2688 = arith.constant 2688 : index
    %c0_417 = arith.constant 0 : index
    %450 = vector.load %arg2[%c2688, %c0_417] : memref<3456x64xbf16, #tpu.memory_space<vmem>>, vector<64x64xbf16>
    %cst_418 = arith.constant dense<0.000000e+00> : vector<36x64xf32>
    %451 = tpu.matmul %449, %450, %cst_418 {dimension_numbers = #tpu.dot_dimension_numbers<[1], [0], [0], [1], [0, 0, 1, 1], [], []>} : vector<36x64xbf16>, vector<64x64xbf16>, vector<36x64xf32> -> vector<36x64xf32>
    %452 = arith.addf %447, %451 : vector<36x64xf32>
    %c13_419 = arith.constant 13 : index
    %c0_420 = arith.constant 0 : index
    %453 = vector.load %arg5[%c13_419, %c0_420] : memref<50x64xf32, #tpu.memory_space<vmem>>, vector<36x64xf32>
    %454 = arith.truncf %453 : vector<36x64xf32> to vector<36x64xbf16>
    %c2752 = arith.constant 2752 : index
    %c0_421 = arith.constant 0 : index
    %455 = vector.load %arg2[%c2752, %c0_421] : memref<3456x64xbf16, #tpu.memory_space<vmem>>, vector<64x64xbf16>
    %cst_422 = arith.constant dense<0.000000e+00> : vector<36x64xf32>
    %456 = tpu.matmul %454, %455, %cst_422 {dimension_numbers = #tpu.dot_dimension_numbers<[1], [0], [0], [1], [0, 0, 1, 1], [], []>} : vector<36x64xbf16>, vector<64x64xbf16>, vector<36x64xf32> -> vector<36x64xf32>
    %457 = arith.addf %452, %456 : vector<36x64xf32>
    %c14_423 = arith.constant 14 : index
    %c0_424 = arith.constant 0 : index
    %458 = vector.load %arg5[%c14_423, %c0_424] : memref<50x64xf32, #tpu.memory_space<vmem>>, vector<36x64xf32>
    %459 = arith.truncf %458 : vector<36x64xf32> to vector<36x64xbf16>
    %c2816 = arith.constant 2816 : index
    %c0_425 = arith.constant 0 : index
    %460 = vector.load %arg2[%c2816, %c0_425] : memref<3456x64xbf16, #tpu.memory_space<vmem>>, vector<64x64xbf16>
    %cst_426 = arith.constant dense<0.000000e+00> : vector<36x64xf32>
    %461 = tpu.matmul %459, %460, %cst_426 {dimension_numbers = #tpu.dot_dimension_numbers<[1], [0], [0], [1], [0, 0, 1, 1], [], []>} : vector<36x64xbf16>, vector<64x64xbf16>, vector<36x64xf32> -> vector<36x64xf32>
    %462 = arith.addf %457, %461 : vector<36x64xf32>
    %c4_427 = arith.constant 4 : index
    %c0_428 = arith.constant 0 : index
    %463 = vector.load %arg3[%c4_427, %c0_428] : memref<6x64xf32, #tpu.memory_space<vmem>>, vector<1x64xf32>
    %464 = vector.broadcast %463 : vector<1x64xf32> to vector<36x64xf32>
    %465 = arith.addf %462, %464 : vector<36x64xf32>
    %cst_429 = arith.constant 0.000000e+00 : f32
    %466 = vector.broadcast %cst_429 : f32 to vector<36x64xf32>
    %467 = arith.maximumf %465, %466 : vector<36x64xf32>
    %468 = vector.extract_strided_slice %467 {offsets = [6, 0], sizes = [4, 64], strides = [1, 1]} : vector<36x64xf32> to vector<4x64xf32>
    %c1_430 = arith.constant 1 : index
    %c0_431 = arith.constant 0 : index
    %469 = vector.load %arg5[%c1_430, %c0_431] : memref<50x64xf32, #tpu.memory_space<vmem>>, vector<4x64xf32>
    tpu.vector_store %arg5[%c1_430, %c0_431], %468 {strides = array<i32>} : memref<50x64xf32, #tpu.memory_space<vmem>>, vector<4x64xf32>,
    %470 = vector.extract_strided_slice %468 {offsets = [1, 0], sizes = [1, 64], strides = [1, 1]} : vector<4x64xf32> to vector<1x64xf32>
    %c0_432 = arith.constant 0 : index
    %c0_433 = arith.constant 0 : index
    %471 = vector.load %arg5[%c0_432, %c0_433] : memref<50x64xf32, #tpu.memory_space<vmem>>, vector<1x64xf32>
    tpu.vector_store %arg5[%c0_432, %c0_433], %470 {strides = array<i32>} : memref<50x64xf32, #tpu.memory_space<vmem>>, vector<1x64xf32>,
    %472 = vector.extract_strided_slice %468 {offsets = [2, 0], sizes = [1, 64], strides = [1, 1]} : vector<4x64xf32> to vector<1x64xf32>
    %c5_434 = arith.constant 5 : index
    %c0_435 = arith.constant 0 : index
    %473 = vector.load %arg5[%c5_434, %c0_435] : memref<50x64xf32, #tpu.memory_space<vmem>>, vector<1x64xf32>
    tpu.vector_store %arg5[%c5_434, %c0_435], %472 {strides = array<i32>} : memref<50x64xf32, #tpu.memory_space<vmem>>, vector<1x64xf32>,
    %474 = vector.extract_strided_slice %467 {offsets = [0, 0], sizes = [4, 64], strides = [1, 1]} : vector<36x64xf32> to vector<4x64xf32>
    %c7_436 = arith.constant 7 : index
    %c0_437 = arith.constant 0 : index
    %475 = vector.load %arg5[%c7_436, %c0_437] : memref<50x64xf32, #tpu.memory_space<vmem>>, vector<4x64xf32>
    tpu.vector_store %arg5[%c7_436, %c0_437], %474 {strides = array<i32>} : memref<50x64xf32, #tpu.memory_space<vmem>>, vector<4x64xf32>,
    %476 = vector.extract_strided_slice %474 {offsets = [1, 0], sizes = [1, 64], strides = [1, 1]} : vector<4x64xf32> to vector<1x64xf32>
    %c6_438 = arith.constant 6 : index
    %c0_439 = arith.constant 0 : index
    %477 = vector.load %arg5[%c6_438, %c0_439] : memref<50x64xf32, #tpu.memory_space<vmem>>, vector<1x64xf32>
    tpu.vector_store %arg5[%c6_438, %c0_439], %476 {strides = array<i32>} : memref<50x64xf32, #tpu.memory_space<vmem>>, vector<1x64xf32>,
    %478 = vector.extract_strided_slice %474 {offsets = [2, 0], sizes = [1, 64], strides = [1, 1]} : vector<4x64xf32> to vector<1x64xf32>
    %c11_440 = arith.constant 11 : index
    %c0_441 = arith.constant 0 : index
    %479 = vector.load %arg5[%c11_440, %c0_441] : memref<50x64xf32, #tpu.memory_space<vmem>>, vector<1x64xf32>
    tpu.vector_store %arg5[%c11_440, %c0_441], %478 {strides = array<i32>} : memref<50x64xf32, #tpu.memory_space<vmem>>, vector<1x64xf32>,
    %480 = vector.extract_strided_slice %467 {offsets = [6, 0], sizes = [4, 64], strides = [1, 1]} : vector<36x64xf32> to vector<4x64xf32>
    %c13_442 = arith.constant 13 : index
    %c0_443 = arith.constant 0 : index
    %481 = vector.load %arg5[%c13_442, %c0_443] : memref<50x64xf32, #tpu.memory_space<vmem>>, vector<4x64xf32>
    tpu.vector_store %arg5[%c13_442, %c0_443], %480 {strides = array<i32>} : memref<50x64xf32, #tpu.memory_space<vmem>>, vector<4x64xf32>,
    %482 = vector.extract_strided_slice %480 {offsets = [1, 0], sizes = [1, 64], strides = [1, 1]} : vector<4x64xf32> to vector<1x64xf32>
    %c12_444 = arith.constant 12 : index
    %c0_445 = arith.constant 0 : index
    %483 = vector.load %arg5[%c12_444, %c0_445] : memref<50x64xf32, #tpu.memory_space<vmem>>, vector<1x64xf32>
    tpu.vector_store %arg5[%c12_444, %c0_445], %482 {strides = array<i32>} : memref<50x64xf32, #tpu.memory_space<vmem>>, vector<1x64xf32>,
    %484 = vector.extract_strided_slice %480 {offsets = [2, 0], sizes = [1, 64], strides = [1, 1]} : vector<4x64xf32> to vector<1x64xf32>
    %c17_446 = arith.constant 17 : index
    %c0_447 = arith.constant 0 : index
    %485 = vector.load %arg5[%c17_446, %c0_447] : memref<50x64xf32, #tpu.memory_space<vmem>>, vector<1x64xf32>
    tpu.vector_store %arg5[%c17_446, %c0_447], %484 {strides = array<i32>} : memref<50x64xf32, #tpu.memory_space<vmem>>, vector<1x64xf32>,
    %486 = vector.extract_strided_slice %467 {offsets = [12, 0], sizes = [4, 64], strides = [1, 1]} : vector<36x64xf32> to vector<4x64xf32>
    %c19_448 = arith.constant 19 : index
    %c0_449 = arith.constant 0 : index
    %487 = vector.load %arg5[%c19_448, %c0_449] : memref<50x64xf32, #tpu.memory_space<vmem>>, vector<4x64xf32>
    tpu.vector_store %arg5[%c19_448, %c0_449], %486 {strides = array<i32>} : memref<50x64xf32, #tpu.memory_space<vmem>>, vector<4x64xf32>,
    %488 = vector.extract_strided_slice %486 {offsets = [1, 0], sizes = [1, 64], strides = [1, 1]} : vector<4x64xf32> to vector<1x64xf32>
    %c18_450 = arith.constant 18 : index
    %c0_451 = arith.constant 0 : index
    %489 = vector.load %arg5[%c18_450, %c0_451] : memref<50x64xf32, #tpu.memory_space<vmem>>, vector<1x64xf32>
    tpu.vector_store %arg5[%c18_450, %c0_451], %488 {strides = array<i32>} : memref<50x64xf32, #tpu.memory_space<vmem>>, vector<1x64xf32>,
    %490 = vector.extract_strided_slice %486 {offsets = [2, 0], sizes = [1, 64], strides = [1, 1]} : vector<4x64xf32> to vector<1x64xf32>
    %c23_452 = arith.constant 23 : index
    %c0_453 = arith.constant 0 : index
    %491 = vector.load %arg5[%c23_452, %c0_453] : memref<50x64xf32, #tpu.memory_space<vmem>>, vector<1x64xf32>
    tpu.vector_store %arg5[%c23_452, %c0_453], %490 {strides = array<i32>} : memref<50x64xf32, #tpu.memory_space<vmem>>, vector<1x64xf32>,
    %492 = vector.extract_strided_slice %467 {offsets = [18, 0], sizes = [4, 64], strides = [1, 1]} : vector<36x64xf32> to vector<4x64xf32>
    %c25_454 = arith.constant 25 : index
    %c0_455 = arith.constant 0 : index
    %493 = vector.load %arg5[%c25_454, %c0_455] : memref<50x64xf32, #tpu.memory_space<vmem>>, vector<4x64xf32>
    tpu.vector_store %arg5[%c25_454, %c0_455], %492 {strides = array<i32>} : memref<50x64xf32, #tpu.memory_space<vmem>>, vector<4x64xf32>,
    %494 = vector.extract_strided_slice %492 {offsets = [1, 0], sizes = [1, 64], strides = [1, 1]} : vector<4x64xf32> to vector<1x64xf32>
    %c24_456 = arith.constant 24 : index
    %c0_457 = arith.constant 0 : index
    %495 = vector.load %arg5[%c24_456, %c0_457] : memref<50x64xf32, #tpu.memory_space<vmem>>, vector<1x64xf32>
    tpu.vector_store %arg5[%c24_456, %c0_457], %494 {strides = array<i32>} : memref<50x64xf32, #tpu.memory_space<vmem>>, vector<1x64xf32>,
    %496 = vector.extract_strided_slice %492 {offsets = [2, 0], sizes = [1, 64], strides = [1, 1]} : vector<4x64xf32> to vector<1x64xf32>
    %c29_458 = arith.constant 29 : index
    %c0_459 = arith.constant 0 : index
    %497 = vector.load %arg5[%c29_458, %c0_459] : memref<50x64xf32, #tpu.memory_space<vmem>>, vector<1x64xf32>
    tpu.vector_store %arg5[%c29_458, %c0_459], %496 {strides = array<i32>} : memref<50x64xf32, #tpu.memory_space<vmem>>, vector<1x64xf32>,
    %498 = vector.extract_strided_slice %467 {offsets = [12, 0], sizes = [4, 64], strides = [1, 1]} : vector<36x64xf32> to vector<4x64xf32>
    %c31_460 = arith.constant 31 : index
    %c0_461 = arith.constant 0 : index
    %499 = vector.load %arg5[%c31_460, %c0_461] : memref<50x64xf32, #tpu.memory_space<vmem>>, vector<4x64xf32>
    tpu.vector_store %arg5[%c31_460, %c0_461], %498 {strides = array<i32>} : memref<50x64xf32, #tpu.memory_space<vmem>>, vector<4x64xf32>,
    %500 = vector.extract_strided_slice %498 {offsets = [1, 0], sizes = [1, 64], strides = [1, 1]} : vector<4x64xf32> to vector<1x64xf32>
    %c30_462 = arith.constant 30 : index
    %c0_463 = arith.constant 0 : index
    %501 = vector.load %arg5[%c30_462, %c0_463] : memref<50x64xf32, #tpu.memory_space<vmem>>, vector<1x64xf32>
    tpu.vector_store %arg5[%c30_462, %c0_463], %500 {strides = array<i32>} : memref<50x64xf32, #tpu.memory_space<vmem>>, vector<1x64xf32>,
    %502 = vector.extract_strided_slice %498 {offsets = [2, 0], sizes = [1, 64], strides = [1, 1]} : vector<4x64xf32> to vector<1x64xf32>
    %c35_464 = arith.constant 35 : index
    %c0_465 = arith.constant 0 : index
    %503 = vector.load %arg5[%c35_464, %c0_465] : memref<50x64xf32, #tpu.memory_space<vmem>>, vector<1x64xf32>
    tpu.vector_store %arg5[%c35_464, %c0_465], %502 {strides = array<i32>} : memref<50x64xf32, #tpu.memory_space<vmem>>, vector<1x64xf32>,
    %cst_466 = arith.constant 0.000000e+00 : f32
    %504 = vector.broadcast %cst_466 : f32 to vector<36x64xf32>
    %c0_467 = arith.constant 0 : index
    %c0_468 = arith.constant 0 : index
    %505 = vector.load %arg5[%c0_467, %c0_468] : memref<50x64xf32, #tpu.memory_space<vmem>>, vector<36x64xf32>
    %506 = arith.truncf %505 : vector<36x64xf32> to vector<36x64xbf16>
    %c2880 = arith.constant 2880 : index
    %c0_469 = arith.constant 0 : index
    %507 = vector.load %arg2[%c2880, %c0_469] : memref<3456x64xbf16, #tpu.memory_space<vmem>>, vector<64x64xbf16>
    %cst_470 = arith.constant dense<0.000000e+00> : vector<36x64xf32>
    %508 = tpu.matmul %506, %507, %cst_470 {dimension_numbers = #tpu.dot_dimension_numbers<[1], [0], [0], [1], [0, 0, 1, 1], [], []>} : vector<36x64xbf16>, vector<64x64xbf16>, vector<36x64xf32> -> vector<36x64xf32>
    %509 = arith.addf %504, %508 : vector<36x64xf32>
    %c1_471 = arith.constant 1 : index
    %c0_472 = arith.constant 0 : index
    %510 = vector.load %arg5[%c1_471, %c0_472] : memref<50x64xf32, #tpu.memory_space<vmem>>, vector<36x64xf32>
    %511 = arith.truncf %510 : vector<36x64xf32> to vector<36x64xbf16>
    %c2944 = arith.constant 2944 : index
    %c0_473 = arith.constant 0 : index
    %512 = vector.load %arg2[%c2944, %c0_473] : memref<3456x64xbf16, #tpu.memory_space<vmem>>, vector<64x64xbf16>
    %cst_474 = arith.constant dense<0.000000e+00> : vector<36x64xf32>
    %513 = tpu.matmul %511, %512, %cst_474 {dimension_numbers = #tpu.dot_dimension_numbers<[1], [0], [0], [1], [0, 0, 1, 1], [], []>} : vector<36x64xbf16>, vector<64x64xbf16>, vector<36x64xf32> -> vector<36x64xf32>
    %514 = arith.addf %509, %513 : vector<36x64xf32>
    %c2_475 = arith.constant 2 : index
    %c0_476 = arith.constant 0 : index
    %515 = vector.load %arg5[%c2_475, %c0_476] : memref<50x64xf32, #tpu.memory_space<vmem>>, vector<36x64xf32>
    %516 = arith.truncf %515 : vector<36x64xf32> to vector<36x64xbf16>
    %c3008 = arith.constant 3008 : index
    %c0_477 = arith.constant 0 : index
    %517 = vector.load %arg2[%c3008, %c0_477] : memref<3456x64xbf16, #tpu.memory_space<vmem>>, vector<64x64xbf16>
    %cst_478 = arith.constant dense<0.000000e+00> : vector<36x64xf32>
    %518 = tpu.matmul %516, %517, %cst_478 {dimension_numbers = #tpu.dot_dimension_numbers<[1], [0], [0], [1], [0, 0, 1, 1], [], []>} : vector<36x64xbf16>, vector<64x64xbf16>, vector<36x64xf32> -> vector<36x64xf32>
    %519 = arith.addf %514, %518 : vector<36x64xf32>
    %c6_479 = arith.constant 6 : index
    %c0_480 = arith.constant 0 : index
    %520 = vector.load %arg5[%c6_479, %c0_480] : memref<50x64xf32, #tpu.memory_space<vmem>>, vector<36x64xf32>
    %521 = arith.truncf %520 : vector<36x64xf32> to vector<36x64xbf16>
    %c3072 = arith.constant 3072 : index
    %c0_481 = arith.constant 0 : index
    %522 = vector.load %arg2[%c3072, %c0_481] : memref<3456x64xbf16, #tpu.memory_space<vmem>>, vector<64x64xbf16>
    %cst_482 = arith.constant dense<0.000000e+00> : vector<36x64xf32>
    %523 = tpu.matmul %521, %522, %cst_482 {dimension_numbers = #tpu.dot_dimension_numbers<[1], [0], [0], [1], [0, 0, 1, 1], [], []>} : vector<36x64xbf16>, vector<64x64xbf16>, vector<36x64xf32> -> vector<36x64xf32>
    %524 = arith.addf %519, %523 : vector<36x64xf32>
    %c7_483 = arith.constant 7 : index
    %c0_484 = arith.constant 0 : index
    %525 = vector.load %arg5[%c7_483, %c0_484] : memref<50x64xf32, #tpu.memory_space<vmem>>, vector<36x64xf32>
    %526 = arith.truncf %525 : vector<36x64xf32> to vector<36x64xbf16>
    %c3136 = arith.constant 3136 : index
    %c0_485 = arith.constant 0 : index
    %527 = vector.load %arg2[%c3136, %c0_485] : memref<3456x64xbf16, #tpu.memory_space<vmem>>, vector<64x64xbf16>
    %cst_486 = arith.constant dense<0.000000e+00> : vector<36x64xf32>
    %528 = tpu.matmul %526, %527, %cst_486 {dimension_numbers = #tpu.dot_dimension_numbers<[1], [0], [0], [1], [0, 0, 1, 1], [], []>} : vector<36x64xbf16>, vector<64x64xbf16>, vector<36x64xf32> -> vector<36x64xf32>
    %529 = arith.addf %524, %528 : vector<36x64xf32>
    %c8_487 = arith.constant 8 : index
    %c0_488 = arith.constant 0 : index
    %530 = vector.load %arg5[%c8_487, %c0_488] : memref<50x64xf32, #tpu.memory_space<vmem>>, vector<36x64xf32>
    %531 = arith.truncf %530 : vector<36x64xf32> to vector<36x64xbf16>
    %c3200 = arith.constant 3200 : index
    %c0_489 = arith.constant 0 : index
    %532 = vector.load %arg2[%c3200, %c0_489] : memref<3456x64xbf16, #tpu.memory_space<vmem>>, vector<64x64xbf16>
    %cst_490 = arith.constant dense<0.000000e+00> : vector<36x64xf32>
    %533 = tpu.matmul %531, %532, %cst_490 {dimension_numbers = #tpu.dot_dimension_numbers<[1], [0], [0], [1], [0, 0, 1, 1], [], []>} : vector<36x64xbf16>, vector<64x64xbf16>, vector<36x64xf32> -> vector<36x64xf32>
    %534 = arith.addf %529, %533 : vector<36x64xf32>
    %c12_491 = arith.constant 12 : index
    %c0_492 = arith.constant 0 : index
    %535 = vector.load %arg5[%c12_491, %c0_492] : memref<50x64xf32, #tpu.memory_space<vmem>>, vector<36x64xf32>
    %536 = arith.truncf %535 : vector<36x64xf32> to vector<36x64xbf16>
    %c3264 = arith.constant 3264 : index
    %c0_493 = arith.constant 0 : index
    %537 = vector.load %arg2[%c3264, %c0_493] : memref<3456x64xbf16, #tpu.memory_space<vmem>>, vector<64x64xbf16>
    %cst_494 = arith.constant dense<0.000000e+00> : vector<36x64xf32>
    %538 = tpu.matmul %536, %537, %cst_494 {dimension_numbers = #tpu.dot_dimension_numbers<[1], [0], [0], [1], [0, 0, 1, 1], [], []>} : vector<36x64xbf16>, vector<64x64xbf16>, vector<36x64xf32> -> vector<36x64xf32>
    %539 = arith.addf %534, %538 : vector<36x64xf32>
    %c13_495 = arith.constant 13 : index
    %c0_496 = arith.constant 0 : index
    %540 = vector.load %arg5[%c13_495, %c0_496] : memref<50x64xf32, #tpu.memory_space<vmem>>, vector<36x64xf32>
    %541 = arith.truncf %540 : vector<36x64xf32> to vector<36x64xbf16>
    %c3328 = arith.constant 3328 : index
    %c0_497 = arith.constant 0 : index
    %542 = vector.load %arg2[%c3328, %c0_497] : memref<3456x64xbf16, #tpu.memory_space<vmem>>, vector<64x64xbf16>
    %cst_498 = arith.constant dense<0.000000e+00> : vector<36x64xf32>
    %543 = tpu.matmul %541, %542, %cst_498 {dimension_numbers = #tpu.dot_dimension_numbers<[1], [0], [0], [1], [0, 0, 1, 1], [], []>} : vector<36x64xbf16>, vector<64x64xbf16>, vector<36x64xf32> -> vector<36x64xf32>
    %544 = arith.addf %539, %543 : vector<36x64xf32>
    %c14_499 = arith.constant 14 : index
    %c0_500 = arith.constant 0 : index
    %545 = vector.load %arg5[%c14_499, %c0_500] : memref<50x64xf32, #tpu.memory_space<vmem>>, vector<36x64xf32>
    %546 = arith.truncf %545 : vector<36x64xf32> to vector<36x64xbf16>
    %c3392 = arith.constant 3392 : index
    %c0_501 = arith.constant 0 : index
    %547 = vector.load %arg2[%c3392, %c0_501] : memref<3456x64xbf16, #tpu.memory_space<vmem>>, vector<64x64xbf16>
    %cst_502 = arith.constant dense<0.000000e+00> : vector<36x64xf32>
    %548 = tpu.matmul %546, %547, %cst_502 {dimension_numbers = #tpu.dot_dimension_numbers<[1], [0], [0], [1], [0, 0, 1, 1], [], []>} : vector<36x64xbf16>, vector<64x64xbf16>, vector<36x64xf32> -> vector<36x64xf32>
    %549 = arith.addf %544, %548 : vector<36x64xf32>
    %c5_503 = arith.constant 5 : index
    %c0_504 = arith.constant 0 : index
    %550 = vector.load %arg3[%c5_503, %c0_504] : memref<6x64xf32, #tpu.memory_space<vmem>>, vector<1x64xf32>
    %551 = vector.broadcast %550 : vector<1x64xf32> to vector<36x64xf32>
    %552 = arith.addf %549, %551 : vector<36x64xf32>
    %c0_505 = arith.constant 0 : index
    %c0_506 = arith.constant 0 : index
    %553 = vector.load %arg6[%c0_505, %c0_506] : memref<16x64xf32, #tpu.memory_space<vmem>>, vector<4x64xf32>
    %554 = vector.extract_strided_slice %552 {offsets = [0, 0], sizes = [4, 64], strides = [1, 1]} : vector<36x64xf32> to vector<4x64xf32>
    %555 = arith.addf %553, %554 : vector<4x64xf32>
    %c0_507 = arith.constant 0 : index
    %c0_508 = arith.constant 0 : index
    %556 = vector.load %arg6[%c0_507, %c0_508] : memref<16x64xf32, #tpu.memory_space<vmem>>, vector<4x64xf32>
    tpu.vector_store %arg6[%c0_507, %c0_508], %555 {strides = array<i32>} : memref<16x64xf32, #tpu.memory_space<vmem>>, vector<4x64xf32>,
    %c4_509 = arith.constant 4 : index
    %c0_510 = arith.constant 0 : index
    %557 = vector.load %arg6[%c4_509, %c0_510] : memref<16x64xf32, #tpu.memory_space<vmem>>, vector<4x64xf32>
    %558 = vector.extract_strided_slice %552 {offsets = [6, 0], sizes = [4, 64], strides = [1, 1]} : vector<36x64xf32> to vector<4x64xf32>
    %559 = arith.addf %557, %558 : vector<4x64xf32>
    %c4_511 = arith.constant 4 : index
    %c0_512 = arith.constant 0 : index
    %560 = vector.load %arg6[%c4_511, %c0_512] : memref<16x64xf32, #tpu.memory_space<vmem>>, vector<4x64xf32>
    tpu.vector_store %arg6[%c4_511, %c0_512], %559 {strides = array<i32>} : memref<16x64xf32, #tpu.memory_space<vmem>>, vector<4x64xf32>,
    %c8_513 = arith.constant 8 : index
    %c0_514 = arith.constant 0 : index
    %561 = vector.load %arg6[%c8_513, %c0_514] : memref<16x64xf32, #tpu.memory_space<vmem>>, vector<4x64xf32>
    %562 = vector.extract_strided_slice %552 {offsets = [12, 0], sizes = [4, 64], strides = [1, 1]} : vector<36x64xf32> to vector<4x64xf32>
    %563 = arith.addf %561, %562 : vector<4x64xf32>
    %c8_515 = arith.constant 8 : index
    %c0_516 = arith.constant 0 : index
    %564 = vector.load %arg6[%c8_515, %c0_516] : memref<16x64xf32, #tpu.memory_space<vmem>>, vector<4x64xf32>
    tpu.vector_store %arg6[%c8_515, %c0_516], %563 {strides = array<i32>} : memref<16x64xf32, #tpu.memory_space<vmem>>, vector<4x64xf32>,
    %c12_517 = arith.constant 12 : index
    %c0_518 = arith.constant 0 : index
    %565 = vector.load %arg6[%c12_517, %c0_518] : memref<16x64xf32, #tpu.memory_space<vmem>>, vector<4x64xf32>
    %566 = vector.extract_strided_slice %552 {offsets = [18, 0], sizes = [4, 64], strides = [1, 1]} : vector<36x64xf32> to vector<4x64xf32>
    %567 = arith.addf %565, %566 : vector<4x64xf32>
    %c12_519 = arith.constant 12 : index
    %c0_520 = arith.constant 0 : index
    %568 = vector.load %arg6[%c12_519, %c0_520] : memref<16x64xf32, #tpu.memory_space<vmem>>, vector<4x64xf32>
    tpu.vector_store %arg6[%c12_519, %c0_520], %567 {strides = array<i32>} : memref<16x64xf32, #tpu.memory_space<vmem>>, vector<4x64xf32>,
    %c0_521 = arith.constant 0 : index
    %c0_522 = arith.constant 0 : index
    %569 = vector.load %arg6[%c0_521, %c0_522] : memref<16x64xf32, #tpu.memory_space<vmem>>, vector<16x64xf32>
    %570 = arith.truncf %569 : vector<16x64xf32> to vector<16x64xbf16>
    %c0_523 = arith.constant 0 : index
    %c0_524 = arith.constant 0 : index
    %571 = vector.load %arg4[%c0_523, %c0_524] : memref<16x64xbf16, #tpu.memory_space<vmem>>, vector<16x64xbf16>
    tpu.vector_store %arg4[%c0_523, %c0_524], %570 {strides = array<i32>} : memref<16x64xbf16, #tpu.memory_space<vmem>>, vector<16x64xbf16>,
    return
  }
  func.func @transform_0(%arg0: i32) -> (i32, i32) {
    %c0_i32 = arith.constant 0 : i32
    %c0_i32_0 = arith.constant 0 : i32
    return %arg0, %c0_i32 : i32, i32
  }
  func.func @transform_1(%arg0: i32) -> (i32, i32) {
    %c0_i32 = arith.constant 0 : i32
    %c0_i32_0 = arith.constant 0 : i32
    %c0_i32_1 = arith.constant 0 : i32
    return %c0_i32, %c0_i32_0 : i32, i32
  }
  func.func @transform_2(%arg0: i32) -> (i32, i32) {
    %c0_i32 = arith.constant 0 : i32
    %c0_i32_0 = arith.constant 0 : i32
    %c0_i32_1 = arith.constant 0 : i32
    return %c0_i32, %c0_i32_0 : i32, i32
  }
  func.func @transform_3(%arg0: i32) -> (i32, i32) {
    %c0_i32 = arith.constant 0 : i32
    %c0_i32_0 = arith.constant 0 : i32
    return %arg0, %c0_i32 : i32, i32
  }
}

module attributes {stable_mosaic.version = 11 : i64} {
  func.func @_fused_matmul_kernel(%arg0: i32, %arg1: memref<64x128xbf16, #tpu.memory_space<vmem>>, %arg2: memref<128x128xbf16, #tpu.memory_space<vmem>>, %arg3: memref<1x128xf32, #tpu.memory_space<vmem>>, %arg4: memref<64x64xbf16, #tpu.memory_space<vmem>>) attributes {dimension_semantics = [#tpu.dimension_semantics<parallel>], iteration_bounds = array<i64: 2>, scalar_prefetch = 0 : i64, scratch_operands = 0 : i64, tpu.core_type = #tpu.core_type<tc>, window_params = [{transform_indices = @transform_0, window_bounds = array<i64: 64, 128>}, {pipeline_mode = #tpu.pipeline_mode<synchronous>, transform_indices = @transform_1, window_bounds = array<i64: 128, 128>}, {pipeline_mode = #tpu.pipeline_mode<synchronous>, transform_indices = @transform_2, window_bounds = array<i64: 1, 128>}, {transform_indices = @transform_3, window_bounds = array<i64: 64, 64>}]} {
    %c0 = arith.constant 0 : index
    %c0_0 = arith.constant 0 : index
    %0 = vector.load %arg1[%c0, %c0_0] : memref<64x128xbf16, #tpu.memory_space<vmem>>, vector<64x128xbf16>
    %c0_1 = arith.constant 0 : index
    %c0_2 = arith.constant 0 : index
    %1 = vector.load %arg2[%c0_1, %c0_2] : memref<128x128xbf16, #tpu.memory_space<vmem>>, vector<128x128xbf16>
    %cst = arith.constant dense<0.000000e+00> : vector<64x128xf32>
    %2 = tpu.matmul %0, %1, %cst {dimension_numbers = #tpu.dot_dimension_numbers<[1], [0], [0], [1], [0, 0, 1, 1], [], []>} : vector<64x128xbf16>, vector<128x128xbf16>, vector<64x128xf32> -> vector<64x128xf32>
    %c0_3 = arith.constant 0 : index
    %c0_4 = arith.constant 0 : index
    %3 = vector.load %arg3[%c0_3, %c0_4] : memref<1x128xf32, #tpu.memory_space<vmem>>, vector<1x128xf32>
    %4 = vector.broadcast %3 : vector<1x128xf32> to vector<64x128xf32>
    %5 = arith.addf %2, %4 : vector<64x128xf32>
    %cst_5 = arith.constant 0.000000e+00 : f32
    %6 = vector.broadcast %cst_5 : f32 to vector<64x128xf32>
    %7 = arith.maximumf %5, %6 : vector<64x128xf32>
    %8 = vector.extract_strided_slice %7 {offsets = [0, 0], sizes = [64, 64], strides = [1, 1]} : vector<64x128xf32> to vector<64x64xf32>
    %9 = arith.truncf %8 : vector<64x64xf32> to vector<64x64xbf16>
    %c0_6 = arith.constant 0 : index
    %c0_7 = arith.constant 0 : index
    %10 = vector.load %arg4[%c0_6, %c0_7] : memref<64x64xbf16, #tpu.memory_space<vmem>>, vector<64x64xbf16>
    tpu.vector_store %arg4[%c0_6, %c0_7], %9 {strides = array<i32>} : memref<64x64xbf16, #tpu.memory_space<vmem>>, vector<64x64xbf16>,
    return
  }
  func.func @transform_0(%arg0: i32) -> (i32, i32) {
    %c0_i32 = arith.constant 0 : i32
    %c0_i32_0 = arith.constant 0 : i32
    return %arg0, %c0_i32 : i32, i32
  }
  func.func @transform_1(%arg0: i32) -> (i32, i32) {
    %c0_i32 = arith.constant 0 : i32
    %c0_i32_0 = arith.constant 0 : i32
    %c0_i32_1 = arith.constant 0 : i32
    return %c0_i32, %c0_i32_0 : i32, i32
  }
  func.func @transform_2(%arg0: i32) -> (i32, i32) {
    %c0_i32 = arith.constant 0 : i32
    %c0_i32_0 = arith.constant 0 : i32
    %c0_i32_1 = arith.constant 0 : i32
    return %c0_i32, %c0_i32_0 : i32, i32
  }
  func.func @transform_3(%arg0: i32) -> (i32, i32) {
    %c0_i32 = arith.constant 0 : i32
    %c0_i32_0 = arith.constant 0 : i32
    return %arg0, %c0_i32 : i32, i32
  }
}

module attributes {stable_mosaic.version = 11 : i64} {
  func.func @_fused_matmul_kernel(%arg0: i32, %arg1: memref<256x896xbf16, #tpu.memory_space<vmem>>, %arg2: memref<896x128xbf16, #tpu.memory_space<vmem>>, %arg3: memref<1x128xf32, #tpu.memory_space<vmem>>, %arg4: memref<256x3xf32, #tpu.memory_space<vmem>>, %arg5: memref<256x3xf32, #tpu.memory_space<vmem>>) attributes {dimension_semantics = [#tpu.dimension_semantics<parallel>], iteration_bounds = array<i64: 2>, scalar_prefetch = 0 : i64, scratch_operands = 0 : i64, tpu.core_type = #tpu.core_type<tc>, window_params = [{transform_indices = @transform_0, window_bounds = array<i64: 256, 896>}, {pipeline_mode = #tpu.pipeline_mode<synchronous>, transform_indices = @transform_1, window_bounds = array<i64: 896, 128>}, {pipeline_mode = #tpu.pipeline_mode<synchronous>, transform_indices = @transform_2, window_bounds = array<i64: 1, 128>}, {transform_indices = @transform_3, window_bounds = array<i64: 256, 3>}, {transform_indices = @transform_4, window_bounds = array<i64: 256, 3>}]} {
    %c0 = arith.constant 0 : index
    %c0_0 = arith.constant 0 : index
    %0 = vector.load %arg1[%c0, %c0_0] : memref<256x896xbf16, #tpu.memory_space<vmem>>, vector<256x896xbf16>
    %c0_1 = arith.constant 0 : index
    %c0_2 = arith.constant 0 : index
    %1 = vector.load %arg2[%c0_1, %c0_2] : memref<896x128xbf16, #tpu.memory_space<vmem>>, vector<896x128xbf16>
    %cst = arith.constant dense<0.000000e+00> : vector<256x128xf32>
    %2 = tpu.matmul %0, %1, %cst {dimension_numbers = #tpu.dot_dimension_numbers<[1], [0], [0], [1], [0, 0, 1, 1], [], []>} : vector<256x896xbf16>, vector<896x128xbf16>, vector<256x128xf32> -> vector<256x128xf32>
    %c0_3 = arith.constant 0 : index
    %c0_4 = arith.constant 0 : index
    %3 = vector.load %arg3[%c0_3, %c0_4] : memref<1x128xf32, #tpu.memory_space<vmem>>, vector<1x128xf32>
    %4 = vector.broadcast %3 : vector<1x128xf32> to vector<256x128xf32>
    %5 = arith.addf %2, %4 : vector<256x128xf32>
    %6 = math.tanh %5 : vector<256x128xf32>
    %7 = vector.extract_strided_slice %6 {offsets = [0, 0], sizes = [256, 3], strides = [1, 1]} : vector<256x128xf32> to vector<256x3xf32>
    %c0_5 = arith.constant 0 : index
    %c0_6 = arith.constant 0 : index
    %8 = vector.load %arg4[%c0_5, %c0_6] : memref<256x3xf32, #tpu.memory_space<vmem>>, vector<256x3xf32>
    %9 = arith.addf %7, %8 : vector<256x3xf32>
    %cst_7 = arith.constant -1.000000e+00 : f32
    %cst_8 = arith.constant 1.000000e+00 : f32
    %10 = vector.broadcast %cst_7 : f32 to vector<256x3xf32>
    %11 = arith.maximumf %10, %9 : vector<256x3xf32>
    %12 = vector.broadcast %cst_8 : f32 to vector<256x3xf32>
    %13 = arith.minimumf %12, %11 : vector<256x3xf32>
    %c0_9 = arith.constant 0 : index
    %c0_10 = arith.constant 0 : index
    %14 = vector.load %arg5[%c0_9, %c0_10] : memref<256x3xf32, #tpu.memory_space<vmem>>, vector<256x3xf32>
    tpu.vector_store %arg5[%c0_9, %c0_10], %13 {strides = array<i32>} : memref<256x3xf32, #tpu.memory_space<vmem>>, vector<256x3xf32>,
    return
  }
  func.func @transform_0(%arg0: i32) -> (i32, i32) {
    %c0_i32 = arith.constant 0 : i32
    %c0_i32_0 = arith.constant 0 : i32
    return %arg0, %c0_i32 : i32, i32
  }
  func.func @transform_1(%arg0: i32) -> (i32, i32) {
    %c0_i32 = arith.constant 0 : i32
    %c0_i32_0 = arith.constant 0 : i32
    %c0_i32_1 = arith.constant 0 : i32
    return %c0_i32, %c0_i32_0 : i32, i32
  }
  func.func @transform_2(%arg0: i32) -> (i32, i32) {
    %c0_i32 = arith.constant 0 : i32
    %c0_i32_0 = arith.constant 0 : i32
    %c0_i32_1 = arith.constant 0 : i32
    return %c0_i32, %c0_i32_0 : i32, i32
  }
  func.func @transform_3(%arg0: i32) -> (i32, i32) {
    %c0_i32 = arith.constant 0 : i32
    %c0_i32_0 = arith.constant 0 : i32
    return %arg0, %c0_i32 : i32, i32
  }
  func.func @transform_4(%arg0: i32) -> (i32, i32) {
    %c0_i32 = arith.constant 0 : i32
    %c0_i32_0 = arith.constant 0 : i32
    return %arg0, %c0_i32 : i32, i32
  }
}

</mosaic_0001>

<bundles_post_ra>
// kernel: _lambda_.7
= control target key start
LH: loop header
LB: loop body
LE: loop exit
PB: predicated region body
PF: predicated region fallthrough
CT: control target
= control target key end

     0   :  { %s1269_s12 = smov 0   ;;  %s1475_s0 = inlined_call_operand.vmem [shape: bf16[512,256], index: 0, kind: input, shape index: {}]   ;;  %s1476_s1 = inlined_call_operand.vmem [shape: bf16[256,128], index: 1, kind: input, shape index: {}]   ;;  %s1477_s2 = inlined_call_operand.vmem [shape: f32[1,128], index: 2, kind: input, shape index: {}]   ;;  %s1478_s3 = inlined_call_operand.vmem [shape: bf16[512,16], index: 3, kind: output, shape index: {}]  }
   0x1 LB: > { %s915_s13 = sadd.s32 4294967295, %s1247_s12   ;;  %p919_p0 = scmp.ge.s32.totalorder %s1247_s12, 1  ;;  %s1247_s12 = sphi %s1269_s12, %s13_s12  }
   0x2   : > { %p139_p1 = scmp.lt.s32.totalorder %s1247_s12, 3 }
   0x4   : > { %p140_p2 = pnand %p919_p0, %p139_p1 }
   0x5   : > { %s920_s16 = sshll.u32 (!%p140_p2), %s915_s13, 5 }
   0x6   : > { %143 = sbr.rel (%p140_p2) target bundleno = 308 (0x134), region = 32  ;;  %p165_p3 = scmp.lt.s32.totalorder (!%p140_p2), %s920_s16, 63 }
   0xb   : > { %v1177_v0 = vld [vmem:[%s1476_s1 + $0x78] sm:$0xff]   ;;  %v1179_v2 = vld [vmem:[%s1476_s1 + $0x70] sm:$0xff]   ;;  %v1181_v4 = vld [vmem:[%s1476_s1 + $0x68] sm:$0xff]   ;;  %s1480_s16 = smov (!%p165_p3, %s920_s16), 63  ;;  %vm826_vm0 = vcmask 125952  }
   0xc   : > { %v1178_v1 = vld [vmem:[%s1476_s1 + $0x38] sm:$0xff]   ;;  %1041 = vmatprep.subr.bf16.mxu0 %v1177_v0  ;;  %1153 = vmatprep.subr.bf16.mxu1 %v1177_v0  ;;  %v1180_v3 = vld [vmem:[%s1476_s1 + $0x30] sm:$0xff]   ;;  %v1182_v5 = vld [vmem:[%s1476_s1 + $0x28] sm:$0xff]   ;;  %s1008_s4 = sshll.u32 %s1480_s16, 3  ;;  %s924_s28 = sshll.u32 %s1480_s16, 2 }
   0xd   : > { %1042 = vmatpush3.bf16.msra.mxu0 %v1178_v1  ;;  %1161 = vmatpush3.bf16.msra.mxu1 %v1178_v1  ;;  %v1183_v6 = vld [vmem:[%s1476_s1 + $0x60] sm:$0xff]   ;;  %v1185_v8 = vld [vmem:[%s1476_s1 + $0x58] sm:$0xff]   ;;  %s1310_s9 = scalar_lea.vmem %s1475_s0, %s1008_s4  ;;  %v1187_v10 = vld [vmem:[%s1476_s1 + $0x50] sm:$0xff]   ;;  %s1376_s4 = scalar_lea.vmem %s1478_s3, %s924_s28 }
   0xe   : > { %1043 = vmatprep.subr.bf16.mxu0 %v1179_v2  ;;  %1154 = vmatprep.subr.bf16.mxu1 %v1179_v2  ;;  %v1184_v7 = vld [vmem:[%s1476_s1 + $0x20] sm:$0xff]   ;;  %v1186_v9 = vld [vmem:[%s1476_s1 + $0x18] sm:$0xff]   ;;  %v1188_v13 = vld [vmem:[%s1476_s1 + $0x10] sm:$0xff]  }
   0xf   : > { %v1195_v11 = vld [vmem:[%s1310_s9 + $0x4] ss:$8 sps:$4 sm:$0xff]   ;;  %v1193_v18 = vld [vmem:[%s1310_s9] ss:$8 sps:$4 sm:$0xff]   ;;  %v1199_v20 = vld [vmem:[%s1310_s9 + $0x14] ss:$8 sps:$4 sm:$0xff]  }
  0x10   : > { %v1198_v12 = vld [vmem:[%s1310_s9 + $0x84] ss:$8 sps:$4 sm:$0xff]   ;;  %537 = vmatprep.mubr.bf16.mxu0 %v1195_v11  ;;  %v1196_v19 = vld [vmem:[%s1310_s9 + $0x80] ss:$8 sps:$4 sm:$0xff]   ;;  %v1201_v21 = vld [vmem:[%s1310_s9 + $0x94] ss:$8 sps:$4 sm:$0xff]  }
  0x11   : > { %1044 = vmatpush3.bf16.msra.mxu0 %v1180_v3  ;;  %1162 = vmatpush3.bf16.msra.mxu1 %v1180_v3  ;;  %v1189_v14 = vld [vmem:[%s1476_s1 + $0x48] sm:$0xff]   ;;  %v1191_v16 = vld [vmem:[%s1476_s1 + $0x40] sm:$0xff]   ;;  %v1203_v22 = vld [vmem:[%s1310_s9 + $0x10] ss:$8 sps:$4 sm:$0xff]  }
  0x12   : > { %1045 = vmatprep.subr.bf16.mxu0 %v1181_v4  ;;  %1155 = vmatprep.subr.bf16.mxu1 %v1181_v4  ;;  %v1190_v15 = vld [vmem:[%s1476_s1 + $0x8] sm:$0xff]   ;;  %v1192_v17 = vld [vmem:[%s1476_s1] sm:$0xff]   ;;  %v1204_v23 = vld [vmem:[%s1310_s9 + $0x90] ss:$8 sps:$4 sm:$0xff]  }
  0x13   : > { %601 = vmatprep.mubr.bf16.mxu1 %v1198_v12  ;;  %v1205_v24 = vld [vmem:[%s1310_s9 + $0x24] ss:$8 sps:$4 sm:$0xff]   ;;  %v1209_v26 = vld [vmem:[%s1310_s9 + $0x20] ss:$8 sps:$4 sm:$0xff]   ;;  %v1211_v28 = vld [vmem:[%s1310_s9 + $0x34] ss:$8 sps:$4 sm:$0xff]  }
  0x14   : > { %v1207_v25 = vld [vmem:[%s1310_s9 + $0xa4] ss:$8 sps:$4 sm:$0xff]   ;;  %v1210_v27 = vld [vmem:[%s1310_s9 + $0xa0] ss:$8 sps:$4 sm:$0xff]   ;;  %v1213_v29 = vld [vmem:[%s1310_s9 + $0xb4] ss:$8 sps:$4 sm:$0xff]  }
  0x15   : > { %1046 = vmatpush3.bf16.msra.mxu0 %v1182_v5  ;;  %1163 = vmatpush3.bf16.msra.mxu1 %v1182_v5  ;;  %v1215_v30 = vld [vmem:[%s1310_s9 + $0x30] ss:$8 sps:$4 sm:$0xff]   ;;  %v1217_v32 = vld [vmem:[%s1310_s9 + $0x44] ss:$8 sps:$4 sm:$0xff]   ;;  %v1221_v34 = vld [vmem:[%s1310_s9 + $0x40] ss:$8 sps:$4 sm:$0xff]  }
  0x16   : > { %1047 = vmatprep.subr.bf16.mxu0 %v1183_v6  ;;  %1156 = vmatprep.subr.bf16.mxu1 %v1183_v6  ;;  %v1216_v31 = vld [vmem:[%s1310_s9 + $0xb0] ss:$8 sps:$4 sm:$0xff]   ;;  %v1219_v33 = vld [vmem:[%s1310_s9 + $0xc4] ss:$8 sps:$4 sm:$0xff]   ;;  %v1222_v35 = vld [vmem:[%s1310_s9 + $0xc0] ss:$8 sps:$4 sm:$0xff]  }
  0x17   : > { %v1223_v36 = vld [vmem:[%s1310_s9 + $0x54] ss:$8 sps:$4 sm:$0xff]   ;;  %v1227_v38 = vld [vmem:[%s1310_s9 + $0x50] ss:$8 sps:$4 sm:$0xff]   ;;  %v1229_v40 = vld [vmem:[%s1310_s9 + $0x64] ss:$8 sps:$4 sm:$0xff]  }
  0x18   : > { %v1225_v37 = vld [vmem:[%s1310_s9 + $0xd4] ss:$8 sps:$4 sm:$0xff]   ;;  %v1228_v39 = vld [vmem:[%s1310_s9 + $0xd0] ss:$8 sps:$4 sm:$0xff]   ;;  %v1231_v41 = vld [vmem:[%s1310_s9 + $0xe4] ss:$8 sps:$4 sm:$0xff]  }
  0x19   : > { %1048 = vmatpush3.bf16.msra.mxu0 %v1184_v7  ;;  %1164 = vmatpush3.bf16.msra.mxu1 %v1184_v7  ;;  %v1233_v42 = vld [vmem:[%s1310_s9 + $0x60] ss:$8 sps:$4 sm:$0xff]   ;;  %v1235_v44 = vld [vmem:[%s1310_s9 + $0x74] ss:$8 sps:$4 sm:$0xff]   ;;  %v1239_v46 = vld [vmem:[%s1310_s9 + $0x70] ss:$8 sps:$4 sm:$0xff]  }
  0x1a   : > { %1049 = vmatprep.subr.bf16.mxu0 %v1185_v8  ;;  %1157 = vmatprep.subr.bf16.mxu1 %v1185_v8  ;;  %v1234_v43 = vld [vmem:[%s1310_s9 + $0xe0] ss:$8 sps:$4 sm:$0xff]   ;;  %v1237_v45 = vld [vmem:[%s1310_s9 + $0xf4] ss:$8 sps:$4 sm:$0xff]   ;;  %v1240_v47 = vld [vmem:[%s1310_s9 + $0xf0] ss:$8 sps:$4 sm:$0xff]  }
  0x1b   : > { %v1368_v50 = vld [vmem:[%s1477_s2] ss:$0 sm:$0xff] }
  0x1d   : > { %1050 = vmatpush3.bf16.msra.mxu0 %v1186_v9  ;;  %1165 = vmatpush3.bf16.msra.mxu1 %v1186_v9 }
  0x1e   : > { %1051 = vmatprep.subr.bf16.mxu0 %v1187_v10  ;;  %1158 = vmatprep.subr.bf16.mxu1 %v1187_v10 }
  0x21   : > { %1052 = vmatpush3.bf16.msra.mxu0 %v1188_v13  ;;  %1166 = vmatpush3.bf16.msra.mxu1 %v1188_v13 }
  0x22   : > { %1053 = vmatprep.subr.bf16.mxu0 %v1189_v14  ;;  %1159 = vmatprep.subr.bf16.mxu1 %v1189_v14 }
  0x25   : > { %1054 = vmatpush3.bf16.msra.mxu0 %v1190_v15  ;;  %1167 = vmatpush3.bf16.msra.mxu1 %v1190_v15 }
  0x26   : > { %1055 = vmatprep.subr.bf16.mxu0 %v1191_v16  ;;  %1160 = vmatprep.subr.bf16.mxu1 %v1191_v16 }
  0x29   : > { %1056 = vmatpush3.bf16.msra.mxu0 %v1192_v17  ;;  %1168 = vmatpush3.bf16.msra.mxu1 %v1192_v17 }
  0x2c   : > { %538 = vmatmul.mubr.bf16.vlgmr.msra.gmra.mxu0 %v1193_v18  ;;  %602 = vmatmul.mubr.bf16.vlgmr.msra.gmra.mxu1 %v1196_v19 }
  0x2d   : > { %545 = vmatprep.mubr.bf16.mxu0 %v1199_v20  ;;  %609 = vmatprep.mubr.bf16.mxu1 %v1201_v21 }
  0x34   : > { %546 = vmatmul.mubr.bf16.gmra.mxu0 %v1203_v22  ;;  %610 = vmatmul.mubr.bf16.gmra.mxu1 %v1204_v23 }
  0x35   : > { %553 = vmatprep.mubr.bf16.mxu0 %v1205_v24  ;;  %617 = vmatprep.mubr.bf16.mxu1 %v1207_v25 }
  0x3c   : > { %554 = vmatmul.mubr.bf16.gmra.mxu0 %v1209_v26  ;;  %618 = vmatmul.mubr.bf16.gmra.mxu1 %v1210_v27 }
  0x3d   : > { %561 = vmatprep.mubr.bf16.mxu0 %v1211_v28  ;;  %625 = vmatprep.mubr.bf16.mxu1 %v1213_v29 }
  0x44   : > { %562 = vmatmul.mubr.bf16.gmra.mxu0 %v1215_v30  ;;  %626 = vmatmul.mubr.bf16.gmra.mxu1 %v1216_v31 }
  0x45   : > { %569 = vmatprep.mubr.bf16.mxu0 %v1217_v32  ;;  %633 = vmatprep.mubr.bf16.mxu1 %v1219_v33 }
  0x4c   : > { %570 = vmatmul.mubr.bf16.gmra.mxu0 %v1221_v34  ;;  %634 = vmatmul.mubr.bf16.gmra.mxu1 %v1222_v35 }
  0x4d   : > { %577 = vmatprep.mubr.bf16.mxu0 %v1223_v36  ;;  %641 = vmatprep.mubr.bf16.mxu1 %v1225_v37 }
  0x54   : > { %578 = vmatmul.mubr.bf16.gmra.mxu0 %v1227_v38  ;;  %642 = vmatmul.mubr.bf16.gmra.mxu1 %v1228_v39 }
  0x55   : > { %585 = vmatprep.mubr.bf16.mxu0 %v1229_v40  ;;  %649 = vmatprep.mubr.bf16.mxu1 %v1231_v41 }
  0x5c   : > { %586 = vmatmul.mubr.bf16.gmra.mxu0 %v1233_v42  ;;  %650 = vmatmul.mubr.bf16.gmra.mxu1 %v1234_v43 }
  0x5d   : > { %593 = vmatprep.mubr.bf16.mxu0 %v1235_v44  ;;  %657 = vmatprep.mubr.bf16.mxu1 %v1237_v45 }
  0x64   : > { %594 = vmatmul.mubr.bf16.gmra.mxu0 %v1239_v46  ;;  %658 = vmatmul.mubr.bf16.gmra.mxu1 %v1240_v47 }
  0xec   : > { %v1057_v48 = vpop.f32.mrf.mxu0  ;;  %v1105_v49 = vpop.f32.mrf.mxu1 }
  0xee   : > { %v1058_v51 = vpop.f32.mrf.mxu0  ;;  %v1106_v52 = vpop.f32.mrf.mxu1 }
  0xef   : > { %v1059_v53 = vadd.f32 %v1058_v51, %v1057_v48  ;;  %v1107_v54 = vadd.f32 %v1106_v52, %v1105_v49 }
  0xf0   : > { %v1060_v55 = vpop.f32.mrf.mxu0  ;;  %v1108_v56 = vpop.f32.mrf.mxu1 }
  0xf1   : > { %v540_v57 = vadd.f32 %v1059_v53, %v1368_v50  ;;  %v604_v58 = vadd.f32 %v1107_v54, %v1368_v50 }
  0xf2   : > { %v1061_v59 = vpop.f32.mrf.mxu0  ;;  %v1109_v60 = vpop.f32.mrf.mxu1 }
  0xf3   : > { %v666_v61 = vmax.f32 %v540_v57, 0.0  ;;  %v682_v62 = vmax.f32 %v604_v58, 0.0  ;;  %v1062_v63 = vadd.f32 %v1061_v59, %v1060_v55  ;;  %v1110_v0 = vadd.f32 %v1109_v60, %v1108_v56 }
  0xf4   : > { %v1063_v1 = vpop.f32.mrf.mxu0  ;;  %v1111_v2 = vpop.f32.mrf.mxu1 }
  0xf5   : > { %v1009_v3 = vpack.c.bf16 %v666_v61, %v666_v61  ;;  %v1025_v4 = vpack.c.bf16 %v682_v62, %v682_v62  ;;  %v543_v5 = vadd.f32 %v1062_v63, %v1368_v50  ;;  %v607_v6 = vadd.f32 %v1110_v0, %v1368_v50 }
  0xf6   : > { %v1064_v7 = vpop.f32.mrf.mxu0  ;;  %v1112_v8 = vpop.f32.mrf.mxu1 }
  0xf7   : > { %827 = vst.msk [vmem:[%s1376_s4] sm:$0xf] %vm826_vm0, %v1009_v3  ;;  %843 = vst.msk [vmem:[%s1376_s4 + $0x40] sm:$0xf] %vm826_vm0, %v1025_v4  ;;  %v667_v9 = vmax.f32 %v543_v5, 0.0  ;;  %v683_v10 = vmax.f32 %v607_v6, 0.0  ;;  %v1065_v11 = vadd.f32 %v1064_v7, %v1063_v1  ;;  %v1113_v12 = vadd.f32 %v1112_v8, %v1111_v2 }
  0xf8   : > { %v1066_v13 = vpop.f32.mrf.mxu0  ;;  %v1114_v14 = vpop.f32.mrf.mxu1 }
  0xf9   : > { %v1010_v15 = vpack.c.bf16 %v667_v9, %v667_v9  ;;  %v1026_v16 = vpack.c.bf16 %v683_v10, %v683_v10  ;;  %v548_v17 = vadd.f32 %v1065_v11, %v1368_v50  ;;  %v612_v18 = vadd.f32 %v1113_v12, %v1368_v50 }
  0xfa   : > { %v1067_v19 = vpop.f32.mrf.mxu0  ;;  %v1115_v20 = vpop.f32.mrf.mxu1 }
  0xfb   : > { %828 = vst.msk [vmem:[%s1376_s4 + $0x4] sm:$0xf] %vm826_vm0, %v1010_v15  ;;  %844 = vst.msk [vmem:[%s1376_s4 + $0x44] sm:$0xf] %vm826_vm0, %v1026_v16  ;;  %v668_v21 = vmax.f32 %v548_v17, 0.0  ;;  %v684_v22 = vmax.f32 %v612_v18, 0.0  ;;  %v1068_v23 = vadd.f32 %v1067_v19, %v1066_v13  ;;  %v1116_v24 = vadd.f32 %v1115_v20, %v1114_v14 }
  0xfc   : > { %v1069_v25 = vpop.f32.mrf.mxu0  ;;  %v1117_v26 = vpop.f32.mrf.mxu1 }
  0xfd   : > { %v1011_v27 = vpack.c.bf16 %v668_v21, %v668_v21  ;;  %v1027_v28 = vpack.c.bf16 %v684_v22, %v684_v22  ;;  %v551_v29 = vadd.f32 %v1068_v23, %v1368_v50  ;;  %v615_v30 = vadd.f32 %v1116_v24, %v1368_v50 }
  0xfe   : > { %v1070_v31 = vpop.f32.mrf.mxu0  ;;  %v1118_v32 = vpop.f32.mrf.mxu1 }
  0xff   : > { %829 = vst.msk [vmem:[%s1376_s4 + $0x8] sm:$0xf] %vm826_vm0, %v1011_v27  ;;  %845 = vst.msk [vmem:[%s1376_s4 + $0x48] sm:$0xf] %vm826_vm0, %v1027_v28  ;;  %v669_v33 = vmax.f32 %v551_v29, 0.0  ;;  %v685_v34 = vmax.f32 %v615_v30, 0.0  ;;  %v1071_v35 = vadd.f32 %v1070_v31, %v1069_v25  ;;  %v1119_v36 = vadd.f32 %v1118_v32, %v1117_v26 }
 0x100   : > { %v1072_v37 = vpop.f32.mrf.mxu0  ;;  %v1120_v38 = vpop.f32.mrf.mxu1 }
 0x101   : > { %v1012_v39 = vpack.c.bf16 %v669_v33, %v669_v33  ;;  %v1028_v40 = vpack.c.bf16 %v685_v34, %v685_v34  ;;  %v556_v41 = vadd.f32 %v1071_v35, %v1368_v50  ;;  %v620_v42 = vadd.f32 %v1119_v36, %v1368_v50 }
 0x102   : > { %v1073_v43 = vpop.f32.mrf.mxu0  ;;  %v1121_v44 = vpop.f32.mrf.mxu1 }
 0x103   : > { %830 = vst.msk [vmem:[%s1376_s4 + $0xc] sm:$0xf] %vm826_vm0, %v1012_v39  ;;  %846 = vst.msk [vmem:[%s1376_s4 + $0x4c] sm:$0xf] %vm826_vm0, %v1028_v40  ;;  %v670_v45 = vmax.f32 %v556_v41, 0.0  ;;  %v686_v46 = vmax.f32 %v620_v42, 0.0  ;;  %v1074_v47 = vadd.f32 %v1073_v43, %v1072_v37  ;;  %v1122_v48 = vadd.f32 %v1121_v44, %v1120_v38 }
 0x104   : > { %v1075_v49 = vpop.f32.mrf.mxu0  ;;  %v1123_v51 = vpop.f32.mrf.mxu1 }
 0x105   : > { %v1013_v52 = vpack.c.bf16 %v670_v45, %v670_v45  ;;  %v1029_v53 = vpack.c.bf16 %v686_v46, %v686_v46  ;;  %v559_v54 = vadd.f32 %v1074_v47, %v1368_v50  ;;  %v623_v55 = vadd.f32 %v1122_v48, %v1368_v50 }
 0x106   : > { %v1076_v56 = vpop.f32.mrf.mxu0  ;;  %v1124_v57 = vpop.f32.mrf.mxu1 }
 0x107   : > { %831 = vst.msk [vmem:[%s1376_s4 + $0x10] sm:$0xf] %vm826_vm0, %v1013_v52  ;;  %847 = vst.msk [vmem:[%s1376_s4 + $0x50] sm:$0xf] %vm826_vm0, %v1029_v53  ;;  %v671_v58 = vmax.f32 %v559_v54, 0.0  ;;  %v687_v59 = vmax.f32 %v623_v55, 0.0  ;;  %v1077_v60 = vadd.f32 %v1076_v56, %v1075_v49  ;;  %v1125_v61 = vadd.f32 %v1124_v57, %v1123_v51 }
 0x108   : > { %v1078_v62 = vpop.f32.mrf.mxu0  ;;  %v1126_v63 = vpop.f32.mrf.mxu1 }
 0x109   : > { %v1014_v0 = vpack.c.bf16 %v671_v58, %v671_v58  ;;  %v1030_v1 = vpack.c.bf16 %v687_v59, %v687_v59  ;;  %v564_v2 = vadd.f32 %v1077_v60, %v1368_v50  ;;  %v628_v3 = vadd.f32 %v1125_v61, %v1368_v50 }
 0x10a   : > { %v1079_v4 = vpop.f32.mrf.mxu0  ;;  %v1127_v5 = vpop.f32.mrf.mxu1 }
 0x10b   : > { %832 = vst.msk [vmem:[%s1376_s4 + $0x14] sm:$0xf] %vm826_vm0, %v1014_v0  ;;  %848 = vst.msk [vmem:[%s1376_s4 + $0x54] sm:$0xf] %vm826_vm0, %v1030_v1  ;;  %v672_v6 = vmax.f32 %v564_v2, 0.0  ;;  %v688_v7 = vmax.f32 %v628_v3, 0.0  ;;  %v1080_v8 = vadd.f32 %v1079_v4, %v1078_v62  ;;  %v1128_v9 = vadd.f32 %v1127_v5, %v1126_v63 }
 0x10c   : > { %v1081_v10 = vpop.f32.mrf.mxu0  ;;  %v1129_v11 = vpop.f32.mrf.mxu1 }
 0x10d   : > { %v1015_v12 = vpack.c.bf16 %v672_v6, %v672_v6  ;;  %v1031_v13 = vpack.c.bf16 %v688_v7, %v688_v7  ;;  %v567_v14 = vadd.f32 %v1080_v8, %v1368_v50  ;;  %v631_v15 = vadd.f32 %v1128_v9, %v1368_v50 }
 0x10e   : > { %v1082_v16 = vpop.f32.mrf.mxu0  ;;  %v1130_v17 = vpop.f32.mrf.mxu1 }
 0x10f   : > { %833 = vst.msk [vmem:[%s1376_s4 + $0x18] sm:$0xf] %vm826_vm0, %v1015_v12  ;;  %849 = vst.msk [vmem:[%s1376_s4 + $0x58] sm:$0xf] %vm826_vm0, %v1031_v13  ;;  %v673_v18 = vmax.f32 %v567_v14, 0.0  ;;  %v689_v19 = vmax.f32 %v631_v15, 0.0  ;;  %v1083_v20 = vadd.f32 %v1082_v16, %v1081_v10  ;;  %v1131_v21 = vadd.f32 %v1130_v17, %v1129_v11 }
 0x110   : > { %v1084_v22 = vpop.f32.mrf.mxu0  ;;  %v1132_v23 = vpop.f32.mrf.mxu1 }
 0x111   : > { %v1016_v24 = vpack.c.bf16 %v673_v18, %v673_v18  ;;  %v1032_v25 = vpack.c.bf16 %v689_v19, %v689_v19  ;;  %v572_v26 = vadd.f32 %v1083_v20, %v1368_v50  ;;  %v636_v27 = vadd.f32 %v1131_v21, %v1368_v50 }
 0x112   : > { %v1085_v28 = vpop.f32.mrf.mxu0  ;;  %v1133_v29 = vpop.f32.mrf.mxu1 }
 0x113   : > { %834 = vst.msk [vmem:[%s1376_s4 + $0x1c] sm:$0xf] %vm826_vm0, %v1016_v24  ;;  %850 = vst.msk [vmem:[%s1376_s4 + $0x5c] sm:$0xf] %vm826_vm0, %v1032_v25  ;;  %v674_v30 = vmax.f32 %v572_v26, 0.0  ;;  %v690_v31 = vmax.f32 %v636_v27, 0.0  ;;  %v1086_v32 = vadd.f32 %v1085_v28, %v1084_v22  ;;  %v1134_v33 = vadd.f32 %v1133_v29, %v1132_v23 }
 0x114   : > { %v1087_v34 = vpop.f32.mrf.mxu0  ;;  %v1135_v35 = vpop.f32.mrf.mxu1 }
 0x115   : > { %v1017_v36 = vpack.c.bf16 %v674_v30, %v674_v30  ;;  %v1033_v37 = vpack.c.bf16 %v690_v31, %v690_v31  ;;  %v575_v38 = vadd.f32 %v1086_v32, %v1368_v50  ;;  %v639_v39 = vadd.f32 %v1134_v33, %v1368_v50 }
 0x116   : > { %v1088_v40 = vpop.f32.mrf.mxu0  ;;  %v1136_v41 = vpop.f32.mrf.mxu1 }
 0x117   : > { %835 = vst.msk [vmem:[%s1376_s4 + $0x20] sm:$0xf] %vm826_vm0, %v1017_v36  ;;  %851 = vst.msk [vmem:[%s1376_s4 + $0x60] sm:$0xf] %vm826_vm0, %v1033_v37  ;;  %v675_v42 = vmax.f32 %v575_v38, 0.0  ;;  %v691_v43 = vmax.f32 %v639_v39, 0.0  ;;  %v1089_v44 = vadd.f32 %v1088_v40, %v1087_v34  ;;  %v1137_v45 = vadd.f32 %v1136_v41, %v1135_v35 }
 0x118   : > { %v1090_v46 = vpop.f32.mrf.mxu0  ;;  %v1138_v47 = vpop.f32.mrf.mxu1 }
 0x119   : > { %v1018_v48 = vpack.c.bf16 %v675_v42, %v675_v42  ;;  %v1034_v49 = vpack.c.bf16 %v691_v43, %v691_v43  ;;  %v580_v51 = vadd.f32 %v1089_v44, %v1368_v50  ;;  %v644_v52 = vadd.f32 %v1137_v45, %v1368_v50 }
 0x11a   : > { %v1091_v53 = vpop.f32.mrf.mxu0  ;;  %v1139_v54 = vpop.f32.mrf.mxu1 }
 0x11b   : > { %836 = vst.msk [vmem:[%s1376_s4 + $0x24] sm:$0xf] %vm826_vm0, %v1018_v48  ;;  %852 = vst.msk [vmem:[%s1376_s4 + $0x64] sm:$0xf] %vm826_vm0, %v1034_v49  ;;  %v676_v55 = vmax.f32 %v580_v51, 0.0  ;;  %v692_v56 = vmax.f32 %v644_v52, 0.0  ;;  %v1092_v57 = vadd.f32 %v1091_v53, %v1090_v46  ;;  %v1140_v58 = vadd.f32 %v1139_v54, %v1138_v47 }
 0x11c   : > { %v1093_v59 = vpop.f32.mrf.mxu0  ;;  %v1141_v60 = vpop.f32.mrf.mxu1 }
 0x11d   : > { %v1019_v61 = vpack.c.bf16 %v676_v55, %v676_v55  ;;  %v1035_v62 = vpack.c.bf16 %v692_v56, %v692_v56  ;;  %v583_v63 = vadd.f32 %v1092_v57, %v1368_v50  ;;  %v647_v0 = vadd.f32 %v1140_v58, %v1368_v50 }
 0x11e   : > { %v1094_v1 = vpop.f32.mrf.mxu0  ;;  %v1142_v2 = vpop.f32.mrf.mxu1 }
 0x11f   : > { %837 = vst.msk [vmem:[%s1376_s4 + $0x28] sm:$0xf] %vm826_vm0, %v1019_v61  ;;  %853 = vst.msk [vmem:[%s1376_s4 + $0x68] sm:$0xf] %vm826_vm0, %v1035_v62  ;;  %v677_v3 = vmax.f32 %v583_v63, 0.0  ;;  %v693_v4 = vmax.f32 %v647_v0, 0.0  ;;  %v1095_v5 = vadd.f32 %v1094_v1, %v1093_v59  ;;  %v1143_v6 = vadd.f32 %v1142_v2, %v1141_v60 }
 0x120   : > { %v1096_v7 = vpop.f32.mrf.mxu0  ;;  %v1144_v8 = vpop.f32.mrf.mxu1 }
 0x121   : > { %v1020_v9 = vpack.c.bf16 %v677_v3, %v677_v3  ;;  %v1036_v10 = vpack.c.bf16 %v693_v4, %v693_v4  ;;  %v588_v11 = vadd.f32 %v1095_v5, %v1368_v50  ;;  %v652_v12 = vadd.f32 %v1143_v6, %v1368_v50 }
 0x122   : > { %v1097_v13 = vpop.f32.mrf.mxu0  ;;  %v1145_v14 = vpop.f32.mrf.mxu1 }
 0x123   : > { %838 = vst.msk [vmem:[%s1376_s4 + $0x2c] sm:$0xf] %vm826_vm0, %v1020_v9  ;;  %854 = vst.msk [vmem:[%s1376_s4 + $0x6c] sm:$0xf] %vm826_vm0, %v1036_v10  ;;  %v678_v15 = vmax.f32 %v588_v11, 0.0  ;;  %v694_v16 = vmax.f32 %v652_v12, 0.0  ;;  %v1098_v17 = vadd.f32 %v1097_v13, %v1096_v7  ;;  %v1146_v18 = vadd.f32 %v1145_v14, %v1144_v8 }
 0x124   : > { %v1099_v19 = vpop.f32.mrf.mxu0  ;;  %v1147_v20 = vpop.f32.mrf.mxu1 }
 0x125   : > { %v1021_v21 = vpack.c.bf16 %v678_v15, %v678_v15  ;;  %v1037_v22 = vpack.c.bf16 %v694_v16, %v694_v16  ;;  %v591_v23 = vadd.f32 %v1098_v17, %v1368_v50  ;;  %v655_v24 = vadd.f32 %v1146_v18, %v1368_v50 }
 0x126   : > { %v1100_v25 = vpop.f32.mrf.mxu0  ;;  %v1148_v26 = vpop.f32.mrf.mxu1 }
 0x127   : > { %839 = vst.msk [vmem:[%s1376_s4 + $0x30] sm:$0xf] %vm826_vm0, %v1021_v21  ;;  %855 = vst.msk [vmem:[%s1376_s4 + $0x70] sm:$0xf] %vm826_vm0, %v1037_v22  ;;  %v679_v27 = vmax.f32 %v591_v23, 0.0  ;;  %v695_v28 = vmax.f32 %v655_v24, 0.0  ;;  %v1101_v29 = vadd.f32 %v1100_v25, %v1099_v19  ;;  %v1149_v30 = vadd.f32 %v1148_v26, %v1147_v20 }
 0x128   : > { %v1102_v31 = vpop.f32.mrf.mxu0  ;;  %v1150_v32 = vpop.f32.mrf.mxu1 }
 0x129   : > { %v1022_v33 = vpack.c.bf16 %v679_v27, %v679_v27  ;;  %v1038_v34 = vpack.c.bf16 %v695_v28, %v695_v28  ;;  %v596_v35 = vadd.f32 %v1101_v29, %v1368_v50  ;;  %v660_v36 = vadd.f32 %v1149_v30, %v1368_v50 }
 0x12a   : > { %v1103_v37 = vpop.f32.mrf.mxu0  ;;  %v1151_v38 = vpop.f32.mrf.mxu1 }
 0x12b   : > { %840 = vst.msk [vmem:[%s1376_s4 + $0x34] sm:$0xf] %vm826_vm0, %v1022_v33  ;;  %856 = vst.msk [vmem:[%s1376_s4 + $0x74] sm:$0xf] %vm826_vm0, %v1038_v34  ;;  %v680_v39 = vmax.f32 %v596_v35, 0.0  ;;  %v696_v40 = vmax.f32 %v660_v36, 0.0  ;;  %v1104_v41 = vadd.f32 %v1103_v37, %v1102_v31  ;;  %v1152_v42 = vadd.f32 %v1151_v38, %v1150_v32 }
 0x12d   : > { %v1023_v43 = vpack.c.bf16 %v680_v39, %v680_v39  ;;  %v1039_v44 = vpack.c.bf16 %v696_v40, %v696_v40  ;;  %v599_v45 = vadd.f32 %v1104_v41, %v1368_v50  ;;  %v663_v46 = vadd.f32 %v1152_v42, %v1368_v50 }
 0x12f   : > { %841 = vst.msk [vmem:[%s1376_s4 + $0x38] sm:$0xf] %vm826_vm0, %v1023_v43  ;;  %857 = vst.msk [vmem:[%s1376_s4 + $0x78] sm:$0xf] %vm826_vm0, %v1039_v44  ;;  %v681_v47 = vmax.f32 %v599_v45, 0.0  ;;  %v697_v48 = vmax.f32 %v663_v46, 0.0 }
 0x131   : > { %v1024_v49 = vpack.c.bf16 %v681_v47, %v681_v47  ;;  %v1040_v51 = vpack.c.bf16 %v697_v48, %v697_v48 }
 0x133   : > { %842 = vst.msk [vmem:[%s1376_s4 + $0x3c] sm:$0xf] %vm826_vm0, %v1024_v49  ;;  %858 = vst.msk [vmem:[%s1376_s4 + $0x7c] sm:$0xf] %vm826_vm0, %v1040_v51 }
 0x134 PF: > { %s13_s12 = sadd.s32 1, %s1247_s12  }
 0x135   : > { %p10_p4 = scmp.ge.s32.totalorder %s13_s12, 4  }
 0x137   :  { %12 = sbr.rel (!%p10_p4) target bundleno = 1 (0x1), region = 62 }

// kernel: _lambda_.8
= control target key start
LH: loop header
LB: loop body
LE: loop exit
PB: predicated region body
PF: predicated region fallthrough
CT: control target
= control target key end

     0   :  { %s705_s12 = smov 0   ;;  %s805_s0 = inlined_call_operand.vmem [shape: bf16[128,256], index: 0, kind: input, shape index: {}]   ;;  %s806_s1 = inlined_call_operand.vmem [shape: bf16[256,128], index: 1, kind: input, shape index: {}]   ;;  %s807_s2 = inlined_call_operand.vmem [shape: f32[1,128], index: 2, kind: input, shape index: {}]   ;;  %s808_s3 = inlined_call_operand.vmem [shape: bf16[128,32], index: 3, kind: output, shape index: {}]  }
   0x1 LB: > { %s531_s13 = sadd.s32 4294967295, %s683_s12   ;;  %p535_p0 = scmp.ge.s32.totalorder %s683_s12, 1  ;;  %s683_s12 = sphi %s705_s12, %s13_s12  }
   0x2   : > { %p139_p1 = scmp.lt.s32.totalorder %s683_s12, 3 }
   0x4   : > { %p140_p2 = pnand %p535_p0, %p139_p1 }
   0x5   : > { %s536_s16 = sshll.u32 (!%p140_p2), %s531_s13, 3 }
   0x6   : > { %143 = sbr.rel (%p140_p2) target bundleno = 260 (0x104), region = 32  ;;  %p165_p3 = scmp.lt.s32.totalorder (!%p140_p2), %s536_s16, 15 }
   0xb   : > { %v649_v0 = vld [vmem:[%s806_s1 + $0x78] sm:$0xff]   ;;  %v651_v2 = vld [vmem:[%s806_s1 + $0x70] sm:$0xff]   ;;  %v653_v4 = vld [vmem:[%s806_s1 + $0x68] sm:$0xff]   ;;  %s810_s16 = smov (!%p165_p3, %s536_s16), 15  ;;  %vm466_vm0 = vcmask 257024  }
   0xc   : > { %v650_v1 = vld [vmem:[%s806_s1 + $0x38] sm:$0xff]   ;;  %585 = vmatprep.subr.bf16.mxu0 %v649_v0  ;;  %625 = vmatprep.subr.bf16.mxu1 %v649_v0  ;;  %v652_v3 = vld [vmem:[%s806_s1 + $0x30] sm:$0xff]   ;;  %v654_v5 = vld [vmem:[%s806_s1 + $0x28] sm:$0xff]   ;;  %s576_s4 = sshll.u32 %s810_s16, 3  ;;  %s540_s28 = sshll.u32 %s810_s16, 2 }
   0xd   : > { %586 = vmatpush3.bf16.msra.mxu0 %v650_v1  ;;  %633 = vmatpush3.bf16.msra.mxu1 %v650_v1  ;;  %v655_v6 = vld [vmem:[%s806_s1 + $0x60] sm:$0xff]   ;;  %v657_v8 = vld [vmem:[%s806_s1 + $0x58] sm:$0xff]   ;;  %s746_s9 = scalar_lea.vmem %s805_s0, %s576_s4  ;;  %v659_v10 = vld [vmem:[%s806_s1 + $0x50] sm:$0xff]   ;;  %s784_s4 = scalar_lea.vmem %s808_s3, %s540_s28 }
   0xe   : > { %587 = vmatprep.subr.bf16.mxu0 %v651_v2  ;;  %626 = vmatprep.subr.bf16.mxu1 %v651_v2  ;;  %v656_v7 = vld [vmem:[%s806_s1 + $0x20] sm:$0xff]   ;;  %v658_v9 = vld [vmem:[%s806_s1 + $0x18] sm:$0xff]   ;;  %v660_v13 = vld [vmem:[%s806_s1 + $0x10] sm:$0xff]  }
   0xf   : > { %v667_v11 = vld [vmem:[%s746_s9 + $0x4] ss:$8 sps:$4 sm:$0xff]   ;;  %v665_v18 = vld [vmem:[%s746_s9] ss:$8 sps:$4 sm:$0xff]   ;;  %v671_v20 = vld [vmem:[%s746_s9 + $0x14] ss:$8 sps:$4 sm:$0xff]  }
  0x10   : > { %v670_v12 = vld [vmem:[%s746_s9 + $0x24] ss:$8 sps:$4 sm:$0xff]   ;;  %393 = vmatprep.mubr.bf16.mxu0 %v667_v11  ;;  %v668_v19 = vld [vmem:[%s746_s9 + $0x20] ss:$8 sps:$4 sm:$0xff]   ;;  %v673_v21 = vld [vmem:[%s746_s9 + $0x34] ss:$8 sps:$4 sm:$0xff]  }
  0x11   : > { %588 = vmatpush3.bf16.msra.mxu0 %v652_v3  ;;  %634 = vmatpush3.bf16.msra.mxu1 %v652_v3  ;;  %v661_v14 = vld [vmem:[%s806_s1 + $0x48] sm:$0xff]   ;;  %v663_v16 = vld [vmem:[%s806_s1 + $0x40] sm:$0xff]   ;;  %v675_v22 = vld [vmem:[%s746_s9 + $0x10] ss:$8 sps:$4 sm:$0xff]  }
  0x12   : > { %589 = vmatprep.subr.bf16.mxu0 %v653_v4  ;;  %627 = vmatprep.subr.bf16.mxu1 %v653_v4  ;;  %v662_v15 = vld [vmem:[%s806_s1 + $0x8] sm:$0xff]   ;;  %v664_v17 = vld [vmem:[%s806_s1] sm:$0xff]   ;;  %v676_v23 = vld [vmem:[%s746_s9 + $0x30] ss:$8 sps:$4 sm:$0xff]  }
  0x13   : > { %409 = vmatprep.mubr.bf16.mxu1 %v670_v12  ;;  %v541_v26 = vld [vmem:[%s807_s2] ss:$0 sm:$0xff] }
  0x15   : > { %590 = vmatpush3.bf16.msra.mxu0 %v654_v5  ;;  %635 = vmatpush3.bf16.msra.mxu1 %v654_v5 }
  0x16   : > { %591 = vmatprep.subr.bf16.mxu0 %v655_v6  ;;  %628 = vmatprep.subr.bf16.mxu1 %v655_v6 }
  0x19   : > { %592 = vmatpush3.bf16.msra.mxu0 %v656_v7  ;;  %636 = vmatpush3.bf16.msra.mxu1 %v656_v7 }
  0x1a   : > { %593 = vmatprep.subr.bf16.mxu0 %v657_v8  ;;  %629 = vmatprep.subr.bf16.mxu1 %v657_v8 }
  0x1d   : > { %594 = vmatpush3.bf16.msra.mxu0 %v658_v9  ;;  %637 = vmatpush3.bf16.msra.mxu1 %v658_v9 }
  0x1e   : > { %595 = vmatprep.subr.bf16.mxu0 %v659_v10  ;;  %630 = vmatprep.subr.bf16.mxu1 %v659_v10 }
  0x21   : > { %596 = vmatpush3.bf16.msra.mxu0 %v660_v13  ;;  %638 = vmatpush3.bf16.msra.mxu1 %v660_v13 }
  0x22   : > { %597 = vmatprep.subr.bf16.mxu0 %v661_v14  ;;  %631 = vmatprep.subr.bf16.mxu1 %v661_v14 }
  0x25   : > { %598 = vmatpush3.bf16.msra.mxu0 %v662_v15  ;;  %639 = vmatpush3.bf16.msra.mxu1 %v662_v15 }
  0x26   : > { %599 = vmatprep.subr.bf16.mxu0 %v663_v16  ;;  %632 = vmatprep.subr.bf16.mxu1 %v663_v16 }
  0x29   : > { %600 = vmatpush3.bf16.msra.mxu0 %v664_v17  ;;  %640 = vmatpush3.bf16.msra.mxu1 %v664_v17 }
  0x2c   : > { %394 = vmatmul.mubr.bf16.vlgmr.msra.gmra.mxu0 %v665_v18  ;;  %410 = vmatmul.mubr.bf16.vlgmr.msra.gmra.mxu1 %v668_v19 }
  0x2d   : > { %401 = vmatprep.mubr.bf16.mxu0 %v671_v20  ;;  %417 = vmatprep.mubr.bf16.mxu1 %v673_v21 }
  0x34   : > { %402 = vmatmul.mubr.bf16.gmra.mxu0 %v675_v22  ;;  %418 = vmatmul.mubr.bf16.gmra.mxu1 %v676_v23 }
  0xec   : > { %v601_v24 = vpop.f32.mrf.mxu0  ;;  %v613_v25 = vpop.f32.mrf.mxu1 }
  0xee   : > { %v602_v27 = vpop.f32.mrf.mxu0  ;;  %v614_v28 = vpop.f32.mrf.mxu1 }
  0xef   : > { %v603_v29 = vadd.f32 %v602_v27, %v601_v24  ;;  %v615_v30 = vadd.f32 %v614_v28, %v613_v25 }
  0xf0   : > { %v604_v31 = vpop.f32.mrf.mxu0  ;;  %v616_v32 = vpop.f32.mrf.mxu1 }
  0xf1   : > { %v396_v33 = vadd.f32 %v603_v29, %v541_v26  ;;  %v412_v34 = vadd.f32 %v615_v30, %v541_v26 }
  0xf2   : > { %v605_v35 = vpop.f32.mrf.mxu0  ;;  %v617_v36 = vpop.f32.mrf.mxu1 }
  0xf3   : > { %v426_v37 = vmax.f32 %v396_v33, 0.0  ;;  %v430_v38 = vmax.f32 %v412_v34, 0.0  ;;  %v606_v39 = vadd.f32 %v605_v35, %v604_v31  ;;  %v618_v40 = vadd.f32 %v617_v36, %v616_v32 }
  0xf4   : > { %v607_v41 = vpop.f32.mrf.mxu0  ;;  %v619_v42 = vpop.f32.mrf.mxu1 }
  0xf5   : > { %v577_v43 = vpack.c.bf16 %v426_v37, %v426_v37  ;;  %v581_v44 = vpack.c.bf16 %v430_v38, %v430_v38  ;;  %v399_v45 = vadd.f32 %v606_v39, %v541_v26  ;;  %v415_v46 = vadd.f32 %v618_v40, %v541_v26 }
  0xf6   : > { %v608_v47 = vpop.f32.mrf.mxu0  ;;  %v620_v48 = vpop.f32.mrf.mxu1 }
  0xf7   : > { %467 = vst.msk [vmem:[%s784_s4] sm:$0xf] %vm466_vm0, %v577_v43  ;;  %471 = vst.msk [vmem:[%s784_s4 + $0x10] sm:$0xf] %vm466_vm0, %v581_v44  ;;  %v427_v49 = vmax.f32 %v399_v45, 0.0  ;;  %v431_v50 = vmax.f32 %v415_v46, 0.0  ;;  %v609_v51 = vadd.f32 %v608_v47, %v607_v41  ;;  %v621_v52 = vadd.f32 %v620_v48, %v619_v42 }
  0xf8   : > { %v610_v53 = vpop.f32.mrf.mxu0  ;;  %v622_v54 = vpop.f32.mrf.mxu1 }
  0xf9   : > { %v578_v55 = vpack.c.bf16 %v427_v49, %v427_v49  ;;  %v582_v56 = vpack.c.bf16 %v431_v50, %v431_v50  ;;  %v404_v57 = vadd.f32 %v609_v51, %v541_v26  ;;  %v420_v58 = vadd.f32 %v621_v52, %v541_v26 }
  0xfa   : > { %v611_v59 = vpop.f32.mrf.mxu0  ;;  %v623_v60 = vpop.f32.mrf.mxu1 }
  0xfb   : > { %468 = vst.msk [vmem:[%s784_s4 + $0x4] sm:$0xf] %vm466_vm0, %v578_v55  ;;  %472 = vst.msk [vmem:[%s784_s4 + $0x14] sm:$0xf] %vm466_vm0, %v582_v56  ;;  %v428_v61 = vmax.f32 %v404_v57, 0.0  ;;  %v432_v62 = vmax.f32 %v420_v58, 0.0  ;;  %v612_v63 = vadd.f32 %v611_v59, %v610_v53  ;;  %v624_v0 = vadd.f32 %v623_v60, %v622_v54 }
  0xfd   : > { %v579_v1 = vpack.c.bf16 %v428_v61, %v428_v61  ;;  %v583_v2 = vpack.c.bf16 %v432_v62, %v432_v62  ;;  %v407_v3 = vadd.f32 %v612_v63, %v541_v26  ;;  %v423_v4 = vadd.f32 %v624_v0, %v541_v26 }
  0xff   : > { %469 = vst.msk [vmem:[%s784_s4 + $0x8] sm:$0xf] %vm466_vm0, %v579_v1  ;;  %473 = vst.msk [vmem:[%s784_s4 + $0x18] sm:$0xf] %vm466_vm0, %v583_v2  ;;  %v429_v5 = vmax.f32 %v407_v3, 0.0  ;;  %v433_v6 = vmax.f32 %v423_v4, 0.0 }
 0x101   : > { %v580_v7 = vpack.c.bf16 %v429_v5, %v429_v5  ;;  %v584_v8 = vpack.c.bf16 %v433_v6, %v433_v6 }
 0x103   : > { %470 = vst.msk [vmem:[%s784_s4 + $0xc] sm:$0xf] %vm466_vm0, %v580_v7  ;;  %474 = vst.msk [vmem:[%s784_s4 + $0x1c] sm:$0xf] %vm466_vm0, %v584_v8 }
 0x104 PF: > { %s13_s12 = sadd.s32 1, %s683_s12  }
 0x105   : > { %p10_p4 = scmp.ge.s32.totalorder %s13_s12, 4  }
 0x107   :  { %12 = sbr.rel (!%p10_p4) target bundleno = 1 (0x1), region = 62 }

// kernel: _lambda_.9
= control target key start
LH: loop header
LB: loop body
LE: loop exit
PB: predicated region body
PF: predicated region fallthrough
CT: control target
= control target key end

     0   :  { %s711_s12 = smov 0   ;;  %s807_s0 = inlined_call_operand.vmem [shape: bf16[32,384], index: 0, kind: input, shape index: {}]   ;;  %s808_s1 = inlined_call_operand.vmem [shape: bf16[384,128], index: 1, kind: input, shape index: {}]   ;;  %s809_s2 = inlined_call_operand.vmem [shape: f32[1,128], index: 2, kind: input, shape index: {}]   ;;  %s810_s3 = inlined_call_operand.vmem [shape: bf16[32,64], index: 3, kind: output, shape index: {}]  }
   0x1 LB: > { %s548_s13 = sadd.s32 4294967295, %s687_s12   ;;  %p552_p0 = scmp.ge.s32.totalorder %s687_s12, 1  ;;  %s687_s12 = sphi %s711_s12, %s13_s12  }
   0x2   : > { %p139_p1 = scmp.lt.s32.totalorder %s687_s12, 3 }
   0x4   : > { %p140_p2 = pnand %p552_p0, %p139_p1 }
   0x5   : > { %s553_s30 = sshll.u32 (!%p140_p2), %s548_s13, 1 }
   0x6   : > { %143 = sbr.rel (%p140_p2) target bundleno = 254 (0xfe), region = 32  ;;  %p165_p3 = scmp.lt.s32.totalorder (!%p140_p2), %s553_s30, 3 }
   0xb   : > { %v653_v0 = vld [vmem:[%s808_s1 + $0x78] sm:$0xff]   ;;  %v689_v1 = vmov 0.0   ;;  %v656_v4 = vld [vmem:[%s808_s1 + $0x70] sm:$0xff]   ;;  %vm690_vm0 = vmmov 0   ;;  %v659_v7 = vld [vmem:[%s808_s1 + $0x68] sm:$0xff]   ;;  %s812_s30 = smov (!%p165_p3, %s553_s30), 3 }
   0xc   : > { %622 = vmatprep.subr.bf16.mxu1 %v689_v1  ;;  %v654_v2 = vld [vmem:[%s808_s1 + $0x38] sm:$0xff]   ;;  %591 = vmatprep.subr.bf16.mxu0 %v653_v0  ;;  %v657_v5 = vld [vmem:[%s808_s1 + $0x30] sm:$0xff]   ;;  %v660_v8 = vld [vmem:[%s808_s1 + $0x28] sm:$0xff]   ;;  %s642_s23 = smul.u32 12, %s812_s30  ;;  %s556_s18 = sshll.u32 %s812_s30, 2  ;;  %vm489_vm1 = vcmask 519168  }
   0xd   : > { %v655_v3 = vld [vmem:[%s808_s1 + $0xb8] sm:$0xff]   ;;  %592 = vmatpush3.bf16.msra.mxu0 %v654_v2  ;;  %638 = vmatprep.mubr.msk.bf16.mxu1 %vm690_vm0, %v689_v1  ;;  %v658_v6 = vld [vmem:[%s808_s1 + $0xb0] sm:$0xff]   ;;  %v661_v9 = vld [vmem:[%s808_s1 + $0xa8] sm:$0xff]   ;;  %s175_s21 = scalar_lea.vmem %s810_s3, %s556_s18 }
   0xe   : > { %623 = vmatpush3.bf16.msra.mxu1 %v655_v3  ;;  %593 = vmatprep.subr.bf16.mxu0 %v656_v4  ;;  %v662_v10 = vld [vmem:[%s808_s1 + $0x60] sm:$0xff]   ;;  %v665_v13 = vld [vmem:[%s808_s1 + $0x58] sm:$0xff]   ;;  %v668_v16 = vld [vmem:[%s808_s1 + $0x50] sm:$0xff]   ;;  %s169_s6 = scalar_lea.vmem %s807_s0, %s642_s23 }
   0xf   : > { %624 = vmatprep.subr.bf16.mxu1 %v689_v1  ;;  %v663_v11 = vld [vmem:[%s808_s1 + $0x20] sm:$0xff]   ;;  %v666_v14 = vld [vmem:[%s808_s1 + $0x18] sm:$0xff]   ;;  %v669_v17 = vld [vmem:[%s808_s1 + $0x10] sm:$0xff]  }
  0x10   : > { %v664_v12 = vld [vmem:[%s808_s1 + $0xa0] sm:$0xff]   ;;  %v667_v15 = vld [vmem:[%s808_s1 + $0x98] sm:$0xff]   ;;  %v670_v18 = vld [vmem:[%s808_s1 + $0x90] sm:$0xff]  }
  0x11   : > { %594 = vmatpush3.bf16.msra.mxu0 %v657_v5  ;;  %v671_v19 = vld [vmem:[%s808_s1 + $0x48] sm:$0xff]   ;;  %v674_v22 = vld [vmem:[%s808_s1 + $0x40] sm:$0xff]  }
  0x12   : > { %625 = vmatpush3.bf16.msra.mxu1 %v658_v6  ;;  %595 = vmatprep.subr.bf16.mxu0 %v659_v7  ;;  %v672_v20 = vld [vmem:[%s808_s1 + $0x8] sm:$0xff]   ;;  %v679_v23 = vld [vmem:[%s169_s6 + $0x4] ss:$12 sps:$4 sm:$0xff]   ;;  %v557_v30 = vld [vmem:[%s809_s2] ss:$0 sm:$0xff] }
  0x13   : > { %626 = vmatprep.subr.bf16.mxu1 %v689_v1  ;;  %v673_v21 = vld [vmem:[%s808_s1 + $0x88] sm:$0xff]   ;;  %v675_v24 = vld [vmem:[%s808_s1] sm:$0xff]   ;;  %429 = vmatprep.mubr.bf16.mxu0 %v679_v23 }
  0x14   : > { %v676_v25 = vld [vmem:[%s808_s1 + $0x80] sm:$0xff]   ;;  %v680_v27 = vld [vmem:[%s169_s6 + $0x8] ss:$12 sps:$4 sm:$0xff]  }
  0x15   : > { %596 = vmatpush3.bf16.msra.mxu0 %v660_v8  ;;  %v677_v26 = vld [vmem:[%s169_s6] ss:$12 sps:$4 sm:$0xff]  }
  0x16   : > { %627 = vmatpush3.bf16.msra.mxu1 %v661_v9  ;;  %597 = vmatprep.subr.bf16.mxu0 %v662_v10 }
  0x17   : > { %628 = vmatprep.subr.bf16.mxu1 %v689_v1 }
  0x19   : > { %598 = vmatpush3.bf16.msra.mxu0 %v663_v11 }
  0x1a   : > { %629 = vmatpush3.bf16.msra.mxu1 %v664_v12  ;;  %599 = vmatprep.subr.bf16.mxu0 %v665_v13 }
  0x1b   : > { %630 = vmatprep.subr.bf16.mxu1 %v689_v1 }
  0x1d   : > { %600 = vmatpush3.bf16.msra.mxu0 %v666_v14 }
  0x1e   : > { %631 = vmatpush3.bf16.msra.mxu1 %v667_v15  ;;  %601 = vmatprep.subr.bf16.mxu0 %v668_v16 }
  0x1f   : > { %632 = vmatprep.subr.bf16.mxu1 %v689_v1 }
  0x21   : > { %602 = vmatpush3.bf16.msra.mxu0 %v669_v17 }
  0x22   : > { %633 = vmatpush3.bf16.msra.mxu1 %v670_v18  ;;  %603 = vmatprep.subr.bf16.mxu0 %v671_v19 }
  0x23   : > { %634 = vmatprep.subr.bf16.mxu1 %v689_v1 }
  0x25   : > { %604 = vmatpush3.bf16.msra.mxu0 %v672_v20 }
  0x26   : > { %635 = vmatpush3.bf16.msra.mxu1 %v673_v21  ;;  %605 = vmatprep.subr.bf16.mxu0 %v674_v22 }
  0x27   : > { %636 = vmatprep.subr.bf16.mxu1 %v689_v1 }
  0x29   : > { %606 = vmatpush3.bf16.msra.mxu0 %v675_v24 }
  0x2a   : > { %637 = vmatpush3.bf16.msra.mxu1 %v676_v25 }
  0x2c   : > { %430 = vmatmul.mubr.bf16.vlgmr.msra.gmra.mxu0 %v677_v26 }
  0x2d   : > { %639 = vmatmul.mubr.bf16.vlgmr.msra.gmra.mxu1 %v680_v27 }
  0xec   : > { %v607_v28 = vpop.f32.mrf.mxu0 }
  0xed   : > { %v472_v29 = vpop.f32.mrf.mxu1 }
  0xee   : > { %v608_v31 = vpop.f32.mrf.mxu0 }
  0xef   : > { %v609_v32 = vadd.f32 %v608_v31, %v607_v28  ;;  %v640_v33 = vpop.f32.mrf.mxu1 }
  0xf0   : > { %v610_v34 = vpop.f32.mrf.mxu0 }
  0xf1   : > { %v432_v35 = vadd.f32 %v609_v32, %v557_v30  ;;  %v475_v36 = vpop.f32.mrf.mxu1 }
  0xf2   : > { %v611_v37 = vpop.f32.mrf.mxu0 }
  0xf3   : > { %v473_v38 = vadd.f32 %v472_v29, %v432_v35  ;;  %v612_v39 = vadd.f32 %v611_v37, %v610_v34  ;;  %v641_v40 = vpop.f32.mrf.mxu1 }
  0xf5   : > { %v479_v41 = vmax.f32 %v473_v38, 0.0  ;;  %v435_v42 = vadd.f32 %v612_v39, %v557_v30 }
  0xf7   : > { %v589_v43 = vpack.c.bf16 %v479_v41, %v479_v41  ;;  %v476_v44 = vadd.f32 %v475_v36, %v435_v42 }
  0xf9   : > { %490 = vst.msk [vmem:[%s175_s21] sm:$0xf] %vm489_vm1, %v589_v43  ;;  %v480_v45 = vmax.f32 %v476_v44, 0.0 }
  0xfb   : > { %v590_v46 = vpack.c.bf16 %v480_v45, %v480_v45 }
  0xfd   : > { %491 = vst.msk [vmem:[%s175_s21 + $0x4] sm:$0xf] %vm489_vm1, %v590_v46 }
  0xfe PF: > { %s13_s12 = sadd.s32 1, %s687_s12  }
  0xff   : > { %p10_p4 = scmp.ge.s32.totalorder %s13_s12, 4  }
 0x101   :  { %12 = sbr.rel (!%p10_p4) target bundleno = 1 (0x1), region = 62 }

// kernel: _lambda_.11
= control target key start
LH: loop header
LB: loop body
LE: loop exit
PB: predicated region body
PF: predicated region fallthrough
CT: control target
= control target key end

     0   :  { %s552_s12 = smov 0   ;;  %s624_s0 = inlined_call_operand.vmem [shape: bf16[32,256], index: 0, kind: input, shape index: {}]   ;;  %s625_s1 = inlined_call_operand.vmem [shape: bf16[256,128], index: 1, kind: input, shape index: {}]   ;;  %s626_s2 = inlined_call_operand.vmem [shape: f32[1,128], index: 2, kind: input, shape index: {}]   ;;  %s627_s3 = inlined_call_operand.vmem [shape: bf16[32,128], index: 3, kind: output, shape index: {}]  }
   0x1 LB: > { %s434_s13 = sadd.s32 4294967295, %s530_s12   ;;  %p438_p0 = scmp.ge.s32.totalorder %s530_s12, 1  ;;  %s530_s12 = sphi %s552_s12, %s13_s12  }
   0x2   : > { %p139_p1 = scmp.lt.s32.totalorder %s530_s12, 3 }
   0x4   : > { %p140_p2 = pnand %p438_p0, %p139_p1 }
   0x5   : > { %s439_s16 = sshll.u32 (!%p140_p2), %s434_s13, 1 }
   0x6   : > { %143 = sbr.rel (%p140_p2) target bundleno = 252 (0xfc), region = 32  ;;  %p165_p3 = scmp.lt.s32.totalorder (!%p140_p2), %s439_s16, 3 }
   0xb   : > { %v505_v0 = vld [vmem:[%s625_s1 + $0x78] sm:$0xff]   ;;  %v507_v2 = vld [vmem:[%s625_s1 + $0x70] sm:$0xff]   ;;  %v509_v4 = vld [vmem:[%s625_s1 + $0x68] sm:$0xff]   ;;  %s629_s16 = smov (!%p165_p3, %s439_s16), 3 }
   0xc   : > { %v506_v1 = vld [vmem:[%s625_s1 + $0x38] sm:$0xff]   ;;  %475 = vmatprep.subr.bf16.mxu0 %v505_v0  ;;  %v508_v3 = vld [vmem:[%s625_s1 + $0x30] sm:$0xff]   ;;  %v510_v5 = vld [vmem:[%s625_s1 + $0x28] sm:$0xff]   ;;  %s467_s4 = sshll.u32 %s629_s16, 3  ;;  %s443_s28 = sshll.u32 %s629_s16, 2 }
   0xd   : > { %476 = vmatpush3.bf16.msra.mxu0 %v506_v1  ;;  %v511_v6 = vld [vmem:[%s625_s1 + $0x60] sm:$0xff]   ;;  %v513_v8 = vld [vmem:[%s625_s1 + $0x58] sm:$0xff]   ;;  %s169_s9 = scalar_lea.vmem %s624_s0, %s467_s4  ;;  %v515_v10 = vld [vmem:[%s625_s1 + $0x50] sm:$0xff]   ;;  %s175_s4 = scalar_lea.vmem %s627_s3, %s443_s28 }
   0xe   : > { %477 = vmatprep.subr.bf16.mxu0 %v507_v2  ;;  %v512_v7 = vld [vmem:[%s625_s1 + $0x20] sm:$0xff]   ;;  %v514_v9 = vld [vmem:[%s625_s1 + $0x18] sm:$0xff]   ;;  %v516_v12 = vld [vmem:[%s625_s1 + $0x10] sm:$0xff]  }
   0xf   : > { %v523_v11 = vld [vmem:[%s169_s9 + $0x4] ss:$8 sps:$4 sm:$0xff]   ;;  %v521_v17 = vld [vmem:[%s169_s9] ss:$8 sps:$4 sm:$0xff]  }
  0x10   : > { %357 = vmatprep.mubr.bf16.mxu0 %v523_v11  ;;  %v517_v13 = vld [vmem:[%s625_s1 + $0x48] sm:$0xff]   ;;  %v519_v15 = vld [vmem:[%s625_s1 + $0x40] sm:$0xff]  }
  0x11   : > { %478 = vmatpush3.bf16.msra.mxu0 %v508_v3  ;;  %v518_v14 = vld [vmem:[%s625_s1 + $0x8] sm:$0xff]   ;;  %v520_v16 = vld [vmem:[%s625_s1] sm:$0xff]  }
  0x12   : > { %479 = vmatprep.subr.bf16.mxu0 %v509_v4  ;;  %v444_v21 = vld [vmem:[%s626_s2] ss:$0 sm:$0xff] }
  0x15   : > { %480 = vmatpush3.bf16.msra.mxu0 %v510_v5 }
  0x16   : > { %481 = vmatprep.subr.bf16.mxu0 %v511_v6 }
  0x19   : > { %482 = vmatpush3.bf16.msra.mxu0 %v512_v7 }
  0x1a   : > { %483 = vmatprep.subr.bf16.mxu0 %v513_v8 }
  0x1d   : > { %484 = vmatpush3.bf16.msra.mxu0 %v514_v9 }
  0x1e   : > { %485 = vmatprep.subr.bf16.mxu0 %v515_v10 }
  0x21   : > { %486 = vmatpush3.bf16.msra.mxu0 %v516_v12 }
  0x22   : > { %487 = vmatprep.subr.bf16.mxu0 %v517_v13 }
  0x25   : > { %488 = vmatpush3.bf16.msra.mxu0 %v518_v14 }
  0x26   : > { %489 = vmatprep.subr.bf16.mxu0 %v519_v15 }
  0x29   : > { %490 = vmatpush3.bf16.msra.mxu0 %v520_v16 }
  0x2c   : > { %358 = vmatmul.mubr.bf16.vlgmr.msra.gmra.mxu0 %v521_v17 }
  0xec   : > { %v491_v18 = vpop.f32.mrf.mxu0 }
  0xee   : > { %v492_v19 = vpop.f32.mrf.mxu0 }
  0xef   : > { %v493_v20 = vadd.f32 %v492_v19, %v491_v18 }
  0xf0   : > { %v494_v22 = vpop.f32.mrf.mxu0 }
  0xf1   : > { %v360_v24 = vadd.f32 %v493_v20, %v444_v21 }
  0xf2   : > { %v495_v23 = vpop.f32.mrf.mxu0 }
  0xf3   : > { %v496_v25 = vadd.f32 %v495_v23, %v494_v22  ;;  %v366_v27 = vmax.f32 %v360_v24, 0.0 }
  0xf5   : > { %v363_v26 = vadd.f32 %v496_v25, %v444_v21 }
  0xf7   : > { %v367_v28 = vmax.f32 %v363_v26, 0.0 }
  0xf9   : > { %v473_v29 = vpack.c.bf16 %v367_v28, %v366_v27 }
  0xfb   : > { %474 = vst [vmem:[%s175_s4] sm:$0xff] %v473_v29  }
  0xfc PF: > { %s13_s12 = sadd.s32 1, %s530_s12  }
  0xfd   : > { %p10_p4 = scmp.ge.s32.totalorder %s13_s12, 4  }
  0xff   :  { %12 = sbr.rel (!%p10_p4) target bundleno = 1 (0x1), region = 62 }

// kernel: _lambda_.12
= control target key start
LH: loop header
LB: loop body
LE: loop exit
PB: predicated region body
PF: predicated region fallthrough
CT: control target
= control target key end

     0   :  { %s588_s12 = smov 0   ;;  %s663_s0 = inlined_call_operand.vmem [shape: bf16[128,128], index: 0, kind: input, shape index: {}]   ;;  %s664_s1 = inlined_call_operand.vmem [shape: bf16[128,128], index: 1, kind: input, shape index: {}]   ;;  %s665_s2 = inlined_call_operand.vmem [shape: f32[1,128], index: 2, kind: input, shape index: {}]   ;;  %s666_s3 = inlined_call_operand.vmem [shape: bf16[128,64], index: 3, kind: output, shape index: {}]  }
   0x1 LB: > { %s448_s13 = sadd.s32 4294967295, %s566_s12   ;;  %p452_p0 = scmp.ge.s32.totalorder %s566_s12, 1  ;;  %s566_s12 = sphi %s588_s12, %s13_s12  }
   0x2   : > { %p138_p1 = scmp.lt.s32.totalorder %s566_s12, 3 }
   0x4   : > { %p139_p2 = pnand %p452_p0, %p138_p1 }
   0x5   : > { %s453_s16 = sshll.u32 (!%p139_p2), %s448_s13, 3 }
   0x6   : > { %142 = sbr.rel (%p139_p2) target bundleno = 251 (0xfb), region = 32  ;;  %p163_p3 = scmp.lt.s32.totalorder (!%p139_p2), %s453_s16, 15 }
   0xb   : > { %v548_v0 = vld [vmem:[%s664_s1 + $0x38] sm:$0xff]   ;;  %v549_v1 = vld [vmem:[%s664_s1 + $0x30] sm:$0xff]   ;;  %s668_s16 = smov (!%p163_p3, %s453_s16), 15  ;;  %v550_v2 = vld [vmem:[%s664_s1 + $0x28] sm:$0xff]   ;;  %vm383_vm0 = vcmask 519168  }
   0xc   : > { %500 = vmatprep.subr.bf16.mxu0 %v548_v0  ;;  %524 = vmatprep.subr.bf16.mxu1 %v548_v0  ;;  %s454_s21 = sshll.u32 %s668_s16, 2  ;;  %v551_v3 = vld [vmem:[%s664_s1 + $0x20] sm:$0xff]   ;;  %v552_v6 = vld [vmem:[%s664_s1 + $0x18] sm:$0xff]   ;;  %v553_v7 = vld [vmem:[%s664_s1 + $0x10] sm:$0xff]  }
   0xd   : > { %501 = vmatpush3.bf16.msra.mxu0 %v548_v0  ;;  %532 = vmatpush3.bf16.msra.mxu1 %v548_v0  ;;  %s613_s24 = scalar_lea.vmem %s663_s0, %s454_s21  ;;  %v554_v8 = vld [vmem:[%s664_s1 + $0x8] sm:$0xff]   ;;  %v555_v9 = vld [vmem:[%s664_s1] sm:$0xff]   ;;  %s642_s13 = scalar_lea.vmem %s666_s3, %s454_s21 }
   0xe   : > { %502 = vmatprep.subr.bf16.mxu0 %v549_v1  ;;  %525 = vmatprep.subr.bf16.mxu1 %v549_v1  ;;  %v556_v4 = vld [vmem:[%s613_s24] sm:$0xff]   ;;  %v557_v5 = vld [vmem:[%s613_s24 + $0x10] sm:$0xff]   ;;  %v558_v10 = vld [vmem:[%s613_s24 + $0x8] sm:$0xff]  }
   0xf   : > { %516 = vmatprep.mubr.bf16.mxu0 %v556_v4  ;;  %520 = vmatprep.mubr.bf16.mxu1 %v557_v5  ;;  %v559_v11 = vld [vmem:[%s613_s24 + $0x18] sm:$0xff]   ;;  %v457_v12 = vld [vmem:[%s665_s2] ss:$0 sm:$0xff] }
  0x11   : > { %503 = vmatpush3.bf16.msra.mxu0 %v549_v1  ;;  %533 = vmatpush3.bf16.msra.mxu1 %v549_v1 }
  0x12   : > { %504 = vmatprep.subr.bf16.mxu0 %v550_v2  ;;  %526 = vmatprep.subr.bf16.mxu1 %v550_v2 }
  0x15   : > { %505 = vmatpush3.bf16.msra.mxu0 %v550_v2  ;;  %534 = vmatpush3.bf16.msra.mxu1 %v550_v2 }
  0x16   : > { %506 = vmatprep.subr.bf16.mxu0 %v551_v3  ;;  %527 = vmatprep.subr.bf16.mxu1 %v551_v3 }
  0x19   : > { %507 = vmatpush3.bf16.msra.mxu0 %v551_v3  ;;  %535 = vmatpush3.bf16.msra.mxu1 %v551_v3 }
  0x1a   : > { %508 = vmatprep.subr.bf16.mxu0 %v552_v6  ;;  %528 = vmatprep.subr.bf16.mxu1 %v552_v6 }
  0x1d   : > { %509 = vmatpush3.bf16.msra.mxu0 %v552_v6  ;;  %536 = vmatpush3.bf16.msra.mxu1 %v552_v6 }
  0x1e   : > { %510 = vmatprep.subr.bf16.mxu0 %v553_v7  ;;  %529 = vmatprep.subr.bf16.mxu1 %v553_v7 }
  0x21   : > { %511 = vmatpush3.bf16.msra.mxu0 %v553_v7  ;;  %537 = vmatpush3.bf16.msra.mxu1 %v553_v7 }
  0x22   : > { %512 = vmatprep.subr.bf16.mxu0 %v554_v8  ;;  %530 = vmatprep.subr.bf16.mxu1 %v554_v8 }
  0x25   : > { %513 = vmatpush3.bf16.msra.mxu0 %v554_v8  ;;  %538 = vmatpush3.bf16.msra.mxu1 %v554_v8 }
  0x26   : > { %514 = vmatprep.subr.bf16.mxu0 %v555_v9  ;;  %531 = vmatprep.subr.bf16.mxu1 %v555_v9 }
  0x29   : > { %515 = vmatpush3.bf16.msra.mxu0 %v555_v9  ;;  %539 = vmatpush3.bf16.msra.mxu1 %v555_v9 }
  0x2c   : > { %517 = vmatmul.mubr.bf16.vlgmr.msra.gmra.mxu0 %v558_v10  ;;  %521 = vmatmul.mubr.bf16.vlgmr.msra.gmra.mxu1 %v559_v11 }
  0xec   : > { %v518_v13 = vpop.f32.mrf.mxu0  ;;  %v522_v14 = vpop.f32.mrf.mxu1 }
  0xed   : > { %v321_v15 = vadd.f32 %v518_v13, %v457_v12  ;;  %v337_v16 = vadd.f32 %v522_v14, %v457_v12 }
  0xee   : > { %v312_v17 = vpop.f32.mrf.mxu0  ;;  %v328_v18 = vpop.f32.mrf.mxu1 }
  0xef   : > { %v345_v19 = vmax.f32 %v321_v15, 0.0  ;;  %v349_v20 = vmax.f32 %v337_v16, 0.0  ;;  %v313_v21 = vadd.f32 %v457_v12, %v312_v17  ;;  %v329_v22 = vadd.f32 %v457_v12, %v328_v18 }
  0xf0   : > { %v519_v23 = vpop.f32.mrf.mxu0  ;;  %v523_v24 = vpop.f32.mrf.mxu1 }
  0xf1   : > { %v482_v25 = vpack.c.bf16 %v345_v19, %v345_v19  ;;  %v486_v26 = vpack.c.bf16 %v349_v20, %v349_v20  ;;  %v343_v27 = vmax.f32 %v313_v21, 0.0  ;;  %v347_v28 = vmax.f32 %v329_v22, 0.0 }
  0xf2   : > { %v324_v29 = vadd.f32 %v519_v23, %v457_v12  ;;  %v340_v30 = vadd.f32 %v523_v24, %v457_v12  ;;  %v315_v31 = vpop.f32.mrf.mxu0  ;;  %v331_v32 = vpop.f32.mrf.mxu1 }
  0xf3   : > { %386 = vst.msk [vmem:[%s642_s13 + $0x8] sm:$0xf] %vm383_vm0, %v482_v25  ;;  %390 = vst.msk [vmem:[%s642_s13 + $0x18] sm:$0xf] %vm383_vm0, %v486_v26  ;;  %v480_v33 = vpack.c.bf16 %v343_v27, %v343_v27  ;;  %v484_v34 = vpack.c.bf16 %v347_v28, %v347_v28  ;;  %v316_v35 = vadd.f32 %v457_v12, %v315_v31 }
  0xf4   : > { %v332_v36 = vadd.f32 %v457_v12, %v331_v32  ;;  %v346_v37 = vmax.f32 %v324_v29, 0.0  ;;  %v350_v38 = vmax.f32 %v340_v30, 0.0 }
  0xf5   : > { %384 = vst.msk [vmem:[%s642_s13] sm:$0xf] %vm383_vm0, %v480_v33  ;;  %388 = vst.msk [vmem:[%s642_s13 + $0x10] sm:$0xf] %vm383_vm0, %v484_v34  ;;  %v344_v39 = vmax.f32 %v316_v35, 0.0 }
  0xf6   : > { %v348_v40 = vmax.f32 %v332_v36, 0.0  ;;  %v483_v41 = vpack.c.bf16 %v346_v37, %v346_v37  ;;  %v487_v42 = vpack.c.bf16 %v350_v38, %v350_v38 }
  0xf7   : > { %v481_v43 = vpack.c.bf16 %v344_v39, %v344_v39 }
  0xf8   : > { %v485_v44 = vpack.c.bf16 %v348_v40, %v348_v40  ;;  %387 = vst.msk [vmem:[%s642_s13 + $0xc] sm:$0xf] %vm383_vm0, %v483_v41  ;;  %391 = vst.msk [vmem:[%s642_s13 + $0x1c] sm:$0xf] %vm383_vm0, %v487_v42 }
  0xf9   : > { %385 = vst.msk [vmem:[%s642_s13 + $0x4] sm:$0xf] %vm383_vm0, %v481_v43 }
  0xfa   : > { %389 = vst.msk [vmem:[%s642_s13 + $0x14] sm:$0xf] %vm383_vm0, %v485_v44 }
  0xfb PF: > { %s13_s12 = sadd.s32 1, %s566_s12  }
  0xfc   : > { %p10_p4 = scmp.ge.s32.totalorder %s13_s12, 4  }
  0xfe   :  { %12 = sbr.rel (!%p10_p4) target bundleno = 1 (0x1), region = 62 }

// kernel: _lambda_.10
= control target key start
LH: loop header
LB: loop body
LE: loop exit
PB: predicated region body
PF: predicated region fallthrough
CT: control target
= control target key end

     0   :  { %s8337_s12 = smov 0   ;;  %s10116_s0 = inlined_call_operand.vmem [shape: bf16[32,64], index: 0, kind: input, shape index: {}]   ;;  %s10117_s1 = inlined_call_operand.vmem [shape: bf16[3456,64], index: 1, kind: input, shape index: {}]   ;;  %s10118_s2 = inlined_call_operand.vmem [shape: f32[6,64], index: 2, kind: input, shape index: {}]   ;;  %s10119_s3 = inlined_call_operand.vmem [shape: bf16[32,64], index: 3, kind: output, shape index: {}]  }
   0x1 LB: > { %s6217_s13 = sadd.s32 4294967295, %s8313_s12   ;;  %p6221_p0 = scmp.ge.s32.totalorder %s8313_s12, 1  ;;  %s8313_s12 = sphi %s8337_s12, %s13_s12  }
   0x2   : > { %p138_p1 = scmp.lt.s32.totalorder %s8313_s12, 3 }
   0x4   : > { %p139_p2 = pnand %p6221_p0, %p138_p1 }
   0x5   : > { %s6222_s20 = sshll.u32 (!%p139_p2), %s6217_s13, 1 }
   0x6   : > { %142 = sbr.rel (%p139_p2) target bundleno = 1942 (0x796), region = 32  ;;  %p163_p3 = scmp.lt.s32.totalorder (!%p139_p2), %s6222_s20, 3 }
   0xb   : > { %v8088_v0 = vld [vmem:[%s10117_s1 + $0x38] sm:$0xff]   ;;  %v8315_v1 = vmov 0.0   ;;  %v8090_v3 = vld [vmem:[%s10117_s1 + $0x30] sm:$0xff]   ;;  %vm8316_vm0 = vmmov 0   ;;  %vm175_vm1 = vcmask 523264   ;;  %s10121_s20 = smov (!%p163_p3, %s6222_s20), 3 }
   0xc   : > { %6998 = vmatprep.subr.bf16.mxu0 %v8315_v1  ;;  %7018 = vmatprep.subr.bf16.mxu1 %v8315_v1  ;;  %v8089_v2 = vld [vmem:[%s10117_s1 + $0x18] sm:$0xff]   ;;  %v8091_v4 = vld [vmem:[%s10117_s1 + $0x10] sm:$0xff]   ;;  %176 = vst.msk [vmem:[#allocation2] sm:$0xff] %vm175_vm1, %v8315_v1  ;;  %177 = vst.msk [vmem:[#allocation2 + $0x8] sm:$0xff] %vm175_vm1, %v8315_v1  ;;  %s6223_s27 = sshll.u32 %s10121_s20, 2  ;;  %vm191_vm2 = vcmask 519168  }
   0xd   : > { %6999 = vmatpush3.bf16.msra.mxu0 %v8088_v0  ;;  %7006 = vmatprep.mubr.msk.bf16.mxu0 %vm8316_vm0, %v8315_v1  ;;  %178 = vst.msk [vmem:[#allocation2 + $0x10] sm:$0xff] %vm175_vm1, %v8315_v1  ;;  %179 = vst.msk [vmem:[#allocation2 + $0x18] sm:$0xff] %vm175_vm1, %v8315_v1  ;;  %v8092_v5 = vld [vmem:[%s10117_s1 + $0x28] sm:$0xff]   ;;  %s166_s30 = scalar_lea.vmem %s10116_s0, %s6223_s27  ;;  %v8094_v8 = vld [vmem:[%s10117_s1 + $0x20] sm:$0xff]   ;;  %vm193_vm3 = vcmask 517121   ;;  %vm195_vm4 = vcmask 518146   ;;  %s172_s6 = scalar_lea.vmem %s10119_s3, %s6223_s27 }
   0xe   : > { %7019 = vmatpush3.bf16.msra.mxu1 %v8089_v2  ;;  %7000 = vmatprep.subr.bf16.mxu0 %v8315_v1  ;;  %180 = vst.msk [vmem:[#allocation2 + $0x20] sm:$0xff] %vm175_vm1, %v8315_v1  ;;  %181 = vst.msk [vmem:[#allocation2 + $0x28] sm:$0xff] %vm175_vm1, %v8315_v1  ;;  %v8093_v6 = vld [vmem:[%s10117_s1 + $0x8] sm:$0xff]   ;;  %v6617_v7 = vld [vmem:[%s166_s30] sm:$0xff]   ;;  %vm182_vm5 = vcmask 517120   ;;  %vm1176_vm6 = vcmask 523270  }
   0xf   : > { %7020 = vmatprep.subr.bf16.mxu1 %v8315_v1  ;;  %7026 = vmatprep.mubr.msk.bf16.mxu1 %vm8316_vm0, %v8315_v1  ;;  %v6618_v9 = vunpack.c.l.bf16 %v6617_v7  ;;  %v6619_v10 = vunpack.c.h.bf16 %v6617_v7  ;;  %v8095_v11 = vld [vmem:[%s10117_s1] sm:$0xff]   ;;  %v8096_v18 = vld [vmem:[%s10117_s1 + $0x58] sm:$0xff]   ;;  %v8097_v26 = vld [vmem:[%s10117_s1 + $0x50] sm:$0xff]   ;;  %183 = vst.msk [vmem:[#allocation2 + $0x30] sm:$0x3] %vm182_vm5, %v8315_v1  ;;  %vm1179_vm7 = vcmask 523271  }
  0x10   : > { %v8098_v25 = vld [vmem:[%s10117_s1 + $0x78] sm:$0xff]   ;;  %v8100_v31 = vld [vmem:[%s10117_s1 + $0x70] sm:$0xff]   ;;  %v8099_v34 = vld [vmem:[%s10117_s1 + $0x48] sm:$0xff]   ;;  %vm1181_vm8 = vcmask 516096   ;;  %vm1190_vm9 = vcmask 523268   ;;  %vm1192_vm10 = vcmask 521221  }
  0x11   : > { %7001 = vmatpush3.bf16.msra.mxu0 %v8090_v3  ;;  %188 = vst.msk [vmem:[#allocation3] sm:$0xff] %vm175_vm1, %v6618_v9  ;;  %189 = vst.msk [vmem:[#allocation3 + $0x8] sm:$0xff] %vm175_vm1, %v6619_v10  ;;  %v8102_v35 = vld [vmem:[%s10117_s1 + $0x68] sm:$0xff]   ;;  %v8101_v36 = vld [vmem:[%s10117_s1 + $0x40] sm:$0xff]   ;;  %vm1194_vm11 = vcmask 522246   ;;  %vm1196_vm12 = vcmask 521218  }
  0x12   : > { %7021 = vmatpush3.bf16.msra.mxu1 %v8091_v4  ;;  %7002 = vmatprep.subr.bf16.mxu0 %v8315_v1  ;;  %v8103_v39 = vld [vmem:[%s10117_s1 + $0x60] sm:$0xff]   ;;  %v8104_v47 = vld [vmem:[%s10117_s1 + $0x98] sm:$0xff]   ;;  %v8105_v50 = vld [vmem:[%s10117_s1 + $0x90] sm:$0xff]   ;;  %vm1198_vm13 = vcmask 519171   ;;  %vm1200_vm14 = vcmask 520196   ;;  %vm2167_vm15 = vcmask 1041408  }
  0x13   : > { %7022 = vmatprep.subr.bf16.mxu1 %v8315_v1  ;;  %v8106_v49 = vld [vmem:[%s10117_s1 + $0xb8] sm:$0xff]   ;;  %v8108_v55 = vld [vmem:[%s10117_s1 + $0xb0] sm:$0xff]   ;;  %v8107_v56 = vld [vmem:[%s10117_s1 + $0x88] sm:$0xff]  }
  0x14   : > { %v8110_v59 = vld [vmem:[%s10117_s1 + $0xa8] sm:$0xff]   ;;  %v8109_v61 = vld [vmem:[%s10117_s1 + $0x80] sm:$0xff]   ;;  %v8113_v9 = vld [vmem:[%s10117_s1 + $0xd0] sm:$0xff]  }
  0x15   : > { %7003 = vmatpush3.bf16.msra.mxu0 %v8092_v5  ;;  %v533_v62 = vld [vmem:[#allocation2 + $0x26] sm:$0xf]  ;;  %v8112_v5 = vld [vmem:[%s10117_s1 + $0xd8] sm:$0xff]  }
  0x16   : > { %7023 = vmatpush3.bf16.msra.mxu1 %v8093_v6  ;;  %7004 = vmatprep.subr.bf16.mxu0 %v8315_v1  ;;  %v8111_v63 = vld [vmem:[%s10117_s1 + $0xa0] sm:$0xff]   ;;  %v536_v2 = vpack.c.bf16 %v533_v62, %v533_v62 }
  0x17   : > { %7024 = vmatprep.subr.bf16.mxu1 %v8315_v1 }
  0x18   : > { %v190_v12 = vld [vmem:[#allocation3 + $0x4] sm:$0xf]  ;;  %v197_v13 = vld [vmem:[#allocation3] sm:$0xf]  ;;  %v205_v15 = vld [vmem:[#allocation3 + $0x8] sm:$0xf] }
  0x19   : > { %7005 = vmatpush3.bf16.msra.mxu0 %v8094_v8  ;;  %v201_v14 = vld [vmem:[#allocation3 + $0x4] sm:$0xf]  ;;  %192 = vst.msk [vmem:[#allocation2 + $0x1] sm:$0xf] %vm191_vm2, %v190_v12  ;;  %198 = vst.msk [vmem:[#allocation2 + $0x7] sm:$0xf] %vm191_vm2, %v197_v13 }
  0x1a   : > { %7025 = vmatpush3.bf16.msra.mxu1 %v8095_v11  ;;  %7038 = vmatprep.subr.bf16.mxu0 %v8315_v1  ;;  %194 = vst.msk [vmem:[#allocation2 - $0x1] sm:$0x2] %vm193_vm3, %v190_v12  ;;  %199 = vst.msk [vmem:[#allocation2 + $0x5] sm:$0x2] %vm193_vm3, %v197_v13  ;;  %v209_v16 = vld [vmem:[#allocation3 + $0xc] sm:$0xf] }
  0x1b   : > { %7058 = vmatprep.subr.bf16.mxu1 %v8315_v1  ;;  %196 = vst.msk [vmem:[#allocation2 + $0x3] sm:$0x4] %vm195_vm4, %v190_v12  ;;  %200 = vst.msk [vmem:[#allocation2 + $0x9] sm:$0x4] %vm195_vm4, %v197_v13  ;;  %v213_v17 = vld [vmem:[#allocation3 + $0x8] sm:$0xf] }
  0x1c   : > { %202 = vst.msk [vmem:[#allocation2 + $0xd] sm:$0xf] %vm191_vm2, %v201_v14  ;;  %206 = vst.msk [vmem:[#allocation2 + $0x13] sm:$0xf] %vm191_vm2, %v205_v15  ;;  %v8114_v8 = vld [vmem:[%s10117_s1 + $0xf8] sm:$0xff]   ;;  %v8116_v13 = vld [vmem:[%s10117_s1 + $0xf0] sm:$0xff]  }
  0x1d   : > { %203 = vst.msk [vmem:[#allocation2 + $0xb] sm:$0x2] %vm193_vm3, %v201_v14  ;;  %207 = vst.msk [vmem:[#allocation2 + $0x11] sm:$0x2] %vm193_vm3, %v205_v15 }
  0x1e   : > { %204 = vst.msk [vmem:[#allocation2 + $0xf] sm:$0x4] %vm195_vm4, %v201_v14  ;;  %208 = vst.msk [vmem:[#allocation2 + $0x15] sm:$0x4] %vm195_vm4, %v205_v15  ;;  %v8115_v14 = vld [vmem:[%s10117_s1 + $0xc8] sm:$0xff]  }
  0x1f   : > { %210 = vst.msk [vmem:[#allocation2 + $0x19] sm:$0xf] %vm191_vm2, %v209_v16  ;;  %214 = vst.msk [vmem:[#allocation2 + $0x1f] sm:$0xf] %vm191_vm2, %v213_v17 }
  0x20   : > { %211 = vst.msk [vmem:[#allocation2 + $0x17] sm:$0x2] %vm193_vm3, %v209_v16  ;;  %215 = vst.msk [vmem:[#allocation2 + $0x1d] sm:$0x2] %vm193_vm3, %v213_v17 }
  0x21   : > { %212 = vst.msk [vmem:[#allocation2 + $0x1b] sm:$0x4] %vm195_vm4, %v209_v16  ;;  %216 = vst.msk [vmem:[#allocation2 + $0x21] sm:$0x4] %vm195_vm4, %v213_v17  ;;  %v8118_v17 = vld [vmem:[%s10117_s1 + $0xe8] sm:$0xff]  }
  0x22   : > { %v217_v19 = vld [vmem:[#allocation2] sm:$0xff] }
  0x23   : > { %v233_v20 = vld [vmem:[#allocation2 + $0x1] sm:$0xff] }
  0x24   : > { %v234_v21 = vld [vmem:[#allocation2 + $0x9] sm:$0xff] }
  0x25   : > { %v238_v22 = vpack.c.bf16 %v234_v21, %v233_v20  ;;  %v8426_v23 = vld [vmem:[#allocation2 + $0x8] sm:$0xff]  ;;  %v8440_v29 = vld [vmem:[#allocation2 + $0x10] sm:$0xff]  ;;  %v8119_v21 = vld [vmem:[%s10117_s1 + $0xe0] sm:$0xff]  }
  0x26   : > { %v222_v24 = vpack.c.bf16 %v8426_v23, %v217_v19  ;;  %v424_v42 = vld [vmem:[#allocation2 + $0xa] sm:$0xff]  ;;  %v423_v43 = vld [vmem:[#allocation2 + $0x2] sm:$0xff]  ;;  %v746_v7 = vpack.c.bf16 %v8440_v29, %v8426_v23 }
  0x27   : > { %7007 = vmatmul.mubr.msk.bf16.vlgmr.msra.gmra.mxu0 %vm175_vm1, %v238_v22  ;;  %v235_v27 = vld [vmem:[#allocation2 + $0x11] sm:$0xff]  ;;  %v529_v44 = vld [vmem:[#allocation2 + $0x6] sm:$0xff]  ;;  %v428_v46 = vpack.c.bf16 %v424_v42, %v423_v43 }
  0x28   : > { %7027 = vmatmul.mubr.msk.bf16.vlgmr.msra.gmra.mxu1 %vm175_vm1, %v222_v24  ;;  %7039 = vmatpush3.bf16.msra.mxu0 %v8096_v18  ;;  %v236_v28 = vld [vmem:[#allocation2 + $0x19] sm:$0xff]  ;;  %v237_v37 = vld [vmem:[#allocation2 + $0x21] sm:$0xf]  ;;  %v8482_v45 = vld [vmem:[#allocation2 + $0xe] sm:$0xff] }
  0x29   : > { %7040 = vmatprep.subr.bf16.mxu0 %v8315_v1  ;;  %7010 = vmatprep.mubr.msk.bf16.mxu0 %vm8316_vm0, %v8315_v1  ;;  %v8442_v30 = vld [vmem:[#allocation2 + $0x18] sm:$0xff]  ;;  %v239_v32 = vpack.c.bf16 %v236_v28, %v235_v27  ;;  %v221_v38 = vld [vmem:[#allocation2 + $0x20] sm:$0xf]  ;;  %v240_v40 = vpack.c.bf16 %v237_v37, %v237_v37  ;;  %v534_v48 = vpack.c.bf16 %v8482_v45, %v529_v44  ;;  %v635_v3 = vld [vmem:[#allocation2 + $0x7] sm:$0xff] }
  0x2a   : > { %7030 = vmatprep.mubr.msk.bf16.mxu1 %vm8316_vm0, %v8315_v1  ;;  %7059 = vmatpush3.bf16.msra.mxu1 %v8098_v25  ;;  %v223_v33 = vpack.c.bf16 %v8442_v30, %v8440_v29  ;;  %v224_v41 = vpack.c.bf16 %v221_v38, %v221_v38  ;;  %v425_v51 = vld [vmem:[#allocation2 + $0x12] sm:$0xff]  ;;  %v426_v52 = vld [vmem:[#allocation2 + $0x1a] sm:$0xff]  ;;  %v427_v60 = vld [vmem:[#allocation2 + $0x22] sm:$0xf] }
  0x2b   : > { %7060 = vmatprep.subr.bf16.mxu1 %v8315_v1  ;;  %v8494_v53 = vld [vmem:[#allocation2 + $0x16] sm:$0xff]  ;;  %v8497_v54 = vld [vmem:[#allocation2 + $0x1e] sm:$0xff]  ;;  %v429_v57 = vpack.c.bf16 %v426_v52, %v425_v51  ;;  %v430_v0 = vpack.c.bf16 %v427_v60, %v427_v60  ;;  %v639_v18 = vld [vmem:[#allocation2 + $0x27] sm:$0xf] }
  0x2c   : > { %7041 = vmatpush3.bf16.msra.mxu0 %v8097_v26  ;;  %v535_v58 = vpack.c.bf16 %v8497_v54, %v8494_v53  ;;  %v636_v4 = vld [vmem:[#allocation2 + $0xf] sm:$0xff]  ;;  %v637_v10 = vld [vmem:[#allocation2 + $0x17] sm:$0xff]  ;;  %v638_v11 = vld [vmem:[#allocation2 + $0x1f] sm:$0xff]  ;;  %v642_v22 = vpack.c.bf16 %v639_v18, %v639_v18  ;;  %v1064_v42 = vpack.c.bf16 %v8494_v53, %v8482_v45 }
  0x2d   : > { %7042 = vmatprep.subr.bf16.mxu0 %v8315_v1  ;;  %v640_v6 = vpack.c.bf16 %v636_v4, %v635_v3  ;;  %v744_v12 = vld [vmem:[#allocation2 + $0x20] sm:$0xff]  ;;  %v641_v15 = vpack.c.bf16 %v638_v11, %v637_v10  ;;  %v745_v20 = vld [vmem:[#allocation2 + $0x28] sm:$0xf]  ;;  %v847_v24 = vld [vmem:[#allocation2 + $0xc] sm:$0xff] }
  0x2e   : > { %7061 = vmatpush3.bf16.msra.mxu1 %v8100_v31  ;;  %v747_v16 = vpack.c.bf16 %v744_v12, %v8442_v30  ;;  %v8117_v19 = vld [vmem:[%s10117_s1 + $0xc0] sm:$0xff]   ;;  %v748_v23 = vpack.c.bf16 %v745_v20, %v745_v20  ;;  %v848_v25 = vld [vmem:[#allocation2 + $0x14] sm:$0xff]  ;;  %v1063_v51 = vld [vmem:[#allocation2 + $0x2e] sm:$0xf] }
  0x2f   : > { %7011 = vmatmul.mubr.msk.bf16.gmra.mxu0 %vm175_vm1, %v239_v32  ;;  %7062 = vmatprep.subr.bf16.mxu1 %v8315_v1  ;;  %v953_v26 = vld [vmem:[#allocation2 + $0xd] sm:$0xff]  ;;  %v954_v27 = vld [vmem:[#allocation2 + $0x15] sm:$0xff]  ;;  %v852_v29 = vpack.c.bf16 %v848_v25, %v847_v24  ;;  %v1066_v52 = vpack.c.bf16 %v1063_v51, %v1063_v51 }
  0x30   : > { %7031 = vmatmul.mubr.msk.bf16.gmra.mxu1 %vm175_vm1, %v223_v33  ;;  %7043 = vmatpush3.bf16.msra.mxu0 %v8099_v34  ;;  %v8120_v28 = vld [vmem:[%s10117_s1 + $0x118] sm:$0xff]   ;;  %v958_v30 = vpack.c.bf16 %v954_v27, %v953_v26  ;;  %v8121_v32 = vld [vmem:[%s10117_s1 + $0x110] sm:$0xff]   ;;  %v850_v33 = vld [vmem:[#allocation2 + $0x24] sm:$0xff] }
  0x31   : > { %7014 = vmatprep.mubr.msk.bf16.mxu0 %vm8316_vm0, %v8315_v1  ;;  %7034 = vmatprep.mubr.msk.bf16.mxu1 %vm8316_vm0, %v8315_v1  ;;  %v849_v31 = vld [vmem:[#allocation2 + $0x1c] sm:$0xff]  ;;  %v1062_v43 = vld [vmem:[#allocation2 + $0x26] sm:$0xff] }
  0x32   : > { %7044 = vmatprep.subr.bf16.mxu0 %v8315_v1  ;;  %7063 = vmatpush3.bf16.msra.mxu1 %v8102_v35  ;;  %v955_v34 = vld [vmem:[#allocation2 + $0x1d] sm:$0xff]  ;;  %v956_v35 = vld [vmem:[#allocation2 + $0x25] sm:$0xff]  ;;  %v853_v37 = vpack.c.bf16 %v850_v33, %v849_v31  ;;  %v1065_v44 = vpack.c.bf16 %v1062_v43, %v8497_v54 }
  0x33   : > { %7064 = vmatprep.subr.bf16.mxu1 %v8315_v1  ;;  %v959_v38 = vpack.c.bf16 %v956_v35, %v955_v34  ;;  %v8126_v45 = vld [vmem:[%s10117_s1 + $0x138] sm:$0xff]   ;;  %v8127_v53 = vld [vmem:[%s10117_s1 + $0x148] sm:$0xff]  }
  0x34   : > { %7045 = vmatpush3.bf16.msra.mxu0 %v8101_v36  ;;  %v8122_v36 = vld [vmem:[%s10117_s1 + $0x108] sm:$0xff]  }
  0x35   : > { %7078 = vmatprep.subr.bf16.mxu0 %v8315_v1  ;;  %v8129_v54 = vld [vmem:[%s10117_s1 + $0x128] sm:$0xff]  }
  0x36   : > { %7065 = vmatpush3.bf16.msra.mxu1 %v8103_v39  ;;  %v851_v39 = vld [vmem:[#allocation2 + $0x2c] sm:$0xf] }
  0x37   : > { %7015 = vmatmul.mubr.msk.bf16.gmra.mxu0 %vm175_vm1, %v240_v40  ;;  %7098 = vmatprep.subr.bf16.mxu1 %v8315_v1  ;;  %v8123_v40 = vld [vmem:[%s10117_s1 + $0x100] sm:$0xff]  }
  0x38   : > { %7035 = vmatmul.mubr.msk.bf16.gmra.mxu1 %vm175_vm1, %v224_v41  ;;  %7046 = vmatprep.mubr.msk.bf16.mxu0 %vm8316_vm0, %v8315_v1  ;;  %v854_v41 = vpack.c.bf16 %v851_v39, %v851_v39 }
  0x39   : > { %7066 = vmatprep.mubr.msk.bf16.mxu1 %vm8316_vm0, %v8315_v1 }
  0x3f   : > { %7047 = vmatmul.mubr.msk.bf16.vlgmr.msra.gmra.mxu0 %vm175_vm1, %v428_v46  ;;  %v8124_v46 = vld [vmem:[%s10117_s1 + $0x158] sm:$0xff]  }
  0x40   : > { %7079 = vmatpush3.bf16.msra.mxu0 %v8104_v47  ;;  %7067 = vmatmul.mubr.msk.bf16.vlgmr.msra.gmra.mxu1 %vm175_vm1, %v534_v48  ;;  %v957_v47 = vld [vmem:[#allocation2 + $0x2d] sm:$0xf] }
  0x41   : > { %7080 = vmatprep.subr.bf16.mxu0 %v8315_v1  ;;  %7050 = vmatprep.mubr.msk.bf16.mxu0 %vm8316_vm0, %v8315_v1  ;;  %v960_v48 = vpack.c.bf16 %v957_v47, %v957_v47 }
  0x42   : > { %7070 = vmatprep.mubr.msk.bf16.mxu1 %vm8316_vm0, %v8315_v1  ;;  %7099 = vmatpush3.bf16.msra.mxu1 %v8106_v49  ;;  %v8125_v49 = vld [vmem:[%s10117_s1 + $0x150] sm:$0xff]  }
  0x43   : > { %7100 = vmatprep.subr.bf16.mxu1 %v8315_v1 }
  0x44   : > { %7081 = vmatpush3.bf16.msra.mxu0 %v8105_v50  ;;  %v8128_v50 = vld [vmem:[%s10117_s1 + $0x130] sm:$0xff]  }
  0x45   : > { %7082 = vmatprep.subr.bf16.mxu0 %v8315_v1 }
  0x46   : > { %7101 = vmatpush3.bf16.msra.mxu1 %v8108_v55  ;;  %v8130_v55 = vld [vmem:[%s10117_s1 + $0x140] sm:$0xff]  }
  0x47   : > { %7051 = vmatmul.mubr.msk.bf16.gmra.mxu0 %vm175_vm1, %v429_v57  ;;  %7102 = vmatprep.subr.bf16.mxu1 %v8315_v1 }
  0x48   : > { %7071 = vmatmul.mubr.msk.bf16.gmra.mxu1 %vm175_vm1, %v535_v58  ;;  %7083 = vmatpush3.bf16.msra.mxu0 %v8107_v56  ;;  %v8131_v56 = vld [vmem:[%s10117_s1 + $0x120] sm:$0xff]  }
  0x49   : > { %7054 = vmatprep.mubr.msk.bf16.mxu0 %vm8316_vm0, %v8315_v1  ;;  %7074 = vmatprep.mubr.msk.bf16.mxu1 %vm8316_vm0, %v8315_v1 }
  0x4a   : > { %7084 = vmatprep.subr.bf16.mxu0 %v8315_v1  ;;  %7103 = vmatpush3.bf16.msra.mxu1 %v8110_v59 }
  0x4b   : > { %7104 = vmatprep.subr.bf16.mxu1 %v8315_v1 }
  0x4c   : > { %7085 = vmatpush3.bf16.msra.mxu0 %v8109_v61 }
  0x4d   : > { %7118 = vmatprep.subr.bf16.mxu0 %v8315_v1 }
  0x4e   : > { %7105 = vmatpush3.bf16.msra.mxu1 %v8111_v63 }
  0x4f   : > { %7055 = vmatmul.mubr.msk.bf16.gmra.mxu0 %vm175_vm1, %v430_v0  ;;  %7138 = vmatprep.subr.bf16.mxu1 %v8315_v1 }
  0x50   : > { %7075 = vmatmul.mubr.msk.bf16.gmra.mxu1 %vm175_vm1, %v536_v2  ;;  %7086 = vmatprep.mubr.msk.bf16.mxu0 %vm8316_vm0, %v8315_v1 }
  0x51   : > { %7106 = vmatprep.mubr.msk.bf16.mxu1 %vm8316_vm0, %v8315_v1 }
  0x57   : > { %7087 = vmatmul.mubr.msk.bf16.vlgmr.msra.gmra.mxu0 %vm175_vm1, %v640_v6 }
  0x58   : > { %7119 = vmatpush3.bf16.msra.mxu0 %v8112_v5  ;;  %7107 = vmatmul.mubr.msk.bf16.vlgmr.msra.gmra.mxu1 %vm175_vm1, %v746_v7 }
  0x59   : > { %7120 = vmatprep.subr.bf16.mxu0 %v8315_v1  ;;  %7090 = vmatprep.mubr.msk.bf16.mxu0 %vm8316_vm0, %v8315_v1 }
  0x5a   : > { %7110 = vmatprep.mubr.msk.bf16.mxu1 %vm8316_vm0, %v8315_v1  ;;  %7139 = vmatpush3.bf16.msra.mxu1 %v8114_v8 }
  0x5b   : > { %7140 = vmatprep.subr.bf16.mxu1 %v8315_v1 }
  0x5c   : > { %7121 = vmatpush3.bf16.msra.mxu0 %v8113_v9 }
  0x5d   : > { %7122 = vmatprep.subr.bf16.mxu0 %v8315_v1 }
  0x5e   : > { %7141 = vmatpush3.bf16.msra.mxu1 %v8116_v13 }
  0x5f   : > { %7091 = vmatmul.mubr.msk.bf16.gmra.mxu0 %vm175_vm1, %v641_v15  ;;  %7142 = vmatprep.subr.bf16.mxu1 %v8315_v1 }
  0x60   : > { %7111 = vmatmul.mubr.msk.bf16.gmra.mxu1 %vm175_vm1, %v747_v16  ;;  %7123 = vmatpush3.bf16.msra.mxu0 %v8115_v14 }
  0x61   : > { %7094 = vmatprep.mubr.msk.bf16.mxu0 %vm8316_vm0, %v8315_v1  ;;  %7114 = vmatprep.mubr.msk.bf16.mxu1 %vm8316_vm0, %v8315_v1 }
  0x62   : > { %7124 = vmatprep.subr.bf16.mxu0 %v8315_v1  ;;  %7143 = vmatpush3.bf16.msra.mxu1 %v8118_v17 }
  0x63   : > { %7144 = vmatprep.subr.bf16.mxu1 %v8315_v1 }
  0x64   : > { %7125 = vmatpush3.bf16.msra.mxu0 %v8117_v19 }
  0x65   : > { %7158 = vmatprep.subr.bf16.mxu0 %v8315_v1 }
  0x66   : > { %7145 = vmatpush3.bf16.msra.mxu1 %v8119_v21 }
  0x67   : > { %7095 = vmatmul.mubr.msk.bf16.gmra.mxu0 %vm175_vm1, %v642_v22  ;;  %7178 = vmatprep.subr.bf16.mxu1 %v8315_v1 }
  0x68   : > { %7115 = vmatmul.mubr.msk.bf16.gmra.mxu1 %vm175_vm1, %v748_v23  ;;  %7126 = vmatprep.mubr.msk.bf16.mxu0 %vm8316_vm0, %v8315_v1 }
  0x69   : > { %7146 = vmatprep.mubr.msk.bf16.mxu1 %vm8316_vm0, %v8315_v1 }
  0x6f   : > { %7127 = vmatmul.mubr.msk.bf16.vlgmr.msra.gmra.mxu0 %vm175_vm1, %v852_v29 }
  0x70   : > { %7159 = vmatpush3.bf16.msra.mxu0 %v8120_v28  ;;  %7147 = vmatmul.mubr.msk.bf16.vlgmr.msra.gmra.mxu1 %vm175_vm1, %v958_v30 }
  0x71   : > { %7160 = vmatprep.subr.bf16.mxu0 %v8315_v1  ;;  %7130 = vmatprep.mubr.msk.bf16.mxu0 %vm8316_vm0, %v8315_v1 }
  0x72   : > { %7150 = vmatprep.mubr.msk.bf16.mxu1 %vm8316_vm0, %v8315_v1  ;;  %7179 = vmatpush3.bf16.msra.mxu1 %v8124_v46 }
  0x73   : > { %7180 = vmatprep.subr.bf16.mxu1 %v8315_v1 }
  0x74   : > { %7161 = vmatpush3.bf16.msra.mxu0 %v8121_v32 }
  0x75   : > { %7162 = vmatprep.subr.bf16.mxu0 %v8315_v1 }
  0x76   : > { %7181 = vmatpush3.bf16.msra.mxu1 %v8125_v49 }
  0x77   : > { %7131 = vmatmul.mubr.msk.bf16.gmra.mxu0 %vm175_vm1, %v853_v37  ;;  %7182 = vmatprep.subr.bf16.mxu1 %v8315_v1 }
  0x78   : > { %7151 = vmatmul.mubr.msk.bf16.gmra.mxu1 %vm175_vm1, %v959_v38  ;;  %7163 = vmatpush3.bf16.msra.mxu0 %v8122_v36 }
  0x79   : > { %7134 = vmatprep.mubr.msk.bf16.mxu0 %vm8316_vm0, %v8315_v1  ;;  %7164 = vmatprep.subr.bf16.mxu0 %v8315_v1 }
  0x7a   : > { %7154 = vmatprep.mubr.msk.bf16.mxu1 %vm8316_vm0, %v8315_v1  ;;  %7183 = vmatpush3.bf16.msra.mxu1 %v8127_v53 }
  0x7b   : > { %7184 = vmatprep.subr.bf16.mxu1 %v8315_v1 }
  0x7c   : > { %7165 = vmatpush3.bf16.msra.mxu0 %v8123_v40 }
  0x7d   : > { %7198 = vmatprep.subr.bf16.mxu0 %v8315_v1 }
  0x7e   : > { %7185 = vmatpush3.bf16.msra.mxu1 %v8130_v55 }
  0x7f   : > { %7135 = vmatmul.mubr.msk.bf16.gmra.mxu0 %vm175_vm1, %v854_v41  ;;  %7218 = vmatprep.subr.bf16.mxu1 %v8315_v1 }
  0x80   : > { %7166 = vmatprep.mubr.msk.bf16.mxu0 %vm8316_vm0, %v8315_v1  ;;  %7155 = vmatmul.mubr.msk.bf16.gmra.mxu1 %vm175_vm1, %v960_v48 }
  0x81   : > { %7186 = vmatprep.mubr.msk.bf16.mxu1 %vm8316_vm0, %v8315_v1 }
  0x87   : > { %7167 = vmatmul.mubr.msk.bf16.vlgmr.msra.gmra.mxu0 %vm175_vm1, %v1064_v42 }
  0x88   : > { %7170 = vmatprep.mubr.msk.bf16.mxu0 %vm8316_vm0, %v8315_v1  ;;  %7199 = vmatpush3.bf16.msra.mxu0 %v8126_v45 }
  0x89   : > { %7200 = vmatprep.subr.bf16.mxu0 %v8315_v1 }
  0x8c   : > { %7201 = vmatpush3.bf16.msra.mxu0 %v8128_v50 }
  0x8d   : > { %7202 = vmatprep.subr.bf16.mxu0 %v8315_v1 }
  0x8f   : > { %7171 = vmatmul.mubr.msk.bf16.gmra.mxu0 %vm175_vm1, %v1065_v44 }
  0x90   : > { %7174 = vmatprep.mubr.msk.bf16.mxu0 %vm8316_vm0, %v8315_v1  ;;  %7203 = vmatpush3.bf16.msra.mxu0 %v8129_v54 }
  0x91   : > { %7204 = vmatprep.subr.bf16.mxu0 %v8315_v1 }
  0x94   : > { %7205 = vmatpush3.bf16.msra.mxu0 %v8131_v56 }
  0x95   : > { %7238 = vmatprep.subr.bf16.mxu0 %v8315_v1 }
  0x97   : > { %7175 = vmatmul.mubr.msk.bf16.gmra.mxu0 %vm175_vm1, %v1066_v52 }
  0x98   : > { %7206 = vmatprep.mubr.msk.bf16.mxu0 %vm8316_vm0, %v8315_v1 }
  0xe7   : > { %v316_v57 = vpop.f32.mrf.mxu0 }
  0xe8   : > { %v403_v58 = vpop.f32.mrf.mxu1 }
  0xe9   : > { %v8674_v59 = vadd.f32 %v403_v58, %v316_v57  ;;  %v7008_v60 = vpop.f32.mrf.mxu0 }
  0xea   : > { %v7028_v61 = vpop.f32.mrf.mxu1 }
  0xeb   : > { %v319_v62 = vpop.f32.mrf.mxu0 }
  0xec   : > { %v406_v63 = vpop.f32.mrf.mxu1 }
  0xed   : > { %v8676_v0 = vadd.f32 %v406_v63, %v319_v62  ;;  %v7009_v2 = vpop.f32.mrf.mxu0 }
  0xee   : > { %v7029_v3 = vpop.f32.mrf.mxu1 }
  0xef   : > { %v324_v4 = vpop.f32.mrf.mxu0 }
  0xf0   : > { %v411_v5 = vpop.f32.mrf.mxu1 }
  0xf1   : > { %v8678_v6 = vadd.f32 %v411_v5, %v324_v4  ;;  %v7012_v7 = vpop.f32.mrf.mxu0 }
  0xf2   : > { %v7032_v8 = vpop.f32.mrf.mxu1 }
  0xf3   : > { %v327_v9 = vpop.f32.mrf.mxu0 }
  0xf4   : > { %v414_v10 = vpop.f32.mrf.mxu1 }
  0xf5   : > { %v7013_v11 = vpop.f32.mrf.mxu0 }
  0xf6   : > { %v7033_v12 = vpop.f32.mrf.mxu1 }
  0xf7   : > { %v331_v13 = vpop.f32.mrf.mxu0 }
  0xf8   : > { %v418_v14 = vpop.f32.mrf.mxu1 }
  0xf9   : > { %v7016_v15 = vpop.f32.mrf.mxu0 }
  0xfa   : > { %v7036_v16 = vpop.f32.mrf.mxu1 }
  0xfb   : > { %v333_v17 = vpop.f32.mrf.mxu0 }
  0xfc   : > { %v420_v18 = vpop.f32.mrf.mxu1 }
  0xfd   : > { %v7017_v19 = vpop.f32.mrf.mxu0 }
  0xfe   : > { %v7037_v20 = vpop.f32.mrf.mxu1 }
  0xff   : > { %v506_v21 = vpop.f32.mrf.mxu0 }
 0x100   : > { %v612_v22 = vpop.f32.mrf.mxu1  ;;  %v526_v16 = vadd.f32 %v506_v21, %v8674_v59 }
 0x101   : > { %v7048_v23 = vpop.f32.mrf.mxu0 }
 0x102   : > { %v7068_v24 = vpop.f32.mrf.mxu1  ;;  %v632_v23 = vadd.f32 %v612_v22, %v526_v16 }
 0x103   : > { %v509_v25 = vpop.f32.mrf.mxu0 }
 0x104   : > { %v615_v26 = vpop.f32.mrf.mxu1  ;;  %v527_v24 = vadd.f32 %v509_v25, %v8676_v0 }
 0x105   : > { %v7049_v27 = vpop.f32.mrf.mxu0 }
 0x106   : > { %v7069_v28 = vpop.f32.mrf.mxu1 }
 0x107   : > { %v514_v29 = vpop.f32.mrf.mxu0 }
 0x108   : > { %v8680_v30 = vpop.f32.mrf.mxu1 }
 0x109   : > { %v7052_v31 = vpop.f32.mrf.mxu0 }
 0x10a   : > { %v7072_v32 = vpop.f32.mrf.mxu1 }
 0x10b   : > { %v517_v33 = vpop.f32.mrf.mxu0 }
 0x10c   : > { %v623_v34 = vpop.f32.mrf.mxu1 }
 0x10d   : > { %v7053_v35 = vpop.f32.mrf.mxu0  ;;  %v633_v34 = vadd.f32 %v615_v26, %v527_v24  ;;  %v6289_v26 = vld [vmem:[%s10118_s2] ss:$0 sm:$0xff] }
 0x10e   : > { %v7073_v36 = vpop.f32.mrf.mxu1  ;;  %v528_v35 = vadd.f32 %v514_v29, %v8678_v6  ;;  %v8139_v24 = vld [vmem:[%s10117_s1 + $0x180] sm:$0xff]  }
 0x10f   : > { %v521_v37 = vpop.f32.mrf.mxu0 }
 0x110   : > { %v627_v38 = vpop.f32.mrf.mxu1  ;;  %v634_v21 = vadd.f32 %v8680_v30, %v528_v35  ;;  %v8140_v35 = vld [vmem:[%s10117_s1 + $0x1b8] sm:$0xff]  }
 0x111   : > { %v7056_v39 = vpop.f32.mrf.mxu0 }
 0x112   : > { %v7076_v40 = vpop.f32.mrf.mxu1 }
 0x113   : > { %v523_v41 = vpop.f32.mrf.mxu0 }
 0x114   : > { %v629_v42 = vpop.f32.mrf.mxu1 }
 0x115   : > { %v7057_v43 = vpop.f32.mrf.mxu0 }
 0x116   : > { %v7077_v44 = vpop.f32.mrf.mxu1 }
 0x117   : > { %v718_v46 = vpop.f32.mrf.mxu0 }
 0x118   : > { %v824_v45 = vpop.f32.mrf.mxu1  ;;  %v738_v31 = vadd.f32 %v718_v46, %v632_v23 }
 0x119   : > { %v7088_v47 = vpop.f32.mrf.mxu0 }
 0x11a   : > { %v7108_v48 = vpop.f32.mrf.mxu1  ;;  %v844_v38 = vadd.f32 %v824_v45, %v738_v31 }
 0x11b   : > { %v721_v49 = vpop.f32.mrf.mxu0 }
 0x11c   : > { %v827_v50 = vpop.f32.mrf.mxu1  ;;  %v739_v39 = vadd.f32 %v721_v49, %v633_v34 }
 0x11d   : > { %v7089_v51 = vpop.f32.mrf.mxu0 }
 0x11e   : > { %v7109_v52 = vpop.f32.mrf.mxu1  ;;  %v845_v22 = vadd.f32 %v827_v50, %v739_v39  ;;  %v8142_v39 = vld [vmem:[%s10117_s1 + $0x1d8] sm:$0xff]  }
 0x11f   : > { %v726_v53 = vpop.f32.mrf.mxu0 }
 0x120   : > { %v832_v54 = vpop.f32.mrf.mxu1  ;;  %v740_v42 = vadd.f32 %v726_v53, %v634_v21 }
 0x121   : > { %v7092_v55 = vpop.f32.mrf.mxu0 }
 0x122   : > { %v7112_v56 = vpop.f32.mrf.mxu1  ;;  %v846_v6 = vadd.f32 %v832_v54, %v740_v42  ;;  %v8143_v42 = vld [vmem:[%s10117_s1 + $0x1a8] sm:$0xff]  }
 0x123   : > { %v729_v57 = vpop.f32.mrf.mxu0 }
 0x124   : > { %v835_v58 = vpop.f32.mrf.mxu1 }
 0x125   : > { %v7093_v60 = vpop.f32.mrf.mxu0 }
 0x126   : > { %v7113_v61 = vpop.f32.mrf.mxu1 }
 0x127   : > { %v733_v62 = vpop.f32.mrf.mxu0 }
 0x128   : > { %v839_v63 = vpop.f32.mrf.mxu1 }
 0x129   : > { %v7096_v2 = vpop.f32.mrf.mxu0 }
 0x12a   : > { %v7116_v3 = vpop.f32.mrf.mxu1 }
 0x12b   : > { %v735_v4 = vpop.f32.mrf.mxu0 }
 0x12c   : > { %v841_v5 = vpop.f32.mrf.mxu1  ;;  %v8132_v4 = vld [vmem:[%s10117_s1 + $0x178] sm:$0xff]  }
 0x12d   : > { %v7097_v7 = vpop.f32.mrf.mxu0 }
 0x12e   : > { %v7117_v8 = vpop.f32.mrf.mxu1 }
 0x12f   : > { %v930_v9 = vpop.f32.mrf.mxu0 }
 0x130   : > { %v1036_v10 = vpop.f32.mrf.mxu1  ;;  %v950_v40 = vadd.f32 %v930_v9, %v844_v38  ;;  %v8134_v9 = vld [vmem:[%s10117_s1 + $0x198] sm:$0xff]  }
 0x131   : > { %v7128_v11 = vpop.f32.mrf.mxu0 }
 0x132   : > { %v7148_v12 = vpop.f32.mrf.mxu1  ;;  %v1056_v25 = vadd.f32 %v1036_v10, %v950_v40  ;;  %v8133_v10 = vld [vmem:[%s10117_s1 + $0x170] sm:$0xff]  }
 0x133   : > { %v933_v13 = vpop.f32.mrf.mxu0 }
 0x134   : > { %v1039_v14 = vpop.f32.mrf.mxu1  ;;  %v951_v43 = vadd.f32 %v933_v13, %v845_v22  ;;  %v8136_v13 = vld [vmem:[%s10117_s1 + $0x190] sm:$0xff]  }
 0x135   : > { %v7129_v15 = vpop.f32.mrf.mxu0 }
 0x136   : > { %v7149_v17 = vpop.f32.mrf.mxu1  ;;  %v1057_v45 = vadd.f32 %v1039_v14, %v951_v43  ;;  %v8135_v15 = vld [vmem:[%s10117_s1 + $0x168] sm:$0xff]  }
 0x137   : > { %v938_v18 = vpop.f32.mrf.mxu0 }
 0x138   : > { %v1044_v19 = vpop.f32.mrf.mxu1  ;;  %v952_v47 = vadd.f32 %v938_v18, %v846_v6  ;;  %v1521_v6 = vld [vmem:[#allocation2 + $0x26] sm:$0xf] }
 0x139   : > { %v7132_v20 = vpop.f32.mrf.mxu0 }
 0x13a   : > { %v7152_v27 = vpop.f32.mrf.mxu1  ;;  %v1058_v52 = vadd.f32 %v1044_v19, %v952_v47  ;;  %v8137_v19 = vld [vmem:[%s10117_s1 + $0x188] sm:$0xff]   ;;  %v8138_v20 = vld [vmem:[%s10117_s1 + $0x160] sm:$0xff]  }
 0x13b   : > { %v941_v28 = vpop.f32.mrf.mxu0 }
 0x13c   : > { %v1047_v32 = vpop.f32.mrf.mxu1 }
 0x13d   : > { %v7133_v33 = vpop.f32.mrf.mxu0 }
 0x13e   : > { %v7153_v36 = vpop.f32.mrf.mxu1 }
 0x13f   : > { %v945_v37 = vpop.f32.mrf.mxu0 }
 0x141   : > { %v7136_v59 = vpop.f32.mrf.mxu0 }
 0x142   : > { %v8141_v59 = vld [vmem:[%s10117_s1 + $0x1b0] sm:$0xff]  }
 0x143   : > { %v947_v41 = vpop.f32.mrf.mxu0 }
 0x144   : > { %v8144_v41 = vld [vmem:[%s10117_s1 + $0x1d0] sm:$0xff]  }
 0x145   : > { %v7137_v0 = vpop.f32.mrf.mxu0 }
 0x147   : > { %v1142_v44 = vpop.f32.mrf.mxu0 }
 0x148   : > { %v1162_v29 = vadd.f32 %v1142_v44, %v1056_v25  ;;  %v8145_v44 = vld [vmem:[%s10117_s1 + $0x1c8] sm:$0xff]  }
 0x149   : > { %v7168_v46 = vpop.f32.mrf.mxu0 }
 0x14a   : > { %v1170_v48 = vadd.f32 %v6289_v26, %v1162_v29  ;;  %v8147_v46 = vld [vmem:[%s10117_s1 + $0x1c0] sm:$0xff]  }
 0x14b   : > { %v1145_v30 = vpop.f32.mrf.mxu0 }
 0x14c   : > { %v1173_v49 = vmax.f32 %v1170_v48, 0.0  ;;  %v1163_v50 = vadd.f32 %v1145_v30, %v1057_v45  ;;  %v1524_v45 = vpack.c.bf16 %v1521_v6, %v1521_v6 }
 0x14d   : > { %v7169_v51 = vpop.f32.mrf.mxu0 }
 0x14e   : > { %1177 = vst.msk [vmem:[#allocation2 - $0x5] sm:$0xc0] %vm1176_vm6, %v1173_v49  ;;  %1186 = vst.msk [vmem:[#allocation2 + $0x7] sm:$0xc0] %vm1176_vm6, %v1173_v49  ;;  %v1171_v53 = vadd.f32 %v6289_v26, %v1163_v50 }
 0x14f   : > { %1180 = vst.msk [vmem:[#allocation2 - $0x7] sm:$0x80] %vm1179_vm7, %v1173_v49  ;;  %1188 = vst.msk [vmem:[#allocation2 + $0x5] sm:$0x80] %vm1179_vm7, %v1173_v49  ;;  %v1150_v54 = vpop.f32.mrf.mxu0 }
 0x150   : > { %1183 = vst.msk [vmem:[#allocation2 + $0x7] sm:$0xf] %vm191_vm2, %v1173_v49  ;;  %v1174_v55 = vmax.f32 %v1171_v53, 0.0  ;;  %v1164_v56 = vadd.f32 %v1150_v54, %v1058_v52  ;;  %v8150_v52 = vld [vmem:[%s10117_s1 + $0x218] sm:$0xff]   ;;  %v8149_v53 = vld [vmem:[%s10117_s1 + $0x1f0] sm:$0xff]   ;;  %v1051_v54 = vpop.f32.mrf.mxu1 }
 0x151   : > { %1184 = vst.msk [vmem:[#allocation2 + $0x5] sm:$0x2] %vm193_vm3, %v1173_v49  ;;  %v7172_v57 = vpop.f32.mrf.mxu0 }
 0x152   : > { %1185 = vst.msk [vmem:[#allocation2 + $0x9] sm:$0x4] %vm195_vm4, %v1173_v49  ;;  %v1172_v58 = vadd.f32 %v6289_v26, %v1164_v56  ;;  %v8146_v26 = vld [vmem:[%s10117_s1 + $0x1a0] sm:$0xff]   ;;  %v8148_v49 = vld [vmem:[%s10117_s1 + $0x1f8] sm:$0xff]   ;;  %v8152_v56 = vld [vmem:[%s10117_s1 + $0x210] sm:$0xff]   ;;  %v7156_v57 = vpop.f32.mrf.mxu1 }
 0x153   : > { %1182 = vst.msk [vmem:[#allocation2 + $0x5] sm:$0x1] %vm1181_vm8, %v1174_v55  ;;  %1189 = vst.msk [vmem:[#allocation2 + $0x11] sm:$0x1] %vm1181_vm8, %v1174_v55  ;;  %v1153_v60 = vpop.f32.mrf.mxu0 }
 0x154   : > { %1191 = vst.msk [vmem:[#allocation2 + $0xf] sm:$0xf0] %vm1190_vm9, %v1174_v55  ;;  %1202 = vst.msk [vmem:[#allocation2 + $0x1b] sm:$0xf0] %vm1190_vm9, %v1174_v55  ;;  %v1175_v61 = vmax.f32 %v1172_v58, 0.0  ;;  %v8151_v60 = vld [vmem:[%s10117_s1 + $0x1e8] sm:$0xff]  }
 0x155   : > { %1193 = vst.msk [vmem:[#allocation2 + $0xd] sm:$0x20] %vm1192_vm10, %v1174_v55  ;;  %1203 = vst.msk [vmem:[#allocation2 + $0x19] sm:$0x20] %vm1192_vm10, %v1174_v55  ;;  %v7173_v62 = vpop.f32.mrf.mxu0 }
 0x156   : > { %1195 = vst.msk [vmem:[#allocation2 + $0x11] sm:$0x40] %vm1194_vm11, %v1174_v55  ;;  %1204 = vst.msk [vmem:[#allocation2 + $0x1d] sm:$0x40] %vm1194_vm11, %v1174_v55 }
 0x157   : > { %1178 = vst.msk [vmem:[#allocation2 + $0x3] sm:$0x3] %vm182_vm5, %v1174_v55  ;;  %1187 = vst.msk [vmem:[#allocation2 + $0xf] sm:$0x3] %vm182_vm5, %v1174_v55 }
 0x158   : > { %1197 = vst.msk [vmem:[#allocation2 + $0x17] sm:$0x3c] %vm1196_vm12, %v1175_v61 }
 0x159   : > { %1199 = vst.msk [vmem:[#allocation2 + $0x15] sm:$0x8] %vm1198_vm13, %v1175_v61  ;;  %v1517_v36 = vld [vmem:[#allocation2 + $0x6] sm:$0xff] }
 0x15a   : > { %1201 = vst.msk [vmem:[#allocation2 + $0x19] sm:$0x10] %vm1200_vm14, %v1175_v61  ;;  %v1623_v30 = vld [vmem:[#allocation2 + $0x7] sm:$0xff] }
 0x15d   : > { %v1225_v23 = vld [vmem:[#allocation2 + $0x21] sm:$0xf] }
 0x15e   : > { %v1205_v63 = vld [vmem:[#allocation2] sm:$0xff]  ;;  %v1222_v3 = vld [vmem:[#allocation2 + $0x9] sm:$0xff]  ;;  %v1228_v28 = vpack.c.bf16 %v1225_v23, %v1225_v23 }
 0x15f   : > { %v1221_v2 = vld [vmem:[#allocation2 + $0x1] sm:$0xff]  ;;  %v8737_v17 = vld [vmem:[#allocation2 + $0x10] sm:$0xff] }
 0x160   : > { %v1226_v5 = vpack.c.bf16 %v1222_v3, %v1221_v2  ;;  %v8712_v7 = vld [vmem:[#allocation2 + $0x8] sm:$0xff]  ;;  %v1223_v11 = vld [vmem:[#allocation2 + $0x11] sm:$0xff]  ;;  %v1209_v27 = vld [vmem:[#allocation2 + $0x20] sm:$0xf] }
 0x161   : > { %v1210_v8 = vpack.c.bf16 %v8712_v7, %v1205_v63  ;;  %v1224_v12 = vld [vmem:[#allocation2 + $0x19] sm:$0xff]  ;;  %v1212_v31 = vpack.c.bf16 %v1209_v27, %v1209_v27  ;;  %v1411_v32 = vld [vmem:[#allocation2 + $0x2] sm:$0xff]  ;;  %v1412_v33 = vld [vmem:[#allocation2 + $0xa] sm:$0xff]  ;;  %v1734_v51 = vpack.c.bf16 %v8737_v17, %v8712_v7  ;;  %v1053_v63 = vpop.f32.mrf.mxu1 }
 0x162   : > { %7187 = vmatmul.mubr.msk.bf16.vlgmr.msra.gmra.mxu1 %vm175_vm1, %v1226_v5  ;;  %v8731_v14 = vld [vmem:[#allocation2 + $0x18] sm:$0xff]  ;;  %v1227_v16 = vpack.c.bf16 %v1224_v12, %v1223_v11  ;;  %v8768_v34 = vld [vmem:[#allocation2 + $0xe] sm:$0xff]  ;;  %v1416_v37 = vpack.c.bf16 %v1412_v33, %v1411_v32  ;;  %v1415_v29 = vld [vmem:[#allocation2 + $0x22] sm:$0xf]  ;;  %v1157_v5 = vpop.f32.mrf.mxu0 }
 0x163   : > { %7207 = vmatmul.mubr.msk.bf16.vlgmr.msra.gmra.mxu0 %vm175_vm1, %v1210_v8  ;;  %7219 = vmatpush3.bf16.msra.mxu1 %v8132_v4  ;;  %v1211_v18 = vpack.c.bf16 %v8731_v14, %v8737_v17  ;;  %v1522_v38 = vpack.c.bf16 %v8768_v34, %v1517_v36  ;;  %v1413_v21 = vld [vmem:[#allocation2 + $0x12] sm:$0xff]  ;;  %v1414_v40 = vld [vmem:[#allocation2 + $0x1a] sm:$0xff]  ;;  %v1418_v47 = vpack.c.bf16 %v1415_v29, %v1415_v29  ;;  %v8153_v3 = vld [vmem:[%s10117_s1 + $0x208] sm:$0xff]   ;;  %v7157_v4 = vpop.f32.mrf.mxu1 }
 0x164   : > { %7220 = vmatprep.subr.bf16.mxu1 %v8315_v1  ;;  %7190 = vmatprep.mubr.msk.bf16.mxu1 %vm8316_vm0, %v8315_v1  ;;  %v8790_v22 = vld [vmem:[#allocation2 + $0x16] sm:$0xff]  ;;  %v1417_v0 = vpack.c.bf16 %v1414_v40, %v1413_v21  ;;  %v8796_v25 = vld [vmem:[#allocation2 + $0x1e] sm:$0xff]  ;;  %v1627_v7 = vld [vmem:[#allocation2 + $0x27] sm:$0xf] }
 0x165   : > { %7210 = vmatprep.mubr.msk.bf16.mxu0 %vm8316_vm0, %v8315_v1  ;;  %7239 = vmatpush3.bf16.msra.mxu0 %v8134_v9  ;;  %v1523_v43 = vpack.c.bf16 %v8796_v25, %v8790_v22  ;;  %v1624_v48 = vld [vmem:[#allocation2 + $0xf] sm:$0xff]  ;;  %v1625_v55 = vld [vmem:[#allocation2 + $0x17] sm:$0xff]  ;;  %v1626_v58 = vld [vmem:[#allocation2 + $0x1f] sm:$0xff]  ;;  %v1630_v12 = vpack.c.bf16 %v1627_v7, %v1627_v7  ;;  %v2052_v21 = vpack.c.bf16 %v8790_v22, %v8768_v34 }
 0x166   : > { %7240 = vmatprep.subr.bf16.mxu0 %v8315_v1  ;;  %v1628_v50 = vpack.c.bf16 %v1624_v48, %v1623_v30  ;;  %v1629_v61 = vpack.c.bf16 %v1626_v58, %v1625_v55  ;;  %v1732_v62 = vld [vmem:[#allocation2 + $0x20] sm:$0xff]  ;;  %v1733_v9 = vld [vmem:[#allocation2 + $0x28] sm:$0xf]  ;;  %v1942_v17 = vld [vmem:[#allocation2 + $0x15] sm:$0xff] }
 0x167   : > { %7221 = vmatpush3.bf16.msra.mxu1 %v8133_v10  ;;  %v1735_v2 = vpack.c.bf16 %v1732_v62, %v8731_v14  ;;  %v8154_v8 = vld [vmem:[%s10117_s1 + $0x1e0] sm:$0xff]   ;;  %v7176_v10 = vpop.f32.mrf.mxu0  ;;  %v1736_v14 = vpack.c.bf16 %v1733_v9, %v1733_v9  ;;  %v1941_v23 = vld [vmem:[#allocation2 + $0xd] sm:$0xff]  ;;  %v8162_v34 = vld [vmem:[%s10117_s1 + $0x258] sm:$0xff]  }
 0x168   : > { %7222 = vmatprep.subr.bf16.mxu1 %v8315_v1  ;;  %v8155_v11 = vld [vmem:[%s10117_s1 + $0x200] sm:$0xff]   ;;  %v8157_v27 = vld [vmem:[%s10117_s1 + $0x230] sm:$0xff]   ;;  %v8158_v32 = vld [vmem:[%s10117_s1 + $0x228] sm:$0xff]  }
 0x169   : > { %7241 = vmatpush3.bf16.msra.mxu0 %v8136_v13  ;;  %v1159_v13 = vpop.f32.mrf.mxu0  ;;  %v8304_v33 = vld [vmem:[#allocation2 + $0x24] sm:$0xff]  ;;  %v1945_v22 = vld [vmem:[#allocation2 + $0x2d] sm:$0xf] }
 0x16a   : > { %7191 = vmatmul.mubr.msk.bf16.gmra.mxu1 %vm175_vm1, %v1227_v16  ;;  %7242 = vmatprep.subr.bf16.mxu0 %v8315_v1  ;;  %v1836_v16 = vld [vmem:[#allocation2 + $0x14] sm:$0xff]  ;;  %v8305_v36 = vld [vmem:[#allocation2 + $0x25] sm:$0xff] }
 0x16b   : > { %7211 = vmatmul.mubr.msk.bf16.gmra.mxu0 %vm175_vm1, %v1211_v18  ;;  %7223 = vmatpush3.bf16.msra.mxu1 %v8135_v15  ;;  %v7177_v15 = vpop.f32.mrf.mxu0  ;;  %v1835_v18 = vld [vmem:[#allocation2 + $0xc] sm:$0xff] }
 0x16c   : > { %7194 = vmatprep.mubr.msk.bf16.mxu1 %vm8316_vm0, %v8315_v1  ;;  %7214 = vmatprep.mubr.msk.bf16.mxu0 %vm8316_vm0, %v8315_v1  ;;  %v8306_v40 = vld [vmem:[#allocation2 + $0x26] sm:$0xff] }
 0x16d   : > { %7224 = vmatprep.subr.bf16.mxu1 %v8315_v1  ;;  %7243 = vmatpush3.bf16.msra.mxu0 %v8137_v19  ;;  %v8156_v19 = vld [vmem:[%s10117_s1 + $0x238] sm:$0xff]   ;;  %v8165_v29 = vld [vmem:[%s10117_s1 + $0x248] sm:$0xff]  }
 0x16e   : > { %7244 = vmatprep.subr.bf16.mxu0 %v8315_v1 }
 0x16f   : > { %7225 = vmatpush3.bf16.msra.mxu1 %v8138_v20  ;;  %v1840_v20 = vpack.c.bf16 %v1836_v16, %v1835_v18 }
 0x170   : > { %7258 = vmatprep.subr.bf16.mxu1 %v8315_v1 }
 0x171   : > { %7245 = vmatpush3.bf16.msra.mxu0 %v8139_v24  ;;  %v1946_v24 = vpack.c.bf16 %v1942_v17, %v1941_v23 }
 0x172   : > { %7195 = vmatmul.mubr.msk.bf16.gmra.mxu1 %vm175_vm1, %v1228_v28  ;;  %7278 = vmatprep.subr.bf16.mxu0 %v8315_v1  ;;  %v1837_v28 = vld [vmem:[#allocation2 + $0x1c] sm:$0xff] }
 0x173   : > { %7215 = vmatmul.mubr.msk.bf16.gmra.mxu0 %vm175_vm1, %v1212_v31  ;;  %7226 = vmatprep.mubr.msk.bf16.mxu1 %vm8316_vm0, %v8315_v1  ;;  %v1943_v31 = vld [vmem:[#allocation2 + $0x1d] sm:$0xff] }
 0x174   : > { %7246 = vmatprep.mubr.msk.bf16.mxu0 %vm8316_vm0, %v8315_v1 }
 0x17a   : > { %7227 = vmatmul.mubr.msk.bf16.vlgmr.msra.gmra.mxu1 %vm175_vm1, %v1416_v37  ;;  %v1947_v37 = vpack.c.bf16 %v8305_v36, %v1943_v31 }
 0x17b   : > { %7247 = vmatmul.mubr.msk.bf16.vlgmr.msra.gmra.mxu0 %vm175_vm1, %v1522_v38  ;;  %7259 = vmatpush3.bf16.msra.mxu1 %v8140_v35  ;;  %v1841_v35 = vpack.c.bf16 %v8304_v33, %v1837_v28  ;;  %v1839_v38 = vld [vmem:[#allocation2 + $0x2c] sm:$0xf] }
 0x17c   : > { %7260 = vmatprep.subr.bf16.mxu1 %v8315_v1  ;;  %7230 = vmatprep.mubr.msk.bf16.mxu1 %vm8316_vm0, %v8315_v1 }
 0x17d   : > { %7250 = vmatprep.mubr.msk.bf16.mxu0 %vm8316_vm0, %v8315_v1  ;;  %7279 = vmatpush3.bf16.msra.mxu0 %v8142_v39  ;;  %v8159_v39 = vld [vmem:[%s10117_s1 + $0x220] sm:$0xff]  }
 0x17e   : > { %7280 = vmatprep.subr.bf16.mxu0 %v8315_v1 }
 0x17f   : > { %7261 = vmatpush3.bf16.msra.mxu1 %v8141_v59  ;;  %v1842_v59 = vpack.c.bf16 %v1839_v38, %v1839_v38 }
 0x180   : > { %7262 = vmatprep.subr.bf16.mxu1 %v8315_v1 }
 0x181   : > { %7281 = vmatpush3.bf16.msra.mxu0 %v8144_v41  ;;  %v2053_v41 = vpack.c.bf16 %v8306_v40, %v8796_v25  ;;  %v8161_v25 = vld [vmem:[%s10117_s1 + $0x270] sm:$0xff]  }
 0x182   : > { %7231 = vmatmul.mubr.msk.bf16.gmra.mxu1 %vm175_vm1, %v1417_v0  ;;  %7282 = vmatprep.subr.bf16.mxu0 %v8315_v1  ;;  %v1948_v0 = vpack.c.bf16 %v1945_v22, %v1945_v22 }
 0x183   : > { %7251 = vmatmul.mubr.msk.bf16.gmra.mxu0 %vm175_vm1, %v1523_v43  ;;  %7263 = vmatpush3.bf16.msra.mxu1 %v8143_v42  ;;  %v8160_v42 = vld [vmem:[%s10117_s1 + $0x278] sm:$0xff]   ;;  %v8164_v43 = vld [vmem:[%s10117_s1 + $0x250] sm:$0xff]  }
 0x184   : > { %7234 = vmatprep.mubr.msk.bf16.mxu1 %vm8316_vm0, %v8315_v1  ;;  %7254 = vmatprep.mubr.msk.bf16.mxu0 %vm8316_vm0, %v8315_v1 }
 0x185   : > { %7264 = vmatprep.subr.bf16.mxu1 %v8315_v1  ;;  %7283 = vmatpush3.bf16.msra.mxu0 %v8145_v44  ;;  %v2051_v44 = vld [vmem:[#allocation2 + $0x2e] sm:$0xf] }
 0x186   : > { %7284 = vmatprep.subr.bf16.mxu0 %v8315_v1  ;;  %v2054_v6 = vpack.c.bf16 %v2051_v44, %v2051_v44 }
 0x187   : > { %7265 = vmatpush3.bf16.msra.mxu1 %v8146_v26  ;;  %v8163_v26 = vld [vmem:[%s10117_s1 + $0x268] sm:$0xff]  }
 0x188   : > { %7298 = vmatprep.subr.bf16.mxu1 %v8315_v1 }
 0x189   : > { %7285 = vmatpush3.bf16.msra.mxu0 %v8147_v46 }
 0x18a   : > { %7235 = vmatmul.mubr.msk.bf16.gmra.mxu1 %vm175_vm1, %v1418_v47  ;;  %7318 = vmatprep.subr.bf16.mxu0 %v8315_v1  ;;  %v8167_v47 = vld [vmem:[%s10117_s1 + $0x240] sm:$0xff]  }
 0x18b   : > { %7255 = vmatmul.mubr.msk.bf16.gmra.mxu0 %vm175_vm1, %v1524_v45  ;;  %7266 = vmatprep.mubr.msk.bf16.mxu1 %vm8316_vm0, %v8315_v1  ;;  %v8166_v45 = vld [vmem:[%s10117_s1 + $0x260] sm:$0xff]  }
 0x18c   : > { %7286 = vmatprep.mubr.msk.bf16.mxu0 %vm8316_vm0, %v8315_v1 }
 0x192   : > { %7267 = vmatmul.mubr.msk.bf16.vlgmr.msra.gmra.mxu1 %vm175_vm1, %v1628_v50 }
 0x193   : > { %7287 = vmatmul.mubr.msk.bf16.vlgmr.msra.gmra.mxu0 %vm175_vm1, %v1734_v51  ;;  %7299 = vmatpush3.bf16.msra.mxu1 %v8148_v49 }
 0x194   : > { %7300 = vmatprep.subr.bf16.mxu1 %v8315_v1  ;;  %7270 = vmatprep.mubr.msk.bf16.mxu1 %vm8316_vm0, %v8315_v1 }
 0x195   : > { %7290 = vmatprep.mubr.msk.bf16.mxu0 %vm8316_vm0, %v8315_v1  ;;  %7319 = vmatpush3.bf16.msra.mxu0 %v8150_v52 }
 0x196   : > { %7320 = vmatprep.subr.bf16.mxu0 %v8315_v1 }
 0x197   : > { %7301 = vmatpush3.bf16.msra.mxu1 %v8149_v53 }
 0x198   : > { %7302 = vmatprep.subr.bf16.mxu1 %v8315_v1 }
 0x199   : > { %7321 = vmatpush3.bf16.msra.mxu0 %v8152_v56 }
 0x19a   : > { %7271 = vmatmul.mubr.msk.bf16.gmra.mxu1 %vm175_vm1, %v1629_v61  ;;  %7322 = vmatprep.subr.bf16.mxu0 %v8315_v1 }
 0x19b   : > { %7291 = vmatmul.mubr.msk.bf16.gmra.mxu0 %vm175_vm1, %v1735_v2  ;;  %7303 = vmatpush3.bf16.msra.mxu1 %v8151_v60 }
 0x19c   : > { %7274 = vmatprep.mubr.msk.bf16.mxu1 %vm8316_vm0, %v8315_v1  ;;  %7294 = vmatprep.mubr.msk.bf16.mxu0 %vm8316_vm0, %v8315_v1 }
 0x19d   : > { %7304 = vmatprep.subr.bf16.mxu1 %v8315_v1  ;;  %7323 = vmatpush3.bf16.msra.mxu0 %v8153_v3 }
 0x19e   : > { %7324 = vmatprep.subr.bf16.mxu0 %v8315_v1 }
 0x19f   : > { %7305 = vmatpush3.bf16.msra.mxu1 %v8154_v8 }
 0x1a0   : > { %7338 = vmatprep.subr.bf16.mxu1 %v8315_v1 }
 0x1a1   : > { %7325 = vmatpush3.bf16.msra.mxu0 %v8155_v11 }
 0x1a2   : > { %7275 = vmatmul.mubr.msk.bf16.gmra.mxu1 %vm175_vm1, %v1630_v12  ;;  %7358 = vmatprep.subr.bf16.mxu0 %v8315_v1 }
 0x1a3   : > { %7295 = vmatmul.mubr.msk.bf16.gmra.mxu0 %vm175_vm1, %v1736_v14  ;;  %7306 = vmatprep.mubr.msk.bf16.mxu1 %vm8316_vm0, %v8315_v1 }
 0x1a4   : > { %7326 = vmatprep.mubr.msk.bf16.mxu0 %vm8316_vm0, %v8315_v1 }
 0x1aa   : > { %7307 = vmatmul.mubr.msk.bf16.vlgmr.msra.gmra.mxu1 %vm175_vm1, %v1840_v20 }
 0x1ab   : > { %7327 = vmatmul.mubr.msk.bf16.vlgmr.msra.gmra.mxu0 %vm175_vm1, %v1946_v24  ;;  %7339 = vmatpush3.bf16.msra.mxu1 %v8156_v19 }
 0x1ac   : > { %7340 = vmatprep.subr.bf16.mxu1 %v8315_v1  ;;  %7310 = vmatprep.mubr.msk.bf16.mxu1 %vm8316_vm0, %v8315_v1 }
 0x1ad   : > { %7330 = vmatprep.mubr.msk.bf16.mxu0 %vm8316_vm0, %v8315_v1  ;;  %7359 = vmatpush3.bf16.msra.mxu0 %v8160_v42 }
 0x1ae   : > { %7360 = vmatprep.subr.bf16.mxu0 %v8315_v1 }
 0x1af   : > { %7341 = vmatpush3.bf16.msra.mxu1 %v8157_v27 }
 0x1b0   : > { %7342 = vmatprep.subr.bf16.mxu1 %v8315_v1 }
 0x1b1   : > { %7361 = vmatpush3.bf16.msra.mxu0 %v8161_v25 }
 0x1b2   : > { %7311 = vmatmul.mubr.msk.bf16.gmra.mxu1 %vm175_vm1, %v1841_v35  ;;  %7362 = vmatprep.subr.bf16.mxu0 %v8315_v1 }
 0x1b3   : > { %7331 = vmatmul.mubr.msk.bf16.gmra.mxu0 %vm175_vm1, %v1947_v37  ;;  %7343 = vmatpush3.bf16.msra.mxu1 %v8158_v32 }
 0x1b4   : > { %7314 = vmatprep.mubr.msk.bf16.mxu1 %vm8316_vm0, %v8315_v1  ;;  %7344 = vmatprep.subr.bf16.mxu1 %v8315_v1 }
 0x1b5   : > { %7334 = vmatprep.mubr.msk.bf16.mxu0 %vm8316_vm0, %v8315_v1  ;;  %7363 = vmatpush3.bf16.msra.mxu0 %v8163_v26 }
 0x1b6   : > { %7364 = vmatprep.subr.bf16.mxu0 %v8315_v1 }
 0x1b7   : > { %7345 = vmatpush3.bf16.msra.mxu1 %v8159_v39 }
 0x1b8   : > { %7378 = vmatprep.subr.bf16.mxu1 %v8315_v1 }
 0x1b9   : > { %7365 = vmatpush3.bf16.msra.mxu0 %v8166_v45 }
 0x1ba   : > { %7315 = vmatmul.mubr.msk.bf16.gmra.mxu1 %vm175_vm1, %v1842_v59  ;;  %7398 = vmatprep.subr.bf16.mxu0 %v8315_v1 }
 0x1bb   : > { %7346 = vmatprep.mubr.msk.bf16.mxu1 %vm8316_vm0, %v8315_v1  ;;  %7335 = vmatmul.mubr.msk.bf16.gmra.mxu0 %vm175_vm1, %v1948_v0 }
 0x1bc   : > { %7366 = vmatprep.mubr.msk.bf16.mxu0 %vm8316_vm0, %v8315_v1 }
 0x1c2   : > { %7347 = vmatmul.mubr.msk.bf16.vlgmr.msra.gmra.mxu1 %vm175_vm1, %v2052_v21 }
 0x1c3   : > { %7350 = vmatprep.mubr.msk.bf16.mxu1 %vm8316_vm0, %v8315_v1  ;;  %7379 = vmatpush3.bf16.msra.mxu1 %v8162_v34 }
 0x1c4   : > { %7380 = vmatprep.subr.bf16.mxu1 %v8315_v1 }
 0x1c7   : > { %7381 = vmatpush3.bf16.msra.mxu1 %v8164_v43 }
 0x1c8   : > { %7382 = vmatprep.subr.bf16.mxu1 %v8315_v1 }
 0x1ca   : > { %7351 = vmatmul.mubr.msk.bf16.gmra.mxu1 %vm175_vm1, %v2053_v41 }
 0x1cb   : > { %7354 = vmatprep.mubr.msk.bf16.mxu1 %vm8316_vm0, %v8315_v1  ;;  %7383 = vmatpush3.bf16.msra.mxu1 %v8165_v29 }
 0x1cc   : > { %7384 = vmatprep.subr.bf16.mxu1 %v8315_v1 }
 0x1cf   : > { %7385 = vmatpush3.bf16.msra.mxu1 %v8167_v47 }
 0x1d0   : > { %7418 = vmatprep.subr.bf16.mxu1 %v8315_v1 }
 0x1d2   : > { %7355 = vmatmul.mubr.msk.bf16.gmra.mxu1 %vm175_vm1, %v2054_v6 }
 0x1d3   : > { %7386 = vmatprep.mubr.msk.bf16.mxu1 %vm8316_vm0, %v8315_v1 }
 0x222   : > { %v1304_v46 = vpop.f32.mrf.mxu1 }
 0x223   : > { %v1391_v48 = vpop.f32.mrf.mxu0 }
 0x224   : > { %v8954_v30 = vadd.f32 %v1391_v48, %v1304_v46  ;;  %v7188_v49 = vpop.f32.mrf.mxu1 }
 0x225   : > { %v7208_v50 = vpop.f32.mrf.mxu0 }
 0x226   : > { %v1307_v51 = vpop.f32.mrf.mxu1 }
 0x227   : > { %v1394_v52 = vpop.f32.mrf.mxu0 }
 0x228   : > { %v8960_v53 = vadd.f32 %v1394_v52, %v1307_v51  ;;  %v7189_v54 = vpop.f32.mrf.mxu1 }
 0x229   : > { %v7209_v55 = vpop.f32.mrf.mxu0 }
 0x22a   : > { %v1312_v56 = vpop.f32.mrf.mxu1 }
 0x22b   : > { %v1399_v57 = vpop.f32.mrf.mxu0 }
 0x22c   : > { %v8962_v58 = vadd.f32 %v1399_v57, %v1312_v56  ;;  %v7192_v60 = vpop.f32.mrf.mxu1 }
 0x22d   : > { %v7212_v61 = vpop.f32.mrf.mxu0 }
 0x22e   : > { %v1315_v62 = vpop.f32.mrf.mxu1 }
 0x22f   : > { %v1402_v63 = vpop.f32.mrf.mxu0 }
 0x230   : > { %v7193_v2 = vpop.f32.mrf.mxu1 }
 0x231   : > { %v7213_v3 = vpop.f32.mrf.mxu0 }
 0x232   : > { %v1319_v4 = vpop.f32.mrf.mxu1 }
 0x233   : > { %v1406_v5 = vpop.f32.mrf.mxu0 }
 0x234   : > { %v7196_v7 = vpop.f32.mrf.mxu1 }
 0x235   : > { %v7216_v8 = vpop.f32.mrf.mxu0 }
 0x236   : > { %v1321_v9 = vpop.f32.mrf.mxu1 }
 0x237   : > { %v1408_v10 = vpop.f32.mrf.mxu0 }
 0x238   : > { %v7197_v11 = vpop.f32.mrf.mxu1 }
 0x239   : > { %v7217_v12 = vpop.f32.mrf.mxu0 }
 0x23a   : > { %v1494_v13 = vpop.f32.mrf.mxu1 }
 0x23b   : > { %v1600_v14 = vpop.f32.mrf.mxu0  ;;  %v1514_v8 = vadd.f32 %v1494_v13, %v8954_v30 }
 0x23c   : > { %v7228_v15 = vpop.f32.mrf.mxu1 }
 0x23d   : > { %v7248_v16 = vpop.f32.mrf.mxu0  ;;  %v1620_v15 = vadd.f32 %v1600_v14, %v1514_v8 }
 0x23e   : > { %v1497_v17 = vpop.f32.mrf.mxu1 }
 0x23f   : > { %v1603_v18 = vpop.f32.mrf.mxu0  ;;  %v1515_v16 = vadd.f32 %v1497_v17, %v8960_v53 }
 0x240   : > { %v7229_v19 = vpop.f32.mrf.mxu1 }
 0x241   : > { %v7249_v20 = vpop.f32.mrf.mxu0 }
 0x242   : > { %v1502_v23 = vpop.f32.mrf.mxu1 }
 0x243   : > { %v8964_v24 = vpop.f32.mrf.mxu0 }
 0x244   : > { %v7232_v27 = vpop.f32.mrf.mxu1 }
 0x245   : > { %v7252_v28 = vpop.f32.mrf.mxu0 }
 0x246   : > { %v1505_v31 = vpop.f32.mrf.mxu1 }
 0x247   : > { %v1611_v32 = vpop.f32.mrf.mxu0 }
 0x248   : > { %v7233_v33 = vpop.f32.mrf.mxu1  ;;  %v1621_v32 = vadd.f32 %v1603_v18, %v1515_v16  ;;  %v6353_v18 = vld [vmem:[%s10118_s2 + $0x1] ss:$0 sm:$0xff] }
 0x249   : > { %v7253_v35 = vpop.f32.mrf.mxu0  ;;  %v1516_v33 = vadd.f32 %v1502_v23, %v8962_v58 }
 0x24a   : > { %v1509_v36 = vpop.f32.mrf.mxu1 }
 0x24b   : > { %v1615_v37 = vpop.f32.mrf.mxu0  ;;  %v1622_v13 = vadd.f32 %v8964_v24, %v1516_v33  ;;  %v8172_v33 = vld [vmem:[%s10117_s1 + $0x2b0] sm:$0xff]  }
 0x24c   : > { %v7236_v38 = vpop.f32.mrf.mxu1 }
 0x24d   : > { %v7256_v39 = vpop.f32.mrf.mxu0 }
 0x24e   : > { %v1511_v59 = vpop.f32.mrf.mxu1 }
 0x24f   : > { %v1617_v21 = vpop.f32.mrf.mxu0 }
 0x250   : > { %v7237_v40 = vpop.f32.mrf.mxu1 }
 0x251   : > { %v7257_v41 = vpop.f32.mrf.mxu0 }
 0x252   : > { %v1706_v42 = vpop.f32.mrf.mxu1 }
 0x253   : > { %v1812_v34 = vpop.f32.mrf.mxu0  ;;  %v1726_v27 = vadd.f32 %v1706_v42, %v1620_v15  ;;  %v2161_v42 = vld [vmem:[#allocation3] sm:$0xf] }
 0x254   : > { %v7268_v22 = vpop.f32.mrf.mxu1 }
 0x255   : > { %v7288_v0 = vpop.f32.mrf.mxu0  ;;  %v1832_v37 = vadd.f32 %v1812_v34, %v1726_v27  ;;  %v8170_v27 = vld [vmem:[%s10117_s1 + $0x2b8] sm:$0xff]  }
 0x256   : > { %v1709_v25 = vpop.f32.mrf.mxu1 }
 0x257   : > { %v1815_v43 = vpop.f32.mrf.mxu0  ;;  %v1727_v38 = vadd.f32 %v1709_v25, %v1621_v32 }
 0x258   : > { %v7269_v44 = vpop.f32.mrf.mxu1 }
 0x259   : > { %v7289_v26 = vpop.f32.mrf.mxu0  ;;  %v1833_v14 = vadd.f32 %v1815_v43, %v1727_v38 }
 0x25a   : > { %v1714_v6 = vpop.f32.mrf.mxu1 }
 0x25b   : > { %v1820_v29 = vpop.f32.mrf.mxu0  ;;  %v1728_v21 = vadd.f32 %v1714_v6, %v1622_v13  ;;  %v8173_v13 = vld [vmem:[%s10117_s1 + $0x2a8] sm:$0xff]  }
 0x25c   : > { %v7272_v46 = vpop.f32.mrf.mxu1 }
 0x25d   : > { %v7292_v45 = vpop.f32.mrf.mxu0  ;;  %v1834_v58 = vadd.f32 %v1820_v29, %v1728_v21 }
 0x25e   : > { %v1717_v47 = vpop.f32.mrf.mxu1  ;;  %v2174_v45 = vld [vmem:[#allocation3 + $0x8] sm:$0xf] }
 0x25f   : > { %v1823_v48 = vpop.f32.mrf.mxu0 }
 0x260   : > { %v7273_v49 = vpop.f32.mrf.mxu1 }
 0x261   : > { %v7293_v50 = vpop.f32.mrf.mxu0  ;;  %v2164_v49 = vld [vmem:[#allocation3 + $0x4] sm:$0xf] }
 0x262   : > { %v1721_v51 = vpop.f32.mrf.mxu1 }
 0x263   : > { %v1827_v52 = vpop.f32.mrf.mxu0 }
 0x264   : > { %v7276_v54 = vpop.f32.mrf.mxu1 }
 0x265   : > { %v7296_v55 = vpop.f32.mrf.mxu0 }
 0x266   : > { %v1723_v56 = vpop.f32.mrf.mxu1 }
 0x267   : > { %v1829_v57 = vpop.f32.mrf.mxu0 }
 0x268   : > { %v7277_v60 = vpop.f32.mrf.mxu1 }
 0x269   : > { %v7297_v61 = vpop.f32.mrf.mxu0  ;;  %v2179_v60 = vld [vmem:[#allocation3 + $0xc] sm:$0xf] }
 0x26a   : > { %v1918_v62 = vpop.f32.mrf.mxu1 }
 0x26b   : > { %v2024_v63 = vpop.f32.mrf.mxu0  ;;  %v1938_v39 = vadd.f32 %v1918_v62, %v1832_v37 }
 0x26c   : > { %v7308_v2 = vpop.f32.mrf.mxu1 }
 0x26d   : > { %v7328_v3 = vpop.f32.mrf.mxu0  ;;  %v2044_v17 = vadd.f32 %v2024_v63, %v1938_v39  ;;  %v8174_v39 = vld [vmem:[%s10117_s1 + $0x280] sm:$0xff]  }
 0x26e   : > { %v1921_v4 = vpop.f32.mrf.mxu1 }
 0x26f   : > { %v2027_v5 = vpop.f32.mrf.mxu0  ;;  %v1939_v40 = vadd.f32 %v1921_v4, %v1833_v14  ;;  %v8175_v14 = vld [vmem:[%s10117_s1 + $0x2a0] sm:$0xff]  }
 0x270   : > { %v7309_v7 = vpop.f32.mrf.mxu1 }
 0x271   : > { %v7329_v9 = vpop.f32.mrf.mxu0  ;;  %v2045_v22 = vadd.f32 %v2027_v5, %v1939_v40 }
 0x272   : > { %v1926_v10 = vpop.f32.mrf.mxu1 }
 0x273   : > { %v2032_v11 = vpop.f32.mrf.mxu0  ;;  %v1940_v0 = vadd.f32 %v1926_v10, %v1834_v58  ;;  %v8168_v10 = vld [vmem:[%s10117_s1 + $0x298] sm:$0xff]  }
 0x274   : > { %v7312_v12 = vpop.f32.mrf.mxu1 }
 0x275   : > { %v7332_v19 = vpop.f32.mrf.mxu0  ;;  %v2046_v6 = vadd.f32 %v2032_v11, %v1940_v0  ;;  %v8177_v0 = vld [vmem:[%s10117_s1 + $0x2d0] sm:$0xff]  }
 0x276   : > { %v1929_v20 = vpop.f32.mrf.mxu1 }
 0x277   : > { %v2035_v28 = vpop.f32.mrf.mxu0 }
 0x278   : > { %v7313_v31 = vpop.f32.mrf.mxu1  ;;  %v8169_v28 = vld [vmem:[%s10117_s1 + $0x290] sm:$0xff]  }
 0x279   : > { %v7333_v35 = vpop.f32.mrf.mxu0 }
 0x27a   : > { %v1933_v36 = vpop.f32.mrf.mxu1 }
 0x27b   : > { %v8171_v36 = vld [vmem:[%s10117_s1 + $0x288] sm:$0xff]  }
 0x27c   : > { %v7316_v30 = vpop.f32.mrf.mxu1 }
 0x27e   : > { %v1935_v59 = vpop.f32.mrf.mxu1 }
 0x280   : > { %v7317_v53 = vpop.f32.mrf.mxu1 }
 0x282   : > { %v2130_v41 = vpop.f32.mrf.mxu1 }
 0x283   : > { %v2150_v23 = vadd.f32 %v2130_v41, %v2044_v17 }
 0x284   : > { %v7348_v34 = vpop.f32.mrf.mxu1 }
 0x285   : > { %v2158_v25 = vadd.f32 %v6353_v18, %v2150_v23  ;;  %v8176_v23 = vld [vmem:[%s10117_s1 + $0x2d8] sm:$0xff]  }
 0x286   : > { %v2133_v24 = vpop.f32.mrf.mxu1 }
 0x287   : > { %v2162_v44 = vadd.f32 %v2161_v42, %v2158_v25  ;;  %v2151_v26 = vadd.f32 %v2133_v24, %v2045_v22  ;;  %v2168_v48 = vrot.slane %v2158_v25, 6  ;;  %v8178_v22 = vld [vmem:[%s10117_s1 + $0x2f8] sm:$0xff]  }
 0x288   : > { %v7349_v43 = vpop.f32.mrf.mxu1 }
 0x289   : > { %2163 = vst.msk [vmem:[#allocation3] sm:$0xf] %vm191_vm2, %v2162_v44  ;;  %v2159_v46 = vadd.f32 %v6353_v18, %v2151_v26  ;;  %v8180_v44 = vld [vmem:[%s10117_s1 + $0x2f0] sm:$0xff]   ;;  %v8179_v43 = vld [vmem:[%s10117_s1 + $0x2c8] sm:$0xff]  }
 0x28a   : > { %v2138_v47 = vpop.f32.mrf.mxu1 }
 0x28b   : > { %v2169_v29 = vrot.slane %v2159_v46, 6  ;;  %v2175_v50 = vrot.slane %v2159_v46, 4  ;;  %v2152_v51 = vadd.f32 %v2138_v47, %v2046_v6  ;;  %v8181_v47 = vld [vmem:[%s10117_s1 + $0x2e8] sm:$0xff]  }
 0x28c   : > { %v7352_v52 = vpop.f32.mrf.mxu1 }
 0x28d   : > { %v2170_v54 = vsel %vm2167_vm15, %v2168_v48, %v2169_v29  ;;  %v2177_v55 = vadd.f32 %v2175_v50, %v2174_v45  ;;  %v2160_v56 = vadd.f32 %v6353_v18, %v2152_v51  ;;  %v8182_v48 = vld [vmem:[%s10117_s1 + $0x2c0] sm:$0xff]  }
 0x28e   : > { %v2172_v57 = vadd.f32 %v2170_v54, %v2164_v49  ;;  %v2141_v61 = vpop.f32.mrf.mxu1  ;;  %v2525_v49 = vld [vmem:[#allocation2 + $0x26] sm:$0xf] }
 0x28f   : > { %2178 = vst.msk [vmem:[#allocation3 + $0x8] sm:$0xf] %vm191_vm2, %v2177_v55  ;;  %v2181_v62 = vrot.slane %v2160_v56, 2  ;;  %v8183_v50 = vld [vmem:[%s10117_s1 + $0x2e0] sm:$0xff]   ;;  %v2528_v51 = vpack.c.bf16 %v2525_v49, %v2525_v49  ;;  %v8184_v56 = vld [vmem:[%s10117_s1 + $0x318] sm:$0xff]  }
 0x290   : > { %v2189_v63 = vld [vmem:[#allocation3] sm:$0xf]  ;;  %2173 = vst.msk [vmem:[#allocation3 + $0x4] sm:$0xf] %vm191_vm2, %v2172_v57  ;;  %v7353_v2 = vpop.f32.mrf.mxu1 }
 0x291   : > { %2191 = vst.msk [vmem:[#allocation2 + $0x5] sm:$0x2] %vm193_vm3, %v2189_v63  ;;  %v2183_v3 = vadd.f32 %v2181_v62, %v2179_v60  ;;  %v8186_v61 = vld [vmem:[%s10117_s1 + $0x338] sm:$0xff]   ;;  %v8185_v62 = vld [vmem:[%s10117_s1 + $0x310] sm:$0xff]  }
 0x292   : > { %2192 = vst.msk [vmem:[#allocation2 + $0x9] sm:$0x4] %vm195_vm4, %v2189_v63  ;;  %v8188_v2 = vld [vmem:[%s10117_s1 + $0x330] sm:$0xff]  }
 0x293   : > { %2190 = vst.msk [vmem:[#allocation2 + $0x7] sm:$0xf] %vm191_vm2, %v2189_v63  ;;  %2184 = vst.msk [vmem:[#allocation3 + $0xc] sm:$0xf] %vm191_vm2, %v2183_v3 }
 0x296   : > { %v2197_v4 = vld [vmem:[#allocation3 + $0x8] sm:$0xf] }
 0x297   : > { %v2205_v5 = vld [vmem:[#allocation3 + $0x8] sm:$0xf]  ;;  %v2185_v7 = vld [vmem:[#allocation3 + $0x4] sm:$0xf]  ;;  %2198 = vst.msk [vmem:[#allocation2 + $0x13] sm:$0xf] %vm191_vm2, %v2197_v4 }
 0x298   : > { %v2193_v8 = vld [vmem:[#allocation3 + $0x4] sm:$0xf]  ;;  %2199 = vst.msk [vmem:[#allocation2 + $0x11] sm:$0x2] %vm193_vm3, %v2197_v4  ;;  %2207 = vst.msk [vmem:[#allocation2 + $0x1d] sm:$0x2] %vm193_vm3, %v2205_v5 }
 0x299   : > { %2200 = vst.msk [vmem:[#allocation2 + $0x15] sm:$0x4] %vm195_vm4, %v2197_v4  ;;  %2208 = vst.msk [vmem:[#allocation2 + $0x21] sm:$0x4] %vm195_vm4, %v2205_v5  ;;  %v8187_v4 = vld [vmem:[%s10117_s1 + $0x308] sm:$0xff]  }
 0x29a   : > { %2206 = vst.msk [vmem:[#allocation2 + $0x1f] sm:$0xf] %vm191_vm2, %v2205_v5  ;;  %2186 = vst.msk [vmem:[#allocation2 + $0x1] sm:$0xf] %vm191_vm2, %v2185_v7  ;;  %v2201_v9 = vld [vmem:[#allocation3 + $0xc] sm:$0xf] }
 0x29b   : > { %2187 = vst.msk [vmem:[#allocation2 - $0x1] sm:$0x2] %vm193_vm3, %v2185_v7  ;;  %2195 = vst.msk [vmem:[#allocation2 + $0xb] sm:$0x2] %vm193_vm3, %v2193_v8 }
 0x29c   : > { %2188 = vst.msk [vmem:[#allocation2 + $0x3] sm:$0x4] %vm195_vm4, %v2185_v7  ;;  %2196 = vst.msk [vmem:[#allocation2 + $0xf] sm:$0x4] %vm195_vm4, %v2193_v8 }
 0x29d   : > { %2194 = vst.msk [vmem:[#allocation2 + $0xd] sm:$0xf] %vm191_vm2, %v2193_v8  ;;  %2202 = vst.msk [vmem:[#allocation2 + $0x19] sm:$0xf] %vm191_vm2, %v2201_v9 }
 0x29e   : > { %2203 = vst.msk [vmem:[#allocation2 + $0x17] sm:$0x2] %vm193_vm3, %v2201_v9 }
 0x29f   : > { %2204 = vst.msk [vmem:[#allocation2 + $0x1b] sm:$0x4] %vm195_vm4, %v2201_v9  ;;  %v8189_v9 = vld [vmem:[%s10117_s1 + $0x328] sm:$0xff]  }
 0x2a1   : > { %v2229_v59 = vld [vmem:[#allocation2 + $0x21] sm:$0xf] }
 0x2a2   : > { %v2213_v21 = vld [vmem:[#allocation2 + $0x20] sm:$0xf]  ;;  %v2232_v53 = vpack.c.bf16 %v2229_v59, %v2229_v59 }
 0x2a3   : > { %v2209_v11 = vld [vmem:[#allocation2] sm:$0xff]  ;;  %v2216_v17 = vpack.c.bf16 %v2213_v21, %v2213_v21  ;;  %v8193_v21 = vld [vmem:[%s10117_s1 + $0x350] sm:$0xff]  }
 0x2a4   : > { %v2225_v12 = vld [vmem:[#allocation2 + $0x1] sm:$0xff]  ;;  %v2226_v15 = vld [vmem:[#allocation2 + $0x9] sm:$0xff] }
 0x2a5   : > { %v2230_v16 = vpack.c.bf16 %v2226_v15, %v2225_v12  ;;  %v8999_v19 = vld [vmem:[#allocation2 + $0x8] sm:$0xff]  ;;  %v2227_v31 = vld [vmem:[#allocation2 + $0x11] sm:$0xff]  ;;  %v9083_v46 = vld [vmem:[#allocation2 + $0x1e] sm:$0xff]  ;;  %v2039_v12 = vpop.f32.mrf.mxu0 }
 0x2a6   : > { %v2214_v20 = vpack.c.bf16 %v8999_v19, %v2209_v11  ;;  %v2228_v32 = vld [vmem:[#allocation2 + $0x19] sm:$0xff]  ;;  %v9024_v38 = vld [vmem:[#allocation2 + $0x10] sm:$0xff]  ;;  %v2415_v40 = vld [vmem:[#allocation2 + $0x2] sm:$0xff] }
 0x2a7   : > { %7367 = vmatmul.mubr.msk.bf16.vlgmr.msra.gmra.mxu0 %vm175_vm1, %v2230_v16  ;;  %v9018_v35 = vld [vmem:[#allocation2 + $0x18] sm:$0xff]  ;;  %v2231_v37 = vpack.c.bf16 %v2228_v32, %v2227_v31  ;;  %v2416_v41 = vld [vmem:[#allocation2 + $0xa] sm:$0xff]  ;;  %v2419_v29 = vld [vmem:[#allocation2 + $0x22] sm:$0xf]  ;;  %v2738_v60 = vpack.c.bf16 %v9024_v38, %v8999_v19  ;;  %v7336_v19 = vpop.f32.mrf.mxu0  ;;  %v2145_v32 = vpop.f32.mrf.mxu1 }
 0x2a8   : > { %7387 = vmatmul.mubr.msk.bf16.vlgmr.msra.gmra.mxu1 %vm175_vm1, %v2214_v20  ;;  %7399 = vmatpush3.bf16.msra.mxu0 %v8168_v10  ;;  %v2215_v30 = vpack.c.bf16 %v9018_v35, %v9024_v38  ;;  %v2521_v18 = vld [vmem:[#allocation2 + $0x6] sm:$0xff]  ;;  %v9055_v58 = vld [vmem:[#allocation2 + $0xe] sm:$0xff]  ;;  %v2420_v42 = vpack.c.bf16 %v2416_v41, %v2415_v40  ;;  %v2418_v24 = vld [vmem:[#allocation2 + $0x1a] sm:$0xff]  ;;  %v2422_v52 = vpack.c.bf16 %v2419_v29, %v2419_v29 }
 0x2a9   : > { %7400 = vmatprep.subr.bf16.mxu0 %v8315_v1  ;;  %7370 = vmatprep.mubr.msk.bf16.mxu0 %vm8316_vm0, %v8315_v1  ;;  %v2526_v34 = vpack.c.bf16 %v9055_v58, %v2521_v18  ;;  %v2417_v25 = vld [vmem:[#allocation2 + $0x12] sm:$0xff]  ;;  %v2627_v54 = vld [vmem:[#allocation2 + $0x7] sm:$0xff]  ;;  %v2630_v3 = vld [vmem:[#allocation2 + $0x1f] sm:$0xff] }
 0x2aa   : > { %7390 = vmatprep.mubr.msk.bf16.mxu1 %vm8316_vm0, %v8315_v1  ;;  %7419 = vmatpush3.bf16.msra.mxu1 %v8170_v27  ;;  %v9077_v26 = vld [vmem:[#allocation2 + $0x16] sm:$0xff]  ;;  %v2421_v6 = vpack.c.bf16 %v2418_v24, %v2417_v25  ;;  %v2736_v7 = vld [vmem:[#allocation2 + $0x20] sm:$0xff]  ;;  %v2737_v15 = vld [vmem:[#allocation2 + $0x28] sm:$0xf] }
 0x2ab   : > { %7420 = vmatprep.subr.bf16.mxu1 %v8315_v1  ;;  %v2527_v45 = vpack.c.bf16 %v9083_v46, %v9077_v26  ;;  %v2628_v55 = vld [vmem:[#allocation2 + $0xf] sm:$0xff]  ;;  %v2629_v63 = vld [vmem:[#allocation2 + $0x17] sm:$0xff]  ;;  %v2739_v8 = vpack.c.bf16 %v2736_v7, %v9018_v35  ;;  %v2631_v10 = vld [vmem:[#allocation2 + $0x27] sm:$0xf]  ;;  %v2740_v27 = vpack.c.bf16 %v2737_v15, %v2737_v15  ;;  %v3056_v25 = vpack.c.bf16 %v9077_v26, %v9055_v58 }
 0x2ac   : > { %7401 = vmatpush3.bf16.msra.mxu0 %v8169_v28  ;;  %v2632_v57 = vpack.c.bf16 %v2628_v55, %v2627_v54  ;;  %v2633_v5 = vpack.c.bf16 %v2630_v3, %v2629_v63  ;;  %v8190_v11 = vld [vmem:[%s10117_s1 + $0x300] sm:$0xff]   ;;  %v2634_v20 = vpack.c.bf16 %v2631_v10, %v2631_v10  ;;  %v2041_v28 = vpop.f32.mrf.mxu0  ;;  %v2840_v35 = vld [vmem:[#allocation2 + $0x14] sm:$0xff]  ;;  %v2839_v38 = vld [vmem:[#allocation2 + $0xc] sm:$0xff] }
 0x2ad   : > { %7402 = vmatprep.subr.bf16.mxu0 %v8315_v1  ;;  %v8191_v16 = vld [vmem:[%s10117_s1 + $0x320] sm:$0xff]   ;;  %v2945_v59 = vld [vmem:[#allocation2 + $0xd] sm:$0xff]  ;;  %v8198_v26 = vld [vmem:[%s10117_s1 + $0x378] sm:$0xff]  }
 0x2ae   : > { %7421 = vmatpush3.bf16.msra.mxu1 %v8172_v33  ;;  %v7337_v31 = vpop.f32.mrf.mxu0  ;;  %v7356_v33 = vpop.f32.mrf.mxu1  ;;  %v2947_v40 = vld [vmem:[#allocation2 + $0x1d] sm:$0xff]  ;;  %v9182_v41 = vld [vmem:[#allocation2 + $0x25] sm:$0xff]  ;;  %v8197_v58 = vld [vmem:[%s10117_s1 + $0x390] sm:$0xff]  }
 0x2af   : > { %7371 = vmatmul.mubr.msk.bf16.gmra.mxu0 %vm175_vm1, %v2231_v37  ;;  %7422 = vmatprep.subr.bf16.mxu1 %v8315_v1  ;;  %v2946_v37 = vld [vmem:[#allocation2 + $0x15] sm:$0xff]  ;;  %v8194_v18 = vld [vmem:[%s10117_s1 + $0x348] sm:$0xff]  }
 0x2b0   : > { %7391 = vmatmul.mubr.msk.bf16.gmra.mxu1 %vm175_vm1, %v2215_v30  ;;  %7403 = vmatpush3.bf16.msra.mxu0 %v8171_v36  ;;  %v2147_v36 = vpop.f32.mrf.mxu1  ;;  %v8192_v30 = vld [vmem:[%s10117_s1 + $0x358] sm:$0xff]   ;;  %v9209_v24 = vld [vmem:[#allocation2 + $0x26] sm:$0xff] }
 0x2b1   : > { %7374 = vmatprep.mubr.msk.bf16.mxu0 %vm8316_vm0, %v8315_v1  ;;  %7394 = vmatprep.mubr.msk.bf16.mxu1 %vm8316_vm0, %v8315_v1  ;;  %v8201_v29 = vld [vmem:[%s10117_s1 + $0x368] sm:$0xff]  }
 0x2b2   : > { %7404 = vmatprep.subr.bf16.mxu0 %v8315_v1  ;;  %7423 = vmatpush3.bf16.msra.mxu1 %v8173_v13  ;;  %v7357_v13 = vpop.f32.mrf.mxu1 }
 0x2b3   : > { %7424 = vmatprep.subr.bf16.mxu1 %v8315_v1 }
 0x2b4   : > { %7405 = vmatpush3.bf16.msra.mxu0 %v8174_v39  ;;  %v2844_v39 = vpack.c.bf16 %v2840_v35, %v2839_v38 }
 0x2b5   : > { %7438 = vmatprep.subr.bf16.mxu0 %v8315_v1 }
 0x2b6   : > { %7425 = vmatpush3.bf16.msra.mxu1 %v8175_v14  ;;  %v2950_v14 = vpack.c.bf16 %v2946_v37, %v2945_v59 }
 0x2b7   : > { %7375 = vmatmul.mubr.msk.bf16.gmra.mxu0 %vm175_vm1, %v2232_v53  ;;  %7458 = vmatprep.subr.bf16.mxu1 %v8315_v1  ;;  %v2841_v53 = vld [vmem:[#allocation2 + $0x1c] sm:$0xff] }
 0x2b8   : > { %7395 = vmatmul.mubr.msk.bf16.gmra.mxu1 %vm175_vm1, %v2216_v17  ;;  %7406 = vmatprep.mubr.msk.bf16.mxu0 %vm8316_vm0, %v8315_v1  ;;  %v9180_v17 = vld [vmem:[#allocation2 + $0x24] sm:$0xff] }
 0x2b9   : > { %7426 = vmatprep.mubr.msk.bf16.mxu1 %vm8316_vm0, %v8315_v1 }
 0x2bf   : > { %7407 = vmatmul.mubr.msk.bf16.vlgmr.msra.gmra.mxu0 %vm175_vm1, %v2420_v42  ;;  %v2951_v42 = vpack.c.bf16 %v9182_v41, %v2947_v40 }
 0x2c0   : > { %7427 = vmatmul.mubr.msk.bf16.vlgmr.msra.gmra.mxu1 %vm175_vm1, %v2526_v34  ;;  %7439 = vmatpush3.bf16.msra.mxu0 %v8176_v23  ;;  %v2845_v23 = vpack.c.bf16 %v9180_v17, %v2841_v53  ;;  %v2843_v34 = vld [vmem:[#allocation2 + $0x2c] sm:$0xf] }
 0x2c1   : > { %7440 = vmatprep.subr.bf16.mxu0 %v8315_v1  ;;  %7410 = vmatprep.mubr.msk.bf16.mxu0 %vm8316_vm0, %v8315_v1 }
 0x2c2   : > { %7430 = vmatprep.mubr.msk.bf16.mxu1 %vm8316_vm0, %v8315_v1  ;;  %7459 = vmatpush3.bf16.msra.mxu1 %v8178_v22  ;;  %v8195_v22 = vld [vmem:[%s10117_s1 + $0x340] sm:$0xff]  }
 0x2c3   : > { %7460 = vmatprep.subr.bf16.mxu1 %v8315_v1 }
 0x2c4   : > { %7441 = vmatpush3.bf16.msra.mxu0 %v8177_v0  ;;  %v2846_v0 = vpack.c.bf16 %v2843_v34, %v2843_v34 }
 0x2c5   : > { %7442 = vmatprep.subr.bf16.mxu0 %v8315_v1 }
 0x2c6   : > { %7461 = vmatpush3.bf16.msra.mxu1 %v8180_v44  ;;  %v3057_v44 = vpack.c.bf16 %v9209_v24, %v9083_v46 }
 0x2c7   : > { %7411 = vmatmul.mubr.msk.bf16.gmra.mxu0 %vm175_vm1, %v2421_v6  ;;  %7462 = vmatprep.subr.bf16.mxu1 %v8315_v1  ;;  %v2949_v6 = vld [vmem:[#allocation2 + $0x2d] sm:$0xf] }
 0x2c8   : > { %7431 = vmatmul.mubr.msk.bf16.gmra.mxu1 %vm175_vm1, %v2527_v45  ;;  %7443 = vmatpush3.bf16.msra.mxu0 %v8179_v43  ;;  %v8196_v43 = vld [vmem:[%s10117_s1 + $0x398] sm:$0xff]   ;;  %v2952_v46 = vpack.c.bf16 %v2949_v6, %v2949_v6  ;;  %v8199_v45 = vld [vmem:[%s10117_s1 + $0x388] sm:$0xff]  }
 0x2c9   : > { %7414 = vmatprep.mubr.msk.bf16.mxu0 %vm8316_vm0, %v8315_v1  ;;  %7434 = vmatprep.mubr.msk.bf16.mxu1 %vm8316_vm0, %v8315_v1 }
 0x2ca   : > { %7444 = vmatprep.subr.bf16.mxu0 %v8315_v1  ;;  %7463 = vmatpush3.bf16.msra.mxu1 %v8181_v47  ;;  %v8200_v47 = vld [vmem:[%s10117_s1 + $0x370] sm:$0xff]  }
 0x2cb   : > { %7464 = vmatprep.subr.bf16.mxu1 %v8315_v1 }
 0x2cc   : > { %7445 = vmatpush3.bf16.msra.mxu0 %v8182_v48  ;;  %v3055_v48 = vld [vmem:[#allocation2 + $0x2e] sm:$0xf] }
 0x2cd   : > { %7478 = vmatprep.subr.bf16.mxu0 %v8315_v1  ;;  %v3058_v49 = vpack.c.bf16 %v3055_v48, %v3055_v48 }
 0x2ce   : > { %7465 = vmatpush3.bf16.msra.mxu1 %v8183_v50  ;;  %v8202_v50 = vld [vmem:[%s10117_s1 + $0x380] sm:$0xff]  }
 0x2cf   : > { %7415 = vmatmul.mubr.msk.bf16.gmra.mxu0 %vm175_vm1, %v2422_v52  ;;  %7498 = vmatprep.subr.bf16.mxu1 %v8315_v1 }
 0x2d0   : > { %7435 = vmatmul.mubr.msk.bf16.gmra.mxu1 %vm175_vm1, %v2528_v51  ;;  %7446 = vmatprep.mubr.msk.bf16.mxu0 %vm8316_vm0, %v8315_v1  ;;  %v8203_v51 = vld [vmem:[%s10117_s1 + $0x360] sm:$0xff]  }
 0x2d1   : > { %7466 = vmatprep.mubr.msk.bf16.mxu1 %vm8316_vm0, %v8315_v1 }
 0x2d7   : > { %7447 = vmatmul.mubr.msk.bf16.vlgmr.msra.gmra.mxu0 %vm175_vm1, %v2632_v57 }
 0x2d8   : > { %7467 = vmatmul.mubr.msk.bf16.vlgmr.msra.gmra.mxu1 %vm175_vm1, %v2738_v60  ;;  %7479 = vmatpush3.bf16.msra.mxu0 %v8184_v56 }
 0x2d9   : > { %7480 = vmatprep.subr.bf16.mxu0 %v8315_v1  ;;  %7450 = vmatprep.mubr.msk.bf16.mxu0 %vm8316_vm0, %v8315_v1 }
 0x2da   : > { %7470 = vmatprep.mubr.msk.bf16.mxu1 %vm8316_vm0, %v8315_v1  ;;  %7499 = vmatpush3.bf16.msra.mxu1 %v8186_v61 }
 0x2db   : > { %7500 = vmatprep.subr.bf16.mxu1 %v8315_v1 }
 0x2dc   : > { %7481 = vmatpush3.bf16.msra.mxu0 %v8185_v62 }
 0x2dd   : > { %7482 = vmatprep.subr.bf16.mxu0 %v8315_v1 }
 0x2de   : > { %7501 = vmatpush3.bf16.msra.mxu1 %v8188_v2 }
 0x2df   : > { %7451 = vmatmul.mubr.msk.bf16.gmra.mxu0 %vm175_vm1, %v2633_v5  ;;  %7502 = vmatprep.subr.bf16.mxu1 %v8315_v1 }
 0x2e0   : > { %7471 = vmatmul.mubr.msk.bf16.gmra.mxu1 %vm175_vm1, %v2739_v8  ;;  %7483 = vmatpush3.bf16.msra.mxu0 %v8187_v4 }
 0x2e1   : > { %7454 = vmatprep.mubr.msk.bf16.mxu0 %vm8316_vm0, %v8315_v1  ;;  %7474 = vmatprep.mubr.msk.bf16.mxu1 %vm8316_vm0, %v8315_v1 }
 0x2e2   : > { %7484 = vmatprep.subr.bf16.mxu0 %v8315_v1  ;;  %7503 = vmatpush3.bf16.msra.mxu1 %v8189_v9 }
 0x2e3   : > { %7504 = vmatprep.subr.bf16.mxu1 %v8315_v1 }
 0x2e4   : > { %7485 = vmatpush3.bf16.msra.mxu0 %v8190_v11 }
 0x2e5   : > { %7518 = vmatprep.subr.bf16.mxu0 %v8315_v1 }
 0x2e6   : > { %7505 = vmatpush3.bf16.msra.mxu1 %v8191_v16 }
 0x2e7   : > { %7455 = vmatmul.mubr.msk.bf16.gmra.mxu0 %vm175_vm1, %v2634_v20  ;;  %7538 = vmatprep.subr.bf16.mxu1 %v8315_v1 }
 0x2e8   : > { %7475 = vmatmul.mubr.msk.bf16.gmra.mxu1 %vm175_vm1, %v2740_v27  ;;  %7486 = vmatprep.mubr.msk.bf16.mxu0 %vm8316_vm0, %v8315_v1 }
 0x2e9   : > { %7506 = vmatprep.mubr.msk.bf16.mxu1 %vm8316_vm0, %v8315_v1 }
 0x2ef   : > { %7487 = vmatmul.mubr.msk.bf16.vlgmr.msra.gmra.mxu0 %vm175_vm1, %v2844_v39 }
 0x2f0   : > { %7507 = vmatmul.mubr.msk.bf16.vlgmr.msra.gmra.mxu1 %vm175_vm1, %v2950_v14  ;;  %7519 = vmatpush3.bf16.msra.mxu0 %v8192_v30 }
 0x2f1   : > { %7520 = vmatprep.subr.bf16.mxu0 %v8315_v1  ;;  %7490 = vmatprep.mubr.msk.bf16.mxu0 %vm8316_vm0, %v8315_v1 }
 0x2f2   : > { %7510 = vmatprep.mubr.msk.bf16.mxu1 %vm8316_vm0, %v8315_v1  ;;  %7539 = vmatpush3.bf16.msra.mxu1 %v8196_v43 }
 0x2f3   : > { %7540 = vmatprep.subr.bf16.mxu1 %v8315_v1 }
 0x2f4   : > { %7521 = vmatpush3.bf16.msra.mxu0 %v8193_v21 }
 0x2f5   : > { %7522 = vmatprep.subr.bf16.mxu0 %v8315_v1 }
 0x2f6   : > { %7541 = vmatpush3.bf16.msra.mxu1 %v8197_v58 }
 0x2f7   : > { %7491 = vmatmul.mubr.msk.bf16.gmra.mxu0 %vm175_vm1, %v2845_v23  ;;  %7542 = vmatprep.subr.bf16.mxu1 %v8315_v1 }
 0x2f8   : > { %7511 = vmatmul.mubr.msk.bf16.gmra.mxu1 %vm175_vm1, %v2951_v42  ;;  %7523 = vmatpush3.bf16.msra.mxu0 %v8194_v18 }
 0x2f9   : > { %7494 = vmatprep.mubr.msk.bf16.mxu0 %vm8316_vm0, %v8315_v1  ;;  %7524 = vmatprep.subr.bf16.mxu0 %v8315_v1 }
 0x2fa   : > { %7514 = vmatprep.mubr.msk.bf16.mxu1 %vm8316_vm0, %v8315_v1  ;;  %7543 = vmatpush3.bf16.msra.mxu1 %v8199_v45 }
 0x2fb   : > { %7544 = vmatprep.subr.bf16.mxu1 %v8315_v1 }
 0x2fc   : > { %7525 = vmatpush3.bf16.msra.mxu0 %v8195_v22 }
 0x2fd   : > { %7558 = vmatprep.subr.bf16.mxu0 %v8315_v1 }
 0x2fe   : > { %7545 = vmatpush3.bf16.msra.mxu1 %v8202_v50 }
 0x2ff   : > { %7495 = vmatmul.mubr.msk.bf16.gmra.mxu0 %vm175_vm1, %v2846_v0  ;;  %7578 = vmatprep.subr.bf16.mxu1 %v8315_v1 }
 0x300   : > { %7526 = vmatprep.mubr.msk.bf16.mxu0 %vm8316_vm0, %v8315_v1  ;;  %7515 = vmatmul.mubr.msk.bf16.gmra.mxu1 %vm175_vm1, %v2952_v46 }
 0x301   : > { %7546 = vmatprep.mubr.msk.bf16.mxu1 %vm8316_vm0, %v8315_v1 }
 0x307   : > { %7527 = vmatmul.mubr.msk.bf16.vlgmr.msra.gmra.mxu0 %vm175_vm1, %v3056_v25 }
 0x308   : > { %7530 = vmatprep.mubr.msk.bf16.mxu0 %vm8316_vm0, %v8315_v1  ;;  %7559 = vmatpush3.bf16.msra.mxu0 %v8198_v26 }
 0x309   : > { %7560 = vmatprep.subr.bf16.mxu0 %v8315_v1 }
 0x30c   : > { %7561 = vmatpush3.bf16.msra.mxu0 %v8200_v47 }
 0x30d   : > { %7562 = vmatprep.subr.bf16.mxu0 %v8315_v1 }
 0x30f   : > { %7531 = vmatmul.mubr.msk.bf16.gmra.mxu0 %vm175_vm1, %v3057_v44 }
 0x310   : > { %7534 = vmatprep.mubr.msk.bf16.mxu0 %vm8316_vm0, %v8315_v1  ;;  %7563 = vmatpush3.bf16.msra.mxu0 %v8201_v29 }
 0x311   : > { %7564 = vmatprep.subr.bf16.mxu0 %v8315_v1 }
 0x314   : > { %7565 = vmatpush3.bf16.msra.mxu0 %v8203_v51 }
 0x315   : > { %7598 = vmatprep.subr.bf16.mxu0 %v8315_v1 }
 0x317   : > { %7535 = vmatmul.mubr.msk.bf16.gmra.mxu0 %vm175_vm1, %v3058_v49 }
 0x318   : > { %7566 = vmatprep.mubr.msk.bf16.mxu0 %vm8316_vm0, %v8315_v1 }
 0x367   : > { %v2308_v52 = vpop.f32.mrf.mxu0 }
 0x368   : > { %v2395_v54 = vpop.f32.mrf.mxu1 }
 0x369   : > { %v9254_v55 = vadd.f32 %v2395_v54, %v2308_v52  ;;  %v7368_v56 = vpop.f32.mrf.mxu0 }
 0x36a   : > { %v7388_v57 = vpop.f32.mrf.mxu1 }
 0x36b   : > { %v2311_v60 = vpop.f32.mrf.mxu0 }
 0x36c   : > { %v2398_v61 = vpop.f32.mrf.mxu1 }
 0x36d   : > { %v9256_v62 = vadd.f32 %v2398_v61, %v2311_v60  ;;  %v7369_v63 = vpop.f32.mrf.mxu0 }
 0x36e   : > { %v7389_v2 = vpop.f32.mrf.mxu1 }
 0x36f   : > { %v2316_v3 = vpop.f32.mrf.mxu0 }
 0x370   : > { %v2403_v4 = vpop.f32.mrf.mxu1 }
 0x371   : > { %v9258_v5 = vadd.f32 %v2403_v4, %v2316_v3  ;;  %v7372_v7 = vpop.f32.mrf.mxu0 }
 0x372   : > { %v7392_v8 = vpop.f32.mrf.mxu1 }
 0x373   : > { %v2319_v9 = vpop.f32.mrf.mxu0 }
 0x374   : > { %v2406_v10 = vpop.f32.mrf.mxu1 }
 0x375   : > { %v7373_v11 = vpop.f32.mrf.mxu0 }
 0x376   : > { %v7393_v12 = vpop.f32.mrf.mxu1 }
 0x377   : > { %v2323_v15 = vpop.f32.mrf.mxu0 }
 0x378   : > { %v2410_v16 = vpop.f32.mrf.mxu1 }
 0x379   : > { %v7376_v19 = vpop.f32.mrf.mxu0 }
 0x37a   : > { %v7396_v20 = vpop.f32.mrf.mxu1 }
 0x37b   : > { %v2325_v27 = vpop.f32.mrf.mxu0 }
 0x37c   : > { %v2412_v28 = vpop.f32.mrf.mxu1 }
 0x37d   : > { %v7377_v31 = vpop.f32.mrf.mxu0 }
 0x37e   : > { %v7397_v32 = vpop.f32.mrf.mxu1 }
 0x37f   : > { %v2498_v33 = vpop.f32.mrf.mxu0 }
 0x380   : > { %v2604_v35 = vpop.f32.mrf.mxu1  ;;  %v2518_v31 = vadd.f32 %v2498_v33, %v9254_v55 }
 0x381   : > { %v7408_v36 = vpop.f32.mrf.mxu0 }
 0x382   : > { %v7428_v37 = vpop.f32.mrf.mxu1 }
 0x383   : > { %v2501_v38 = vpop.f32.mrf.mxu0 }
 0x384   : > { %v2607_v30 = vpop.f32.mrf.mxu1 }
 0x385   : > { %v7409_v13 = vpop.f32.mrf.mxu0 }
 0x386   : > { %v7429_v39 = vpop.f32.mrf.mxu1 }
 0x387   : > { %v2506_v59 = vpop.f32.mrf.mxu0  ;;  %v2624_v39 = vadd.f32 %v2604_v35, %v2518_v31  ;;  %v8208_v31 = vld [vmem:[%s10117_s1 + $0x3d0] sm:$0xff]  }
 0x388   : > { %v9260_v14 = vpop.f32.mrf.mxu1 }
 0x389   : > { %v7412_v21 = vpop.f32.mrf.mxu0 }
 0x38a   : > { %v7432_v53 = vpop.f32.mrf.mxu1  ;;  %v2519_v21 = vadd.f32 %v2501_v38, %v9256_v62 }
 0x38b   : > { %v2509_v40 = vpop.f32.mrf.mxu0 }
 0x38c   : > { %v2615_v18 = vpop.f32.mrf.mxu1 }
 0x38d   : > { %v7413_v23 = vpop.f32.mrf.mxu0 }
 0x38e   : > { %v7433_v42 = vpop.f32.mrf.mxu1 }
 0x38f   : > { %v2513_v34 = vpop.f32.mrf.mxu0 }
 0x390   : > { %v2619_v22 = vpop.f32.mrf.mxu1  ;;  %v2625_v34 = vadd.f32 %v2607_v30, %v2519_v21  ;;  %v6417_v30 = vld [vmem:[%s10118_s2 + $0x2] ss:$0 sm:$0xff]  ;;  %v8209_v21 = vld [vmem:[%s10117_s1 + $0x3c8] sm:$0xff]  }
 0x391   : > { %v7416_v0 = vpop.f32.mrf.mxu0  ;;  %v2520_v22 = vadd.f32 %v2506_v59, %v9258_v5 }
 0x392   : > { %v7436_v25 = vpop.f32.mrf.mxu1 }
 0x393   : > { %v2515_v44 = vpop.f32.mrf.mxu0  ;;  %v2626_v33 = vadd.f32 %v9260_v14, %v2520_v22 }
 0x394   : > { %v2621_v43 = vpop.f32.mrf.mxu1 }
 0x395   : > { %v7417_v58 = vpop.f32.mrf.mxu0 }
 0x396   : > { %v7437_v26 = vpop.f32.mrf.mxu1 }
 0x397   : > { %v2710_v6 = vpop.f32.mrf.mxu0 }
 0x398   : > { %v2816_v46 = vpop.f32.mrf.mxu1  ;;  %v2730_v18 = vadd.f32 %v2710_v6, %v2624_v39 }
 0x399   : > { %v7448_v45 = vpop.f32.mrf.mxu0 }
 0x39a   : > { %v7468_v47 = vpop.f32.mrf.mxu1  ;;  %v2836_v44 = vadd.f32 %v2816_v46, %v2730_v18  ;;  %v8211_v18 = vld [vmem:[%s10117_s1 + $0x3c0] sm:$0xff]  }
 0x39b   : > { %v2713_v48 = vpop.f32.mrf.mxu0 }
 0x39c   : > { %v2819_v49 = vpop.f32.mrf.mxu1  ;;  %v2731_v43 = vadd.f32 %v2713_v48, %v2625_v34 }
 0x39d   : > { %v7449_v29 = vpop.f32.mrf.mxu0 }
 0x39e   : > { %v7469_v50 = vpop.f32.mrf.mxu1  ;;  %v2837_v35 = vadd.f32 %v2819_v49, %v2731_v43 }
 0x39f   : > { %v2718_v51 = vpop.f32.mrf.mxu0 }
 0x3a0   : > { %v2824_v52 = vpop.f32.mrf.mxu1  ;;  %v2732_v45 = vadd.f32 %v2718_v51, %v2626_v33 }
 0x3a1   : > { %v7452_v54 = vpop.f32.mrf.mxu0 }
 0x3a2   : > { %v7472_v56 = vpop.f32.mrf.mxu1  ;;  %v2838_v5 = vadd.f32 %v2824_v52, %v2732_v45 }
 0x3a3   : > { %v2721_v57 = vpop.f32.mrf.mxu0 }
 0x3a4   : > { %v2827_v60 = vpop.f32.mrf.mxu1 }
 0x3a5   : > { %v7453_v61 = vpop.f32.mrf.mxu0 }
 0x3a6   : > { %v7473_v63 = vpop.f32.mrf.mxu1 }
 0x3a7   : > { %v2725_v2 = vpop.f32.mrf.mxu0 }
 0x3a8   : > { %v2831_v3 = vpop.f32.mrf.mxu1 }
 0x3a9   : > { %v7456_v4 = vpop.f32.mrf.mxu0 }
 0x3aa   : > { %v7476_v7 = vpop.f32.mrf.mxu1 }
 0x3ab   : > { %v2727_v8 = vpop.f32.mrf.mxu0 }
 0x3ac   : > { %v2833_v9 = vpop.f32.mrf.mxu1  ;;  %v8204_v8 = vld [vmem:[%s10117_s1 + $0x3b8] sm:$0xff]  }
 0x3ad   : > { %v7457_v10 = vpop.f32.mrf.mxu0 }
 0x3ae   : > { %v7477_v11 = vpop.f32.mrf.mxu1 }
 0x3af   : > { %v2922_v12 = vpop.f32.mrf.mxu0 }
 0x3b0   : > { %v3028_v15 = vpop.f32.mrf.mxu1  ;;  %v2942_v58 = vadd.f32 %v2922_v12, %v2836_v44  ;;  %v8212_v44 = vld [vmem:[%s10117_s1 + $0x3f8] sm:$0xff]  }
 0x3b1   : > { %v7488_v16 = vpop.f32.mrf.mxu0 }
 0x3b2   : > { %v7508_v19 = vpop.f32.mrf.mxu1  ;;  %v3048_v38 = vadd.f32 %v3028_v15, %v2942_v58  ;;  %v8214_v58 = vld [vmem:[%s10117_s1 + $0x418] sm:$0xff]  }
 0x3b3   : > { %v2925_v20 = vpop.f32.mrf.mxu0  ;;  %v8206_v19 = vld [vmem:[%s10117_s1 + $0x3d8] sm:$0xff]  }
 0x3b4   : > { %v3031_v27 = vpop.f32.mrf.mxu1  ;;  %v2943_v47 = vadd.f32 %v2925_v20, %v2837_v35  ;;  %v8205_v20 = vld [vmem:[%s10117_s1 + $0x3b0] sm:$0xff]  }
 0x3b5   : > { %v7489_v28 = vpop.f32.mrf.mxu0 }
 0x3b6   : > { %v7509_v32 = vpop.f32.mrf.mxu1  ;;  %v3049_v46 = vadd.f32 %v3031_v27, %v2943_v47  ;;  %v8215_v47 = vld [vmem:[%s10117_s1 + $0x3e8] sm:$0xff]  }
 0x3b7   : > { %v2930_v36 = vpop.f32.mrf.mxu0 }
 0x3b8   : > { %v3036_v37 = vpop.f32.mrf.mxu1  ;;  %v2944_v48 = vadd.f32 %v2930_v36, %v2838_v5  ;;  %v8207_v36 = vld [vmem:[%s10117_s1 + $0x3a8] sm:$0xff]  }
 0x3b9   : > { %v7492_v13 = vpop.f32.mrf.mxu0 }
 0x3ba   : > { %v7512_v53 = vpop.f32.mrf.mxu1  ;;  %v3050_v49 = vadd.f32 %v3036_v37, %v2944_v48 }
 0x3bb   : > { %v2933_v40 = vpop.f32.mrf.mxu0  ;;  %v8210_v53 = vld [vmem:[%s10117_s1 + $0x3a0] sm:$0xff]  }
 0x3bc   : > { %v3039_v23 = vpop.f32.mrf.mxu1 }
 0x3bd   : > { %v7493_v42 = vpop.f32.mrf.mxu0 }
 0x3be   : > { %v7513_v0 = vpop.f32.mrf.mxu1 }
 0x3bf   : > { %v2937_v25 = vpop.f32.mrf.mxu0 }
 0x3c1   : > { %v7496_v55 = vpop.f32.mrf.mxu0 }
 0x3c3   : > { %v2939_v26 = vpop.f32.mrf.mxu0 }
 0x3c4   : > { %v8213_v26 = vld [vmem:[%s10117_s1 + $0x3f0] sm:$0xff]  }
 0x3c5   : > { %v7497_v62 = vpop.f32.mrf.mxu0 }
 0x3c6   : > { %v8216_v62 = vld [vmem:[%s10117_s1 + $0x410] sm:$0xff]  }
 0x3c7   : > { %v3134_v6 = vpop.f32.mrf.mxu0 }
 0x3c8   : > { %v3154_v59 = vadd.f32 %v3134_v6, %v3048_v38 }
 0x3c9   : > { %v7528_v29 = vpop.f32.mrf.mxu0 }
 0x3ca   : > { %v3162_v50 = vadd.f32 %v6417_v30, %v3154_v59  ;;  %v8217_v59 = vld [vmem:[%s10117_s1 + $0x408] sm:$0xff]   ;;  %v8218_v29 = vld [vmem:[%s10117_s1 + $0x3e0] sm:$0xff]  }
 0x3cb   : > { %v3137_v54 = vpop.f32.mrf.mxu0 }
 0x3cc   : > { %v3165_v14 = vmax.f32 %v3162_v50, 0.0  ;;  %v3155_v56 = vadd.f32 %v3137_v54, %v3049_v46  ;;  %v3504_v46 = vld [vmem:[#allocation2 + $0x26] sm:$0xf] }
 0x3cd   : > { %v7529_v57 = vpop.f32.mrf.mxu0  ;;  %v8219_v50 = vld [vmem:[%s10117_s1 + $0x400] sm:$0xff]   ;;  %v3507_v54 = vpack.c.bf16 %v3504_v46, %v3504_v46 }
 0x3ce   : > { %3168 = vst.msk [vmem:[#allocation2 - $0x5] sm:$0xc0] %vm1176_vm6, %v3165_v14  ;;  %3175 = vst.msk [vmem:[#allocation2 + $0x7] sm:$0xc0] %vm1176_vm6, %v3165_v14  ;;  %v3163_v51 = vadd.f32 %v6417_v30, %v3155_v56 }
 0x3cf   : > { %3170 = vst.msk [vmem:[#allocation2 - $0x7] sm:$0x80] %vm1179_vm7, %v3165_v14  ;;  %3177 = vst.msk [vmem:[#allocation2 + $0x5] sm:$0x80] %vm1179_vm7, %v3165_v14  ;;  %v3142_v52 = vpop.f32.mrf.mxu0 }
 0x3d0   : > { %3172 = vst.msk [vmem:[#allocation2 + $0x7] sm:$0xf] %vm191_vm2, %v3165_v14  ;;  %v3166_v60 = vmax.f32 %v3163_v51, 0.0  ;;  %v3156_v61 = vadd.f32 %v3142_v52, %v3050_v49  ;;  %v8220_v49 = vld [vmem:[%s10117_s1 + $0x438] sm:$0xff]  }
 0x3d1   : > { %3173 = vst.msk [vmem:[#allocation2 + $0x5] sm:$0x2] %vm193_vm3, %v3165_v14  ;;  %v7532_v63 = vpop.f32.mrf.mxu0 }
 0x3d2   : > { %3174 = vst.msk [vmem:[#allocation2 + $0x9] sm:$0x4] %vm195_vm4, %v3165_v14  ;;  %v3164_v2 = vadd.f32 %v6417_v30, %v3156_v61  ;;  %v8221_v61 = vld [vmem:[%s10117_s1 + $0x430] sm:$0xff]  }
 0x3d3   : > { %3169 = vst.msk [vmem:[#allocation2 + $0x3] sm:$0x3] %vm182_vm5, %v3166_v60  ;;  %3176 = vst.msk [vmem:[#allocation2 + $0xf] sm:$0x3] %vm182_vm5, %v3166_v60  ;;  %v3145_v3 = vpop.f32.mrf.mxu0 }
 0x3d4   : > { %3171 = vst.msk [vmem:[#allocation2 + $0x5] sm:$0x1] %vm1181_vm8, %v3166_v60  ;;  %3178 = vst.msk [vmem:[#allocation2 + $0x11] sm:$0x1] %vm1181_vm8, %v3166_v60  ;;  %v3167_v4 = vmax.f32 %v3164_v2, 0.0  ;;  %v8224_v2 = vld [vmem:[%s10117_s1 + $0x450] sm:$0xff]  }
 0x3d5   : > { %3179 = vst.msk [vmem:[#allocation2 + $0xf] sm:$0xf0] %vm1190_vm9, %v3166_v60  ;;  %3185 = vst.msk [vmem:[#allocation2 + $0x1b] sm:$0xf0] %vm1190_vm9, %v3166_v60  ;;  %v7533_v7 = vpop.f32.mrf.mxu0 }
 0x3d6   : > { %3180 = vst.msk [vmem:[#allocation2 + $0xd] sm:$0x20] %vm1192_vm10, %v3166_v60  ;;  %3186 = vst.msk [vmem:[#allocation2 + $0x19] sm:$0x20] %vm1192_vm10, %v3166_v60 }
 0x3d7   : > { %3181 = vst.msk [vmem:[#allocation2 + $0x11] sm:$0x40] %vm1194_vm11, %v3166_v60  ;;  %3187 = vst.msk [vmem:[#allocation2 + $0x1d] sm:$0x40] %vm1194_vm11, %v3166_v60  ;;  %v8222_v60 = vld [vmem:[%s10117_s1 + $0x458] sm:$0xff]  }
 0x3d8   : > { %3182 = vst.msk [vmem:[#allocation2 + $0x17] sm:$0x3c] %vm1196_vm12, %v3167_v4 }
 0x3d9   : > { %3183 = vst.msk [vmem:[#allocation2 + $0x15] sm:$0x8] %vm1198_vm13, %v3167_v4  ;;  %v3500_v55 = vld [vmem:[#allocation2 + $0x6] sm:$0xff] }
 0x3da   : > { %3184 = vst.msk [vmem:[#allocation2 + $0x19] sm:$0x10] %vm1200_vm14, %v3167_v4  ;;  %v3205_v10 = vld [vmem:[#allocation2 + $0x9] sm:$0xff] }
 0x3db   : > { %v3204_v9 = vld [vmem:[#allocation2 + $0x1] sm:$0xff]  ;;  %v3395_v0 = vld [vmem:[#allocation2 + $0xa] sm:$0xff] }
 0x3dc   : > { %v3188_v11 = vld [vmem:[#allocation2] sm:$0xff]  ;;  %v3209_v12 = vpack.c.bf16 %v3205_v10, %v3204_v9  ;;  %v9292_v15 = vld [vmem:[#allocation2 + $0x8] sm:$0xff] }
 0x3dd   : > { %v3193_v16 = vpack.c.bf16 %v9292_v15, %v3188_v11  ;;  %v3394_v22 = vld [vmem:[#allocation2 + $0x2] sm:$0xff]  ;;  %v9348_v25 = vld [vmem:[#allocation2 + $0xe] sm:$0xff] }
 0x3de   : > { %7547 = vmatmul.mubr.msk.bf16.vlgmr.msra.gmra.mxu1 %vm175_vm1, %v3209_v12  ;;  %v9317_v13 = vld [vmem:[#allocation2 + $0x10] sm:$0xff]  ;;  %v3208_v40 = vld [vmem:[#allocation2 + $0x21] sm:$0xf]  ;;  %v3399_v43 = vpack.c.bf16 %v3395_v0, %v3394_v22  ;;  %v3505_v33 = vpack.c.bf16 %v9348_v25, %v3500_v55  ;;  %v3606_v57 = vld [vmem:[#allocation2 + $0x7] sm:$0xff] }
 0x3df   : > { %7567 = vmatmul.mubr.msk.bf16.vlgmr.msra.gmra.mxu0 %vm175_vm1, %v3193_v16  ;;  %7579 = vmatpush3.bf16.msra.mxu1 %v8204_v8  ;;  %v3192_v23 = vld [vmem:[#allocation2 + $0x20] sm:$0xf]  ;;  %v3211_v42 = vpack.c.bf16 %v3208_v40, %v3208_v40  ;;  %v3607_v56 = vld [vmem:[#allocation2 + $0xf] sm:$0xff]  ;;  %v3717_v52 = vpack.c.bf16 %v9317_v13, %v9292_v15  ;;  %v3610_v11 = vld [vmem:[#allocation2 + $0x27] sm:$0xf]  ;;  %v3043_v15 = vpop.f32.mrf.mxu1 }
 0x3e0   : > { %7580 = vmatprep.subr.bf16.mxu1 %v8315_v1  ;;  %7550 = vmatprep.mubr.msk.bf16.mxu1 %vm8316_vm0, %v8315_v1  ;;  %v3206_v27 = vld [vmem:[#allocation2 + $0x11] sm:$0xff]  ;;  %v3195_v34 = vpack.c.bf16 %v3192_v23, %v3192_v23  ;;  %v9376_v30 = vld [vmem:[#allocation2 + $0x1e] sm:$0xff]  ;;  %v3611_v51 = vpack.c.bf16 %v3607_v56, %v3606_v57  ;;  %v8223_v4 = vld [vmem:[%s10117_s1 + $0x428] sm:$0xff]  }
 0x3e1   : > { %7570 = vmatprep.mubr.msk.bf16.mxu0 %vm8316_vm0, %v8315_v1  ;;  %v3207_v28 = vld [vmem:[#allocation2 + $0x19] sm:$0xff]  ;;  %7599 = vmatpush3.bf16.msra.mxu0 %v8206_v19  ;;  %v3398_v48 = vld [vmem:[#allocation2 + $0x22] sm:$0xf]  ;;  %v8225_v10 = vld [vmem:[%s10117_s1 + $0x448] sm:$0xff]  }
 0x3e2   : > { %v9311_v32 = vld [vmem:[#allocation2 + $0x18] sm:$0xff]  ;;  %7600 = vmatprep.subr.bf16.mxu0 %v8315_v1  ;;  %v3210_v37 = vpack.c.bf16 %v3207_v28, %v3206_v27  ;;  %v3401_v14 = vpack.c.bf16 %v3398_v48, %v3398_v48  ;;  %v3715_v8 = vld [vmem:[#allocation2 + $0x20] sm:$0xff]  ;;  %v3716_v16 = vld [vmem:[#allocation2 + $0x28] sm:$0xf]  ;;  %v3613_v27 = vpack.c.bf16 %v3610_v11, %v3610_v11 }
 0x3e3   : > { %7581 = vmatpush3.bf16.msra.mxu1 %v8205_v20  ;;  %v3194_v39 = vpack.c.bf16 %v9311_v32, %v9317_v13  ;;  %v3396_v35 = vld [vmem:[#allocation2 + $0x12] sm:$0xff]  ;;  %v3397_v45 = vld [vmem:[#allocation2 + $0x1a] sm:$0xff]  ;;  %v3718_v9 = vpack.c.bf16 %v3715_v8, %v9311_v32  ;;  %v7516_v20 = vpop.f32.mrf.mxu1  ;;  %v3719_v28 = vpack.c.bf16 %v3716_v16, %v3716_v16  ;;  %v3149_v32 = vpop.f32.mrf.mxu0 }
 0x3e4   : > { %7582 = vmatprep.subr.bf16.mxu1 %v8315_v1  ;;  %v9370_v38 = vld [vmem:[#allocation2 + $0x16] sm:$0xff]  ;;  %v3400_v6 = vpack.c.bf16 %v3397_v45, %v3396_v35  ;;  %v3609_v3 = vld [vmem:[#allocation2 + $0x1f] sm:$0xff]  ;;  %v3818_v40 = vld [vmem:[#allocation2 + $0xc] sm:$0xff]  ;;  %v4036_v35 = vpack.c.bf16 %v9209_v24, %v9376_v30 }
 0x3e5   : > { %7601 = vmatpush3.bf16.msra.mxu0 %v8208_v31  ;;  %v3506_v5 = vpack.c.bf16 %v9376_v30, %v9370_v38  ;;  %v3608_v63 = vld [vmem:[#allocation2 + $0x17] sm:$0xff]  ;;  %v8226_v12 = vld [vmem:[%s10117_s1 + $0x420] sm:$0xff]   ;;  %v3045_v31 = vpop.f32.mrf.mxu1 }
 0x3e6   : > { %7551 = vmatmul.mubr.msk.bf16.gmra.mxu1 %vm175_vm1, %v3210_v37  ;;  %7602 = vmatprep.subr.bf16.mxu0 %v8315_v1  ;;  %v3612_v7 = vpack.c.bf16 %v3609_v3, %v3608_v63  ;;  %v8227_v19 = vld [vmem:[%s10117_s1 + $0x440] sm:$0xff]   ;;  %v7536_v37 = vpop.f32.mrf.mxu0  ;;  %v8229_v22 = vld [vmem:[%s10117_s1 + $0x470] sm:$0xff]   ;;  %v8232_v45 = vld [vmem:[%s10117_s1 + $0x4b8] sm:$0xff]  }
 0x3e7   : > { %7571 = vmatmul.mubr.msk.bf16.gmra.mxu0 %vm175_vm1, %v3194_v39  ;;  %7583 = vmatpush3.bf16.msra.mxu1 %v8207_v36  ;;  %v7517_v36 = vpop.f32.mrf.mxu1  ;;  %v3819_v39 = vld [vmem:[#allocation2 + $0x14] sm:$0xff]  ;;  %v3820_v0 = vld [vmem:[#allocation2 + $0x1c] sm:$0xff] }
 0x3e8   : > { %7554 = vmatprep.mubr.msk.bf16.mxu1 %vm8316_vm0, %v8315_v1  ;;  %7574 = vmatprep.mubr.msk.bf16.mxu0 %vm8316_vm0, %v8315_v1  ;;  %v3151_v13 = vpop.f32.mrf.mxu0  ;;  %v3823_v23 = vpack.c.bf16 %v3819_v39, %v3818_v40  ;;  %v3824_v55 = vpack.c.bf16 %v9180_v17, %v3820_v0  ;;  %v8233_v24 = vld [vmem:[%s10117_s1 + $0x4b0] sm:$0xff]   ;;  %v8238_v48 = vld [vmem:[%s10117_s1 + $0x4a0] sm:$0xff]  }
 0x3e9   : > { %7584 = vmatprep.subr.bf16.mxu1 %v8315_v1  ;;  %7603 = vmatpush3.bf16.msra.mxu0 %v8209_v21 }
 0x3ea   : > { %7604 = vmatprep.subr.bf16.mxu0 %v8315_v1  ;;  %v7537_v21 = vpop.f32.mrf.mxu0 }
 0x3eb   : > { %7585 = vmatpush3.bf16.msra.mxu1 %v8210_v53  ;;  %v3925_v53 = vld [vmem:[#allocation2 + $0x15] sm:$0xff] }
 0x3ec   : > { %7618 = vmatprep.subr.bf16.mxu1 %v8315_v1 }
 0x3ed   : > { %7605 = vmatpush3.bf16.msra.mxu0 %v8211_v18  ;;  %v8228_v18 = vld [vmem:[%s10117_s1 + $0x478] sm:$0xff]  }
 0x3ee   : > { %7555 = vmatmul.mubr.msk.bf16.gmra.mxu1 %vm175_vm1, %v3211_v42  ;;  %7638 = vmatprep.subr.bf16.mxu0 %v8315_v1  ;;  %v3924_v42 = vld [vmem:[#allocation2 + $0xd] sm:$0xff] }
 0x3ef   : > { %7575 = vmatmul.mubr.msk.bf16.gmra.mxu0 %vm175_vm1, %v3195_v34  ;;  %7586 = vmatprep.mubr.msk.bf16.mxu1 %vm8316_vm0, %v8315_v1  ;;  %v3929_v34 = vpack.c.bf16 %v3925_v53, %v3924_v42 }
 0x3f0   : > { %7606 = vmatprep.mubr.msk.bf16.mxu0 %vm8316_vm0, %v8315_v1 }
 0x3f6   : > { %7587 = vmatmul.mubr.msk.bf16.vlgmr.msra.gmra.mxu1 %vm175_vm1, %v3399_v43  ;;  %v8230_v43 = vld [vmem:[%s10117_s1 + $0x468] sm:$0xff]  }
 0x3f7   : > { %7607 = vmatmul.mubr.msk.bf16.vlgmr.msra.gmra.mxu0 %vm175_vm1, %v3505_v33  ;;  %7619 = vmatpush3.bf16.msra.mxu1 %v8212_v44  ;;  %v3926_v44 = vld [vmem:[#allocation2 + $0x1d] sm:$0xff] }
 0x3f8   : > { %7620 = vmatprep.subr.bf16.mxu1 %v8315_v1  ;;  %7590 = vmatprep.mubr.msk.bf16.mxu1 %vm8316_vm0, %v8315_v1  ;;  %v3930_v33 = vpack.c.bf16 %v9182_v41, %v3926_v44  ;;  %v4035_v41 = vpack.c.bf16 %v9370_v38, %v9348_v25  ;;  %v8234_v25 = vld [vmem:[%s10117_s1 + $0x498] sm:$0xff]  }
 0x3f9   : > { %7610 = vmatprep.mubr.msk.bf16.mxu0 %vm8316_vm0, %v8315_v1  ;;  %7639 = vmatpush3.bf16.msra.mxu0 %v8214_v58  ;;  %v3822_v58 = vld [vmem:[#allocation2 + $0x2c] sm:$0xf] }
 0x3fa   : > { %7640 = vmatprep.subr.bf16.mxu0 %v8315_v1  ;;  %v3825_v17 = vpack.c.bf16 %v3822_v58, %v3822_v58 }
 0x3fb   : > { %7621 = vmatpush3.bf16.msra.mxu1 %v8213_v26  ;;  %v8231_v26 = vld [vmem:[%s10117_s1 + $0x460] sm:$0xff]  }
 0x3fc   : > { %7622 = vmatprep.subr.bf16.mxu1 %v8315_v1 }
 0x3fd   : > { %7641 = vmatpush3.bf16.msra.mxu0 %v8216_v62  ;;  %v3928_v62 = vld [vmem:[#allocation2 + $0x2d] sm:$0xf] }
 0x3fe   : > { %7591 = vmatmul.mubr.msk.bf16.gmra.mxu1 %vm175_vm1, %v3400_v6  ;;  %7642 = vmatprep.subr.bf16.mxu0 %v8315_v1  ;;  %v3931_v38 = vpack.c.bf16 %v3928_v62, %v3928_v62  ;;  %v4034_v6 = vld [vmem:[#allocation2 + $0x2e] sm:$0xf] }
 0x3ff   : > { %7611 = vmatmul.mubr.msk.bf16.gmra.mxu0 %vm175_vm1, %v3506_v5  ;;  %7623 = vmatpush3.bf16.msra.mxu1 %v8215_v47  ;;  %v8236_v47 = vld [vmem:[%s10117_s1 + $0x490] sm:$0xff]   ;;  %v4037_v30 = vpack.c.bf16 %v4034_v6, %v4034_v6  ;;  %v8235_v5 = vld [vmem:[%s10117_s1 + $0x4a8] sm:$0xff]  }
 0x400   : > { %7594 = vmatprep.mubr.msk.bf16.mxu1 %vm8316_vm0, %v8315_v1  ;;  %7614 = vmatprep.mubr.msk.bf16.mxu0 %vm8316_vm0, %v8315_v1 }
 0x401   : > { %7624 = vmatprep.subr.bf16.mxu1 %v8315_v1  ;;  %7643 = vmatpush3.bf16.msra.mxu0 %v8217_v59  ;;  %v8237_v59 = vld [vmem:[%s10117_s1 + $0x488] sm:$0xff]  }
 0x402   : > { %7644 = vmatprep.subr.bf16.mxu0 %v8315_v1 }
 0x403   : > { %7625 = vmatpush3.bf16.msra.mxu1 %v8218_v29 }
 0x404   : > { %7658 = vmatprep.subr.bf16.mxu1 %v8315_v1 }
 0x405   : > { %7645 = vmatpush3.bf16.msra.mxu0 %v8219_v50  ;;  %v8239_v50 = vld [vmem:[%s10117_s1 + $0x480] sm:$0xff]  }
 0x406   : > { %7595 = vmatmul.mubr.msk.bf16.gmra.mxu1 %vm175_vm1, %v3401_v14  ;;  %7678 = vmatprep.subr.bf16.mxu0 %v8315_v1 }
 0x407   : > { %7615 = vmatmul.mubr.msk.bf16.gmra.mxu0 %vm175_vm1, %v3507_v54  ;;  %7626 = vmatprep.mubr.msk.bf16.mxu1 %vm8316_vm0, %v8315_v1 }
 0x408   : > { %7646 = vmatprep.mubr.msk.bf16.mxu0 %vm8316_vm0, %v8315_v1 }
 0x40e   : > { %7627 = vmatmul.mubr.msk.bf16.vlgmr.msra.gmra.mxu1 %vm175_vm1, %v3611_v51 }
 0x40f   : > { %7647 = vmatmul.mubr.msk.bf16.vlgmr.msra.gmra.mxu0 %vm175_vm1, %v3717_v52  ;;  %7659 = vmatpush3.bf16.msra.mxu1 %v8220_v49 }
 0x410   : > { %7660 = vmatprep.subr.bf16.mxu1 %v8315_v1  ;;  %7630 = vmatprep.mubr.msk.bf16.mxu1 %vm8316_vm0, %v8315_v1 }
 0x411   : > { %7650 = vmatprep.mubr.msk.bf16.mxu0 %vm8316_vm0, %v8315_v1  ;;  %7679 = vmatpush3.bf16.msra.mxu0 %v8222_v60 }
 0x412   : > { %7680 = vmatprep.subr.bf16.mxu0 %v8315_v1 }
 0x413   : > { %7661 = vmatpush3.bf16.msra.mxu1 %v8221_v61 }
 0x414   : > { %7662 = vmatprep.subr.bf16.mxu1 %v8315_v1 }
 0x415   : > { %7681 = vmatpush3.bf16.msra.mxu0 %v8224_v2 }
 0x416   : > { %7631 = vmatmul.mubr.msk.bf16.gmra.mxu1 %vm175_vm1, %v3612_v7  ;;  %7682 = vmatprep.subr.bf16.mxu0 %v8315_v1 }
 0x417   : > { %7651 = vmatmul.mubr.msk.bf16.gmra.mxu0 %vm175_vm1, %v3718_v9  ;;  %7663 = vmatpush3.bf16.msra.mxu1 %v8223_v4 }
 0x418   : > { %7634 = vmatprep.mubr.msk.bf16.mxu1 %vm8316_vm0, %v8315_v1  ;;  %7654 = vmatprep.mubr.msk.bf16.mxu0 %vm8316_vm0, %v8315_v1 }
 0x419   : > { %7664 = vmatprep.subr.bf16.mxu1 %v8315_v1  ;;  %7683 = vmatpush3.bf16.msra.mxu0 %v8225_v10 }
 0x41a   : > { %7684 = vmatprep.subr.bf16.mxu0 %v8315_v1 }
 0x41b   : > { %7665 = vmatpush3.bf16.msra.mxu1 %v8226_v12 }
 0x41c   : > { %7698 = vmatprep.subr.bf16.mxu1 %v8315_v1 }
 0x41d   : > { %7685 = vmatpush3.bf16.msra.mxu0 %v8227_v19 }
 0x41e   : > { %7635 = vmatmul.mubr.msk.bf16.gmra.mxu1 %vm175_vm1, %v3613_v27  ;;  %7718 = vmatprep.subr.bf16.mxu0 %v8315_v1 }
 0x41f   : > { %7655 = vmatmul.mubr.msk.bf16.gmra.mxu0 %vm175_vm1, %v3719_v28  ;;  %7666 = vmatprep.mubr.msk.bf16.mxu1 %vm8316_vm0, %v8315_v1 }
 0x420   : > { %7686 = vmatprep.mubr.msk.bf16.mxu0 %vm8316_vm0, %v8315_v1 }
 0x426   : > { %7667 = vmatmul.mubr.msk.bf16.vlgmr.msra.gmra.mxu1 %vm175_vm1, %v3823_v23 }
 0x427   : > { %7687 = vmatmul.mubr.msk.bf16.vlgmr.msra.gmra.mxu0 %vm175_vm1, %v3929_v34  ;;  %7699 = vmatpush3.bf16.msra.mxu1 %v8228_v18 }
 0x428   : > { %7700 = vmatprep.subr.bf16.mxu1 %v8315_v1  ;;  %7670 = vmatprep.mubr.msk.bf16.mxu1 %vm8316_vm0, %v8315_v1 }
 0x429   : > { %7690 = vmatprep.mubr.msk.bf16.mxu0 %vm8316_vm0, %v8315_v1  ;;  %7719 = vmatpush3.bf16.msra.mxu0 %v8232_v45 }
 0x42a   : > { %7720 = vmatprep.subr.bf16.mxu0 %v8315_v1 }
 0x42b   : > { %7701 = vmatpush3.bf16.msra.mxu1 %v8229_v22 }
 0x42c   : > { %7702 = vmatprep.subr.bf16.mxu1 %v8315_v1 }
 0x42d   : > { %7721 = vmatpush3.bf16.msra.mxu0 %v8233_v24 }
 0x42e   : > { %7671 = vmatmul.mubr.msk.bf16.gmra.mxu1 %vm175_vm1, %v3824_v55  ;;  %7722 = vmatprep.subr.bf16.mxu0 %v8315_v1 }
 0x42f   : > { %7691 = vmatmul.mubr.msk.bf16.gmra.mxu0 %vm175_vm1, %v3930_v33  ;;  %7703 = vmatpush3.bf16.msra.mxu1 %v8230_v43 }
 0x430   : > { %7674 = vmatprep.mubr.msk.bf16.mxu1 %vm8316_vm0, %v8315_v1  ;;  %7704 = vmatprep.subr.bf16.mxu1 %v8315_v1 }
 0x431   : > { %7694 = vmatprep.mubr.msk.bf16.mxu0 %vm8316_vm0, %v8315_v1  ;;  %7723 = vmatpush3.bf16.msra.mxu0 %v8235_v5 }
 0x432   : > { %7724 = vmatprep.subr.bf16.mxu0 %v8315_v1 }
 0x433   : > { %7705 = vmatpush3.bf16.msra.mxu1 %v8231_v26 }
 0x434   : > { %7738 = vmatprep.subr.bf16.mxu1 %v8315_v1 }
 0x435   : > { %7725 = vmatpush3.bf16.msra.mxu0 %v8238_v48 }
 0x436   : > { %7675 = vmatmul.mubr.msk.bf16.gmra.mxu1 %vm175_vm1, %v3825_v17  ;;  %7758 = vmatprep.subr.bf16.mxu0 %v8315_v1 }
 0x437   : > { %7706 = vmatprep.mubr.msk.bf16.mxu1 %vm8316_vm0, %v8315_v1  ;;  %7695 = vmatmul.mubr.msk.bf16.gmra.mxu0 %vm175_vm1, %v3931_v38 }
 0x438   : > { %7726 = vmatprep.mubr.msk.bf16.mxu0 %vm8316_vm0, %v8315_v1 }
 0x43e   : > { %7707 = vmatmul.mubr.msk.bf16.vlgmr.msra.gmra.mxu1 %vm175_vm1, %v4035_v41 }
 0x43f   : > { %7710 = vmatprep.mubr.msk.bf16.mxu1 %vm8316_vm0, %v8315_v1  ;;  %7739 = vmatpush3.bf16.msra.mxu1 %v8234_v25 }
 0x440   : > { %7740 = vmatprep.subr.bf16.mxu1 %v8315_v1 }
 0x443   : > { %7741 = vmatpush3.bf16.msra.mxu1 %v8236_v47 }
 0x444   : > { %7742 = vmatprep.subr.bf16.mxu1 %v8315_v1 }
 0x446   : > { %7711 = vmatmul.mubr.msk.bf16.gmra.mxu1 %vm175_vm1, %v4036_v35 }
 0x447   : > { %7714 = vmatprep.mubr.msk.bf16.mxu1 %vm8316_vm0, %v8315_v1  ;;  %7743 = vmatpush3.bf16.msra.mxu1 %v8237_v59 }
 0x448   : > { %7744 = vmatprep.subr.bf16.mxu1 %v8315_v1 }
 0x44b   : > { %7745 = vmatpush3.bf16.msra.mxu1 %v8239_v50 }
 0x44c   : > { %7778 = vmatprep.subr.bf16.mxu1 %v8315_v1 }
 0x44e   : > { %7715 = vmatmul.mubr.msk.bf16.gmra.mxu1 %vm175_vm1, %v4037_v30 }
 0x44f   : > { %7746 = vmatprep.mubr.msk.bf16.mxu1 %vm8316_vm0, %v8315_v1 }
 0x49e   : > { %v3287_v29 = vpop.f32.mrf.mxu1 }
 0x49f   : > { %v3374_v46 = vpop.f32.mrf.mxu0 }
 0x4a0   : > { %v9537_v54 = vadd.f32 %v3374_v46, %v3287_v29  ;;  %v7548_v14 = vpop.f32.mrf.mxu1 }
 0x4a1   : > { %v7568_v56 = vpop.f32.mrf.mxu0 }
 0x4a2   : > { %v3290_v57 = vpop.f32.mrf.mxu1 }
 0x4a3   : > { %v3377_v49 = vpop.f32.mrf.mxu0 }
 0x4a4   : > { %v9541_v51 = vadd.f32 %v3377_v49, %v3290_v57  ;;  %v7549_v52 = vpop.f32.mrf.mxu1 }
 0x4a5   : > { %v7569_v60 = vpop.f32.mrf.mxu0 }
 0x4a6   : > { %v3295_v61 = vpop.f32.mrf.mxu1 }
 0x4a7   : > { %v3382_v63 = vpop.f32.mrf.mxu0 }
 0x4a8   : > { %v9545_v2 = vadd.f32 %v3382_v63, %v3295_v61  ;;  %v7552_v3 = vpop.f32.mrf.mxu1 }
 0x4a9   : > { %v7572_v4 = vpop.f32.mrf.mxu0 }
 0x4aa   : > { %v3298_v7 = vpop.f32.mrf.mxu1 }
 0x4ab   : > { %v3385_v8 = vpop.f32.mrf.mxu0 }
 0x4ac   : > { %v7553_v9 = vpop.f32.mrf.mxu1 }
 0x4ad   : > { %v7573_v10 = vpop.f32.mrf.mxu0 }
 0x4ae   : > { %v3302_v11 = vpop.f32.mrf.mxu1 }
 0x4af   : > { %v3389_v12 = vpop.f32.mrf.mxu0 }
 0x4b0   : > { %v7556_v15 = vpop.f32.mrf.mxu1 }
 0x4b1   : > { %v7576_v16 = vpop.f32.mrf.mxu0 }
 0x4b2   : > { %v3304_v19 = vpop.f32.mrf.mxu1 }
 0x4b3   : > { %v3391_v20 = vpop.f32.mrf.mxu0 }
 0x4b4   : > { %v7557_v27 = vpop.f32.mrf.mxu1 }
 0x4b5   : > { %v7577_v28 = vpop.f32.mrf.mxu0 }
 0x4b6   : > { %v3477_v31 = vpop.f32.mrf.mxu1 }
 0x4b7   : > { %v3583_v32 = vpop.f32.mrf.mxu0  ;;  %v3497_v16 = vadd.f32 %v3477_v31, %v9537_v54 }
 0x4b8   : > { %v7588_v36 = vpop.f32.mrf.mxu1 }
 0x4b9   : > { %v7608_v37 = vpop.f32.mrf.mxu0  ;;  %v3603_v36 = vadd.f32 %v3583_v32, %v3497_v16 }
 0x4ba   : > { %v3480_v13 = vpop.f32.mrf.mxu1 }
 0x4bb   : > { %v3586_v39 = vpop.f32.mrf.mxu0  ;;  %v3498_v37 = vadd.f32 %v3480_v13, %v9541_v51 }
 0x4bc   : > { %v7589_v21 = vpop.f32.mrf.mxu1 }
 0x4bd   : > { %v7609_v53 = vpop.f32.mrf.mxu0 }
 0x4be   : > { %v3485_v40 = vpop.f32.mrf.mxu1 }
 0x4bf   : > { %v9547_v18 = vpop.f32.mrf.mxu0 }
 0x4c0   : > { %v7592_v23 = vpop.f32.mrf.mxu1 }
 0x4c1   : > { %v7612_v42 = vpop.f32.mrf.mxu0 }
 0x4c2   : > { %v3488_v34 = vpop.f32.mrf.mxu1 }
 0x4c3   : > { %v3594_v22 = vpop.f32.mrf.mxu0 }
 0x4c4   : > { %v7593_v0 = vpop.f32.mrf.mxu1  ;;  %v3604_v22 = vadd.f32 %v3586_v39, %v3498_v37  ;;  %v6481_v39 = vld [vmem:[%s10118_s2 + $0x3] ss:$0 sm:$0xff] }
 0x4c5   : > { %v7613_v44 = vpop.f32.mrf.mxu0  ;;  %v3499_v0 = vadd.f32 %v3485_v40, %v9545_v2 }
 0x4c6   : > { %v3492_v43 = vpop.f32.mrf.mxu1 }
 0x4c7   : > { %v3598_v55 = vpop.f32.mrf.mxu0  ;;  %v3605_v31 = vadd.f32 %v9547_v18, %v3499_v0  ;;  %v8244_v0 = vld [vmem:[%s10117_s1 + $0x4f0] sm:$0xff]  }
 0x4c8   : > { %v7596_v33 = vpop.f32.mrf.mxu1 }
 0x4c9   : > { %v7616_v58 = vpop.f32.mrf.mxu0 }
 0x4ca   : > { %v3494_v26 = vpop.f32.mrf.mxu1 }
 0x4cb   : > { %v3600_v17 = vpop.f32.mrf.mxu0 }
 0x4cc   : > { %v7597_v41 = vpop.f32.mrf.mxu1 }
 0x4cd   : > { %v7617_v35 = vpop.f32.mrf.mxu0 }
 0x4ce   : > { %v3689_v45 = vpop.f32.mrf.mxu1 }
 0x4cf   : > { %v3795_v25 = vpop.f32.mrf.mxu0  ;;  %v3709_v23 = vadd.f32 %v3689_v45, %v3603_v36 }
 0x4d0   : > { %v7628_v62 = vpop.f32.mrf.mxu1 }
 0x4d1   : > { %v7648_v38 = vpop.f32.mrf.mxu0  ;;  %v3815_v55 = vadd.f32 %v3795_v25, %v3709_v23  ;;  %v8242_v23 = vld [vmem:[%s10117_s1 + $0x4f8] sm:$0xff]  }
 0x4d2   : > { %v3692_v24 = vpop.f32.mrf.mxu1 }
 0x4d3   : > { %v3798_v47 = vpop.f32.mrf.mxu0  ;;  %v3710_v33 = vadd.f32 %v3692_v24, %v3604_v22  ;;  %v4144_v24 = vld [vmem:[#allocation3] sm:$0xf] }
 0x4d4   : > { %v7629_v6 = vpop.f32.mrf.mxu1 }
 0x4d5   : > { %v7649_v30 = vpop.f32.mrf.mxu0  ;;  %v3816_v32 = vadd.f32 %v3798_v47, %v3710_v33 }
 0x4d6   : > { %v3697_v5 = vpop.f32.mrf.mxu1 }
 0x4d7   : > { %v3803_v59 = vpop.f32.mrf.mxu0  ;;  %v3711_v17 = vadd.f32 %v3697_v5, %v3605_v31  ;;  %v8245_v31 = vld [vmem:[%s10117_s1 + $0x4e8] sm:$0xff]  }
 0x4d8   : > { %v7632_v29 = vpop.f32.mrf.mxu1 }
 0x4d9   : > { %v7652_v46 = vpop.f32.mrf.mxu0  ;;  %v3817_v2 = vadd.f32 %v3803_v59, %v3711_v17  ;;  %v4156_v59 = vld [vmem:[#allocation3 + $0x8] sm:$0xf] }
 0x4da   : > { %v3700_v48 = vpop.f32.mrf.mxu1 }
 0x4db   : > { %v3806_v50 = vpop.f32.mrf.mxu0 }
 0x4dc   : > { %v7633_v14 = vpop.f32.mrf.mxu1 }
 0x4dd   : > { %v7653_v56 = vpop.f32.mrf.mxu0 }
 0x4de   : > { %v3704_v57 = vpop.f32.mrf.mxu1 }
 0x4df   : > { %v3810_v49 = vpop.f32.mrf.mxu0 }
 0x4e0   : > { %v7636_v52 = vpop.f32.mrf.mxu1  ;;  %v4147_v49 = vld [vmem:[#allocation3 + $0x4] sm:$0xf] }
 0x4e1   : > { %v7656_v60 = vpop.f32.mrf.mxu0 }
 0x4e2   : > { %v3706_v61 = vpop.f32.mrf.mxu1 }
 0x4e3   : > { %v3812_v63 = vpop.f32.mrf.mxu0 }
 0x4e4   : > { %v7637_v3 = vpop.f32.mrf.mxu1 }
 0x4e5   : > { %v7657_v4 = vpop.f32.mrf.mxu0 }
 0x4e6   : > { %v3901_v7 = vpop.f32.mrf.mxu1 }
 0x4e7   : > { %v4007_v8 = vpop.f32.mrf.mxu0  ;;  %v3921_v58 = vadd.f32 %v3901_v7, %v3815_v55 }
 0x4e8   : > { %v7668_v9 = vpop.f32.mrf.mxu1 }
 0x4e9   : > { %v7688_v10 = vpop.f32.mrf.mxu0  ;;  %v4027_v13 = vadd.f32 %v4007_v8, %v3921_v58  ;;  %v4161_v8 = vld [vmem:[#allocation3 + $0xc] sm:$0xf] }
 0x4ea   : > { %v3904_v11 = vpop.f32.mrf.mxu1  ;;  %v8246_v58 = vld [vmem:[%s10117_s1 + $0x4c0] sm:$0xff]  }
 0x4eb   : > { %v4010_v12 = vpop.f32.mrf.mxu0  ;;  %v3922_v41 = vadd.f32 %v3904_v11, %v3816_v32  ;;  %v8247_v32 = vld [vmem:[%s10117_s1 + $0x4e0] sm:$0xff]  }
 0x4ec   : > { %v7669_v15 = vpop.f32.mrf.mxu1 }
 0x4ed   : > { %v7689_v19 = vpop.f32.mrf.mxu0  ;;  %v4028_v25 = vadd.f32 %v4010_v12, %v3922_v41 }
 0x4ee   : > { %v3909_v20 = vpop.f32.mrf.mxu1 }
 0x4ef   : > { %v4015_v27 = vpop.f32.mrf.mxu0  ;;  %v3923_v62 = vadd.f32 %v3909_v20, %v3817_v2  ;;  %v8240_v20 = vld [vmem:[%s10117_s1 + $0x4d8] sm:$0xff]  }
 0x4f0   : > { %v7672_v28 = vpop.f32.mrf.mxu1 }
 0x4f1   : > { %v7692_v21 = vpop.f32.mrf.mxu0  ;;  %v4029_v5 = vadd.f32 %v4015_v27, %v3923_v62  ;;  %v8250_v62 = vld [vmem:[%s10117_s1 + $0x538] sm:$0xff]  }
 0x4f2   : > { %v3912_v53 = vpop.f32.mrf.mxu1 }
 0x4f3   : > { %v4018_v42 = vpop.f32.mrf.mxu0 }
 0x4f4   : > { %v7673_v34 = vpop.f32.mrf.mxu1  ;;  %v8241_v42 = vld [vmem:[%s10117_s1 + $0x4d0] sm:$0xff]  }
 0x4f5   : > { %v7693_v44 = vpop.f32.mrf.mxu0 }
 0x4f6   : > { %v3916_v43 = vpop.f32.mrf.mxu1 }
 0x4f7   : > { %v8243_v43 = vld [vmem:[%s10117_s1 + $0x4c8] sm:$0xff]  }
 0x4f8   : > { %v7676_v54 = vpop.f32.mrf.mxu1 }
 0x4fa   : > { %v3918_v26 = vpop.f32.mrf.mxu1 }
 0x4fc   : > { %v7677_v51 = vpop.f32.mrf.mxu1 }
 0x4fe   : > { %v4113_v35 = vpop.f32.mrf.mxu1 }
 0x4ff   : > { %v4133_v40 = vadd.f32 %v4113_v35, %v4027_v13 }
 0x500   : > { %v7708_v45 = vpop.f32.mrf.mxu1 }
 0x501   : > { %v4141_v38 = vadd.f32 %v6481_v39, %v4133_v40  ;;  %v8248_v40 = vld [vmem:[%s10117_s1 + $0x518] sm:$0xff]  }
 0x502   : > { %v4116_v18 = vpop.f32.mrf.mxu1 }
 0x503   : > { %v4145_v6 = vadd.f32 %v4144_v24, %v4141_v38  ;;  %v4134_v30 = vadd.f32 %v4116_v18, %v4028_v25  ;;  %v4150_v48 = vrot.slane %v4141_v38, 6  ;;  %v8249_v38 = vld [vmem:[%s10117_s1 + $0x510] sm:$0xff]  }
 0x504   : > { %v7709_v47 = vpop.f32.mrf.mxu1 }
 0x505   : > { %4146 = vst.msk [vmem:[#allocation3] sm:$0xf] %vm191_vm2, %v4145_v6  ;;  %v4142_v29 = vadd.f32 %v6481_v39, %v4134_v30  ;;  %v8252_v6 = vld [vmem:[%s10117_s1 + $0x530] sm:$0xff]   ;;  %v8251_v47 = vld [vmem:[%s10117_s1 + $0x508] sm:$0xff]  }
 0x506   : > { %v4121_v46 = vpop.f32.mrf.mxu1 }
 0x507   : > { %v4151_v50 = vrot.slane %v4142_v29, 6  ;;  %v4157_v14 = vrot.slane %v4142_v29, 4  ;;  %v4135_v56 = vadd.f32 %v4121_v46, %v4029_v5 }
 0x508   : > { %v7712_v57 = vpop.f32.mrf.mxu1 }
 0x509   : > { %v4152_v52 = vsel %vm2167_vm15, %v4150_v48, %v4151_v50  ;;  %v4159_v60 = vadd.f32 %v4157_v14, %v4156_v59  ;;  %v4143_v61 = vadd.f32 %v6481_v39, %v4135_v56  ;;  %v8253_v48 = vld [vmem:[%s10117_s1 + $0x528] sm:$0xff]   ;;  %v8254_v50 = vld [vmem:[%s10117_s1 + $0x500] sm:$0xff]  }
 0x50a   : > { %v4154_v63 = vadd.f32 %v4152_v52, %v4147_v49  ;;  %v4124_v3 = vpop.f32.mrf.mxu1  ;;  %v4507_v14 = vld [vmem:[#allocation2 + $0x26] sm:$0xf] }
 0x50b   : > { %4160 = vst.msk [vmem:[#allocation3 + $0x8] sm:$0xf] %vm191_vm2, %v4159_v60  ;;  %v4163_v4 = vrot.slane %v4143_v61, 2  ;;  %v8255_v59 = vld [vmem:[%s10117_s1 + $0x520] sm:$0xff]   ;;  %v4510_v57 = vpack.c.bf16 %v4507_v14, %v4507_v14  ;;  %v8256_v61 = vld [vmem:[%s10117_s1 + $0x558] sm:$0xff]  }
 0x50c   : > { %v4171_v7 = vld [vmem:[#allocation3] sm:$0xf]  ;;  %4155 = vst.msk [vmem:[#allocation3 + $0x4] sm:$0xf] %vm191_vm2, %v4154_v63  ;;  %v7713_v9 = vpop.f32.mrf.mxu1 }
 0x50d   : > { %4172 = vst.msk [vmem:[#allocation2 + $0x7] sm:$0xf] %vm191_vm2, %v4171_v7  ;;  %v4165_v10 = vadd.f32 %v4163_v4, %v4161_v8  ;;  %v8258_v4 = vld [vmem:[%s10117_s1 + $0x578] sm:$0xff]   ;;  %v8260_v9 = vld [vmem:[%s10117_s1 + $0x570] sm:$0xff]  }
 0x50e   : > { %4173 = vst.msk [vmem:[#allocation2 + $0x5] sm:$0x2] %vm193_vm3, %v4171_v7 }
 0x50f   : > { %4174 = vst.msk [vmem:[#allocation2 + $0x9] sm:$0x4] %vm195_vm4, %v4171_v7  ;;  %v8257_v7 = vld [vmem:[%s10117_s1 + $0x550] sm:$0xff]  }
 0x510   : > { %4166 = vst.msk [vmem:[#allocation3 + $0xc] sm:$0xf] %vm191_vm2, %v4165_v10 }
 0x512   : > { %v4179_v11 = vld [vmem:[#allocation3 + $0x8] sm:$0xf] }
 0x513   : > { %v4187_v12 = vld [vmem:[#allocation3 + $0x8] sm:$0xf]  ;;  %v4167_v15 = vld [vmem:[#allocation3 + $0x4] sm:$0xf]  ;;  %4180 = vst.msk [vmem:[#allocation2 + $0x13] sm:$0xf] %vm191_vm2, %v4179_v11 }
 0x514   : > { %v4175_v16 = vld [vmem:[#allocation3 + $0x4] sm:$0xf]  ;;  %4181 = vst.msk [vmem:[#allocation2 + $0x11] sm:$0x2] %vm193_vm3, %v4179_v11  ;;  %4189 = vst.msk [vmem:[#allocation2 + $0x1d] sm:$0x2] %vm193_vm3, %v4187_v12 }
 0x515   : > { %4182 = vst.msk [vmem:[#allocation2 + $0x15] sm:$0x4] %vm195_vm4, %v4179_v11  ;;  %4190 = vst.msk [vmem:[#allocation2 + $0x21] sm:$0x4] %vm195_vm4, %v4187_v12  ;;  %v8259_v11 = vld [vmem:[%s10117_s1 + $0x548] sm:$0xff]  }
 0x516   : > { %4188 = vst.msk [vmem:[#allocation2 + $0x1f] sm:$0xf] %vm191_vm2, %v4187_v12  ;;  %4168 = vst.msk [vmem:[#allocation2 + $0x1] sm:$0xf] %vm191_vm2, %v4167_v15 }
 0x517   : > { %4169 = vst.msk [vmem:[#allocation2 - $0x1] sm:$0x2] %vm193_vm3, %v4167_v15  ;;  %4177 = vst.msk [vmem:[#allocation2 + $0xb] sm:$0x2] %vm193_vm3, %v4175_v16  ;;  %v4183_v19 = vld [vmem:[#allocation3 + $0xc] sm:$0xf] }
 0x518   : > { %4170 = vst.msk [vmem:[#allocation2 + $0x3] sm:$0x4] %vm195_vm4, %v4167_v15  ;;  %4178 = vst.msk [vmem:[#allocation2 + $0xf] sm:$0x4] %vm195_vm4, %v4175_v16 }
 0x519   : > { %4176 = vst.msk [vmem:[#allocation2 + $0xd] sm:$0xf] %vm191_vm2, %v4175_v16  ;;  %4184 = vst.msk [vmem:[#allocation2 + $0x19] sm:$0xf] %vm191_vm2, %v4183_v19 }
 0x51a   : > { %4185 = vst.msk [vmem:[#allocation2 + $0x17] sm:$0x2] %vm193_vm3, %v4183_v19 }
 0x51b   : > { %4186 = vst.msk [vmem:[#allocation2 + $0x1b] sm:$0x4] %vm195_vm4, %v4183_v19  ;;  %v8261_v19 = vld [vmem:[%s10117_s1 + $0x568] sm:$0xff]  }
 0x51d   : > { %v4211_v26 = vld [vmem:[#allocation2 + $0x21] sm:$0xf] }
 0x51e   : > { %v4195_v17 = vld [vmem:[#allocation2 + $0x20] sm:$0xf]  ;;  %v4214_v51 = vpack.c.bf16 %v4211_v26, %v4211_v26 }
 0x51f   : > { %v4207_v27 = vld [vmem:[#allocation2 + $0x1] sm:$0xff]  ;;  %v4198_v13 = vpack.c.bf16 %v4195_v17, %v4195_v17  ;;  %v8265_v17 = vld [vmem:[%s10117_s1 + $0x590] sm:$0xff]  }
 0x520   : > { %v4208_v28 = vld [vmem:[#allocation2 + $0x9] sm:$0xff]  ;;  %v4191_v36 = vld [vmem:[#allocation2] sm:$0xff] }
 0x521   : > { %v4212_v37 = vpack.c.bf16 %v4208_v28, %v4207_v27  ;;  %v9582_v21 = vld [vmem:[#allocation2 + $0x8] sm:$0xff]  ;;  %v4209_v34 = vld [vmem:[#allocation2 + $0x11] sm:$0xff]  ;;  %v9666_v29 = vld [vmem:[#allocation2 + $0x1e] sm:$0xff] }
 0x522   : > { %v4196_v53 = vpack.c.bf16 %v9582_v21, %v4191_v36  ;;  %v4210_v22 = vld [vmem:[#allocation2 + $0x19] sm:$0xff]  ;;  %v9607_v33 = vld [vmem:[#allocation2 + $0x10] sm:$0xff]  ;;  %v4397_v41 = vld [vmem:[#allocation2 + $0x2] sm:$0xff]  ;;  %v4022_v36 = vpop.f32.mrf.mxu0 }
 0x523   : > { %7727 = vmatmul.mubr.msk.bf16.vlgmr.msra.gmra.mxu0 %vm175_vm1, %v4212_v37  ;;  %v9601_v44 = vld [vmem:[#allocation2 + $0x18] sm:$0xff]  ;;  %v4213_v55 = vpack.c.bf16 %v4210_v22, %v4209_v34  ;;  %v4398_v35 = vld [vmem:[#allocation2 + $0xa] sm:$0xff]  ;;  %v4401_v56 = vld [vmem:[#allocation2 + $0x22] sm:$0xf]  ;;  %v4720_v3 = vpack.c.bf16 %v9607_v33, %v9582_v21  ;;  %v4128_v34 = vpop.f32.mrf.mxu1 }
 0x524   : > { %7747 = vmatmul.mubr.msk.bf16.vlgmr.msra.gmra.mxu1 %vm175_vm1, %v4196_v53  ;;  %7759 = vmatpush3.bf16.msra.mxu0 %v8240_v20  ;;  %v4197_v54 = vpack.c.bf16 %v9601_v44, %v9607_v33  ;;  %v4503_v39 = vld [vmem:[#allocation2 + $0x6] sm:$0xff]  ;;  %v9638_v2 = vld [vmem:[#allocation2 + $0xe] sm:$0xff]  ;;  %v4402_v45 = vpack.c.bf16 %v4398_v35, %v4397_v41  ;;  %v4400_v18 = vld [vmem:[#allocation2 + $0x1a] sm:$0xff]  ;;  %v4404_v49 = vpack.c.bf16 %v4401_v56, %v4401_v56  ;;  %v7696_v53 = vpop.f32.mrf.mxu0 }
 0x525   : > { %7760 = vmatprep.subr.bf16.mxu0 %v8315_v1  ;;  %7730 = vmatprep.mubr.msk.bf16.mxu0 %vm8316_vm0, %v8315_v1  ;;  %v4508_v25 = vpack.c.bf16 %v9638_v2, %v4503_v39  ;;  %v4399_v24 = vld [vmem:[#allocation2 + $0x12] sm:$0xff]  ;;  %v4609_v52 = vld [vmem:[#allocation2 + $0x7] sm:$0xff]  ;;  %v4612_v10 = vld [vmem:[#allocation2 + $0x1f] sm:$0xff] }
 0x526   : > { %7750 = vmatprep.mubr.msk.bf16.mxu1 %vm8316_vm0, %v8315_v1  ;;  %7779 = vmatpush3.bf16.msra.mxu1 %v8242_v23  ;;  %v9660_v30 = vld [vmem:[#allocation2 + $0x16] sm:$0xff]  ;;  %v4403_v5 = vpack.c.bf16 %v4400_v18, %v4399_v24  ;;  %v4718_v15 = vld [vmem:[#allocation2 + $0x20] sm:$0xff]  ;;  %v4719_v28 = vld [vmem:[#allocation2 + $0x28] sm:$0xf] }
 0x527   : > { %7780 = vmatprep.subr.bf16.mxu1 %v8315_v1  ;;  %v4509_v46 = vpack.c.bf16 %v9666_v29, %v9660_v30  ;;  %v4610_v60 = vld [vmem:[#allocation2 + $0xf] sm:$0xff]  ;;  %v4611_v8 = vld [vmem:[#allocation2 + $0x17] sm:$0xff]  ;;  %v4721_v16 = vpack.c.bf16 %v4718_v15, %v9601_v44  ;;  %v4613_v20 = vld [vmem:[#allocation2 + $0x27] sm:$0xf]  ;;  %v4722_v23 = vpack.c.bf16 %v4719_v28, %v4719_v28  ;;  %v5038_v24 = vpack.c.bf16 %v9660_v30, %v9638_v2 }
 0x528   : > { %7761 = vmatpush3.bf16.msra.mxu0 %v8241_v42  ;;  %v4614_v63 = vpack.c.bf16 %v4610_v60, %v4609_v52  ;;  %v4615_v12 = vpack.c.bf16 %v4612_v10, %v4611_v8  ;;  %v8262_v27 = vld [vmem:[%s10117_s1 + $0x540] sm:$0xff]   ;;  %v4616_v21 = vpack.c.bf16 %v4613_v20, %v4613_v20  ;;  %v4024_v42 = vpop.f32.mrf.mxu0  ;;  %v4927_v26 = vld [vmem:[#allocation2 + $0xd] sm:$0xff]  ;;  %v8270_v30 = vld [vmem:[%s10117_s1 + $0x5b8] sm:$0xff]  }
 0x529   : > { %7762 = vmatprep.subr.bf16.mxu0 %v8315_v1  ;;  %v8263_v37 = vld [vmem:[%s10117_s1 + $0x560] sm:$0xff]   ;;  %v8266_v39 = vld [vmem:[%s10117_s1 + $0x588] sm:$0xff]   ;;  %v8269_v2 = vld [vmem:[%s10117_s1 + $0x5d0] sm:$0xff]  }
 0x52a   : > { %7781 = vmatpush3.bf16.msra.mxu1 %v8244_v0  ;;  %v7697_v22 = vpop.f32.mrf.mxu0  ;;  %v7716_v0 = vpop.f32.mrf.mxu1  ;;  %v4929_v41 = vld [vmem:[#allocation2 + $0x1d] sm:$0xff]  ;;  %v9765_v35 = vld [vmem:[#allocation2 + $0x25] sm:$0xff] }
 0x52b   : > { %7731 = vmatmul.mubr.msk.bf16.gmra.mxu0 %vm175_vm1, %v4213_v55  ;;  %7782 = vmatprep.subr.bf16.mxu1 %v8315_v1  ;;  %v4928_v55 = vld [vmem:[#allocation2 + $0x15] sm:$0xff]  ;;  %v9792_v18 = vld [vmem:[#allocation2 + $0x26] sm:$0xff] }
 0x52c   : > { %7751 = vmatmul.mubr.msk.bf16.gmra.mxu1 %vm175_vm1, %v4197_v54  ;;  %7763 = vmatpush3.bf16.msra.mxu0 %v8243_v43  ;;  %v4130_v44 = vpop.f32.mrf.mxu1  ;;  %v4822_v43 = vld [vmem:[#allocation2 + $0x14] sm:$0xff]  ;;  %v4821_v54 = vld [vmem:[#allocation2 + $0xc] sm:$0xff] }
 0x52d   : > { %7734 = vmatprep.mubr.msk.bf16.mxu0 %vm8316_vm0, %v8315_v1  ;;  %7754 = vmatprep.mubr.msk.bf16.mxu1 %vm8316_vm0, %v8315_v1  ;;  %v8273_v56 = vld [vmem:[%s10117_s1 + $0x5a8] sm:$0xff]  }
 0x52e   : > { %7764 = vmatprep.subr.bf16.mxu0 %v8315_v1  ;;  %7783 = vmatpush3.bf16.msra.mxu1 %v8245_v31  ;;  %v7717_v33 = vpop.f32.mrf.mxu1  ;;  %v8264_v31 = vld [vmem:[%s10117_s1 + $0x598] sm:$0xff]  }
 0x52f   : > { %7784 = vmatprep.subr.bf16.mxu1 %v8315_v1 }
 0x530   : > { %7765 = vmatpush3.bf16.msra.mxu0 %v8246_v58  ;;  %v4826_v58 = vpack.c.bf16 %v4822_v43, %v4821_v54 }
 0x531   : > { %7798 = vmatprep.subr.bf16.mxu0 %v8315_v1 }
 0x532   : > { %7785 = vmatpush3.bf16.msra.mxu1 %v8247_v32  ;;  %v4932_v32 = vpack.c.bf16 %v4928_v55, %v4927_v26 }
 0x533   : > { %7735 = vmatmul.mubr.msk.bf16.gmra.mxu0 %vm175_vm1, %v4214_v51  ;;  %7818 = vmatprep.subr.bf16.mxu1 %v8315_v1  ;;  %v4823_v51 = vld [vmem:[#allocation2 + $0x1c] sm:$0xff] }
 0x534   : > { %7755 = vmatmul.mubr.msk.bf16.gmra.mxu1 %vm175_vm1, %v4198_v13  ;;  %7766 = vmatprep.mubr.msk.bf16.mxu0 %vm8316_vm0, %v8315_v1  ;;  %v9763_v13 = vld [vmem:[#allocation2 + $0x24] sm:$0xff] }
 0x535   : > { %7786 = vmatprep.mubr.msk.bf16.mxu1 %vm8316_vm0, %v8315_v1 }
 0x53b   : > { %7767 = vmatmul.mubr.msk.bf16.vlgmr.msra.gmra.mxu0 %vm175_vm1, %v4402_v45  ;;  %v4933_v45 = vpack.c.bf16 %v9765_v35, %v4929_v41 }
 0x53c   : > { %7787 = vmatmul.mubr.msk.bf16.vlgmr.msra.gmra.mxu1 %vm175_vm1, %v4508_v25  ;;  %7799 = vmatpush3.bf16.msra.mxu0 %v8248_v40  ;;  %v4827_v40 = vpack.c.bf16 %v9763_v13, %v4823_v51  ;;  %v4825_v25 = vld [vmem:[#allocation2 + $0x2c] sm:$0xf] }
 0x53d   : > { %7800 = vmatprep.subr.bf16.mxu0 %v8315_v1  ;;  %7770 = vmatprep.mubr.msk.bf16.mxu0 %vm8316_vm0, %v8315_v1 }
 0x53e   : > { %7790 = vmatprep.mubr.msk.bf16.mxu1 %vm8316_vm0, %v8315_v1  ;;  %7819 = vmatpush3.bf16.msra.mxu1 %v8250_v62  ;;  %v8267_v62 = vld [vmem:[%s10117_s1 + $0x580] sm:$0xff]  }
 0x53f   : > { %7820 = vmatprep.subr.bf16.mxu1 %v8315_v1 }
 0x540   : > { %7801 = vmatpush3.bf16.msra.mxu0 %v8249_v38  ;;  %v4828_v38 = vpack.c.bf16 %v4825_v25, %v4825_v25 }
 0x541   : > { %7802 = vmatprep.subr.bf16.mxu0 %v8315_v1 }
 0x542   : > { %7821 = vmatpush3.bf16.msra.mxu1 %v8252_v6  ;;  %v5039_v6 = vpack.c.bf16 %v9792_v18, %v9666_v29 }
 0x543   : > { %7771 = vmatmul.mubr.msk.bf16.gmra.mxu0 %vm175_vm1, %v4403_v5  ;;  %7822 = vmatprep.subr.bf16.mxu1 %v8315_v1  ;;  %v4931_v5 = vld [vmem:[#allocation2 + $0x2d] sm:$0xf] }
 0x544   : > { %7791 = vmatmul.mubr.msk.bf16.gmra.mxu1 %vm175_vm1, %v4509_v46  ;;  %7803 = vmatpush3.bf16.msra.mxu0 %v8251_v47  ;;  %v8268_v47 = vld [vmem:[%s10117_s1 + $0x5d8] sm:$0xff]   ;;  %v4934_v29 = vpack.c.bf16 %v4931_v5, %v4931_v5  ;;  %v8271_v46 = vld [vmem:[%s10117_s1 + $0x5c8] sm:$0xff]  }
 0x545   : > { %7774 = vmatprep.mubr.msk.bf16.mxu0 %vm8316_vm0, %v8315_v1  ;;  %7794 = vmatprep.mubr.msk.bf16.mxu1 %vm8316_vm0, %v8315_v1 }
 0x546   : > { %7804 = vmatprep.subr.bf16.mxu0 %v8315_v1  ;;  %7823 = vmatpush3.bf16.msra.mxu1 %v8253_v48  ;;  %v8272_v48 = vld [vmem:[%s10117_s1 + $0x5b0] sm:$0xff]  }
 0x547   : > { %7824 = vmatprep.subr.bf16.mxu1 %v8315_v1 }
 0x548   : > { %7805 = vmatpush3.bf16.msra.mxu0 %v8254_v50  ;;  %v5037_v50 = vld [vmem:[#allocation2 + $0x2e] sm:$0xf] }
 0x549   : > { %7838 = vmatprep.subr.bf16.mxu0 %v8315_v1  ;;  %v5040_v14 = vpack.c.bf16 %v5037_v50, %v5037_v50 }
 0x54a   : > { %7825 = vmatpush3.bf16.msra.mxu1 %v8255_v59  ;;  %v8274_v59 = vld [vmem:[%s10117_s1 + $0x5c0] sm:$0xff]  }
 0x54b   : > { %7775 = vmatmul.mubr.msk.bf16.gmra.mxu0 %vm175_vm1, %v4404_v49  ;;  %7858 = vmatprep.subr.bf16.mxu1 %v8315_v1 }
 0x54c   : > { %7795 = vmatmul.mubr.msk.bf16.gmra.mxu1 %vm175_vm1, %v4510_v57  ;;  %7806 = vmatprep.mubr.msk.bf16.mxu0 %vm8316_vm0, %v8315_v1  ;;  %v8275_v57 = vld [vmem:[%s10117_s1 + $0x5a0] sm:$0xff]  }
 0x54d   : > { %7826 = vmatprep.mubr.msk.bf16.mxu1 %vm8316_vm0, %v8315_v1 }
 0x553   : > { %7807 = vmatmul.mubr.msk.bf16.vlgmr.msra.gmra.mxu0 %vm175_vm1, %v4614_v63 }
 0x554   : > { %7827 = vmatmul.mubr.msk.bf16.vlgmr.msra.gmra.mxu1 %vm175_vm1, %v4720_v3  ;;  %7839 = vmatpush3.bf16.msra.mxu0 %v8256_v61 }
 0x555   : > { %7840 = vmatprep.subr.bf16.mxu0 %v8315_v1  ;;  %7810 = vmatprep.mubr.msk.bf16.mxu0 %vm8316_vm0, %v8315_v1 }
 0x556   : > { %7830 = vmatprep.mubr.msk.bf16.mxu1 %vm8316_vm0, %v8315_v1  ;;  %7859 = vmatpush3.bf16.msra.mxu1 %v8258_v4 }
 0x557   : > { %7860 = vmatprep.subr.bf16.mxu1 %v8315_v1 }
 0x558   : > { %7841 = vmatpush3.bf16.msra.mxu0 %v8257_v7 }
 0x559   : > { %7842 = vmatprep.subr.bf16.mxu0 %v8315_v1 }
 0x55a   : > { %7861 = vmatpush3.bf16.msra.mxu1 %v8260_v9 }
 0x55b   : > { %7811 = vmatmul.mubr.msk.bf16.gmra.mxu0 %vm175_vm1, %v4615_v12  ;;  %7862 = vmatprep.subr.bf16.mxu1 %v8315_v1 }
 0x55c   : > { %7831 = vmatmul.mubr.msk.bf16.gmra.mxu1 %vm175_vm1, %v4721_v16  ;;  %7843 = vmatpush3.bf16.msra.mxu0 %v8259_v11 }
 0x55d   : > { %7814 = vmatprep.mubr.msk.bf16.mxu0 %vm8316_vm0, %v8315_v1  ;;  %7834 = vmatprep.mubr.msk.bf16.mxu1 %vm8316_vm0, %v8315_v1 }
 0x55e   : > { %7844 = vmatprep.subr.bf16.mxu0 %v8315_v1  ;;  %7863 = vmatpush3.bf16.msra.mxu1 %v8261_v19 }
 0x55f   : > { %7864 = vmatprep.subr.bf16.mxu1 %v8315_v1 }
 0x560   : > { %7845 = vmatpush3.bf16.msra.mxu0 %v8262_v27 }
 0x561   : > { %7878 = vmatprep.subr.bf16.mxu0 %v8315_v1 }
 0x562   : > { %7865 = vmatpush3.bf16.msra.mxu1 %v8263_v37 }
 0x563   : > { %7815 = vmatmul.mubr.msk.bf16.gmra.mxu0 %vm175_vm1, %v4616_v21  ;;  %7898 = vmatprep.subr.bf16.mxu1 %v8315_v1 }
 0x564   : > { %7835 = vmatmul.mubr.msk.bf16.gmra.mxu1 %vm175_vm1, %v4722_v23  ;;  %7846 = vmatprep.mubr.msk.bf16.mxu0 %vm8316_vm0, %v8315_v1 }
 0x565   : > { %7866 = vmatprep.mubr.msk.bf16.mxu1 %vm8316_vm0, %v8315_v1 }
 0x56b   : > { %7847 = vmatmul.mubr.msk.bf16.vlgmr.msra.gmra.mxu0 %vm175_vm1, %v4826_v58 }
 0x56c   : > { %7867 = vmatmul.mubr.msk.bf16.vlgmr.msra.gmra.mxu1 %vm175_vm1, %v4932_v32  ;;  %7879 = vmatpush3.bf16.msra.mxu0 %v8264_v31 }
 0x56d   : > { %7880 = vmatprep.subr.bf16.mxu0 %v8315_v1  ;;  %7850 = vmatprep.mubr.msk.bf16.mxu0 %vm8316_vm0, %v8315_v1 }
 0x56e   : > { %7870 = vmatprep.mubr.msk.bf16.mxu1 %vm8316_vm0, %v8315_v1  ;;  %7899 = vmatpush3.bf16.msra.mxu1 %v8268_v47 }
 0x56f   : > { %7900 = vmatprep.subr.bf16.mxu1 %v8315_v1 }
 0x570   : > { %7881 = vmatpush3.bf16.msra.mxu0 %v8265_v17 }
 0x571   : > { %7882 = vmatprep.subr.bf16.mxu0 %v8315_v1 }
 0x572   : > { %7901 = vmatpush3.bf16.msra.mxu1 %v8269_v2 }
 0x573   : > { %7851 = vmatmul.mubr.msk.bf16.gmra.mxu0 %vm175_vm1, %v4827_v40  ;;  %7902 = vmatprep.subr.bf16.mxu1 %v8315_v1 }
 0x574   : > { %7871 = vmatmul.mubr.msk.bf16.gmra.mxu1 %vm175_vm1, %v4933_v45  ;;  %7883 = vmatpush3.bf16.msra.mxu0 %v8266_v39 }
 0x575   : > { %7854 = vmatprep.mubr.msk.bf16.mxu0 %vm8316_vm0, %v8315_v1  ;;  %7884 = vmatprep.subr.bf16.mxu0 %v8315_v1 }
 0x576   : > { %7874 = vmatprep.mubr.msk.bf16.mxu1 %vm8316_vm0, %v8315_v1  ;;  %7903 = vmatpush3.bf16.msra.mxu1 %v8271_v46 }
 0x577   : > { %7904 = vmatprep.subr.bf16.mxu1 %v8315_v1 }
 0x578   : > { %7885 = vmatpush3.bf16.msra.mxu0 %v8267_v62 }
 0x579   : > { %7918 = vmatprep.subr.bf16.mxu0 %v8315_v1 }
 0x57a   : > { %7905 = vmatpush3.bf16.msra.mxu1 %v8274_v59 }
 0x57b   : > { %7855 = vmatmul.mubr.msk.bf16.gmra.mxu0 %vm175_vm1, %v4828_v38  ;;  %7938 = vmatprep.subr.bf16.mxu1 %v8315_v1 }
 0x57c   : > { %7886 = vmatprep.mubr.msk.bf16.mxu0 %vm8316_vm0, %v8315_v1  ;;  %7875 = vmatmul.mubr.msk.bf16.gmra.mxu1 %vm175_vm1, %v4934_v29 }
 0x57d   : > { %7906 = vmatprep.mubr.msk.bf16.mxu1 %vm8316_vm0, %v8315_v1 }
 0x583   : > { %7887 = vmatmul.mubr.msk.bf16.vlgmr.msra.gmra.mxu0 %vm175_vm1, %v5038_v24 }
 0x584   : > { %7890 = vmatprep.mubr.msk.bf16.mxu0 %vm8316_vm0, %v8315_v1  ;;  %7919 = vmatpush3.bf16.msra.mxu0 %v8270_v30 }
 0x585   : > { %7920 = vmatprep.subr.bf16.mxu0 %v8315_v1 }
 0x588   : > { %7921 = vmatpush3.bf16.msra.mxu0 %v8272_v48 }
 0x589   : > { %7922 = vmatprep.subr.bf16.mxu0 %v8315_v1 }
 0x58b   : > { %7891 = vmatmul.mubr.msk.bf16.gmra.mxu0 %vm175_vm1, %v5039_v6 }
 0x58c   : > { %7894 = vmatprep.mubr.msk.bf16.mxu0 %vm8316_vm0, %v8315_v1  ;;  %7923 = vmatpush3.bf16.msra.mxu0 %v8273_v56 }
 0x58d   : > { %7924 = vmatprep.subr.bf16.mxu0 %v8315_v1 }
 0x590   : > { %7925 = vmatpush3.bf16.msra.mxu0 %v8275_v57 }
 0x591   : > { %7958 = vmatprep.subr.bf16.mxu0 %v8315_v1 }
 0x593   : > { %7895 = vmatmul.mubr.msk.bf16.gmra.mxu0 %vm175_vm1, %v5040_v14 }
 0x594   : > { %7926 = vmatprep.mubr.msk.bf16.mxu0 %vm8316_vm0, %v8315_v1 }
 0x5e3   : > { %v4290_v49 = vpop.f32.mrf.mxu0 }
 0x5e4   : > { %v4377_v52 = vpop.f32.mrf.mxu1 }
 0x5e5   : > { %v9837_v60 = vadd.f32 %v4377_v52, %v4290_v49  ;;  %v7728_v61 = vpop.f32.mrf.mxu0 }
 0x5e6   : > { %v7748_v63 = vpop.f32.mrf.mxu1 }
 0x5e7   : > { %v4293_v3 = vpop.f32.mrf.mxu0 }
 0x5e8   : > { %v4380_v4 = vpop.f32.mrf.mxu1 }
 0x5e9   : > { %v9839_v7 = vadd.f32 %v4380_v4, %v4293_v3  ;;  %v7729_v8 = vpop.f32.mrf.mxu0 }
 0x5ea   : > { %v7749_v9 = vpop.f32.mrf.mxu1 }
 0x5eb   : > { %v4298_v10 = vpop.f32.mrf.mxu0 }
 0x5ec   : > { %v4385_v11 = vpop.f32.mrf.mxu1 }
 0x5ed   : > { %v9841_v12 = vadd.f32 %v4385_v11, %v4298_v10  ;;  %v7732_v15 = vpop.f32.mrf.mxu0 }
 0x5ee   : > { %v7752_v16 = vpop.f32.mrf.mxu1 }
 0x5ef   : > { %v4301_v19 = vpop.f32.mrf.mxu0 }
 0x5f0   : > { %v4388_v20 = vpop.f32.mrf.mxu1 }
 0x5f1   : > { %v7733_v27 = vpop.f32.mrf.mxu0 }
 0x5f2   : > { %v7753_v28 = vpop.f32.mrf.mxu1 }
 0x5f3   : > { %v4305_v36 = vpop.f32.mrf.mxu0 }
 0x5f4   : > { %v4392_v37 = vpop.f32.mrf.mxu1 }
 0x5f5   : > { %v7736_v21 = vpop.f32.mrf.mxu0 }
 0x5f6   : > { %v7756_v53 = vpop.f32.mrf.mxu1 }
 0x5f7   : > { %v4307_v23 = vpop.f32.mrf.mxu0 }
 0x5f8   : > { %v4394_v42 = vpop.f32.mrf.mxu1 }
 0x5f9   : > { %v7737_v34 = vpop.f32.mrf.mxu0 }
 0x5fa   : > { %v7757_v22 = vpop.f32.mrf.mxu1 }
 0x5fb   : > { %v4480_v0 = vpop.f32.mrf.mxu0 }
 0x5fc   : > { %v4586_v44 = vpop.f32.mrf.mxu1  ;;  %v4500_v34 = vadd.f32 %v4480_v0, %v9837_v60 }
 0x5fd   : > { %v7768_v43 = vpop.f32.mrf.mxu0 }
 0x5fe   : > { %v7788_v55 = vpop.f32.mrf.mxu1 }
 0x5ff   : > { %v4483_v33 = vpop.f32.mrf.mxu0 }
 0x600   : > { %v4589_v54 = vpop.f32.mrf.mxu1 }
 0x601   : > { %v7769_v31 = vpop.f32.mrf.mxu0 }
 0x602   : > { %v7789_v58 = vpop.f32.mrf.mxu1 }
 0x603   : > { %v4488_v26 = vpop.f32.mrf.mxu0  ;;  %v4606_v58 = vadd.f32 %v4586_v44, %v4500_v34  ;;  %v8280_v34 = vld [vmem:[%s10117_s1 + $0x610] sm:$0xff]  }
 0x604   : > { %v9843_v32 = vpop.f32.mrf.mxu1 }
 0x605   : > { %v7772_v17 = vpop.f32.mrf.mxu0 }
 0x606   : > { %v7792_v51 = vpop.f32.mrf.mxu1  ;;  %v4501_v17 = vadd.f32 %v4483_v33, %v9839_v7 }
 0x607   : > { %v4491_v41 = vpop.f32.mrf.mxu0 }
 0x608   : > { %v4597_v39 = vpop.f32.mrf.mxu1 }
 0x609   : > { %v7773_v40 = vpop.f32.mrf.mxu0 }
 0x60a   : > { %v7793_v45 = vpop.f32.mrf.mxu1 }
 0x60b   : > { %v4495_v25 = vpop.f32.mrf.mxu0 }
 0x60c   : > { %v4601_v62 = vpop.f32.mrf.mxu1  ;;  %v4607_v25 = vadd.f32 %v4589_v54, %v4501_v17  ;;  %v6545_v54 = vld [vmem:[%s10118_s2 + $0x4] ss:$0 sm:$0xff]  ;;  %v8281_v17 = vld [vmem:[%s10117_s1 + $0x608] sm:$0xff]  }
 0x60d   : > { %v7776_v38 = vpop.f32.mrf.mxu0  ;;  %v4502_v62 = vadd.f32 %v4488_v26, %v9841_v12 }
 0x60e   : > { %v7796_v24 = vpop.f32.mrf.mxu1 }
 0x60f   : > { %v4497_v6 = vpop.f32.mrf.mxu0  ;;  %v4608_v0 = vadd.f32 %v9843_v32, %v4502_v62 }
 0x610   : > { %v4603_v47 = vpop.f32.mrf.mxu1 }
 0x611   : > { %v7777_v2 = vpop.f32.mrf.mxu0 }
 0x612   : > { %v7797_v30 = vpop.f32.mrf.mxu1 }
 0x613   : > { %v4692_v5 = vpop.f32.mrf.mxu0 }
 0x614   : > { %v4798_v29 = vpop.f32.mrf.mxu1  ;;  %v4712_v39 = vadd.f32 %v4692_v5, %v4606_v58 }
 0x615   : > { %v7808_v46 = vpop.f32.mrf.mxu0 }
 0x616   : > { %v7828_v48 = vpop.f32.mrf.mxu1  ;;  %v4818_v6 = vadd.f32 %v4798_v29, %v4712_v39  ;;  %v8283_v39 = vld [vmem:[%s10117_s1 + $0x600] sm:$0xff]  }
 0x617   : > { %v4695_v50 = vpop.f32.mrf.mxu0 }
 0x618   : > { %v4801_v14 = vpop.f32.mrf.mxu1  ;;  %v4713_v47 = vadd.f32 %v4695_v50, %v4607_v25 }
 0x619   : > { %v7809_v56 = vpop.f32.mrf.mxu0 }
 0x61a   : > { %v7829_v59 = vpop.f32.mrf.mxu1  ;;  %v4819_v44 = vadd.f32 %v4801_v14, %v4713_v47 }
 0x61b   : > { %v4700_v57 = vpop.f32.mrf.mxu0 }
 0x61c   : > { %v4806_v49 = vpop.f32.mrf.mxu1  ;;  %v4714_v46 = vadd.f32 %v4700_v57, %v4608_v0 }
 0x61d   : > { %v7812_v52 = vpop.f32.mrf.mxu0 }
 0x61e   : > { %v7832_v61 = vpop.f32.mrf.mxu1  ;;  %v4820_v12 = vadd.f32 %v4806_v49, %v4714_v46 }
 0x61f   : > { %v4703_v63 = vpop.f32.mrf.mxu0 }
 0x620   : > { %v4809_v3 = vpop.f32.mrf.mxu1 }
 0x621   : > { %v7813_v4 = vpop.f32.mrf.mxu0 }
 0x622   : > { %v7833_v8 = vpop.f32.mrf.mxu1 }
 0x623   : > { %v4707_v9 = vpop.f32.mrf.mxu0 }
 0x624   : > { %v4813_v10 = vpop.f32.mrf.mxu1 }
 0x625   : > { %v7816_v11 = vpop.f32.mrf.mxu0 }
 0x626   : > { %v7836_v15 = vpop.f32.mrf.mxu1 }
 0x627   : > { %v4709_v16 = vpop.f32.mrf.mxu0 }
 0x628   : > { %v4815_v19 = vpop.f32.mrf.mxu1  ;;  %v8276_v16 = vld [vmem:[%s10117_s1 + $0x5f8] sm:$0xff]  }
 0x629   : > { %v7817_v20 = vpop.f32.mrf.mxu0 }
 0x62a   : > { %v7837_v27 = vpop.f32.mrf.mxu1 }
 0x62b   : > { %v4904_v28 = vpop.f32.mrf.mxu0 }
 0x62c   : > { %v5010_v36 = vpop.f32.mrf.mxu1  ;;  %v4924_v2 = vadd.f32 %v4904_v28, %v4818_v6  ;;  %v8284_v6 = vld [vmem:[%s10117_s1 + $0x638] sm:$0xff]  }
 0x62d   : > { %v7848_v37 = vpop.f32.mrf.mxu0 }
 0x62e   : > { %v7868_v21 = vpop.f32.mrf.mxu1  ;;  %v5030_v33 = vadd.f32 %v5010_v36, %v4924_v2  ;;  %v8286_v2 = vld [vmem:[%s10117_s1 + $0x658] sm:$0xff]  }
 0x62f   : > { %v4907_v53 = vpop.f32.mrf.mxu0  ;;  %v8278_v21 = vld [vmem:[%s10117_s1 + $0x618] sm:$0xff]  }
 0x630   : > { %v5013_v23 = vpop.f32.mrf.mxu1  ;;  %v4925_v48 = vadd.f32 %v4907_v53, %v4819_v44  ;;  %v8277_v53 = vld [vmem:[%s10117_s1 + $0x5f0] sm:$0xff]  }
 0x631   : > { %v7849_v42 = vpop.f32.mrf.mxu0 }
 0x632   : > { %v7869_v22 = vpop.f32.mrf.mxu1  ;;  %v5031_v29 = vadd.f32 %v5013_v23, %v4925_v48  ;;  %v8287_v48 = vld [vmem:[%s10117_s1 + $0x628] sm:$0xff]  }
 0x633   : > { %v4912_v43 = vpop.f32.mrf.mxu0 }
 0x634   : > { %v5018_v55 = vpop.f32.mrf.mxu1  ;;  %v4926_v50 = vadd.f32 %v4912_v43, %v4820_v12  ;;  %v8279_v43 = vld [vmem:[%s10117_s1 + $0x5e8] sm:$0xff]  }
 0x635   : > { %v7852_v31 = vpop.f32.mrf.mxu0 }
 0x636   : > { %v7872_v51 = vpop.f32.mrf.mxu1  ;;  %v5032_v14 = vadd.f32 %v5018_v55, %v4926_v50 }
 0x637   : > { %v4915_v41 = vpop.f32.mrf.mxu0  ;;  %v8282_v51 = vld [vmem:[%s10117_s1 + $0x5e0] sm:$0xff]  }
 0x638   : > { %v5021_v40 = vpop.f32.mrf.mxu1 }
 0x639   : > { %v7853_v45 = vpop.f32.mrf.mxu0 }
 0x63a   : > { %v7873_v38 = vpop.f32.mrf.mxu1 }
 0x63b   : > { %v4919_v24 = vpop.f32.mrf.mxu0 }
 0x63d   : > { %v7856_v60 = vpop.f32.mrf.mxu0 }
 0x63f   : > { %v4921_v30 = vpop.f32.mrf.mxu0 }
 0x640   : > { %v8285_v30 = vld [vmem:[%s10117_s1 + $0x630] sm:$0xff]  }
 0x641   : > { %v7857_v7 = vpop.f32.mrf.mxu0 }
 0x642   : > { %v8288_v7 = vld [vmem:[%s10117_s1 + $0x650] sm:$0xff]  }
 0x643   : > { %v5116_v5 = vpop.f32.mrf.mxu0 }
 0x644   : > { %v5136_v26 = vadd.f32 %v5116_v5, %v5030_v33 }
 0x645   : > { %v7888_v56 = vpop.f32.mrf.mxu0 }
 0x646   : > { %v5144_v59 = vadd.f32 %v6545_v54, %v5136_v26  ;;  %v8289_v26 = vld [vmem:[%s10117_s1 + $0x648] sm:$0xff]   ;;  %v8290_v56 = vld [vmem:[%s10117_s1 + $0x620] sm:$0xff]  }
 0x647   : > { %v5119_v52 = vpop.f32.mrf.mxu0 }
 0x648   : > { %v5147_v32 = vmax.f32 %v5144_v59, 0.0  ;;  %v5137_v61 = vadd.f32 %v5119_v52, %v5031_v29  ;;  %v5486_v29 = vld [vmem:[#allocation2 + $0x26] sm:$0xf] }
 0x649   : > { %v7889_v63 = vpop.f32.mrf.mxu0  ;;  %v8291_v59 = vld [vmem:[%s10117_s1 + $0x640] sm:$0xff]   ;;  %v5489_v52 = vpack.c.bf16 %v5486_v29, %v5486_v29 }
 0x64a   : > { %5152 = vst.msk [vmem:[#allocation2 - $0x7] sm:$0x80] %vm1179_vm7, %v5147_v32  ;;  %5159 = vst.msk [vmem:[#allocation2 + $0x5] sm:$0x80] %vm1179_vm7, %v5147_v32  ;;  %v5145_v57 = vadd.f32 %v6545_v54, %v5137_v61 }
 0x64b   : > { %5150 = vst.msk [vmem:[#allocation2 - $0x5] sm:$0xc0] %vm1176_vm6, %v5147_v32  ;;  %5157 = vst.msk [vmem:[#allocation2 + $0x7] sm:$0xc0] %vm1176_vm6, %v5147_v32  ;;  %v5124_v49 = vpop.f32.mrf.mxu0 }
 0x64c   : > { %5154 = vst.msk [vmem:[#allocation2 + $0x7] sm:$0xf] %vm191_vm2, %v5147_v32  ;;  %v5148_v3 = vmax.f32 %v5145_v57, 0.0  ;;  %v5138_v4 = vadd.f32 %v5124_v49, %v5032_v14  ;;  %v8292_v14 = vld [vmem:[%s10117_s1 + $0x678] sm:$0xff]  }
 0x64d   : > { %5155 = vst.msk [vmem:[#allocation2 + $0x5] sm:$0x2] %vm193_vm3, %v5147_v32  ;;  %v7892_v8 = vpop.f32.mrf.mxu0 }
 0x64e   : > { %5156 = vst.msk [vmem:[#allocation2 + $0x9] sm:$0x4] %vm195_vm4, %v5147_v32  ;;  %v5146_v9 = vadd.f32 %v6545_v54, %v5138_v4  ;;  %v8293_v4 = vld [vmem:[%s10117_s1 + $0x670] sm:$0xff]  }
 0x64f   : > { %5151 = vst.msk [vmem:[#allocation2 + $0x3] sm:$0x3] %vm182_vm5, %v5148_v3  ;;  %5158 = vst.msk [vmem:[#allocation2 + $0xf] sm:$0x3] %vm182_vm5, %v5148_v3  ;;  %v5127_v10 = vpop.f32.mrf.mxu0 }
 0x650   : > { %5153 = vst.msk [vmem:[#allocation2 + $0x5] sm:$0x1] %vm1181_vm8, %v5148_v3  ;;  %5160 = vst.msk [vmem:[#allocation2 + $0x11] sm:$0x1] %vm1181_vm8, %v5148_v3  ;;  %v5149_v11 = vmax.f32 %v5146_v9, 0.0  ;;  %v8296_v9 = vld [vmem:[%s10117_s1 + $0x690] sm:$0xff]  }
 0x651   : > { %5161 = vst.msk [vmem:[#allocation2 + $0xf] sm:$0xf0] %vm1190_vm9, %v5148_v3  ;;  %5167 = vst.msk [vmem:[#allocation2 + $0x1b] sm:$0xf0] %vm1190_vm9, %v5148_v3  ;;  %v7893_v15 = vpop.f32.mrf.mxu0 }
 0x652   : > { %5162 = vst.msk [vmem:[#allocation2 + $0xd] sm:$0x20] %vm1192_vm10, %v5148_v3  ;;  %5168 = vst.msk [vmem:[#allocation2 + $0x19] sm:$0x20] %vm1192_vm10, %v5148_v3 }
 0x653   : > { %5163 = vst.msk [vmem:[#allocation2 + $0x11] sm:$0x40] %vm1194_vm11, %v5148_v3  ;;  %5169 = vst.msk [vmem:[#allocation2 + $0x1d] sm:$0x40] %vm1194_vm11, %v5148_v3  ;;  %v8294_v3 = vld [vmem:[%s10117_s1 + $0x698] sm:$0xff]  }
 0x654   : > { %5164 = vst.msk [vmem:[#allocation2 + $0x17] sm:$0x3c] %vm1196_vm12, %v5149_v11 }
 0x655   : > { %5165 = vst.msk [vmem:[#allocation2 + $0x15] sm:$0x8] %vm1198_vm13, %v5149_v11  ;;  %v5482_v60 = vld [vmem:[#allocation2 + $0x6] sm:$0xff] }
 0x656   : > { %5166 = vst.msk [vmem:[#allocation2 + $0x19] sm:$0x10] %vm1200_vm14, %v5149_v11  ;;  %v5187_v20 = vld [vmem:[#allocation2 + $0x9] sm:$0xff] }
 0x657   : > { %v5186_v19 = vld [vmem:[#allocation2 + $0x1] sm:$0xff]  ;;  %v5377_v38 = vld [vmem:[#allocation2 + $0xa] sm:$0xff] }
 0x658   : > { %v5170_v27 = vld [vmem:[#allocation2] sm:$0xff]  ;;  %v5191_v28 = vpack.c.bf16 %v5187_v20, %v5186_v19  ;;  %v9875_v36 = vld [vmem:[#allocation2 + $0x8] sm:$0xff] }
 0x659   : > { %v5175_v37 = vpack.c.bf16 %v9875_v36, %v5170_v27  ;;  %v5376_v62 = vld [vmem:[#allocation2 + $0x2] sm:$0xff]  ;;  %v9931_v24 = vld [vmem:[#allocation2 + $0xe] sm:$0xff] }
 0x65a   : > { %7907 = vmatmul.mubr.msk.bf16.vlgmr.msra.gmra.mxu1 %vm175_vm1, %v5191_v28  ;;  %v9900_v31 = vld [vmem:[#allocation2 + $0x10] sm:$0xff]  ;;  %v5190_v41 = vld [vmem:[#allocation2 + $0x21] sm:$0xf]  ;;  %v5381_v47 = vpack.c.bf16 %v5377_v38, %v5376_v62  ;;  %v5487_v0 = vpack.c.bf16 %v9931_v24, %v5482_v60  ;;  %v5588_v63 = vld [vmem:[#allocation2 + $0x7] sm:$0xff] }
 0x65b   : > { %7927 = vmatmul.mubr.msk.bf16.vlgmr.msra.gmra.mxu0 %vm175_vm1, %v5175_v37  ;;  %7939 = vmatpush3.bf16.msra.mxu1 %v8276_v16  ;;  %v5174_v40 = vld [vmem:[#allocation2 + $0x20] sm:$0xf]  ;;  %v5193_v45 = vpack.c.bf16 %v5190_v41, %v5190_v41  ;;  %v5589_v61 = vld [vmem:[#allocation2 + $0xf] sm:$0xff]  ;;  %v5699_v49 = vpack.c.bf16 %v9900_v31, %v9875_v36  ;;  %v5592_v27 = vld [vmem:[#allocation2 + $0x27] sm:$0xf]  ;;  %v5025_v36 = vpop.f32.mrf.mxu1 }
 0x65c   : > { %7940 = vmatprep.subr.bf16.mxu1 %v8315_v1  ;;  %7910 = vmatprep.mubr.msk.bf16.mxu1 %vm8316_vm0, %v8315_v1  ;;  %v5188_v23 = vld [vmem:[#allocation2 + $0x11] sm:$0xff]  ;;  %v5177_v25 = vpack.c.bf16 %v5174_v40, %v5174_v40  ;;  %v9959_v54 = vld [vmem:[#allocation2 + $0x1e] sm:$0xff]  ;;  %v5593_v57 = vpack.c.bf16 %v5589_v61, %v5588_v63  ;;  %v8295_v11 = vld [vmem:[%s10117_s1 + $0x668] sm:$0xff]  }
 0x65d   : > { %7930 = vmatprep.mubr.msk.bf16.mxu0 %vm8316_vm0, %v8315_v1  ;;  %v5189_v42 = vld [vmem:[#allocation2 + $0x19] sm:$0xff]  ;;  %7959 = vmatpush3.bf16.msra.mxu0 %v8278_v21  ;;  %v5380_v50 = vld [vmem:[#allocation2 + $0x22] sm:$0xf]  ;;  %v8297_v20 = vld [vmem:[%s10117_s1 + $0x688] sm:$0xff]  }
 0x65e   : > { %v9894_v22 = vld [vmem:[#allocation2 + $0x18] sm:$0xff]  ;;  %7960 = vmatprep.subr.bf16.mxu0 %v8315_v1  ;;  %v5192_v55 = vpack.c.bf16 %v5189_v42, %v5188_v23  ;;  %v5383_v32 = vpack.c.bf16 %v5380_v50, %v5380_v50  ;;  %v5697_v16 = vld [vmem:[#allocation2 + $0x20] sm:$0xff]  ;;  %v5698_v37 = vld [vmem:[#allocation2 + $0x28] sm:$0xf]  ;;  %v5595_v23 = vpack.c.bf16 %v5592_v27, %v5592_v27 }
 0x65f   : > { %7941 = vmatpush3.bf16.msra.mxu1 %v8277_v53  ;;  %v5176_v58 = vpack.c.bf16 %v9894_v22, %v9900_v31  ;;  %v5378_v44 = vld [vmem:[#allocation2 + $0x12] sm:$0xff]  ;;  %v5379_v46 = vld [vmem:[#allocation2 + $0x1a] sm:$0xff]  ;;  %v5700_v19 = vpack.c.bf16 %v5697_v16, %v9894_v22  ;;  %v7876_v53 = vpop.f32.mrf.mxu1  ;;  %v5701_v42 = vpack.c.bf16 %v5698_v37, %v5698_v37  ;;  %v5131_v22 = vpop.f32.mrf.mxu0 }
 0x660   : > { %7942 = vmatprep.subr.bf16.mxu1 %v8315_v1  ;;  %v9953_v33 = vld [vmem:[#allocation2 + $0x16] sm:$0xff]  ;;  %v5382_v5 = vpack.c.bf16 %v5379_v46, %v5378_v44  ;;  %v5591_v10 = vld [vmem:[#allocation2 + $0x1f] sm:$0xff]  ;;  %v5800_v41 = vld [vmem:[#allocation2 + $0xc] sm:$0xff] }
 0x661   : > { %7961 = vmatpush3.bf16.msra.mxu0 %v8280_v34  ;;  %v5488_v12 = vpack.c.bf16 %v9959_v54, %v9953_v33  ;;  %v5590_v8 = vld [vmem:[#allocation2 + $0x17] sm:$0xff]  ;;  %v8298_v28 = vld [vmem:[%s10117_s1 + $0x660] sm:$0xff]   ;;  %v5027_v34 = vpop.f32.mrf.mxu1  ;;  %v6017_v46 = vpack.c.bf16 %v9953_v33, %v9931_v24 }
 0x662   : > { %7911 = vmatmul.mubr.msk.bf16.gmra.mxu1 %vm175_vm1, %v5192_v55  ;;  %7962 = vmatprep.subr.bf16.mxu0 %v8315_v1  ;;  %v5594_v15 = vpack.c.bf16 %v5591_v10, %v5590_v8  ;;  %v8299_v21 = vld [vmem:[%s10117_s1 + $0x680] sm:$0xff]   ;;  %v7896_v55 = vpop.f32.mrf.mxu0  ;;  %v8301_v62 = vld [vmem:[%s10117_s1 + $0x6b0] sm:$0xff]  }
 0x663   : > { %7931 = vmatmul.mubr.msk.bf16.gmra.mxu0 %vm175_vm1, %v5176_v58  ;;  %7943 = vmatpush3.bf16.msra.mxu1 %v8279_v43  ;;  %v7877_v43 = vpop.f32.mrf.mxu1  ;;  %v5801_v58 = vld [vmem:[#allocation2 + $0x14] sm:$0xff]  ;;  %v5802_v38 = vld [vmem:[#allocation2 + $0x1c] sm:$0xff] }
 0x664   : > { %7914 = vmatprep.mubr.msk.bf16.mxu1 %vm8316_vm0, %v8315_v1  ;;  %7934 = vmatprep.mubr.msk.bf16.mxu0 %vm8316_vm0, %v8315_v1  ;;  %v5133_v31 = vpop.f32.mrf.mxu0  ;;  %v5805_v40 = vpack.c.bf16 %v5801_v58, %v5800_v41  ;;  %v5806_v60 = vpack.c.bf16 %v9763_v13, %v5802_v38  ;;  %v5910_v13 = vld [vmem:[#allocation2 + $0x2d] sm:$0xf] }
 0x665   : > { %7944 = vmatprep.subr.bf16.mxu1 %v8315_v1  ;;  %7963 = vmatpush3.bf16.msra.mxu0 %v8281_v17  ;;  %v5913_v44 = vpack.c.bf16 %v5910_v13, %v5910_v13 }
 0x666   : > { %7964 = vmatprep.subr.bf16.mxu0 %v8315_v1  ;;  %v7897_v17 = vpop.f32.mrf.mxu0 }
 0x667   : > { %7945 = vmatpush3.bf16.msra.mxu1 %v8282_v51  ;;  %v5907_v51 = vld [vmem:[#allocation2 + $0x15] sm:$0xff] }
 0x668   : > { %7978 = vmatprep.subr.bf16.mxu1 %v8315_v1 }
 0x669   : > { %7965 = vmatpush3.bf16.msra.mxu0 %v8283_v39  ;;  %v8300_v39 = vld [vmem:[%s10117_s1 + $0x6b8] sm:$0xff]  }
 0x66a   : > { %7915 = vmatmul.mubr.msk.bf16.gmra.mxu1 %vm175_vm1, %v5193_v45  ;;  %7998 = vmatprep.subr.bf16.mxu0 %v8315_v1  ;;  %v5906_v45 = vld [vmem:[#allocation2 + $0xd] sm:$0xff] }
 0x66b   : > { %7935 = vmatmul.mubr.msk.bf16.gmra.mxu0 %vm175_vm1, %v5177_v25  ;;  %7946 = vmatprep.mubr.msk.bf16.mxu1 %vm8316_vm0, %v8315_v1  ;;  %v5911_v25 = vpack.c.bf16 %v5907_v51, %v5906_v45 }
 0x66c   : > { %7966 = vmatprep.mubr.msk.bf16.mxu0 %vm8316_vm0, %v8315_v1 }
 0x672   : > { %7947 = vmatmul.mubr.msk.bf16.vlgmr.msra.gmra.mxu1 %vm175_vm1, %v5381_v47  ;;  %v8302_v47 = vld [vmem:[%s10117_s1 + $0x6a8] sm:$0xff]  }
 0x673   : > { %7967 = vmatmul.mubr.msk.bf16.vlgmr.msra.gmra.mxu0 %vm175_vm1, %v5487_v0  ;;  %7979 = vmatpush3.bf16.msra.mxu1 %v8284_v6  ;;  %v5908_v6 = vld [vmem:[#allocation2 + $0x1d] sm:$0xff] }
 0x674   : > { %7980 = vmatprep.subr.bf16.mxu1 %v8315_v1  ;;  %7950 = vmatprep.mubr.msk.bf16.mxu1 %vm8316_vm0, %v8315_v1  ;;  %v5912_v0 = vpack.c.bf16 %v9765_v35, %v5908_v6 }
 0x675   : > { %7970 = vmatprep.mubr.msk.bf16.mxu0 %vm8316_vm0, %v8315_v1  ;;  %7999 = vmatpush3.bf16.msra.mxu0 %v8286_v2  ;;  %v5804_v2 = vld [vmem:[#allocation2 + $0x2c] sm:$0xf] }
 0x676   : > { %8000 = vmatprep.subr.bf16.mxu0 %v8315_v1  ;;  %v5807_v35 = vpack.c.bf16 %v5804_v2, %v5804_v2 }
 0x677   : > { %7981 = vmatpush3.bf16.msra.mxu1 %v8285_v30  ;;  %v8303_v30 = vld [vmem:[%s10117_s1 + $0x6a0] sm:$0xff]  }
 0x678   : > { %7982 = vmatprep.subr.bf16.mxu1 %v8315_v1 }
 0x679   : > { %8001 = vmatpush3.bf16.msra.mxu0 %v8288_v7  ;;  %v6018_v7 = vpack.c.bf16 %v9792_v18, %v9959_v54 }
 0x67a   : > { %7951 = vmatmul.mubr.msk.bf16.gmra.mxu1 %vm175_vm1, %v5382_v5  ;;  %8002 = vmatprep.subr.bf16.mxu0 %v8315_v1 }
 0x67b   : > { %7971 = vmatmul.mubr.msk.bf16.gmra.mxu0 %vm175_vm1, %v5488_v12  ;;  %7983 = vmatpush3.bf16.msra.mxu1 %v8287_v48  ;;  %v6016_v48 = vld [vmem:[#allocation2 + $0x2e] sm:$0xf] }
 0x67c   : > { %7954 = vmatprep.mubr.msk.bf16.mxu1 %vm8316_vm0, %v8315_v1  ;;  %7974 = vmatprep.mubr.msk.bf16.mxu0 %vm8316_vm0, %v8315_v1  ;;  %v6019_v5 = vpack.c.bf16 %v6016_v48, %v6016_v48 }
 0x67d   : > { %7984 = vmatprep.subr.bf16.mxu1 %v8315_v1  ;;  %8003 = vmatpush3.bf16.msra.mxu0 %v8289_v26 }
 0x67e   : > { %8004 = vmatprep.subr.bf16.mxu0 %v8315_v1 }
 0x67f   : > { %7985 = vmatpush3.bf16.msra.mxu1 %v8290_v56 }
 0x680   : > { %8018 = vmatprep.subr.bf16.mxu1 %v8315_v1 }
 0x681   : > { %8005 = vmatpush3.bf16.msra.mxu0 %v8291_v59 }
 0x682   : > { %7955 = vmatmul.mubr.msk.bf16.gmra.mxu1 %vm175_vm1, %v5383_v32  ;;  %8038 = vmatprep.subr.bf16.mxu0 %v8315_v1 }
 0x683   : > { %7975 = vmatmul.mubr.msk.bf16.gmra.mxu0 %vm175_vm1, %v5489_v52  ;;  %7986 = vmatprep.mubr.msk.bf16.mxu1 %vm8316_vm0, %v8315_v1 }
 0x684   : > { %8006 = vmatprep.mubr.msk.bf16.mxu0 %vm8316_vm0, %v8315_v1 }
 0x68a   : > { %7987 = vmatmul.mubr.msk.bf16.vlgmr.msra.gmra.mxu1 %vm175_vm1, %v5593_v57 }
 0x68b   : > { %8007 = vmatmul.mubr.msk.bf16.vlgmr.msra.gmra.mxu0 %vm175_vm1, %v5699_v49  ;;  %8019 = vmatpush3.bf16.msra.mxu1 %v8292_v14 }
 0x68c   : > { %8020 = vmatprep.subr.bf16.mxu1 %v8315_v1  ;;  %7990 = vmatprep.mubr.msk.bf16.mxu1 %vm8316_vm0, %v8315_v1 }
 0x68d   : > { %8010 = vmatprep.mubr.msk.bf16.mxu0 %vm8316_vm0, %v8315_v1  ;;  %8039 = vmatpush3.bf16.msra.mxu0 %v8294_v3 }
 0x68e   : > { %8040 = vmatprep.subr.bf16.mxu0 %v8315_v1 }
 0x68f   : > { %8021 = vmatpush3.bf16.msra.mxu1 %v8293_v4 }
 0x690   : > { %8022 = vmatprep.subr.bf16.mxu1 %v8315_v1 }
 0x691   : > { %8041 = vmatpush3.bf16.msra.mxu0 %v8296_v9 }
 0x692   : > { %7991 = vmatmul.mubr.msk.bf16.gmra.mxu1 %vm175_vm1, %v5594_v15  ;;  %8042 = vmatprep.subr.bf16.mxu0 %v8315_v1 }
 0x693   : > { %8011 = vmatmul.mubr.msk.bf16.gmra.mxu0 %vm175_vm1, %v5700_v19  ;;  %8023 = vmatpush3.bf16.msra.mxu1 %v8295_v11 }
 0x694   : > { %7994 = vmatprep.mubr.msk.bf16.mxu1 %vm8316_vm0, %v8315_v1  ;;  %8014 = vmatprep.mubr.msk.bf16.mxu0 %vm8316_vm0, %v8315_v1 }
 0x695   : > { %8024 = vmatprep.subr.bf16.mxu1 %v8315_v1  ;;  %8043 = vmatpush3.bf16.msra.mxu0 %v8297_v20 }
 0x696   : > { %8044 = vmatprep.subr.bf16.mxu0 %v8315_v1 }
 0x697   : > { %8025 = vmatpush3.bf16.msra.mxu1 %v8298_v28 }
 0x698   : > { %8058 = vmatprep.subr.bf16.mxu1 %v8315_v1 }
 0x699   : > { %8045 = vmatpush3.bf16.msra.mxu0 %v8299_v21 }
 0x69a   : > { %7995 = vmatmul.mubr.msk.bf16.gmra.mxu1 %vm175_vm1, %v5595_v23 }
 0x69b   : > { %8015 = vmatmul.mubr.msk.bf16.gmra.mxu0 %vm175_vm1, %v5701_v42  ;;  %8026 = vmatprep.mubr.msk.bf16.mxu1 %vm8316_vm0, %v8315_v1 }
 0x69c   : > { %8046 = vmatprep.mubr.msk.bf16.mxu0 %vm8316_vm0, %v8315_v1 }
 0x6a2   : > { %8027 = vmatmul.mubr.msk.bf16.vlgmr.msra.gmra.mxu1 %vm175_vm1, %v5805_v40 }
 0x6a3   : > { %8047 = vmatmul.mubr.msk.bf16.vlgmr.msra.gmra.mxu0 %vm175_vm1, %v5911_v25  ;;  %8059 = vmatpush3.bf16.msra.mxu1 %v8300_v39 }
 0x6a4   : > { %8060 = vmatprep.subr.bf16.mxu1 %v8315_v1  ;;  %8030 = vmatprep.mubr.msk.bf16.mxu1 %vm8316_vm0, %v8315_v1 }
 0x6a5   : > { %8050 = vmatprep.mubr.msk.bf16.mxu0 %vm8316_vm0, %v8315_v1 }
 0x6a7   : > { %8061 = vmatpush3.bf16.msra.mxu1 %v8301_v62 }
 0x6a8   : > { %8062 = vmatprep.subr.bf16.mxu1 %v8315_v1 }
 0x6aa   : > { %8031 = vmatmul.mubr.msk.bf16.gmra.mxu1 %vm175_vm1, %v5806_v60 }
 0x6ab   : > { %8051 = vmatmul.mubr.msk.bf16.gmra.mxu0 %vm175_vm1, %v5912_v0  ;;  %8063 = vmatpush3.bf16.msra.mxu1 %v8302_v47 }
 0x6ac   : > { %8034 = vmatprep.mubr.msk.bf16.mxu1 %vm8316_vm0, %v8315_v1  ;;  %8064 = vmatprep.subr.bf16.mxu1 %v8315_v1 }
 0x6ad   : > { %8054 = vmatprep.mubr.msk.bf16.mxu0 %vm8316_vm0, %v8315_v1 }
 0x6af   : > { %8065 = vmatpush3.bf16.msra.mxu1 %v8303_v30 }
 0x6b2   : > { %8035 = vmatmul.mubr.msk.bf16.gmra.mxu1 %vm175_vm1, %v5807_v35 }
 0x6b3   : > { %8066 = vmatprep.mubr.msk.bf16.mxu1 %vm8316_vm0, %v8315_v1  ;;  %8055 = vmatmul.mubr.msk.bf16.gmra.mxu0 %vm175_vm1, %v5913_v44 }
 0x6ba   : > { %8067 = vmatmul.mubr.msk.bf16.vlgmr.msra.gmra.mxu1 %vm175_vm1, %v6017_v46 }
 0x6bb   : > { %8070 = vmatprep.mubr.msk.bf16.mxu1 %vm8316_vm0, %v8315_v1 }
 0x6c2   : > { %8071 = vmatmul.mubr.msk.bf16.gmra.mxu1 %vm175_vm1, %v6018_v7 }
 0x6c3   : > { %8074 = vmatprep.mubr.msk.bf16.mxu1 %vm8316_vm0, %v8315_v1 }
 0x6ca   : > { %8075 = vmatmul.mubr.msk.bf16.gmra.mxu1 %vm175_vm1, %v6019_v5 }
 0x71a   : > { %v5269_v12 = vpop.f32.mrf.mxu1 }
 0x71b   : > { %v5356_v26 = vpop.f32.mrf.mxu0 }
 0x71c   : > { %v10086_v24 = vadd.f32 %v5356_v26, %v5269_v12  ;;  %v7908_v33 = vpop.f32.mrf.mxu1 }
 0x71d   : > { %v7928_v56 = vpop.f32.mrf.mxu0 }
 0x71e   : > { %v5272_v29 = vpop.f32.mrf.mxu1 }
 0x71f   : > { %v5359_v50 = vpop.f32.mrf.mxu0 }
 0x720   : > { %v10088_v59 = vadd.f32 %v5359_v50, %v5272_v29  ;;  %v7909_v18 = vpop.f32.mrf.mxu1 }
 0x721   : > { %v7929_v54 = vpop.f32.mrf.mxu0 }
 0x722   : > { %v5277_v52 = vpop.f32.mrf.mxu1 }
 0x723   : > { %v5364_v32 = vpop.f32.mrf.mxu0 }
 0x724   : > { %v10090_v61 = vadd.f32 %v5364_v32, %v5277_v52  ;;  %v7912_v1 = vpop.f32.mrf.mxu1 }
 0x725   : > { %v7932_v63 = vpop.f32.mrf.mxu0 }
 0x726   : > { %v5280_v14 = vpop.f32.mrf.mxu1 }
 0x727   : > { %v5367_v57 = vpop.f32.mrf.mxu0 }
 0x728   : > { %v7913_v49 = vpop.f32.mrf.mxu1 }
 0x729   : > { %v7933_v3 = vpop.f32.mrf.mxu0 }
 0x72a   : > { %v5284_v4 = vpop.f32.mrf.mxu1 }
 0x72b   : > { %v5371_v8 = vpop.f32.mrf.mxu0 }
 0x72c   : > { %v7916_v9 = vpop.f32.mrf.mxu1 }
 0x72d   : > { %v7936_v10 = vpop.f32.mrf.mxu0 }
 0x72e   : > { %v5286_v11 = vpop.f32.mrf.mxu1 }
 0x72f   : > { %v5373_v15 = vpop.f32.mrf.mxu0 }
 0x730   : > { %v7917_v16 = vpop.f32.mrf.mxu1 }
 0x731   : > { %v7937_v19 = vpop.f32.mrf.mxu0 }
 0x732   : > { %v5459_v20 = vpop.f32.mrf.mxu1 }
 0x733   : > { %v5565_v27 = vpop.f32.mrf.mxu0  ;;  %v5479_v9 = vadd.f32 %v5459_v20, %v10086_v24 }
 0x734   : > { %v7948_v28 = vpop.f32.mrf.mxu1 }
 0x735   : > { %v7968_v36 = vpop.f32.mrf.mxu0  ;;  %v5585_v19 = vadd.f32 %v5565_v27, %v5479_v9 }
 0x736   : > { %v5462_v37 = vpop.f32.mrf.mxu1 }
 0x737   : > { %v5568_v21 = vpop.f32.mrf.mxu0  ;;  %v5480_v28 = vadd.f32 %v5462_v37, %v10088_v59 }
 0x738   : > { %v7949_v53 = vpop.f32.mrf.mxu1 }
 0x739   : > { %v7969_v23 = vpop.f32.mrf.mxu0 }
 0x73a   : > { %v5467_v42 = vpop.f32.mrf.mxu1 }
 0x73b   : > { %v10092_v34 = vpop.f32.mrf.mxu0 }
 0x73c   : > { %v7952_v22 = vpop.f32.mrf.mxu1 }
 0x73d   : > { %v7972_v43 = vpop.f32.mrf.mxu0 }
 0x73e   : > { %v5470_v55 = vpop.f32.mrf.mxu1 }
 0x73f   : > { %v5576_v31 = vpop.f32.mrf.mxu0  ;;  %v5586_v55 = vadd.f32 %v5568_v21, %v5480_v28 }
 0x740   : > { %v7953_v58 = vpop.f32.mrf.mxu1  ;;  %v5481_v31 = vadd.f32 %v5467_v42, %v10090_v61  ;;  %v6609_v61 = vld [vmem:[%s10118_s2 + $0x5] ss:$0 sm:$0xff] }
 0x741   : > { %v7973_v17 = vpop.f32.mrf.mxu0 }
 0x742   : > { %v5474_v51 = vpop.f32.mrf.mxu1 }
 0x743   : > { %v5580_v41 = vpop.f32.mrf.mxu0 }
 0x744   : > { %v7956_v39 = vpop.f32.mrf.mxu1 }
 0x745   : > { %v7976_v40 = vpop.f32.mrf.mxu0  ;;  %v5587_v39 = vadd.f32 %v10092_v34, %v5481_v31 }
 0x746   : > { %v5476_v45 = vpop.f32.mrf.mxu1 }
 0x747   : > { %v5582_v25 = vpop.f32.mrf.mxu0 }
 0x748   : > { %v7957_v62 = vpop.f32.mrf.mxu1 }
 0x749   : > { %v7977_v38 = vpop.f32.mrf.mxu0 }
 0x74a   : > { %v5671_v6 = vpop.f32.mrf.mxu1 }
 0x74b   : > { %v5777_v47 = vpop.f32.mrf.mxu0  ;;  %v5691_v23 = vadd.f32 %v5671_v6, %v5585_v19 }
 0x74c   : > { %v7988_v60 = vpop.f32.mrf.mxu1 }
 0x74d   : > { %v8008_v0 = vpop.f32.mrf.mxu0  ;;  %v5797_v51 = vadd.f32 %v5777_v47, %v5691_v23 }
 0x74e   : > { %v5674_v2 = vpop.f32.mrf.mxu1 }
 0x74f   : > { %v5780_v30 = vpop.f32.mrf.mxu0  ;;  %v5692_v41 = vadd.f32 %v5674_v2, %v5586_v55 }
 0x750   : > { %v7989_v13 = vpop.f32.mrf.mxu1 }
 0x751   : > { %v8009_v35 = vpop.f32.mrf.mxu0  ;;  %v5798_v59 = vadd.f32 %v5780_v30, %v5692_v41 }
 0x752   : > { %v5679_v44 = vpop.f32.mrf.mxu1  ;;  %v6126_v35 = vld [vmem:[#allocation3] sm:$0xf] }
 0x753   : > { %v5785_v46 = vpop.f32.mrf.mxu0  ;;  %v5693_v37 = vadd.f32 %v5679_v44, %v5587_v39 }
 0x754   : > { %v7992_v7 = vpop.f32.mrf.mxu1 }
 0x755   : > { %v8012_v48 = vpop.f32.mrf.mxu0  ;;  %v5799_v42 = vadd.f32 %v5785_v46, %v5693_v37  ;;  %v6138_v46 = vld [vmem:[#allocation3 + $0x8] sm:$0xf] }
 0x756   : > { %v5682_v5 = vpop.f32.mrf.mxu1 }
 0x757   : > { %v5788_v12 = vpop.f32.mrf.mxu0 }
 0x758   : > { %v7993_v26 = vpop.f32.mrf.mxu1 }
 0x759   : > { %v8013_v33 = vpop.f32.mrf.mxu0 }
 0x75a   : > { %v5686_v56 = vpop.f32.mrf.mxu1 }
 0x75b   : > { %v5792_v29 = vpop.f32.mrf.mxu0 }
 0x75c   : > { %v7996_v50 = vpop.f32.mrf.mxu1 }
 0x75d   : > { %v8016_v18 = vpop.f32.mrf.mxu0 }
 0x75e   : > { %v5688_v54 = vpop.f32.mrf.mxu1 }
 0x75f   : > { %v5794_v52 = vpop.f32.mrf.mxu0  ;;  %v6129_v54 = vld [vmem:[#allocation3 + $0x4] sm:$0xf] }
 0x760   : > { %v7997_v32 = vpop.f32.mrf.mxu1 }
 0x761   : > { %v8017_v1 = vpop.f32.mrf.mxu0 }
 0x762   : > { %v5883_v63 = vpop.f32.mrf.mxu1 }
 0x763   : > { %v5989_v14 = vpop.f32.mrf.mxu0  ;;  %v5903_v40 = vadd.f32 %v5883_v63, %v5797_v51 }
 0x764   : > { %v8028_v57 = vpop.f32.mrf.mxu1 }
 0x765   : > { %v8048_v49 = vpop.f32.mrf.mxu0  ;;  %v6009_v38 = vadd.f32 %v5989_v14, %v5903_v40 }
 0x766   : > { %v5886_v3 = vpop.f32.mrf.mxu1  ;;  %v6143_v49 = vld [vmem:[#allocation3 + $0xc] sm:$0xf] }
 0x767   : > { %v5992_v4 = vpop.f32.mrf.mxu0  ;;  %v5904_v6 = vadd.f32 %v5886_v3, %v5798_v59 }
 0x768   : > { %v8029_v8 = vpop.f32.mrf.mxu1 }
 0x769   : > { %v8049_v10 = vpop.f32.mrf.mxu0  ;;  %v6010_v2 = vadd.f32 %v5992_v4, %v5904_v6 }
 0x76a   : > { %v5891_v11 = vpop.f32.mrf.mxu1 }
 0x76b   : > { %v5997_v15 = vpop.f32.mrf.mxu0  ;;  %v5905_v34 = vadd.f32 %v5891_v11, %v5799_v42 }
 0x76c   : > { %v8032_v16 = vpop.f32.mrf.mxu1 }
 0x76d   : > { %v8052_v36 = vpop.f32.mrf.mxu0  ;;  %v6011_v5 = vadd.f32 %v5997_v15, %v5905_v34 }
 0x76e   : > { %v5894_v53 = vpop.f32.mrf.mxu1 }
 0x76f   : > { %v6000_v22 = vpop.f32.mrf.mxu0 }
 0x770   : > { %v8033_v43 = vpop.f32.mrf.mxu1 }
 0x771   : > { %v8053_v58 = vpop.f32.mrf.mxu0 }
 0x772   : > { %v5898_v17 = vpop.f32.mrf.mxu1 }
 0x773   : > { %v6004_v24 = vpop.f32.mrf.mxu0 }
 0x774   : > { %v8036_v20 = vpop.f32.mrf.mxu1 }
 0x775   : > { %v8056_v27 = vpop.f32.mrf.mxu0 }
 0x776   : > { %v5900_v45 = vpop.f32.mrf.mxu1 }
 0x777   : > { %v6006_v25 = vpop.f32.mrf.mxu0 }
 0x778   : > { %v8037_v62 = vpop.f32.mrf.mxu1 }
 0x779   : > { %v8057_v21 = vpop.f32.mrf.mxu0 }
 0x77a   : > { %v6095_v60 = vpop.f32.mrf.mxu1 }
 0x77b   : > { %v6115_v47 = vadd.f32 %v6095_v60, %v6009_v38 }
 0x77c   : > { %v8068_v0 = vpop.f32.mrf.mxu1 }
 0x77d   : > { %v6123_v13 = vadd.f32 %v6609_v61, %v6115_v47 }
 0x77e   : > { %v6098_v7 = vpop.f32.mrf.mxu1 }
 0x77f   : > { %v6127_v30 = vadd.f32 %v6126_v35, %v6123_v13  ;;  %v6116_v44 = vadd.f32 %v6098_v7, %v6010_v2  ;;  %v6132_v33 = vrot.slane %v6123_v13, 6 }
 0x780   : > { %v8069_v48 = vpop.f32.mrf.mxu1 }
 0x781   : > { %6128 = vst.msk [vmem:[#allocation3] sm:$0xf] %vm191_vm2, %v6127_v30  ;;  %v6124_v12 = vadd.f32 %v6609_v61, %v6116_v44 }
 0x782   : > { %v6103_v26 = vpop.f32.mrf.mxu1 }
 0x783   : > { %v6133_v56 = vrot.slane %v6124_v12, 6  ;;  %v6139_v29 = vrot.slane %v6124_v12, 4  ;;  %v6117_v50 = vadd.f32 %v6103_v26, %v6011_v5 }
 0x784   : > { %v8072_v18 = vpop.f32.mrf.mxu1 }
 0x785   : > { %v6134_v52 = vsel %vm2167_vm15, %v6132_v33, %v6133_v56  ;;  %v6141_v32 = vadd.f32 %v6139_v29, %v6138_v46  ;;  %v6125_v1 = vadd.f32 %v6609_v61, %v6117_v50 }
 0x786   : > { %v6136_v63 = vadd.f32 %v6134_v52, %v6129_v54  ;;  %v6106_v14 = vpop.f32.mrf.mxu1 }
 0x787   : > { %6142 = vst.msk [vmem:[#allocation3 + $0x8] sm:$0xf] %vm191_vm2, %v6141_v32  ;;  %v6145_v57 = vrot.slane %v6125_v1, 2 }
 0x788   : > { %6137 = vst.msk [vmem:[#allocation3 + $0x4] sm:$0xf] %vm191_vm2, %v6136_v63  ;;  %v8073_v3 = vpop.f32.mrf.mxu1 }
 0x789   : > { %v6147_v4 = vadd.f32 %v6145_v57, %v6143_v49 }
 0x78a   : > { %v6110_v8 = vpop.f32.mrf.mxu1 }
 0x78b   : > { %6148 = vst.msk [vmem:[#allocation3 + $0xc] sm:$0xf] %vm191_vm2, %v6147_v4 }
 0x78c   : > { %v8076_v9 = vpop.f32.mrf.mxu1 }
 0x78e   : > { %v6112_v10 = vpop.f32.mrf.mxu1 }
 0x78f   : > { %v6149_v11 = vld [vmem:[#allocation3] sm:$0xff] }
 0x790   : > { %v6614_v15 = vpack.c.bf16 %v6149_v11, %v6149_v11  ;;  %v8077_v16 = vpop.f32.mrf.mxu1 }
 0x792   : > { %v6150_v19 = vld [vmem:[#allocation3 + $0x8] sm:$0xff]  ;;  %6159 = vst.msk [vmem:[%s172_s6] sm:$0xf] %vm191_vm2, %v6614_v15 }
 0x793   : > { %v6615_v28 = vpack.c.bf16 %v6150_v19, %v6150_v19 }
 0x795   : > { %6160 = vst.msk [vmem:[%s172_s6 + $0x4] sm:$0xf] %vm191_vm2, %v6615_v28 }
 0x796 PF: > { %s13_s12 = sadd.s32 1, %s8313_s12  }
 0x797   : > { %p10_p4 = scmp.ge.s32.totalorder %s13_s12, 4  }
 0x799   :  { %12 = sbr.rel (!%p10_p4) target bundleno = 1 (0x1), region = 62 }

// kernel: _lambda_.13
= control target key start
LH: loop header
LB: loop body
LE: loop exit
PB: predicated region body
PF: predicated region fallthrough
CT: control target
= control target key end

     0   :  { %s3251_s15 = smov 0   ;;  %s4004_s0 = inlined_call_operand.vmem [shape: bf16[512,896], index: 0, kind: input, shape index: {}]   ;;  %s4005_s1 = inlined_call_operand.vmem [shape: bf16[896,128], index: 1, kind: input, shape index: {}]   ;;  %s4006_s2 = inlined_call_operand.vmem [shape: f32[1,128], index: 2, kind: input, shape index: {}]   ;;  %s4007_s3 = inlined_call_operand.vmem [shape: f32[512,3], index: 3, kind: input, shape index: {}]   ;;  %s4008_s4 = inlined_call_operand.vmem [shape: f32[512,3], index: 4, kind: output, shape index: {}]  }
   0x1 LB: > { %s2291_s16 = sadd.s32 4294967295, %s3224_s15   ;;  %p2295_p0 = scmp.ge.s32.totalorder %s3224_s15, 1  ;;  %s3224_s15 = sphi %s3251_s15, %s14_s15  }
   0x2   : > { %p175_p1 = scmp.lt.s32.totalorder %s3224_s15, 3 }
   0x4   : > { %p176_p2 = pnand %p2295_p0, %p175_p1 }
   0x6   : > { %179 = sbr.rel (%p176_p2) target bundleno = 484 (0x1e4), region = 36 }
   0xb   : > { %v2938_v0 = vld [vmem:[%s4005_s1 + $0x78] sm:$0xff]   ;;  %s2296_s19 = sshll.u32 %s2291_s16, 5  ;;  %v2940_v2 = vld [vmem:[%s4005_s1 + $0x70] sm:$0xff]   ;;  %v2942_v4 = vld [vmem:[%s4005_s1 + $0x68] sm:$0xff]   ;;  %vm2190_vm0 = vcmask 23552  }
   0xc   : > { %v2939_v1 = vld [vmem:[%s4005_s1 + $0x38] sm:$0xff]   ;;  %2505 = vmatprep.subr.bf16.mxu0 %v2938_v0  ;;  %2913 = vmatprep.subr.bf16.mxu1 %v2938_v0  ;;  %p208_p3 = scmp.lt.s32.totalorder %s2296_s19, 63  ;;  %v2941_v3 = vld [vmem:[%s4005_s1 + $0x30] sm:$0xff]   ;;  %v2943_v5 = vld [vmem:[%s4005_s1 + $0x28] sm:$0xff]  }
   0xd   : > { %2506 = vmatpush3.bf16.msra.mxu0 %v2939_v1  ;;  %2921 = vmatpush3.bf16.msra.mxu1 %v2939_v1  ;;  %v2944_v6 = vld [vmem:[%s4005_s1 + $0x60] sm:$0xff]   ;;  %v2946_v8 = vld [vmem:[%s4005_s1 + $0x58] sm:$0xff]   ;;  %v2948_v10 = vld [vmem:[%s4005_s1 + $0x50] sm:$0xff]  }
   0xe   : > { %2507 = vmatprep.subr.bf16.mxu0 %v2940_v2  ;;  %2914 = vmatprep.subr.bf16.mxu1 %v2940_v2  ;;  %s4034_s19 = smov (!%p208_p3, %s2296_s19), 63  ;;  %v2945_v7 = vld [vmem:[%s4005_s1 + $0x20] sm:$0xff]   ;;  %v2947_v9 = vld [vmem:[%s4005_s1 + $0x18] sm:$0xff]   ;;  %v2949_v13 = vld [vmem:[%s4005_s1 + $0x10] sm:$0xff]  }
   0xf   : > { %s2929_s6 = smul.u32 28, %s4034_s19  ;;  %v2950_v14 = vld [vmem:[%s4005_s1 + $0x48] sm:$0xff]   ;;  %v2952_v16 = vld [vmem:[%s4005_s1 + $0x40] sm:$0xff]   ;;  %v2960_v18 = vld [vmem:[%s4005_s1 + $0xf8] sm:$0xff]   ;;  %s2299_s18 = sshll.u32 %s4034_s19, 3 }
  0x10   : > { %v2951_v15 = vld [vmem:[%s4005_s1 + $0x8] sm:$0xff]   ;;  %v2953_v17 = vld [vmem:[%s4005_s1] sm:$0xff]   ;;  %v2961_v21 = vld [vmem:[%s4005_s1 + $0x178] sm:$0xff]   ;;  %s3820_s22 = scalar_lea.vmem %s4007_s3, %s2299_s18  ;;  %s3844_s25 = scalar_lea.vmem %s4008_s4, %s2299_s18 }
  0x11   : > { %2508 = vmatpush3.bf16.msra.mxu0 %v2941_v3  ;;  %2922 = vmatpush3.bf16.msra.mxu1 %v2941_v3  ;;  %s3292_s13 = scalar_lea.vmem %s4004_s0, %s2929_s6  ;;  %v2962_v22 = vld [vmem:[%s4005_s1 + $0xb8] sm:$0xff]   ;;  %v2964_v24 = vld [vmem:[%s4005_s1 + $0xf0] sm:$0xff]   ;;  %v2972_v32 = vld [vmem:[%s4005_s1 + $0xe8] sm:$0xff]  }
  0x12   : > { %2509 = vmatprep.subr.bf16.mxu0 %v2942_v4  ;;  %2915 = vmatprep.subr.bf16.mxu1 %v2942_v4  ;;  %v2956_v11 = vld [vmem:[%s3292_s13 + $0x4] ss:$28 sps:$4 sm:$0xff]   ;;  %v2963_v23 = vld [vmem:[%s4005_s1 + $0x138] sm:$0xff]   ;;  %v2975_v27 = vld [vmem:[%s4005_s1 + $0x170] sm:$0xff]  }
  0x13   : > { %v2959_v12 = vld [vmem:[%s3292_s13 + $0x2a4] ss:$28 sps:$4 sm:$0xff]   ;;  %1418 = vmatprep.mubr.bf16.mxu0 %v2956_v11  ;;  %v2966_v25 = vld [vmem:[%s3292_s13 + $0x3c] ss:$28 sps:$4 sm:$0xff]   ;;  %v2965_v28 = vld [vmem:[%s4005_s1 + $0xb0] sm:$0xff]  }
  0x14   : > { %1514 = vmatprep.mubr.bf16.mxu1 %v2959_v12  ;;  %v2954_v19 = vld [vmem:[%s3292_s13] ss:$28 sps:$4 sm:$0xff]   ;;  %v2977_v29 = vld [vmem:[%s4005_s1 + $0x130] sm:$0xff]   ;;  %v2973_v33 = vld [vmem:[%s4005_s1 + $0xa8] sm:$0xff]  }
  0x15   : > { %2510 = vmatpush3.bf16.msra.mxu0 %v2943_v5  ;;  %2923 = vmatpush3.bf16.msra.mxu1 %v2943_v5  ;;  %v2957_v20 = vld [vmem:[%s3292_s13 + $0x2a0] ss:$28 sps:$4 sm:$0xff]   ;;  %v2970_v30 = vld [vmem:[%s3292_s13 + $0x38] ss:$28 sps:$4 sm:$0xff]   ;;  %v2982_v39 = vld [vmem:[%s3292_s13 + $0x70] ss:$28 sps:$4 sm:$0xff]  }
  0x16   : > { %2511 = vmatprep.subr.bf16.mxu0 %v2944_v6  ;;  %2916 = vmatprep.subr.bf16.mxu1 %v2944_v6  ;;  %v2968_v26 = vld [vmem:[%s3292_s13 + $0x2dc] ss:$28 sps:$4 sm:$0xff]   ;;  %v2974_v34 = vld [vmem:[%s4005_s1 + $0xe0] sm:$0xff]   ;;  %v2978_v35 = vld [vmem:[%s3292_s13 + $0x74] ss:$28 sps:$4 sm:$0xff]  }
  0x17   : > { %v2971_v31 = vld [vmem:[%s3292_s13 + $0x2d8] ss:$28 sps:$4 sm:$0xff]   ;;  %v2976_v37 = vld [vmem:[%s4005_s1 + $0xa0] sm:$0xff]   ;;  %v2983_v40 = vld [vmem:[%s3292_s13 + $0x310] ss:$28 sps:$4 sm:$0xff]  }
  0x18   : > { %v2980_v36 = vld [vmem:[%s3292_s13 + $0x314] ss:$28 sps:$4 sm:$0xff]   ;;  %v2984_v38 = vld [vmem:[%s4005_s1 + $0xd8] sm:$0xff]   ;;  %v2995_v41 = vld [vmem:[%s4005_s1 + $0x168] sm:$0xff]  }
  0x19   : > { %2512 = vmatpush3.bf16.msra.mxu0 %v2945_v7  ;;  %2924 = vmatpush3.bf16.msra.mxu1 %v2945_v7  ;;  %v2985_v42 = vld [vmem:[%s4005_s1 + $0x98] sm:$0xff]   ;;  %v2986_v43 = vld [vmem:[%s4005_s1 + $0xd0] sm:$0xff]   ;;  %v2997_v44 = vld [vmem:[%s4005_s1 + $0x128] sm:$0xff]  }
  0x1a   : > { %2513 = vmatprep.subr.bf16.mxu0 %v2946_v8  ;;  %2917 = vmatprep.subr.bf16.mxu1 %v2946_v8  ;;  %v2988_v45 = vld [vmem:[%s3292_s13 + $0xac] ss:$28 sps:$4 sm:$0xff]   ;;  %v2987_v47 = vld [vmem:[%s4005_s1 + $0x90] sm:$0xff]   ;;  %v3006_v51 = vld [vmem:[%s4005_s1 + $0x160] sm:$0xff]  }
  0x1b   : > { %v2990_v46 = vld [vmem:[%s3292_s13 + $0x34c] ss:$28 sps:$4 sm:$0xff]   ;;  %v3008_v53 = vld [vmem:[%s4005_s1 + $0x120] sm:$0xff]   ;;  %v3007_v58 = vld [vmem:[%s4005_s1 + $0x1b8] sm:$0xff]  }
  0x1c   : > { %v2994_v48 = vld [vmem:[%s4005_s1 + $0xc8] sm:$0xff]   ;;  %v3000_v54 = vld [vmem:[%s3292_s13 + $0xe4] ss:$28 sps:$4 sm:$0xff]   ;;  %v3021_v60 = vld [vmem:[%s4005_s1 + $0x158] sm:$0xff]  }
  0x1d   : > { %2514 = vmatpush3.bf16.msra.mxu0 %v2947_v9  ;;  %2925 = vmatpush3.bf16.msra.mxu1 %v2947_v9  ;;  %v2992_v49 = vld [vmem:[%s3292_s13 + $0xa8] ss:$28 sps:$4 sm:$0xff]   ;;  %v3022_v61 = vld [vmem:[%s4005_s1 + $0x118] sm:$0xff]   ;;  %v3023_v1 = vld [vmem:[%s4005_s1 + $0x1b0] sm:$0xff]  }
  0x1e   : > { %2515 = vmatprep.subr.bf16.mxu0 %v2948_v10  ;;  %2918 = vmatprep.subr.bf16.mxu1 %v2948_v10  ;;  %v2993_v50 = vld [vmem:[%s3292_s13 + $0x348] ss:$28 sps:$4 sm:$0xff]   ;;  %v3005_v62 = vld [vmem:[%s3292_s13 + $0xe0] ss:$28 sps:$4 sm:$0xff]   ;;  %v3030_v2 = vld [vmem:[%s4005_s1 + $0x150] sm:$0xff]  }
  0x1f   : > { %v2996_v52 = vld [vmem:[%s4005_s1 + $0x88] sm:$0xff]   ;;  %v2998_v55 = vld [vmem:[%s4005_s1 + $0xc0] sm:$0xff]   ;;  %v3009_v63 = vld [vmem:[%s3292_s13 + $0x11c] ss:$28 sps:$4 sm:$0xff]  }
  0x20   : > { %v3004_v56 = vld [vmem:[%s3292_s13 + $0xc] ss:$28 sps:$4 sm:$0xff]   ;;  %v2999_v57 = vld [vmem:[%s4005_s1 + $0x80] sm:$0xff]   ;;  %v3031_v3 = vld [vmem:[%s4005_s1 + $0x110] sm:$0xff]  }
  0x21   : > { %2516 = vmatpush3.bf16.msra.mxu0 %v2949_v13  ;;  %2926 = vmatpush3.bf16.msra.mxu1 %v2949_v13  ;;  %v3002_v59 = vld [vmem:[%s3292_s13 + $0x8] ss:$28 sps:$4 sm:$0xff]   ;;  %v3013_v4 = vld [vmem:[%s3292_s13 + $0x118] ss:$28 sps:$4 sm:$0xff]   ;;  %v3014_v5 = vld [vmem:[%s3292_s13 + $0x40] ss:$28 sps:$4 sm:$0xff]  }
  0x22   : > { %2517 = vmatprep.subr.bf16.mxu0 %v2950_v14  ;;  %2919 = vmatprep.subr.bf16.mxu1 %v2950_v14  ;;  %v3011_v0 = vld [vmem:[%s3292_s13 + $0x44] ss:$28 sps:$4 sm:$0xff]   ;;  %v3015_v6 = vld [vmem:[%s3292_s13 + $0x154] ss:$28 sps:$4 sm:$0xff]   ;;  %v3038_v7 = vld [vmem:[%s4005_s1 + $0x1a8] sm:$0xff]  }
  0x23   : > { %v3017_v8 = vld [vmem:[%s3292_s13 + $0x7c] ss:$28 sps:$4 sm:$0xff]   ;;  %v3045_v9 = vld [vmem:[%s4005_s1 + $0x148] sm:$0xff]   ;;  %v3026_v14 = vld [vmem:[%s3292_s13 + $0xb4] ss:$28 sps:$4 sm:$0xff]  }
  0x24   : > { %v3046_v10 = vld [vmem:[%s4005_s1 + $0x108] sm:$0xff]   ;;  %v3020_v12 = vld [vmem:[%s3292_s13 + $0x78] ss:$28 sps:$4 sm:$0xff]  }
  0x25   : > { %2518 = vmatpush3.bf16.msra.mxu0 %v2951_v15  ;;  %2927 = vmatpush3.bf16.msra.mxu1 %v2951_v15  ;;  %v3019_v11 = vld [vmem:[%s3292_s13 + $0x150] ss:$28 sps:$4 sm:$0xff]   ;;  %v3053_v15 = vld [vmem:[%s4005_s1 + $0x140] sm:$0xff]  }
  0x26   : > { %2519 = vmatprep.subr.bf16.mxu0 %v2952_v16  ;;  %2920 = vmatprep.subr.bf16.mxu1 %v2952_v16  ;;  %v3024_v13 = vld [vmem:[%s3292_s13 + $0x18c] ss:$28 sps:$4 sm:$0xff]   ;;  %v3054_v16 = vld [vmem:[%s4005_s1 + $0x1a0] sm:$0xff]  }
  0x29   : > { %2520 = vmatpush3.bf16.msra.mxu0 %v2953_v17  ;;  %2928 = vmatpush3.bf16.msra.mxu1 %v2953_v17  ;;  %v3055_v17 = vld [vmem:[%s4005_s1 + $0x100] sm:$0xff]  }
  0x2a   : > { %2617 = vmatprep.subr.bf16.mxu1 %v2960_v18  ;;  %2729 = vmatprep.subr.bf16.mxu0 %v2961_v21  ;;  %v3028_v18 = vld [vmem:[%s3292_s13 + $0x188] ss:$28 sps:$4 sm:$0xff]  }
  0x2b   : > { %v3034_v21 = vld [vmem:[%s3292_s13 + $0xec] ss:$28 sps:$4 sm:$0xff]  }
  0x2c   : > { %1419 = vmatmul.mubr.bf16.vlgmr.msra.gmra.mxu0 %v2954_v19  ;;  %1515 = vmatmul.mubr.bf16.vlgmr.msra.gmra.mxu1 %v2957_v20  ;;  %v3029_v19 = vld [vmem:[%s3292_s13 + $0xb0] ss:$28 sps:$4 sm:$0xff]   ;;  %v3032_v20 = vld [vmem:[%s3292_s13 + $0x1c4] ss:$28 sps:$4 sm:$0xff]  }
  0x2d   : > { %2618 = vmatpush3.bf16.msra.mxu1 %v2962_v22  ;;  %2730 = vmatpush3.bf16.msra.mxu0 %v2963_v23  ;;  %v3068_v22 = vld [vmem:[%s4005_s1 + $0x198] sm:$0xff]  }
  0x2e   : > { %2619 = vmatprep.subr.bf16.mxu1 %v2964_v24  ;;  %1426 = vmatprep.mubr.bf16.mxu0 %v2966_v25  ;;  %v3036_v23 = vld [vmem:[%s3292_s13 + $0x1c0] ss:$28 sps:$4 sm:$0xff]   ;;  %v3037_v24 = vld [vmem:[%s3292_s13 + $0xe8] ss:$28 sps:$4 sm:$0xff]   ;;  %v3081_v25 = vld [vmem:[%s4005_s1 + $0x190] sm:$0xff]  }
  0x2f   : > { %1522 = vmatprep.mubr.bf16.mxu1 %v2968_v26  ;;  %2731 = vmatprep.subr.bf16.mxu0 %v2975_v27  ;;  %v3039_v26 = vld [vmem:[%s3292_s13 + $0x1fc] ss:$28 sps:$4 sm:$0xff]   ;;  %v3041_v27 = vld [vmem:[%s3292_s13 + $0x124] ss:$28 sps:$4 sm:$0xff]  }
  0x31   : > { %2620 = vmatpush3.bf16.msra.mxu1 %v2965_v28  ;;  %2732 = vmatpush3.bf16.msra.mxu0 %v2977_v29  ;;  %v3094_v28 = vld [vmem:[%s4005_s1 + $0x188] sm:$0xff]   ;;  %v3043_v29 = vld [vmem:[%s3292_s13 + $0x1f8] ss:$28 sps:$4 sm:$0xff]  }
  0x32   : > { %2621 = vmatprep.subr.bf16.mxu1 %v2972_v32  ;;  %2733 = vmatprep.subr.bf16.mxu0 %v2995_v41  ;;  %v3049_v32 = vld [vmem:[%s3292_s13 + $0x15c] ss:$28 sps:$4 sm:$0xff]   ;;  %v3066_v41 = vld [vmem:[%s3292_s13 + $0x14] ss:$28 sps:$4 sm:$0xff]  }
  0x34   : > { %1427 = vmatmul.mubr.bf16.gmra.mxu0 %v2970_v30  ;;  %1523 = vmatmul.mubr.bf16.gmra.mxu1 %v2971_v31  ;;  %v3044_v30 = vld [vmem:[%s3292_s13 + $0x120] ss:$28 sps:$4 sm:$0xff]   ;;  %v3047_v31 = vld [vmem:[%s3292_s13 + $0x234] ss:$28 sps:$4 sm:$0xff]  }
  0x35   : > { %2622 = vmatpush3.bf16.msra.mxu1 %v2973_v33  ;;  %1434 = vmatprep.mubr.bf16.mxu0 %v2978_v35  ;;  %v3107_v33 = vld [vmem:[%s4005_s1 + $0x180] sm:$0xff]   ;;  %v3052_v35 = vld [vmem:[%s3292_s13 + $0x158] ss:$28 sps:$4 sm:$0xff]  }
  0x36   : > { %2623 = vmatprep.subr.bf16.mxu1 %v2974_v34  ;;  %1530 = vmatprep.mubr.bf16.mxu1 %v2980_v36  ;;  %v3051_v34 = vld [vmem:[%s3292_s13 + $0x230] ss:$28 sps:$4 sm:$0xff]  }
  0x37   : > { %2734 = vmatpush3.bf16.msra.mxu0 %v2997_v44  ;;  %v3056_v36 = vld [vmem:[%s3292_s13 + $0x26c] ss:$28 sps:$4 sm:$0xff]   ;;  %v3069_v44 = vld [vmem:[%s3292_s13 + $0x204] ss:$28 sps:$4 sm:$0xff]  }
  0x38   : > { %2735 = vmatprep.subr.bf16.mxu0 %v3006_v51  ;;  %v3080_v51 = vld [vmem:[%s3292_s13 + $0x80] ss:$28 sps:$4 sm:$0xff]  }
  0x39   : > { %2624 = vmatpush3.bf16.msra.mxu1 %v2976_v37  ;;  %v3058_v37 = vld [vmem:[%s3292_s13 + $0x194] ss:$28 sps:$4 sm:$0xff]  }
  0x3a   : > { %2625 = vmatprep.subr.bf16.mxu1 %v2984_v38  ;;  %v3060_v38 = vld [vmem:[%s3292_s13 + $0x268] ss:$28 sps:$4 sm:$0xff]  }
  0x3b   : > { %2736 = vmatpush3.bf16.msra.mxu0 %v3008_v53  ;;  %v3084_v53 = vld [vmem:[%s3292_s13 + $0xbc] ss:$28 sps:$4 sm:$0xff]  }
  0x3c   : > { %1435 = vmatmul.mubr.bf16.gmra.mxu0 %v2982_v39  ;;  %1531 = vmatmul.mubr.bf16.gmra.mxu1 %v2983_v40  ;;  %v3061_v39 = vld [vmem:[%s3292_s13 + $0x190] ss:$28 sps:$4 sm:$0xff]  }
  0x3d   : > { %2626 = vmatpush3.bf16.msra.mxu1 %v2985_v42  ;;  %1442 = vmatprep.mubr.bf16.mxu0 %v2988_v45  ;;  %v3062_v40 = vld [vmem:[%s3292_s13 + $0x1cc] ss:$28 sps:$4 sm:$0xff]  }
  0x3e   : > { %2627 = vmatprep.subr.bf16.mxu1 %v2986_v43  ;;  %1538 = vmatprep.mubr.bf16.mxu1 %v2990_v46  ;;  %v3064_v42 = vld [vmem:[%s3292_s13 + $0x10] ss:$28 sps:$4 sm:$0xff]   ;;  %v3067_v43 = vld [vmem:[%s3292_s13 + $0x1c8] ss:$28 sps:$4 sm:$0xff]   ;;  %v3073_v46 = vld [vmem:[%s3292_s13 + $0x200] ss:$28 sps:$4 sm:$0xff]  }
  0x3f   : > { %2737 = vmatprep.subr.bf16.mxu0 %v3021_v60  ;;  %v3071_v45 = vld [vmem:[%s3292_s13 + $0x4c] ss:$28 sps:$4 sm:$0xff]   ;;  %v3095_v60 = vld [vmem:[%s3292_s13 + $0x2e4] ss:$28 sps:$4 sm:$0xff]  }
  0x40   : > { %2738 = vmatpush3.bf16.msra.mxu0 %v3022_v61  ;;  %v3097_v61 = vld [vmem:[%s3292_s13 + $0x12c] ss:$28 sps:$4 sm:$0xff]  }
  0x41   : > { %2628 = vmatpush3.bf16.msra.mxu1 %v2987_v47  ;;  %2739 = vmatprep.subr.bf16.mxu0 %v3030_v2  ;;  %v3074_v47 = vld [vmem:[%s3292_s13 + $0x48] ss:$28 sps:$4 sm:$0xff]   ;;  %v3105_v2 = vld [vmem:[%s3292_s13 + $0x318] ss:$28 sps:$4 sm:$0xff]  }
  0x42   : > { %2629 = vmatprep.subr.bf16.mxu1 %v2994_v48  ;;  %v3075_v48 = vld [vmem:[%s3292_s13 + $0x23c] ss:$28 sps:$4 sm:$0xff]  }
  0x44   : > { %1443 = vmatmul.mubr.bf16.gmra.mxu0 %v2992_v49  ;;  %1539 = vmatmul.mubr.bf16.gmra.mxu1 %v2993_v50  ;;  %v3077_v49 = vld [vmem:[%s3292_s13 + $0x84] ss:$28 sps:$4 sm:$0xff]   ;;  %v3079_v50 = vld [vmem:[%s3292_s13 + $0x238] ss:$28 sps:$4 sm:$0xff]  }
  0x45   : > { %2630 = vmatpush3.bf16.msra.mxu1 %v2996_v52  ;;  %1450 = vmatprep.mubr.bf16.mxu0 %v3000_v54  ;;  %v3082_v52 = vld [vmem:[%s3292_s13 + $0x274] ss:$28 sps:$4 sm:$0xff]  }
  0x46   : > { %2631 = vmatprep.subr.bf16.mxu1 %v2998_v55  ;;  %1579 = vmatprep.mubr.bf16.mxu1 %v3004_v56  ;;  %v3086_v54 = vld [vmem:[%s3292_s13 + $0x270] ss:$28 sps:$4 sm:$0xff]   ;;  %v3087_v55 = vld [vmem:[%s3292_s13 + $0xb8] ss:$28 sps:$4 sm:$0xff]  }
  0x47   : > { %2740 = vmatpush3.bf16.msra.mxu0 %v3031_v3  ;;  %v3088_v56 = vld [vmem:[%s3292_s13 + $0x2ac] ss:$28 sps:$4 sm:$0xff]   ;;  %v3106_v3 = vld [vmem:[%s3292_s13 + $0x160] ss:$28 sps:$4 sm:$0xff]  }
  0x48   : > { %2741 = vmatprep.subr.bf16.mxu0 %v3045_v9  ;;  %v3116_v9 = vld [vmem:[%s3292_s13 + $0x18] ss:$28 sps:$4 sm:$0xff]  }
  0x49   : > { %2632 = vmatpush3.bf16.msra.mxu1 %v2999_v57  ;;  %v3090_v57 = vld [vmem:[%s3292_s13 + $0xf4] ss:$28 sps:$4 sm:$0xff]  }
  0x4a   : > { %2865 = vmatprep.subr.bf16.mxu1 %v3007_v58 }
  0x4b   : > { %2742 = vmatpush3.bf16.msra.mxu0 %v3046_v10  ;;  %v3117_v10 = vld [vmem:[%s3292_s13 + $0x1d0] ss:$28 sps:$4 sm:$0xff]  }
  0x4c   : > { %1451 = vmatmul.mubr.bf16.gmra.mxu0 %v3005_v62  ;;  %1580 = vmatmul.mubr.bf16.vlgmr.msra.gmra.mxu1 %v3002_v59  ;;  %v3093_v59 = vld [vmem:[%s3292_s13 + $0xf0] ss:$28 sps:$4 sm:$0xff]   ;;  %v3099_v62 = vld [vmem:[%s3292_s13 + $0x2e0] ss:$28 sps:$4 sm:$0xff]  }
  0x4d   : > { %2866 = vmatpush3.bf16.msra.mxu1 %v3007_v58  ;;  %1458 = vmatprep.mubr.bf16.mxu0 %v3009_v63  ;;  %v3092_v58 = vld [vmem:[%s3292_s13 + $0x2a8] ss:$28 sps:$4 sm:$0xff]  }
  0x4e   : > { %1587 = vmatprep.mubr.bf16.mxu1 %v3011_v0  ;;  %2867 = vmatprep.subr.bf16.mxu1 %v3023_v1  ;;  %v3100_v63 = vld [vmem:[%s3292_s13 + $0x128] ss:$28 sps:$4 sm:$0xff]   ;;  %v3101_v0 = vld [vmem:[%s3292_s13 + $0x31c] ss:$28 sps:$4 sm:$0xff]  }
  0x4f   : > { %2743 = vmatprep.subr.bf16.mxu0 %v3053_v15  ;;  %v3123_v15 = vld [vmem:[%s3292_s13 + $0xc0] ss:$28 sps:$4 sm:$0xff]  }
  0x50   : > { %2744 = vmatpush3.bf16.msra.mxu0 %v3055_v17  ;;  %v3126_v17 = vld [vmem:[%s3292_s13 + $0xf8] ss:$28 sps:$4 sm:$0xff]  }
  0x51   : > { %2868 = vmatpush3.bf16.msra.mxu1 %v3023_v1  ;;  %v3103_v1 = vld [vmem:[%s3292_s13 + $0x164] ss:$28 sps:$4 sm:$0xff]  }
  0x52   : > { %2869 = vmatprep.subr.bf16.mxu1 %v3038_v7 }
  0x54   : > { %1459 = vmatmul.mubr.bf16.gmra.mxu0 %v3013_v4  ;;  %1588 = vmatmul.mubr.bf16.gmra.mxu1 %v3014_v5  ;;  %v3108_v4 = vld [vmem:[%s3292_s13 + $0x354] ss:$28 sps:$4 sm:$0xff]   ;;  %v3110_v5 = vld [vmem:[%s3292_s13 + $0x19c] ss:$28 sps:$4 sm:$0xff]  }
  0x55   : > { %1466 = vmatprep.mubr.bf16.mxu0 %v3015_v6  ;;  %1595 = vmatprep.mubr.bf16.mxu1 %v3017_v8  ;;  %v3112_v6 = vld [vmem:[%s3292_s13 + $0x350] ss:$28 sps:$4 sm:$0xff]  }
  0x56   : > { %2870 = vmatpush3.bf16.msra.mxu1 %v3038_v7  ;;  %v3113_v7 = vld [vmem:[%s3292_s13 + $0x198] ss:$28 sps:$4 sm:$0xff]  }
  0x57   : > { %2871 = vmatprep.subr.bf16.mxu1 %v3054_v16  ;;  %v3114_v8 = vld [vmem:[%s3292_s13 + $0x1d4] ss:$28 sps:$4 sm:$0xff]  }
  0x5a   : > { %2872 = vmatpush3.bf16.msra.mxu1 %v3054_v16  ;;  %v3124_v16 = vld [vmem:[%s3292_s13 + $0x244] ss:$28 sps:$4 sm:$0xff]  }
  0x5b   : > { %2873 = vmatprep.subr.bf16.mxu1 %v3068_v22 }
  0x5c   : > { %1467 = vmatmul.mubr.bf16.gmra.mxu0 %v3019_v11  ;;  %1596 = vmatmul.mubr.bf16.gmra.mxu1 %v3020_v12  ;;  %v3118_v11 = vld [vmem:[%s3292_s13 + $0x50] ss:$28 sps:$4 sm:$0xff]  }
  0x5d   : > { %1474 = vmatprep.mubr.bf16.mxu0 %v3024_v13  ;;  %1603 = vmatprep.mubr.bf16.mxu1 %v3026_v14  ;;  %v3119_v12 = vld [vmem:[%s3292_s13 + $0x20c] ss:$28 sps:$4 sm:$0xff]  }
  0x5e   : > { %2874 = vmatpush3.bf16.msra.mxu1 %v3068_v22  ;;  %v3121_v13 = vld [vmem:[%s3292_s13 + $0x88] ss:$28 sps:$4 sm:$0xff]   ;;  %v3132_v22 = vld [vmem:[%s3292_s13 + $0x278] ss:$28 sps:$4 sm:$0xff]  }
  0x5f   : > { %2875 = vmatprep.subr.bf16.mxu1 %v3081_v25  ;;  %v3122_v14 = vld [vmem:[%s3292_s13 + $0x208] ss:$28 sps:$4 sm:$0xff]  }
  0x62   : > { %2876 = vmatpush3.bf16.msra.mxu1 %v3081_v25  ;;  %v3136_v25 = vld [vmem:[%s3292_s13 + $0x1d8] ss:$28 sps:$4 sm:$0xff]  }
  0x63   : > { %2877 = vmatprep.subr.bf16.mxu1 %v3094_v28 }
  0x64   : > { %1475 = vmatmul.mubr.bf16.gmra.mxu0 %v3028_v18  ;;  %1604 = vmatmul.mubr.bf16.gmra.mxu1 %v3029_v19  ;;  %v3127_v18 = vld [vmem:[%s3292_s13 + $0x240] ss:$28 sps:$4 sm:$0xff]   ;;  %v3128_v19 = vld [vmem:[%s3292_s13 + $0x130] ss:$28 sps:$4 sm:$0xff]  }
  0x65   : > { %1482 = vmatprep.mubr.bf16.mxu0 %v3032_v20  ;;  %1611 = vmatprep.mubr.bf16.mxu1 %v3034_v21  ;;  %v3129_v20 = vld [vmem:[%s3292_s13 + $0x27c] ss:$28 sps:$4 sm:$0xff]   ;;  %v3131_v21 = vld [vmem:[%s3292_s13 + $0x168] ss:$28 sps:$4 sm:$0xff]  }
  0x66   : > { %2878 = vmatpush3.bf16.msra.mxu1 %v3094_v28  ;;  %v3139_v28 = vld [vmem:[%s3292_s13 + $0x2ec] ss:$28 sps:$4 sm:$0xff]  }
  0x67   : > { %2879 = vmatprep.subr.bf16.mxu1 %v3107_v33 }
  0x6a   : > { %2880 = vmatpush3.bf16.msra.mxu1 %v3107_v33 }
  0x6c   : > { %1483 = vmatmul.mubr.bf16.gmra.mxu0 %v3036_v23  ;;  %1612 = vmatmul.mubr.bf16.gmra.mxu1 %v3037_v24  ;;  %v3133_v23 = vld [vmem:[%s3292_s13 + $0x1a0] ss:$28 sps:$4 sm:$0xff]   ;;  %v3134_v24 = vld [vmem:[%s3292_s13 + $0x2b4] ss:$28 sps:$4 sm:$0xff]  }
  0x6d   : > { %1490 = vmatprep.mubr.bf16.mxu0 %v3039_v26  ;;  %1619 = vmatprep.mubr.bf16.mxu1 %v3041_v27  ;;  %v3137_v26 = vld [vmem:[%s3292_s13 + $0x2b0] ss:$28 sps:$4 sm:$0xff]  }
  0x6e   : > { %v3138_v27 = vld [vmem:[%s3292_s13 + $0x210] ss:$28 sps:$4 sm:$0xff]  }
  0x74   : > { %1491 = vmatmul.mubr.bf16.gmra.mxu0 %v3043_v29  ;;  %1620 = vmatmul.mubr.bf16.gmra.mxu1 %v3044_v30  ;;  %v3141_v29 = vld [vmem:[%s3292_s13 + $0x248] ss:$28 sps:$4 sm:$0xff]  }
  0x75   : > { %1498 = vmatprep.mubr.bf16.mxu0 %v3047_v31  ;;  %1627 = vmatprep.mubr.bf16.mxu1 %v3049_v32 }
  0x7c   : > { %1499 = vmatmul.mubr.bf16.gmra.mxu0 %v3051_v34  ;;  %1628 = vmatmul.mubr.bf16.gmra.mxu1 %v3052_v35 }
  0x7d   : > { %1506 = vmatprep.mubr.bf16.mxu0 %v3056_v36  ;;  %1635 = vmatprep.mubr.bf16.mxu1 %v3058_v37 }
  0x84   : > { %1507 = vmatmul.mubr.bf16.gmra.mxu0 %v3060_v38  ;;  %1636 = vmatmul.mubr.bf16.gmra.mxu1 %v3061_v39  ;;  %v3142_v38 = vld [vmem:[%s3292_s13 + $0x2e8] ss:$28 sps:$4 sm:$0xff]   ;;  %v3143_v39 = vld [vmem:[%s3292_s13 + $0x280] ss:$28 sps:$4 sm:$0xff]  }
  0x85   : > { %1643 = vmatprep.mubr.bf16.mxu1 %v3062_v40  ;;  %1740 = vmatprep.mubr.bf16.mxu0 %v3066_v41  ;;  %v3144_v40 = vld [vmem:[%s3292_s13 + $0x324] ss:$28 sps:$4 sm:$0xff]   ;;  %v3146_v41 = vld [vmem:[%s3292_s13 + $0x2b8] ss:$28 sps:$4 sm:$0xff]  }
  0x8c   : > { %1644 = vmatmul.mubr.bf16.gmra.mxu1 %v3067_v43  ;;  %1741 = vmatmul.mubr.bf16.vlgmr.msra.gmra.mxu0 %v3064_v42 }
  0x8d   : > { %1651 = vmatprep.mubr.bf16.mxu1 %v3069_v44  ;;  %1748 = vmatprep.mubr.bf16.mxu0 %v3071_v45 }
  0x94   : > { %1652 = vmatmul.mubr.bf16.gmra.mxu1 %v3073_v46  ;;  %1749 = vmatmul.mubr.bf16.gmra.mxu0 %v3074_v47 }
  0x95   : > { %1659 = vmatprep.mubr.bf16.mxu1 %v3075_v48  ;;  %1756 = vmatprep.mubr.bf16.mxu0 %v3077_v49 }
  0x9c   : > { %1660 = vmatmul.mubr.bf16.gmra.mxu1 %v3079_v50  ;;  %1757 = vmatmul.mubr.bf16.gmra.mxu0 %v3080_v51 }
  0x9d   : > { %1667 = vmatprep.mubr.bf16.mxu1 %v3082_v52  ;;  %1764 = vmatprep.mubr.bf16.mxu0 %v3084_v53 }
  0xa4   : > { %1668 = vmatmul.mubr.bf16.gmra.mxu1 %v3086_v54  ;;  %1765 = vmatmul.mubr.bf16.gmra.mxu0 %v3087_v55  ;;  %v3147_v54 = vld [vmem:[%s3292_s13 + $0x320] ss:$28 sps:$4 sm:$0xff]   ;;  %v3148_v55 = vld [vmem:[%s3292_s13 + $0x2f0] ss:$28 sps:$4 sm:$0xff]  }
  0xa5   : > { %1675 = vmatprep.mubr.bf16.mxu1 %v3088_v56  ;;  %1772 = vmatprep.mubr.bf16.mxu0 %v3090_v57  ;;  %v3149_v56 = vld [vmem:[%s3292_s13 + $0x35c] ss:$28 sps:$4 sm:$0xff]   ;;  %v3151_v57 = vld [vmem:[%s3292_s13 + $0x328] ss:$28 sps:$4 sm:$0xff]  }
  0xac   : > { %1676 = vmatmul.mubr.bf16.gmra.mxu1 %v3092_v58  ;;  %1773 = vmatmul.mubr.bf16.gmra.mxu0 %v3093_v59 }
  0xad   : > { %1683 = vmatprep.mubr.bf16.mxu1 %v3095_v60  ;;  %1780 = vmatprep.mubr.bf16.mxu0 %v3097_v61 }
  0xb4   : > { %1684 = vmatmul.mubr.bf16.gmra.mxu1 %v3099_v62  ;;  %1781 = vmatmul.mubr.bf16.gmra.mxu0 %v3100_v63 }
  0xb5   : > { %1691 = vmatprep.mubr.bf16.mxu1 %v3101_v0  ;;  %1788 = vmatprep.mubr.bf16.mxu0 %v3103_v1 }
  0xbc   : > { %1692 = vmatmul.mubr.bf16.gmra.mxu1 %v3105_v2  ;;  %1789 = vmatmul.mubr.bf16.gmra.mxu0 %v3106_v3 }
  0xbd   : > { %1699 = vmatprep.mubr.bf16.mxu1 %v3108_v4  ;;  %1796 = vmatprep.mubr.bf16.mxu0 %v3110_v5 }
  0xc4   : > { %1700 = vmatmul.mubr.bf16.gmra.mxu1 %v3112_v6  ;;  %1797 = vmatmul.mubr.bf16.gmra.mxu0 %v3113_v7  ;;  %v3152_v6 = vld [vmem:[%s3292_s13 + $0x358] ss:$28 sps:$4 sm:$0xff]   ;;  %v3153_v7 = vld [vmem:[%s3292_s13 + $0x360] ss:$28 sps:$4 sm:$0xff]  }
  0xc5   : > { %1804 = vmatprep.mubr.bf16.mxu0 %v3114_v8  ;;  %2881 = vmatprep.mubr.bf16.mxu1 %v3116_v9 }
  0xcc   : > { %1805 = vmatmul.mubr.bf16.gmra.mxu0 %v3117_v10  ;;  %2882 = vmatmul.mubr.bf16.vlgmr.msra.gmra.mxu1 %v3118_v11 }
  0xcd   : > { %1812 = vmatprep.mubr.bf16.mxu0 %v3119_v12  ;;  %2885 = vmatprep.mubr.bf16.mxu1 %v3121_v13 }
  0xd4   : > { %1813 = vmatmul.mubr.bf16.gmra.mxu0 %v3122_v14  ;;  %2886 = vmatmul.mubr.bf16.gmra.mxu1 %v3123_v15 }
  0xd5   : > { %1820 = vmatprep.mubr.bf16.mxu0 %v3124_v16  ;;  %2889 = vmatprep.mubr.bf16.mxu1 %v3126_v17 }
  0xdc   : > { %1821 = vmatmul.mubr.bf16.gmra.mxu0 %v3127_v18  ;;  %2890 = vmatmul.mubr.bf16.gmra.mxu1 %v3128_v19 }
  0xdd   : > { %1828 = vmatprep.mubr.bf16.mxu0 %v3129_v20  ;;  %2893 = vmatprep.mubr.bf16.mxu1 %v3131_v21 }
  0xe4   : > { %1829 = vmatmul.mubr.bf16.gmra.mxu0 %v3132_v22  ;;  %2894 = vmatmul.mubr.bf16.gmra.mxu1 %v3133_v23 }
  0xe5   : > { %1836 = vmatprep.mubr.bf16.mxu0 %v3134_v24  ;;  %2897 = vmatprep.mubr.bf16.mxu1 %v3136_v25  ;;  %v3576_v24 = vld [vmem:[%s4006_s2] ss:$0 sm:$0xff] }
  0xec   : > { %v2521_v30 = vpop.f32.mrf.mxu0  ;;  %v2593_v31 = vpop.f32.mrf.mxu1  ;;  %1837 = vmatmul.mubr.bf16.gmra.mxu0 %v3137_v26  ;;  %2898 = vmatmul.mubr.bf16.gmra.mxu1 %v3138_v27 }
  0xed   : > { %1844 = vmatprep.mubr.bf16.mxu0 %v3139_v28  ;;  %2901 = vmatprep.mubr.bf16.mxu1 %v3141_v29 }
  0xee   : > { %v2522_v32 = vpop.f32.mrf.mxu0  ;;  %v2594_v33 = vpop.f32.mrf.mxu1 }
  0xef   : > { %v3537_v34 = vadd.f32 %v2522_v32, %v2521_v30  ;;  %v3539_v35 = vadd.f32 %v2594_v33, %v2593_v31 }
  0xf0   : > { %v2524_v36 = vpop.f32.mrf.mxu0  ;;  %v2596_v37 = vpop.f32.mrf.mxu1 }
  0xf1   : > { %v1421_v29 = vadd.f32 %v3537_v34, %v3576_v24 }
  0xf2   : > { %v2525_v42 = vpop.f32.mrf.mxu0  ;;  %v2597_v43 = vpop.f32.mrf.mxu1 }
  0xf3   : > { %v3545_v44 = vadd.f32 %v2525_v42, %v2524_v36  ;;  %v3547_v45 = vadd.f32 %v2597_v43, %v2596_v37 }
  0xf4   : > { %v2527_v46 = vpop.f32.mrf.mxu0  ;;  %v2599_v47 = vpop.f32.mrf.mxu1  ;;  %1845 = vmatmul.mubr.bf16.gmra.mxu0 %v3142_v38  ;;  %2902 = vmatmul.mubr.bf16.gmra.mxu1 %v3143_v39 }
  0xf5   : > { %1852 = vmatprep.mubr.bf16.mxu0 %v3144_v40  ;;  %2905 = vmatprep.mubr.bf16.mxu1 %v3146_v41  ;;  %v1424_v39 = vadd.f32 %v3545_v44, %v3576_v24 }
  0xf6   : > { %v2528_v48 = vpop.f32.mrf.mxu0  ;;  %v2600_v49 = vpop.f32.mrf.mxu1 }
  0xf7   : > { %v3549_v50 = vadd.f32 %v2528_v48, %v2527_v46  ;;  %v3551_v51 = vadd.f32 %v2600_v49, %v2599_v47 }
  0xf8   : > { %v2530_v52 = vpop.f32.mrf.mxu0  ;;  %v2602_v53 = vpop.f32.mrf.mxu1 }
  0xf9   : > { %v1429_v48 = vadd.f32 %v3549_v50, %v3576_v24 }
  0xfa   : > { %v2531_v58 = vpop.f32.mrf.mxu0  ;;  %v2603_v59 = vpop.f32.mrf.mxu1 }
  0xfb   : > { %v3557_v60 = vadd.f32 %v2531_v58, %v2530_v52  ;;  %v3559_v61 = vadd.f32 %v2603_v59, %v2602_v53 }
  0xfc   : > { %v2533_v62 = vpop.f32.mrf.mxu0  ;;  %v2605_v63 = vpop.f32.mrf.mxu1  ;;  %1853 = vmatmul.mubr.bf16.gmra.mxu0 %v3147_v54  ;;  %2906 = vmatmul.mubr.bf16.gmra.mxu1 %v3148_v55 }
  0xfd   : > { %1860 = vmatprep.mubr.bf16.mxu0 %v3149_v56  ;;  %2909 = vmatprep.mubr.bf16.mxu1 %v3151_v57  ;;  %v1432_v57 = vadd.f32 %v3557_v60, %v3576_v24 }
  0xfe   : > { %v2534_v0 = vpop.f32.mrf.mxu0  ;;  %v2606_v1 = vpop.f32.mrf.mxu1 }
  0xff   : > { %v2535_v2 = vadd.f32 %v2534_v0, %v2533_v62  ;;  %v3561_v3 = vadd.f32 %v2606_v1, %v2605_v63 }
 0x100   : > { %v2536_v4 = vpop.f32.mrf.mxu0  ;;  %v2608_v5 = vpop.f32.mrf.mxu1 }
 0x102   : > { %v2537_v8 = vpop.f32.mrf.mxu0  ;;  %v2609_v9 = vpop.f32.mrf.mxu1 }
 0x103   : > { %v2538_v10 = vadd.f32 %v2537_v8, %v2536_v4  ;;  %v3565_v11 = vadd.f32 %v2609_v9, %v2608_v5  ;;  %v1437_v4 = vadd.f32 %v2535_v2, %v3576_v24 }
 0x104   : > { %v2539_v12 = vpop.f32.mrf.mxu0  ;;  %v2611_v13 = vpop.f32.mrf.mxu1  ;;  %1861 = vmatmul.mubr.bf16.gmra.mxu0 %v3152_v6  ;;  %2910 = vmatmul.mubr.bf16.gmra.mxu1 %v3153_v7 }
 0x106   : > { %v2540_v14 = vpop.f32.mrf.mxu0  ;;  %v2612_v15 = vpop.f32.mrf.mxu1 }
 0x107   : > { %v2541_v16 = vadd.f32 %v2540_v14, %v2539_v12  ;;  %v3567_v17 = vadd.f32 %v2612_v15, %v2611_v13  ;;  %v1440_v13 = vadd.f32 %v2538_v10, %v3576_v24 }
 0x108   : > { %v2542_v18 = vpop.f32.mrf.mxu0  ;;  %v2614_v19 = vpop.f32.mrf.mxu1 }
 0x10a   : > { %v2543_v20 = vpop.f32.mrf.mxu0  ;;  %v2615_v21 = vpop.f32.mrf.mxu1 }
 0x10b   : > { %v3569_v22 = vadd.f32 %v2543_v20, %v2542_v18  ;;  %v3571_v23 = vadd.f32 %v2615_v21, %v2614_v19 }
 0x10c   : > { %v2545_v25 = vpop.f32.mrf.mxu0  ;;  %v2633_v26 = vpop.f32.mrf.mxu1 }
 0x10e   : > { %v2546_v27 = vpop.f32.mrf.mxu0  ;;  %v2634_v28 = vpop.f32.mrf.mxu1 }
 0x10f   : > { %v3580_v30 = vadd.f32 %v2546_v27, %v2545_v25  ;;  %v2635_v31 = vadd.f32 %v2634_v28, %v2633_v26  ;;  %v1445_v25 = vadd.f32 %v2541_v16, %v3576_v24 }
 0x110   : > { %v2548_v32 = vpop.f32.mrf.mxu0  ;;  %v2636_v33 = vpop.f32.mrf.mxu1 }
 0x111   : > { %v3582_v36 = vadd.f32 %v2635_v31, %v1421_v29 }
 0x112   : > { %v2549_v37 = vpop.f32.mrf.mxu0  ;;  %v2637_v38 = vpop.f32.mrf.mxu1 }
 0x113   : > { %v3586_v40 = vadd.f32 %v2549_v37, %v2548_v32  ;;  %v2638_v41 = vadd.f32 %v2637_v38, %v2636_v33  ;;  %v1448_v33 = vadd.f32 %v3569_v22, %v3576_v24 }
 0x114   : > { %v2551_v42 = vpop.f32.mrf.mxu0  ;;  %v2639_v43 = vpop.f32.mrf.mxu1 }
 0x115   : > { %v3588_v46 = vadd.f32 %v2638_v41, %v1424_v39 }
 0x116   : > { %v2552_v34 = vpop.f32.mrf.mxu0  ;;  %v2640_v47 = vpop.f32.mrf.mxu1 }
 0x117   : > { %v3592_v49 = vadd.f32 %v2552_v34, %v2551_v42  ;;  %v2641_v52 = vadd.f32 %v2640_v47, %v2639_v43  ;;  %v1453_v34 = vadd.f32 %v3580_v30, %v3576_v24 }
 0x118   : > { %v2554_v53 = vpop.f32.mrf.mxu0  ;;  %v2642_v54 = vpop.f32.mrf.mxu1 }
 0x119   : > { %v3594_v55 = vadd.f32 %v2641_v52, %v1429_v48 }
 0x11a   : > { %v2555_v44 = vpop.f32.mrf.mxu0  ;;  %v2643_v56 = vpop.f32.mrf.mxu1 }
 0x11b   : > { %v3598_v58 = vadd.f32 %v2555_v44, %v2554_v53  ;;  %v2644_v59 = vadd.f32 %v2643_v56, %v2642_v54  ;;  %v1456_v56 = vadd.f32 %v3586_v40, %v3576_v24 }
 0x11c   : > { %v2557_v62 = vpop.f32.mrf.mxu0  ;;  %v2645_v63 = vpop.f32.mrf.mxu1 }
 0x11d   : > { %v3600_v0 = vadd.f32 %v2644_v59, %v1432_v57  ;;  %v1464_v40 = vadd.f32 %v3598_v58, %v3576_v24 }
 0x11e   : > { %v2558_v50 = vpop.f32.mrf.mxu0  ;;  %v2646_v1 = vpop.f32.mrf.mxu1 }
 0x11f   : > { %v3603_v5 = vadd.f32 %v2558_v50, %v2557_v62  ;;  %v2647_v6 = vadd.f32 %v2646_v1, %v2645_v63 }
 0x120   : > { %v2560_v7 = vpop.f32.mrf.mxu0  ;;  %v2648_v8 = vpop.f32.mrf.mxu1 }
 0x121   : > { %v3605_v9 = vadd.f32 %v2647_v6, %v1437_v4  ;;  %v1461_v4 = vadd.f32 %v3592_v49, %v3576_v24  ;;  %v1469_v49 = vadd.f32 %v3603_v5, %v3576_v24 }
 0x122   : > { %v2561_v12 = vpop.f32.mrf.mxu0  ;;  %v2649_v60 = vpop.f32.mrf.mxu1 }
 0x123   : > { %v3608_v14 = vadd.f32 %v2561_v12, %v2560_v7  ;;  %v2650_v15 = vadd.f32 %v2649_v60, %v2648_v8 }
 0x124   : > { %v2563_v18 = vpop.f32.mrf.mxu0  ;;  %v2651_v19 = vpop.f32.mrf.mxu1 }
 0x125   : > { %v3610_v20 = vadd.f32 %v2650_v15, %v1440_v13  ;;  %v1472_v58 = vadd.f32 %v3608_v14, %v3576_v24 }
 0x126   : > { %v2564_v21 = vpop.f32.mrf.mxu0  ;;  %v2652_v2 = vpop.f32.mrf.mxu1 }
 0x127   : > { %v3613_v26 = vadd.f32 %v2564_v21, %v2563_v18  ;;  %v2653_v27 = vadd.f32 %v2652_v2, %v2651_v19 }
 0x128   : > { %v2566_v28 = vpop.f32.mrf.mxu0  ;;  %v2654_v29 = vpop.f32.mrf.mxu1 }
 0x129   : > { %v3615_v31 = vadd.f32 %v2653_v27, %v1445_v25  ;;  %v1477_v5 = vadd.f32 %v3613_v26, %v3576_v24 }
 0x12a   : > { %v2567_v32 = vpop.f32.mrf.mxu0  ;;  %v2655_v10 = vpop.f32.mrf.mxu1 }
 0x12b   : > { %v3619_v37 = vadd.f32 %v2567_v32, %v2566_v28  ;;  %v2656_v38 = vadd.f32 %v2655_v10, %v2654_v29 }
 0x12c   : > { %v2569_v39 = vpop.f32.mrf.mxu0  ;;  %v2657_v41 = vpop.f32.mrf.mxu1 }
 0x12d   : > { %v3621_v42 = vadd.f32 %v2656_v38, %v1448_v33  ;;  %v1480_v14 = vadd.f32 %v3619_v37, %v3576_v24 }
 0x12e   : > { %v2570_v16 = vpop.f32.mrf.mxu0  ;;  %v2658_v43 = vpop.f32.mrf.mxu1 }
 0x12f   : > { %v3625_v47 = vadd.f32 %v2570_v16, %v2569_v39  ;;  %v2659_v48 = vadd.f32 %v2658_v43, %v2657_v41 }
 0x130   : > { %v2572_v52 = vpop.f32.mrf.mxu0  ;;  %v2660_v53 = vpop.f32.mrf.mxu1 }
 0x131   : > { %v3627_v54 = vadd.f32 %v2659_v48, %v1453_v34 }
 0x132   : > { %v2573_v22 = vpop.f32.mrf.mxu0  ;;  %v2661_v44 = vpop.f32.mrf.mxu1 }
 0x133   : > { %v2574_v57 = vadd.f32 %v2573_v22, %v2572_v52  ;;  %v2662_v59 = vadd.f32 %v2661_v44, %v2660_v53 }
 0x134   : > { %v2575_v62 = vpop.f32.mrf.mxu0  ;;  %v2663_v63 = vpop.f32.mrf.mxu1 }
 0x135   : > { %v3631_v50 = vadd.f32 %v2662_v59, %v1456_v56 }
 0x136   : > { %v2576_v1 = vpop.f32.mrf.mxu0  ;;  %v2664_v30 = vpop.f32.mrf.mxu1 }
 0x137   : > { %v2577_v6 = vadd.f32 %v2576_v1, %v2575_v62  ;;  %v2665_v7 = vadd.f32 %v2664_v30, %v2663_v63 }
 0x138   : > { %v2578_v8 = vpop.f32.mrf.mxu0  ;;  %v2666_v12 = vpop.f32.mrf.mxu1 }
 0x139   : > { %v3635_v60 = vadd.f32 %v2665_v7, %v1461_v4 }
 0x13a   : > { %v2579_v13 = vpop.f32.mrf.mxu0  ;;  %v2667_v15 = vpop.f32.mrf.mxu1 }
 0x13b   : > { %v2580_v18 = vadd.f32 %v2579_v13, %v2578_v8  ;;  %v2668_v19 = vadd.f32 %v2667_v15, %v2666_v12 }
 0x13c   : > { %v2581_v21 = vpop.f32.mrf.mxu0  ;;  %v2669_v2 = vpop.f32.mrf.mxu1 }
 0x13d   : > { %v3639_v25 = vadd.f32 %v2668_v19, %v1464_v40  ;;  %v1485_v40 = vadd.f32 %v3625_v47, %v3576_v24  ;;  %v1493_v47 = vadd.f32 %v2577_v6, %v3576_v24 }
 0x13e   : > { %v2582_v27 = vpop.f32.mrf.mxu0  ;;  %v2670_v28 = vpop.f32.mrf.mxu1 }
 0x13f   : > { %v2583_v29 = vadd.f32 %v2582_v27, %v2581_v21  ;;  %v2671_v32 = vadd.f32 %v2670_v28, %v2669_v2 }
 0x140   : > { %v2584_v10 = vpop.f32.mrf.mxu0  ;;  %v2672_v33 = vpop.f32.mrf.mxu1 }
 0x141   : > { %v3643_v38 = vadd.f32 %v2671_v32, %v1469_v49  ;;  %v1488_v49 = vadd.f32 %v2574_v57, %v3576_v24  ;;  %v1496_v57 = vadd.f32 %v2580_v18, %v3576_v24  ;;  %v1501_v6 = vadd.f32 %v2583_v29, %v3576_v24 }
 0x142   : > { %v2585_v39 = vpop.f32.mrf.mxu0  ;;  %v2673_v41 = vpop.f32.mrf.mxu1 }
 0x143   : > { %v2586_v16 = vadd.f32 %v2585_v39, %v2584_v10  ;;  %v2674_v43 = vadd.f32 %v2673_v41, %v2672_v33 }
 0x144   : > { %v2587_v34 = vpop.f32.mrf.mxu0  ;;  %v2675_v48 = vpop.f32.mrf.mxu1 }
 0x145   : > { %v3647_v52 = vadd.f32 %v2674_v43, %v1472_v58  ;;  %v1504_v18 = vadd.f32 %v2586_v16, %v3576_v24 }
 0x146   : > { %v2588_v53 = vpop.f32.mrf.mxu0  ;;  %v2676_v22 = vpop.f32.mrf.mxu1 }
 0x147   : > { %v2589_v44 = vadd.f32 %v2588_v53, %v2587_v34  ;;  %v2677_v56 = vadd.f32 %v2676_v22, %v2675_v48 }
 0x148   : > { %v2590_v59 = vpop.f32.mrf.mxu0  ;;  %v2678_v62 = vpop.f32.mrf.mxu1 }
 0x149   : > { %v3651_v63 = vadd.f32 %v2677_v56, %v1477_v5  ;;  %v1509_v29 = vadd.f32 %v2589_v44, %v3576_v24  ;;  %v1517_v44 = vadd.f32 %v3539_v35, %v3576_v24 }
 0x14a   : > { %v2591_v1 = vpop.f32.mrf.mxu0  ;;  %v2679_v30 = vpop.f32.mrf.mxu1 }
 0x14b   : > { %v2592_v4 = vadd.f32 %v2591_v1, %v2590_v59  ;;  %v2680_v7 = vadd.f32 %v2679_v30, %v2678_v62 }
 0x14c   : > { %v2681_v8 = vpop.f32.mrf.mxu1  ;;  %v3655_v12 = vpop.f32.mrf.mxu0 }
 0x14d   : > { %v3657_v13 = vadd.f32 %v2680_v7, %v1480_v14  ;;  %v1512_v16 = vadd.f32 %v2592_v4, %v3576_v24 }
 0x14e   : > { %v2682_v15 = vpop.f32.mrf.mxu1  ;;  %v3659_v26 = vpop.f32.mrf.mxu0 }
 0x14f   : > { %v2683_v19 = vadd.f32 %v2682_v15, %v2681_v8 }
 0x150   : > { %v2684_v21 = vpop.f32.mrf.mxu1  ;;  %v3663_v2 = vpop.f32.mrf.mxu0 }
 0x151   : > { %v3665_v27 = vadd.f32 %v2683_v19, %v1485_v40 }
 0x152   : > { %v2685_v37 = vpop.f32.mrf.mxu1  ;;  %v3667_v28 = vpop.f32.mrf.mxu0 }
 0x153   : > { %v2686_v32 = vadd.f32 %v2685_v37, %v2684_v21 }
 0x154   : > { %v2687_v10 = vpop.f32.mrf.mxu1  ;;  %v3670_v33 = vpop.f32.mrf.mxu0 }
 0x155   : > { %v3672_v39 = vadd.f32 %v2686_v32, %v1488_v49 }
 0x156   : > { %v2688_v41 = vpop.f32.mrf.mxu1  ;;  %v3674_v58 = vpop.f32.mrf.mxu0 }
 0x157   : > { %4009 = vst [vmem:[#allocation2_spill] sm:$0xff] %v3672_v39  ;;  %v2689_v43 = vadd.f32 %v2688_v41, %v2687_v10 }
 0x158   : > { %v2690_v34 = vpop.f32.mrf.mxu1  ;;  %v3677_v48 = vpop.f32.mrf.mxu0 }
 0x159   : > { %v3679_v53 = vadd.f32 %v2689_v43, %v1493_v47 }
 0x15a   : > { %v2691_v22 = vpop.f32.mrf.mxu1  ;;  %v3681_v5 = vpop.f32.mrf.mxu0 }
 0x15b   : > { %v2692_v56 = vadd.f32 %v2691_v22, %v2690_v34 }
 0x15c   : > { %v2693_v59 = vpop.f32.mrf.mxu1  ;;  %v3684_v62 = vpop.f32.mrf.mxu0 }
 0x15d   : > { %v3686_v1 = vadd.f32 %v2692_v56, %v1496_v57 }
 0x15e   : > { %v2694_v30 = vpop.f32.mrf.mxu1  ;;  %v3688_v14 = vpop.f32.mrf.mxu0 }
 0x15f   : > { %4010 = vst [vmem:[#allocation3_spill] sm:$0xff] %v3686_v1  ;;  %v2695_v7 = vadd.f32 %v2694_v30, %v2693_v59 }
 0x160   : > { %v2696_v8 = vpop.f32.mrf.mxu1  ;;  %v3691_v15 = vpop.f32.mrf.mxu0 }
 0x161   : > { %v3693_v40 = vadd.f32 %v2695_v7, %v1501_v6 }
 0x162   : > { %v2697_v19 = vpop.f32.mrf.mxu1  ;;  %v3695_v21 = vpop.f32.mrf.mxu0 }
 0x163   : > { %4011 = vst [vmem:[#allocation4_spill] sm:$0xff] %v3693_v40  ;;  %v2698_v37 = vadd.f32 %v2697_v19, %v2696_v8 }
 0x164   : > { %v2699_v49 = vpop.f32.mrf.mxu1  ;;  %v3698_v32 = vpop.f32.mrf.mxu0 }
 0x165   : > { %v3700_v10 = vadd.f32 %v2698_v37, %v1504_v18 }
 0x166   : > { %v2700_v41 = vpop.f32.mrf.mxu1  ;;  %v3702_v47 = vpop.f32.mrf.mxu0 }
 0x167   : > { %4012 = vst [vmem:[#allocation5_spill] sm:$0xff] %v3700_v10  ;;  %v2701_v43 = vadd.f32 %v2700_v41, %v2699_v49 }
 0x168   : > { %v2702_v34 = vpop.f32.mrf.mxu1  ;;  %v3705_v22 = vpop.f32.mrf.mxu0 }
 0x169   : > { %v3707_v57 = vadd.f32 %v2701_v43, %v1509_v29 }
 0x16a   : > { %v2703_v56 = vpop.f32.mrf.mxu1  ;;  %v3709_v59 = vpop.f32.mrf.mxu0 }
 0x16b   : > { %4013 = vst [vmem:[#allocation6_spill] sm:$0xff] %v3707_v57  ;;  %v2704_v30 = vadd.f32 %v2703_v56, %v2702_v34  ;;  %v1520_v34 = vadd.f32 %v3547_v45, %v3576_v24 }
 0x16c   : > { %v2705_v6 = vpop.f32.mrf.mxu1  ;;  %v3712_v7 = vpop.f32.mrf.mxu0 }
 0x16d   : > { %v3714_v8 = vadd.f32 %v2704_v30, %v1512_v16 }
 0x16e   : > { %v2706_v19 = vpop.f32.mrf.mxu1  ;;  %v3716_v18 = vpop.f32.mrf.mxu0 }
 0x16f   : > { %4014 = vst [vmem:[#allocation7_spill] sm:$0xff] %v3714_v8  ;;  %v2707_v37 = vadd.f32 %v2706_v19, %v2705_v6  ;;  %v1525_v6 = vadd.f32 %v3551_v51, %v3576_v24 }
 0x170   : > { %v2708_v49 = vpop.f32.mrf.mxu1  ;;  %v3720_v41 = vpop.f32.mrf.mxu0 }
 0x171   : > { %v3722_v29 = vadd.f32 %v2707_v37, %v1517_v44 }
 0x172   : > { %v2709_v43 = vpop.f32.mrf.mxu1  ;;  %v3724_v4 = vpop.f32.mrf.mxu0 }
 0x173   : > { %4015 = vst [vmem:[#allocation8_spill] sm:$0xff] %v3722_v29  ;;  %v2710_v56 = vadd.f32 %v2709_v43, %v2708_v49  ;;  %v1528_v49 = vadd.f32 %v3559_v61, %v3576_v24 }
 0x174   : > { %v2711_v16 = vpop.f32.mrf.mxu1  ;;  %v3728_v30 = vpop.f32.mrf.mxu0 }
 0x175   : > { %v3730_v10 = vadd.f32 %v2710_v56, %v1520_v34 }
 0x176   : > { %v2712_v8 = vpop.f32.mrf.mxu1  ;;  %v3732_v35 = vpop.f32.mrf.mxu0 }
 0x177   : > { %4016 = vst [vmem:[#allocation9_spill] sm:$0xff] %v3730_v10  ;;  %v2713_v19 = vadd.f32 %v2712_v8, %v2711_v16  ;;  %v1533_v8 = vadd.f32 %v3561_v3, %v3576_v24 }
 0x178   : > { %v2714_v44 = vpop.f32.mrf.mxu1  ;;  %v3736_v37 = vpop.f32.mrf.mxu0 }
 0x179   : > { %v3738_v29 = vadd.f32 %v2713_v19, %v1525_v6 }
 0x17a   : > { %v2715_v40 = vpop.f32.mrf.mxu1  ;;  %v3740_v45 = vpop.f32.mrf.mxu0 }
 0x17b   : > { %4017 = vst [vmem:[#allocation10_spill] sm:$0xff] %v3738_v29  ;;  %v2716_v43 = vadd.f32 %v2715_v40, %v2714_v44  ;;  %v1536_v40 = vadd.f32 %v3565_v11, %v3576_v24  ;;  %v2747_v11 = vadd.f32 %v3659_v26, %v3655_v12  ;;  %v2750_v12 = vadd.f32 %v3667_v28, %v3663_v2 }
 0x17c   : > { %v2717_v34 = vpop.f32.mrf.mxu1  ;;  %v3744_v56 = vpop.f32.mrf.mxu0  ;;  %v2759_v2 = vadd.f32 %v3688_v14, %v3684_v62  ;;  %v2762_v62 = vadd.f32 %v3695_v21, %v3691_v15 }
 0x17d   : > { %v3746_v10 = vadd.f32 %v2716_v43, %v1528_v49 }
 0x17e   : > { %v2718_v57 = vpop.f32.mrf.mxu1  ;;  %v3748_v51 = vpop.f32.mrf.mxu0  ;;  %v1759_v14 = vadd.f32 %v2759_v2, %v3605_v9 }
 0x17f   : > { %4018 = vst [vmem:[#allocation11_spill] sm:$0xff] %v3746_v10  ;;  %v2719_v16 = vadd.f32 %v2718_v57, %v2717_v34  ;;  %v1541_v57 = vadd.f32 %v3567_v17, %v3576_v24  ;;  %v2753_v34 = vadd.f32 %v3674_v58, %v3670_v33  ;;  %v2756_v17 = vadd.f32 %v3681_v5, %v3677_v48 }
 0x180   : > { %v2720_v6 = vpop.f32.mrf.mxu1  ;;  %v3752_v19 = vpop.f32.mrf.mxu0 }
 0x181   : > { %v3754_v29 = vadd.f32 %v2719_v16, %v1533_v8  ;;  %v1751_v33 = vadd.f32 %v2753_v34, %v3594_v55  ;;  %v1754_v48 = vadd.f32 %v2756_v17, %v3600_v0 }
 0x182   : > { %v2721_v39 = vpop.f32.mrf.mxu1  ;;  %v3756_v61 = vpop.f32.mrf.mxu0 }
 0x183   : > { %4019 = vst [vmem:[#allocation12_spill] sm:$0xff] %v3754_v29  ;;  %v2722_v44 = vadd.f32 %v2721_v39, %v2720_v6 }
 0x184   : > { %v2723_v49 = vpop.f32.mrf.mxu1  ;;  %v3760_v43 = vpop.f32.mrf.mxu0 }
 0x185   : > { %v3762_v10 = vadd.f32 %v2722_v44, %v1536_v40  ;;  %v1544_v44 = vadd.f32 %v3571_v23, %v3576_v24  ;;  %v2765_v24 = vadd.f32 %v3702_v47, %v3698_v32  ;;  %v2768_v32 = vadd.f32 %v3709_v59, %v3705_v22 }
 0x186   : > { %v2724_v1 = vpop.f32.mrf.mxu1  ;;  %v3764_v3 = vpop.f32.mrf.mxu0  ;;  %v2777_v22 = vadd.f32 %v3732_v35, %v3728_v30  ;;  %v2771_v30 = vadd.f32 %v3716_v18, %v3712_v7  ;;  %v2780_v35 = vadd.f32 %v3740_v45, %v3736_v37  ;;  %v2774_v37 = vadd.f32 %v3724_v4, %v3720_v41 }
 0x187   : > { %4020 = vst [vmem:[#allocation13_spill] sm:$0xff] %v3762_v10  ;;  %v2725_v8 = vadd.f32 %v2724_v1, %v2723_v49  ;;  %v1767_v0 = vadd.f32 %v2765_v24, %v3615_v31  ;;  %v1770_v15 = vadd.f32 %v2768_v32, %v3621_v42  ;;  %v2062_v24 = vld [vmem:[%s3820_s22] sm:$0xff]  ;;  %v2063_v32 = vld [vmem:[%s3820_s22 + $0x8] sm:$0xff] }
 0x188   : > { %v2726_v16 = vpop.f32.mrf.mxu1  ;;  %v3770_v29 = vpop.f32.mrf.mxu0 }
 0x189   : > { %v3774_v39 = vadd.f32 %v2725_v8, %v1541_v57  ;;  %v1743_v57 = vadd.f32 %v2747_v11, %v3582_v36  ;;  %v1746_v36 = vadd.f32 %v2750_v12, %v3588_v46 }
 0x18a   : > { %v2727_v6 = vpop.f32.mrf.mxu1  ;;  %v3776_v40 = vpop.f32.mrf.mxu0 }
 0x18b   : > { %v2728_v10 = vadd.f32 %v2727_v6, %v2726_v16 }
 0x18c   : > { %v3783_v58 = vpop.f32.mrf.mxu0  ;;  %v2883_v1 = vpop.f32.mrf.mxu1 }
 0x18d   : > { %v3787_v26 = vadd.f32 %v2728_v10, %v1544_v44  ;;  %v1912_v49 = vadd.f32 %v2883_v1, %v1751_v33  ;;  %v1762_v33 = vadd.f32 %v2762_v62, %v3610_v20  ;;  %v2064_v1 = vld [vmem:[%s3820_s22 + $0x10] sm:$0xff] }
 0x18e   : > { %v3790_v8 = vpop.f32.mrf.mxu0  ;;  %v1903_v23 = vpop.f32.mrf.mxu1 }
 0x18f   : > { %3154 = vtanh.f32 %v1912_v49  ;;  %v1904_v55 = vadd.f32 %v1903_v23, %v1743_v57  ;;  %v1783_v57 = vadd.f32 %v2777_v22, %v3635_v60  ;;  %v2065_v60 = vld [vmem:[%s3820_s22 + $0x18] sm:$0xff]  ;;  %v1778_v22 = vadd.f32 %v2774_v37, %v3631_v50 }
 0x190   : > { %v3795_v5 = vpop.f32.mrf.mxu0  ;;  %v2884_v34 = vpop.f32.mrf.mxu1 }
 0x191   : > { %3156 = vtanh.f32 %v1904_v55  ;;  %v1915_v28 = vadd.f32 %v2884_v34, %v1754_v48  ;;  %v1775_v34 = vadd.f32 %v2771_v30, %v3627_v54 }
 0x192   : > { %v3800_v10 = vpop.f32.mrf.mxu0  ;;  %v1906_v16 = vpop.f32.mrf.mxu1 }
 0x193   : > { %3158 = vtanh.f32 %v1915_v28  ;;  %v1907_v47 = vadd.f32 %v1906_v16, %v1746_v36  ;;  %v1786_v28 = vadd.f32 %v2780_v35, %v3639_v25  ;;  %v2789_v36 = vadd.f32 %v3764_v3, %v3760_v43 }
 0x194   : > { %v3806_v11 = vpop.f32.mrf.mxu0  ;;  %v2887_v6 = vpop.f32.mrf.mxu1  ;;  %v2783_v43 = vadd.f32 %v3748_v51, %v3744_v56  ;;  %v2792_v3 = vadd.f32 %v3776_v40, %v3770_v29  ;;  %v2066_v51 = vld [vmem:[%s3820_s22 + $0x20] sm:$0xff] }
 0x195   : > { %3160 = vtanh.f32 %v1907_v47  ;;  %v1928_v46 = vadd.f32 %v2887_v6, %v1767_v0 }
 0x196   : > { %v3811_v44 = vpop.f32.mrf.mxu0  ;;  %v1919_v17 = vpop.f32.mrf.mxu1 }
 0x197   : > { %3162 = vtanh.f32 %v1928_v46  ;;  %v1920_v31 = vadd.f32 %v1919_v17, %v1759_v14  ;;  %v2068_v14 = vld [vmem:[%s3820_s22 + $0x30] sm:$0xff] }
 0x198   : > { %v3823_v21 = vpop.f32.mrf.mxu0  ;;  %v2888_v9 = vpop.f32.mrf.mxu1 }
 0x199   : > { %3164 = vtanh.f32 %v1920_v31  ;;  %v1931_v59 = vadd.f32 %v2888_v9, %v1770_v15 }
 0x19a   : > { %v3831_v12 = vpop.f32.mrf.mxu0  ;;  %v1922_v49 = vpop.f32.mrf.mxu1 }
 0x19b   : > { %3166 = vtanh.f32 %v1931_v59  ;;  %v1923_v42 = vadd.f32 %v1922_v49, %v1762_v33  ;;  %v1799_v59 = vadd.f32 %v2789_v36, %v3651_v63  ;;  %v2786_v49 = vadd.f32 %v3756_v61, %v3752_v19  ;;  %v2067_v61 = vld [vmem:[%s3820_s22 + $0x28] sm:$0xff] }
 0x19c   : > { %v3155_v23 = vpop.eup %3154  ;;  %v3835_v55 = vpop.f32.mrf.mxu0  ;;  %v2795_v19 = vadd.f32 %v3790_v8, %v3783_v58 }
 0x19d   : > { %v2891_v20 = vpop.f32.mrf.mxu1  ;;  %v2096_v48 = vadd.f32 %v3155_v23, %v2064_v1  ;;  %3168 = vtanh.f32 %v1923_v42  ;;  %v2069_v42 = vld [vmem:[%s3820_s22 + $0x38] sm:$0xff]  ;;  %v1794_v58 = vadd.f32 %v2786_v49, %v3647_v52  ;;  %v2798_v52 = vadd.f32 %v3800_v10, %v3795_v5 }
 0x19e   : > { %v1944_v7 = vadd.f32 %v2891_v20, %v1783_v57  ;;  %v3157_v18 = vpop.eup %3156  ;;  %v3847_v45 = vpop.f32.mrf.mxu0  ;;  %v1791_v57 = vadd.f32 %v2783_v43, %v3643_v38  ;;  %v2073_v43 = vld [vmem:[%s3820_s22 + $0x58] sm:$0xff] }
 0x19f   : > { %v1935_v2 = vpop.f32.mrf.mxu1  ;;  %v2473_v41 = vclamps-f32 %v2096_v48, 1.0  ;;  %v2094_v4 = vadd.f32 %v3157_v18, %v2062_v24  ;;  %v1802_v24 = vadd.f32 %v2792_v3, %v3657_v13  ;;  %v2801_v48 = vadd.f32 %v3811_v44, %v3806_v11  ;;  %v2072_v44 = vld [vmem:[%s3820_s22 + $0x50] sm:$0xff] }
 0x1a0   : > { %3170 = vtanh.f32 %v1944_v7  ;;  %v3159_v16 = vpop.eup %3158  ;;  %v1936_v47 = vadd.f32 %v1935_v2, %v1775_v34  ;;  %v3854_v0 = vpop.f32.mrf.mxu0  ;;  %v2804_v11 = vadd.f32 %v3831_v12, %v3823_v21 }
 0x1a1   : > { %v2892_v6 = vpop.f32.mrf.mxu1  ;;  %2193 = vst.msk [vmem:[%s3844_s25 + $0x10] sm:$0xff] %vm2190_vm0, %v2473_v41  ;;  %v2471_v54 = vclamps-f32 %v2094_v4, 1.0  ;;  %v2097_v62 = vadd.f32 %v3159_v16, %v2065_v60  ;;  %v1815_v16 = vadd.f32 %v2801_v48, %v3679_v53 }
 0x1a2   : > { %v1947_v25 = vadd.f32 %v2892_v6, %v1786_v28  ;;  %v3161_v46 = vpop.eup %3160  ;;  %3172 = vtanh.f32 %v1936_v47  ;;  %v3863_v17 = vpop.f32.mrf.mxu0  ;;  %v1807_v6 = vadd.f32 %v2795_v19, %v3665_v27  ;;  %v4024_v19 = vld [vmem:[#allocation4_spill] sm:$0xff] }
 0x1a3   : > { %v1938_v31 = vpop.f32.mrf.mxu1  ;;  %2191 = vst.msk [vmem:[%s3844_s25] sm:$0xff] %vm2190_vm0, %v2471_v54  ;;  %v2474_v15 = vclamps-f32 %v2097_v62, 1.0  ;;  %v2095_v9 = vadd.f32 %v3161_v46, %v2063_v32 }
 0x1a4   : > { %3174 = vtanh.f32 %v1947_v25  ;;  %v3163_v56 = vpop.eup %3162  ;;  %v1939_v29 = vadd.f32 %v1938_v31, %v1778_v22  ;;  %v2811_v40 = vpop.f32.mrf.mxu0  ;;  %v2070_v25 = vld [vmem:[%s3820_s22 + $0x40] sm:$0xff] }
 0x1a5   : > { %v2895_v33 = vpop.f32.mrf.mxu1  ;;  %2194 = vst.msk [vmem:[%s3844_s25 + $0x18] sm:$0xff] %vm2190_vm0, %v2474_v15  ;;  %v2472_v30 = vclamps-f32 %v2095_v9, 1.0  ;;  %v2100_v35 = vadd.f32 %v3163_v56, %v2068_v14  ;;  %v4021_v14 = vld [vmem:[#allocation3_spill] sm:$0xff]  ;;  %v2807_v9 = vadd.f32 %v3847_v45, %v3835_v55 }
 0x1a6   : > { %v1960_v50 = vadd.f32 %v2895_v33, %v1799_v59  ;;  %v3165_v1 = vpop.eup %3164  ;;  %3176 = vtanh.f32 %v1939_v29  ;;  %v2812_v63 = vpop.f32.mrf.mxu0  ;;  %v1818_v22 = vadd.f32 %v2804_v11, %v4021_v14  ;;  %v2071_v33 = vld [vmem:[%s3820_s22 + $0x48] sm:$0xff]  ;;  %v4027_v14 = vld [vmem:[#allocation10_spill] sm:$0xff] }
 0x1a7   : > { %v1951_v23 = vpop.f32.mrf.mxu1  ;;  %2192 = vst.msk [vmem:[%s3844_s25 + $0x8] sm:$0xff] %vm2190_vm0, %v2472_v30  ;;  %v2477_v20 = vclamps-f32 %v2100_v35, 1.0  ;;  %v2098_v7 = vadd.f32 %v3165_v1, %v2066_v51  ;;  %v2813_v5 = vadd.f32 %v2812_v63, %v2811_v40  ;;  %v4022_v35 = vld [vmem:[#allocation2_spill] sm:$0xff]  ;;  %v2076_v1 = vld [vmem:[%s3820_s22 + $0x70] sm:$0xff] }
 0x1a8   : > { %3178 = vtanh.f32 %v1960_v50  ;;  %v3167_v18 = vpop.eup %3166  ;;  %v1952_v37 = vadd.f32 %v1951_v23, %v1791_v57  ;;  %v2814_v38 = vpop.f32.mrf.mxu0  ;;  %v1810_v50 = vadd.f32 %v2798_v52, %v4022_v35  ;;  %v4023_v23 = vld [vmem:[#allocation6_spill] sm:$0xff]  ;;  %v4026_v52 = vld [vmem:[#allocation5_spill] sm:$0xff] }
 0x1a9   : > { %v2896_v60 = vpop.f32.mrf.mxu1  ;;  %2197 = vst.msk [vmem:[%s3844_s25 + $0x30] sm:$0xff] %vm2190_vm0, %v2477_v20  ;;  %v2475_v13 = vclamps-f32 %v2098_v7, 1.0  ;;  %v2101_v34 = vadd.f32 %v3167_v18, %v2069_v42  ;;  %v2081_v35 = vld [vmem:[%s3820_s22 + $0x98] sm:$0xff] }
 0x1aa   : > { %v1963_v2 = vadd.f32 %v2896_v60, %v1802_v24  ;;  %v3169_v28 = vpop.eup %3168  ;;  %3180 = vtanh.f32 %v1952_v37  ;;  %v2815_v36 = vpop.f32.mrf.mxu0  ;;  %v1831_v24 = vadd.f32 %v2813_v5, %v4023_v23  ;;  %v2810_v37 = vadd.f32 %v3863_v17, %v3854_v0  ;;  %v2074_v60 = vld [vmem:[%s3820_s22 + $0x60] sm:$0xff] }
 0x1ab   : > { %v1954_v8 = vpop.f32.mrf.mxu1  ;;  %2195 = vst.msk [vmem:[%s3844_s25 + $0x20] sm:$0xff] %vm2190_vm0, %v2475_v13  ;;  %v2478_v41 = vclamps-f32 %v2101_v34, 1.0  ;;  %v2099_v4 = vadd.f32 %v3169_v28, %v2067_v61  ;;  %v2816_v49 = vadd.f32 %v2815_v36, %v2814_v38  ;;  %v1823_v61 = vadd.f32 %v2807_v9, %v4024_v19 }
 0x1ac   : > { %3182 = vtanh.f32 %v1963_v2  ;;  %v1955_v47 = vadd.f32 %v1954_v8, %v1794_v58  ;;  %v3893_v21 = vpop.f32.mrf.mxu0  ;;  %v2077_v2 = vld [vmem:[%s3820_s22 + $0x78] sm:$0xff] }
 0x1ad   : > { %v3171_v32 = vpop.eup %3170  ;;  %v2899_v12 = vpop.f32.mrf.mxu1  ;;  %2198 = vst.msk [vmem:[%s3844_s25 + $0x38] sm:$0xff] %vm2190_vm0, %v2478_v41  ;;  %v2476_v54 = vclamps-f32 %v2099_v4, 1.0 }
 0x1ae   : > { %v2104_v62 = vadd.f32 %v3171_v32, %v2072_v44  ;;  %v1976_v46 = vadd.f32 %v2899_v12, %v1815_v16  ;;  %3184 = vtanh.f32 %v1955_v47  ;;  %v3902_v53 = vpop.f32.mrf.mxu0  ;;  %v4025_v44 = vld [vmem:[#allocation7_spill] sm:$0xff] }
 0x1af   : > { %v1967_v3 = vpop.f32.mrf.mxu1  ;;  %v3173_v31 = vpop.eup %3172  ;;  %2196 = vst.msk [vmem:[%s3844_s25 + $0x28] sm:$0xff] %vm2190_vm0, %v2476_v54  ;;  %v1834_v36 = vadd.f32 %v2816_v49, %v4025_v44  ;;  %v2075_v12 = vld [vmem:[%s3820_s22 + $0x68] sm:$0xff]  ;;  %v1826_v54 = vadd.f32 %v2810_v37, %v4026_v52 }
 0x1b0   : > { %v2481_v27 = vclamps-f32 %v2104_v62, 1.0  ;;  %3186 = vtanh.f32 %v1976_v46  ;;  %v1968_v10 = vadd.f32 %v1967_v3, %v1807_v6  ;;  %v2102_v59 = vadd.f32 %v3173_v31, %v2070_v25  ;;  %v3909_v56 = vpop.f32.mrf.mxu0  ;;  %v2080_v25 = vld [vmem:[%s3820_s22 + $0x90] sm:$0xff] }
 0x1b1   : > { %v3175_v15 = vpop.eup %3174  ;;  %v2900_v51 = vpop.f32.mrf.mxu1  ;;  %v2819_v46 = vadd.f32 %v3902_v53, %v3893_v21 }
 0x1b2   : > { %2201 = vst.msk [vmem:[%s3844_s25 + $0x50] sm:$0xff] %vm2190_vm0, %v2481_v27  ;;  %v2105_v29 = vadd.f32 %v3175_v15, %v2073_v43  ;;  %3188 = vtanh.f32 %v1968_v10  ;;  %v1979_v30 = vadd.f32 %v2900_v51, %v1818_v22  ;;  %v2479_v40 = vclamps-f32 %v2102_v59, 1.0  ;;  %v3916_v42 = vpop.f32.mrf.mxu0  ;;  %v2078_v59 = vld [vmem:[%s3820_s22 + $0x80] sm:$0xff] }
 0x1b3   : > { %v1970_v55 = vpop.f32.mrf.mxu1  ;;  %v3177_v45 = vpop.eup %3176 }
 0x1b4   : > { %v2482_v63 = vclamps-f32 %v2105_v29, 1.0  ;;  %3190 = vtanh.f32 %v1979_v30  ;;  %v1971_v57 = vadd.f32 %v1970_v55, %v1810_v50  ;;  %2199 = vst.msk [vmem:[%s3844_s25 + $0x40] sm:$0xff] %vm2190_vm0, %v2479_v40  ;;  %v2103_v48 = vadd.f32 %v3177_v45, %v2071_v33  ;;  %v2823_v7 = vpop.f32.mrf.mxu0 }
 0x1b5   : > { %v3179_v20 = vpop.eup %3178  ;;  %v2903_v18 = vpop.f32.mrf.mxu1  ;;  %v2822_v50 = vadd.f32 %v3916_v42, %v3909_v56 }
 0x1b6   : > { %2202 = vst.msk [vmem:[%s3844_s25 + $0x58] sm:$0xff] %vm2190_vm0, %v2482_v63  ;;  %v2108_v38 = vadd.f32 %v3179_v20, %v2076_v1  ;;  %3192 = vtanh.f32 %v1971_v57  ;;  %v1992_v13 = vadd.f32 %v2903_v18, %v1831_v24  ;;  %v2480_v34 = vclamps-f32 %v2103_v48, 1.0  ;;  %v2824_v28 = vpop.f32.mrf.mxu0  ;;  %v4028_v1 = vld [vmem:[#allocation8_spill] sm:$0xff]  ;;  %v4029_v57 = vld [vmem:[#allocation11_spill] sm:$0xff] }
 0x1b7   : > { %v1983_v11 = vpop.f32.mrf.mxu1  ;;  %v3181_v58 = vpop.eup %3180  ;;  %v2825_v41 = vadd.f32 %v2824_v28, %v2823_v7  ;;  %v1839_v49 = vadd.f32 %v2819_v46, %v4028_v1  ;;  %v2079_v20 = vld [vmem:[%s3820_s22 + $0x88] sm:$0xff]  ;;  %v2086_v1 = vld [vmem:[%s3820_s22 + $0xc0] sm:$0xff] }
 0x1b8   : > { %v2485_v8 = vclamps-f32 %v2108_v38, 1.0  ;;  %3194 = vtanh.f32 %v1992_v13  ;;  %v1984_v4 = vadd.f32 %v1983_v11, %v1823_v61  ;;  %2200 = vst.msk [vmem:[%s3844_s25 + $0x48] sm:$0xff] %vm2190_vm0, %v2480_v34  ;;  %v2106_v17 = vadd.f32 %v3181_v58, %v2074_v60  ;;  %v2826_v16 = vpop.f32.mrf.mxu0  ;;  %v2084_v38 = vld [vmem:[%s3820_s22 + $0xb0] sm:$0xff]  ;;  %v4030_v13 = vld [vmem:[#allocation9_spill] sm:$0xff] }
 0x1b9   : > { %v3183_v0 = vpop.eup %3182  ;;  %v2904_v32 = vpop.f32.mrf.mxu1  ;;  %v1847_v22 = vadd.f32 %v2825_v41, %v4027_v14  ;;  %v1842_v34 = vadd.f32 %v2822_v50, %v4030_v13  ;;  %v2091_v13 = vld [vmem:[%s3820_s22 + $0xe8] sm:$0xff] }
 0x1ba   : > { %2205 = vst.msk [vmem:[%s3844_s25 + $0x70] sm:$0xff] %vm2190_vm0, %v2485_v8  ;;  %v2109_v47 = vadd.f32 %v3183_v0, %v2077_v2  ;;  %3196 = vtanh.f32 %v1984_v4  ;;  %v1995_v6 = vadd.f32 %v2904_v32, %v1834_v36  ;;  %v2483_v62 = vclamps-f32 %v2106_v17, 1.0  ;;  %v2827_v43 = vpop.f32.mrf.mxu0  ;;  %v2082_v36 = vld [vmem:[%s3820_s22 + $0xa0] sm:$0xff]  ;;  %v4031_v17 = vld [vmem:[#allocation12_spill] sm:$0xff] }
 0x1bb   : > { %v1986_v3 = vpop.f32.mrf.mxu1  ;;  %v3185_v31 = vpop.eup %3184  ;;  %v2828_v5 = vadd.f32 %v2827_v43, %v2826_v16 }
 0x1bc   : > { %v2486_v27 = vclamps-f32 %v2109_v47, 1.0  ;;  %3198 = vtanh.f32 %v1995_v6  ;;  %v1987_v10 = vadd.f32 %v1986_v3, %v1826_v54  ;;  %2203 = vst.msk [vmem:[%s3844_s25 + $0x60] sm:$0xff] %vm2190_vm0, %v2483_v62  ;;  %v2107_v9 = vadd.f32 %v3185_v31, %v2075_v12  ;;  %v2829_v51 = vpop.f32.mrf.mxu0  ;;  %v2085_v47 = vld [vmem:[%s3820_s22 + $0xb8] sm:$0xff]  ;;  %v2083_v3 = vld [vmem:[%s3820_s22 + $0xa8] sm:$0xff] }
 0x1bd   : > { %v3187_v15 = vpop.eup %3186  ;;  %v2907_v29 = vpop.f32.mrf.mxu1  ;;  %v1850_v23 = vadd.f32 %v2828_v5, %v4029_v57 }
 0x1be   : > { %2206 = vst.msk [vmem:[%s3844_s25 + $0x78] sm:$0xff] %vm2190_vm0, %v2486_v27  ;;  %v2112_v21 = vadd.f32 %v3187_v15, %v2080_v25  ;;  %3200 = vtanh.f32 %v1987_v10  ;;  %v2008_v53 = vadd.f32 %v2907_v29, %v1847_v22  ;;  %v2484_v30 = vclamps-f32 %v2107_v9, 1.0  ;;  %v2830_v40 = vpop.f32.mrf.mxu0  ;;  %v2088_v15 = vld [vmem:[%s3820_s22 + $0xd0] sm:$0xff] }
 0x1bf   : > { %v3189_v33 = vpop.eup %3188  ;;  %v1999_v55 = vpop.f32.mrf.mxu1  ;;  %v2831_v19 = vadd.f32 %v2830_v40, %v2829_v51 }
 0x1c0   : > { %v2489_v45 = vclamps-f32 %v2112_v21, 1.0  ;;  %v2110_v63 = vadd.f32 %v3189_v33, %v2078_v59  ;;  %3202 = vtanh.f32 %v2008_v53  ;;  %2204 = vst.msk [vmem:[%s3844_s25 + $0x68] sm:$0xff] %vm2190_vm0, %v2484_v30  ;;  %v2000_v48 = vadd.f32 %v1999_v55, %v1839_v49  ;;  %v2832_v7 = vpop.f32.mrf.mxu0  ;;  %v4032_v59 = vld [vmem:[#allocation13_spill] sm:$0xff] }
 0x1c1   : > { %v3191_v24 = vpop.eup %3190  ;;  %v2908_v18 = vpop.f32.mrf.mxu1  ;;  %v1855_v16 = vadd.f32 %v2831_v19, %v4031_v17  ;;  %v2089_v55 = vld [vmem:[%s3820_s22 + $0xd8] sm:$0xff] }
 0x1c2   : > { %2209 = vst.msk [vmem:[%s3844_s25 + $0x90] sm:$0xff] %vm2190_vm0, %v2489_v45  ;;  %v2487_v56 = vclamps-f32 %v2110_v63, 1.0  ;;  %v2113_v42 = vadd.f32 %v3191_v24, %v2081_v35  ;;  %v2011_v61 = vadd.f32 %v2908_v18, %v1850_v23  ;;  %3204 = vtanh.f32 %v2000_v48  ;;  %v2833_v60 = vpop.f32.mrf.mxu0  ;;  %v2087_v48 = vld [vmem:[%s3820_s22 + $0xc8] sm:$0xff] }
 0x1c3   : > { %v3193_v37 = vpop.eup %3192  ;;  %v2002_v2 = vpop.f32.mrf.mxu1  ;;  %v2834_v12 = vadd.f32 %v2833_v60, %v2832_v7 }
 0x1c4   : > { %2207 = vst.msk [vmem:[%s3844_s25 + $0x80] sm:$0xff] %vm2190_vm0, %v2487_v56  ;;  %v2490_v28 = vclamps-f32 %v2113_v42, 1.0  ;;  %v2111_v11 = vadd.f32 %v3193_v37, %v2079_v20  ;;  %3206 = vtanh.f32 %v2011_v61  ;;  %v2003_v58 = vadd.f32 %v2002_v2, %v1842_v34  ;;  %v2835_v8 = vpop.f32.mrf.mxu0  ;;  %v2090_v42 = vld [vmem:[%s3820_s22 + $0xe0] sm:$0xff] }
 0x1c5   : > { %v3195_v44 = vpop.eup %3194  ;;  %v2911_v41 = vpop.f32.mrf.mxu1  ;;  %v1858_v51 = vadd.f32 %v2834_v12, %v4032_v59 }
 0x1c6   : > { %2210 = vst.msk [vmem:[%s3844_s25 + $0x98] sm:$0xff] %vm2190_vm0, %v2490_v28  ;;  %v2488_v4 = vclamps-f32 %v2111_v11, 1.0  ;;  %v2116_v0 = vadd.f32 %v3195_v44, %v2084_v38  ;;  %3208 = vtanh.f32 %v2003_v58  ;;  %v2836_v6 = vpop.f32.mrf.mxu0  ;;  %v2092_v38 = vld [vmem:[%s3820_s22 + $0xf0] sm:$0xff]  ;;  %v2093_v11 = vld [vmem:[%s3820_s22 + $0xf8] sm:$0xff] }
 0x1c7   : > { %v3197_v32 = vpop.eup %3196  ;;  %v2015_v52 = vpop.f32.mrf.mxu1  ;;  %v2837_v25 = vadd.f32 %v2836_v6, %v2835_v8 }
 0x1c8   : > { %2208 = vst.msk [vmem:[%s3844_s25 + $0x88] sm:$0xff] %vm2190_vm0, %v2488_v4  ;;  %v2493_v54 = vclamps-f32 %v2116_v0, 1.0  ;;  %v2114_v62 = vadd.f32 %v3197_v32, %v2082_v36  ;;  %v2016_v46 = vadd.f32 %v2015_v52, %v1855_v16  ;;  %v2838_v14 = vpop.f32.mrf.mxu0 }
 0x1c9   : > { %v3199_v43 = vpop.eup %3198  ;;  %v2912_v22 = vpop.f32.mrf.mxu1  ;;  %v1863_v5 = vadd.f32 %v2837_v25, %v3774_v39 }
 0x1ca   : > { %2213 = vst.msk [vmem:[%s3844_s25 + $0xb0] sm:$0xff] %vm2190_vm0, %v2493_v54  ;;  %v2491_v31 = vclamps-f32 %v2114_v62, 1.0  ;;  %v2117_v27 = vadd.f32 %v3199_v43, %v2085_v47  ;;  %3210 = vtanh.f32 %v2016_v46  ;;  %v2839_v9 = vpop.f32.mrf.mxu0 }
 0x1cb   : > { %v3201_v10 = vpop.eup %3200  ;;  %v2018_v29 = vpop.f32.mrf.mxu1  ;;  %v2024_v33 = vadd.f32 %v2911_v41, %v1863_v5  ;;  %v2840_v30 = vadd.f32 %v2839_v9, %v2838_v14 }
 0x1cc   : > { %2211 = vst.msk [vmem:[%s3844_s25 + $0xa0] sm:$0xff] %vm2190_vm0, %v2491_v31  ;;  %v2494_v21 = vclamps-f32 %v2117_v27, 1.0  ;;  %v2115_v53 = vadd.f32 %v3201_v10, %v2083_v3  ;;  %v2019_v50 = vadd.f32 %v2018_v29, %v1858_v51 }
 0x1cd   : > { %v3203_v35 = vpop.eup %3202  ;;  %3212 = vtanh.f32 %v2024_v33  ;;  %v1866_v49 = vadd.f32 %v2840_v30, %v3787_v26 }
 0x1ce   : > { %2214 = vst.msk [vmem:[%s3844_s25 + $0xb8] sm:$0xff] %vm2190_vm0, %v2494_v21  ;;  %v2492_v39 = vclamps-f32 %v2115_v53, 1.0  ;;  %v2120_v40 = vadd.f32 %v3203_v35, %v2088_v15  ;;  %3214 = vtanh.f32 %v2019_v50 }
 0x1cf   : > { %v3205_v45 = vpop.eup %3204  ;;  %v2027_v57 = vadd.f32 %v2912_v22, %v1866_v49 }
 0x1d0   : > { %2212 = vst.msk [vmem:[%s3844_s25 + $0xa8] sm:$0xff] %vm2190_vm0, %v2492_v39  ;;  %v2497_v63 = vclamps-f32 %v2120_v40, 1.0  ;;  %v2118_v24 = vadd.f32 %v3205_v45, %v2086_v1 }
 0x1d1   : > { %v3207_v23 = vpop.eup %3206  ;;  %3216 = vtanh.f32 %v2027_v57 }
 0x1d2   : > { %2217 = vst.msk [vmem:[%s3844_s25 + $0xd0] sm:$0xff] %vm2190_vm0, %v2497_v63  ;;  %v2121_v20 = vadd.f32 %v3207_v23, %v2089_v55  ;;  %v2495_v26 = vclamps-f32 %v2118_v24, 1.0 }
 0x1d3   : > { %v3209_v7 = vpop.eup %3208 }
 0x1d4   : > { %v2498_v18 = vclamps-f32 %v2121_v20, 1.0  ;;  %2215 = vst.msk [vmem:[%s3844_s25 + $0xc0] sm:$0xff] %vm2190_vm0, %v2495_v26  ;;  %v2119_v56 = vadd.f32 %v3209_v7, %v2087_v48 }
 0x1d6   : > { %2218 = vst.msk [vmem:[%s3844_s25 + $0xd8] sm:$0xff] %vm2190_vm0, %v2498_v18  ;;  %v2496_v61 = vclamps-f32 %v2119_v56, 1.0 }
 0x1d7   : > { %v3211_v19 = vpop.eup %3210 }
 0x1d8   : > { %v2122_v37 = vadd.f32 %v3211_v19, %v2090_v42  ;;  %2216 = vst.msk [vmem:[%s3844_s25 + $0xc8] sm:$0xff] %vm2190_vm0, %v2496_v61 }
 0x1da   : > { %v2499_v60 = vclamps-f32 %v2122_v37, 1.0  ;;  %v3213_v34 = vpop.eup %3212 }
 0x1db   : > { %v3215_v2 = vpop.eup %3214  ;;  %v2124_v28 = vadd.f32 %v3213_v34, %v2092_v38 }
 0x1dc   : > { %2219 = vst.msk [vmem:[%s3844_s25 + $0xe0] sm:$0xff] %vm2190_vm0, %v2499_v60  ;;  %v2123_v44 = vadd.f32 %v3215_v2, %v2091_v13 }
 0x1dd   : > { %v2501_v36 = vclamps-f32 %v2124_v28, 1.0 }
 0x1de   : > { %v3217_v58 = vpop.eup %3216  ;;  %v2500_v8 = vclamps-f32 %v2123_v44, 1.0 }
 0x1df   : > { %2221 = vst.msk [vmem:[%s3844_s25 + $0xf0] sm:$0xff] %vm2190_vm0, %v2501_v36  ;;  %v2125_v41 = vadd.f32 %v3217_v58, %v2093_v11 }
 0x1e0   : > { %2220 = vst.msk [vmem:[%s3844_s25 + $0xe8] sm:$0xff] %vm2190_vm0, %v2500_v8 }
 0x1e1   : > { %v2502_v4 = vclamps-f32 %v2125_v41, 1.0 }
 0x1e3   : > { %2222 = vst.msk [vmem:[%s3844_s25 + $0xf8] sm:$0xff] %vm2190_vm0, %v2502_v4 }
 0x1e4 PF: > { %s14_s15 = sadd.s32 1, %s3224_s15  }
 0x1e5   : > { %p11_p4 = scmp.ge.s32.totalorder %s14_s15, 4  }
 0x1e7   :  { %13 = sbr.rel (!%p11_p4) target bundleno = 1 (0x1), region = 69 }

</bundles_post_ra>
